<compile_context>
chip_gen: v7x
topology: tpu7x:2x2x1
jax: 0.10.0
libtpu: 0.0.40
codegen_flags: <defaults>
</compile_context>

<pallas_src>
import functools

import jax
import jax.numpy as jnp
from jax.experimental import pallas as pl
from jax.experimental.pallas import tpu as pltpu


def _round_up(n, m):
    return ((n + m - 1) // m) * m


def _vae_kernel(x_ref, eps_ref,
                w1_ref, b1_ref,
                w2m_ref, b2m_ref, w2v_ref, b2v_ref,
                w3_ref, b3_ref, w4_ref, b4_ref,
                out_ref, mean_ref, logvar_ref):
    """One batch tile: encoder -> reparametrize -> decoder.

    Matmul operands are bf16 (MXU), accumulation and all elementwise math f32.
    """
    # ---- encoder: h1 = relu(x @ W1 + b1) ----
    h1 = jnp.dot(x_ref[...], w1_ref[...], preferred_element_type=jnp.float32)
    h1 = jnp.maximum(h1 + b1_ref[...], 0.0)
    h1b = h1.astype(jnp.bfloat16)

    # ---- encoder head: W2 pre-split into mean / logvar columns (lane-0 aligned) ----
    mean = jnp.dot(h1b, w2m_ref[...], preferred_element_type=jnp.float32) + b2m_ref[...]
    logvar = jnp.dot(h1b, w2v_ref[...], preferred_element_type=jnp.float32) + b2v_ref[...]

    # ---- reparametrization: z = eps * exp(0.5 * logvar) + mean  (f32) ----
    std = jnp.exp(logvar * 0.5)
    z = eps_ref[...] * std + mean
    zb = z.astype(jnp.bfloat16)

    # ---- decoder: out = relu(z @ W3 + b3) @ W4 + b4 ----
    h2 = jnp.dot(zb, w3_ref[...], preferred_element_type=jnp.float32)
    h2 = jnp.maximum(h2 + b3_ref[...], 0.0)
    h2b = h2.astype(jnp.bfloat16)
    out = jnp.dot(h2b, w4_ref[...], preferred_element_type=jnp.float32) + b4_ref[...]

    out_ref[...] = out
    mean_ref[...] = mean
    logvar_ref[...] = logvar


def vae_forward(x, eps, params, *, z_size, batch_tile=128):
    """Pallas wrapper.

    x:   [B, D]  float32
    eps: [B, z]  float32  (Gaussian noise used inside reparametrize, passed in
                           explicitly for determinism)
    Returns ((output, output_2), mean, logvar) matching the PyTorch forward
    (output_2 is self.decoder(z) again, i.e. identical to output).
    """
    B, D = x.shape
    w1, b1, w2, b2, w3, b3, w4, b4 = params
    H = w1.shape[1]

    f32, bf16 = jnp.float32, jnp.bfloat16

    D_pad = _round_up(D, 128)                       # 558 -> 640
    Z_pad = _round_up(max(z_size, 1), 128)          # 10  -> 128
    BT = batch_tile
    B_pad = _round_up(max(B, 8), BT)

    # ---- pad + cast inputs (zero padding is mathematically inert) ----
    x_p = jnp.zeros((B_pad, D_pad), bf16).at[:B, :D].set(x.astype(bf16))
    eps_p = jnp.zeros((B_pad, Z_pad), f32).at[:B, :z_size].set(eps.astype(f32))

    w1_p = jnp.zeros((D_pad, H), bf16).at[:D, :].set(w1.astype(bf16))
    b1_p = b1.reshape(1, H).astype(f32)

    b2_flat = b2.reshape(-1).astype(f32)
    w2m_p = jnp.zeros((H, Z_pad), bf16).at[:, :z_size].set(w2[:, :z_size].astype(bf16))
    w2v_p = jnp.zeros((H, Z_pad), bf16).at[:, :z_size].set(w2[:, z_size:].astype(bf16))
    b2m_p = jnp.zeros((1, Z_pad), f32).at[0, :z_size].set(b2_flat[:z_size])
    b2v_p = jnp.zeros((1, Z_pad), f32).at[0, :z_size].set(b2_flat[z_size:])

    w3_p = jnp.zeros((Z_pad, H), bf16).at[:z_size, :].set(w3.astype(bf16))
    b3_p = b3.reshape(1, H).astype(f32)

    w4_p = jnp.zeros((H, D_pad), bf16).at[:, :D].set(w4.astype(bf16))
    b4_p = jnp.zeros((1, D_pad), f32).at[0, :D].set(b4.reshape(-1).astype(f32))

    grid = (B_pad // BT,)

    def batch_spec(cols):
        return pl.BlockSpec((BT, cols), lambda i: (i, 0))

    def const_spec(shape):
        return pl.BlockSpec(shape, lambda i: (0, 0))

    # advisory cost estimate (FLOPs dominated by the 4 matmuls)
    flops = 2 * B_pad * (D_pad * H + 2 * H * Z_pad + Z_pad * H + H * D_pad)
    bytes_accessed = (
        x_p.size * 2 + eps_p.size * 4
        + (w1_p.size + w2m_p.size + w2v_p.size + w3_p.size + w4_p.size) * 2
        + (b1_p.size + b2m_p.size + b2v_p.size + b3_p.size + b4_p.size) * 4
        + (B_pad * D_pad + 2 * B_pad * Z_pad) * 4
    )
    cost = pl.CostEstimate(flops=flops,
                           transcendentals=B_pad * Z_pad,
                           bytes_accessed=bytes_accessed)

    out, mean, logvar = pl.pallas_call(
        _vae_kernel,
        grid=grid,
        in_specs=[
            batch_spec(D_pad),         # x
            batch_spec(Z_pad),         # eps
            const_spec((D_pad, H)),    # w1
            const_spec((1, H)),        # b1
            const_spec((H, Z_pad)),    # w2_mean
            const_spec((1, Z_pad)),    # b2_mean
            const_spec((H, Z_pad)),    # w2_logvar
            const_spec((1, Z_pad)),    # b2_logvar
            const_spec((Z_pad, H)),    # w3
            const_spec((1, H)),        # b3
            const_spec((H, D_pad)),    # w4
            const_spec((1, D_pad)),    # b4
        ],
        out_specs=(
            batch_spec(D_pad),         # decoder output
            batch_spec(Z_pad),         # mean
            batch_spec(Z_pad),         # logvar
        ),
        out_shape=(
            jax.ShapeDtypeStruct((B_pad, D_pad), jnp.float32),
            jax.ShapeDtypeStruct((B_pad, Z_pad), jnp.float32),
            jax.ShapeDtypeStruct((B_pad, Z_pad), jnp.float32),
        ),
        compiler_params=pltpu.CompilerParams(
            dimension_semantics=("parallel",),
        ),
        cost_estimate=cost,
    )(x_p, eps_p, w1_p, b1_p, w2m_p, b2m_p, w2v_p, b2v_p, w3_p, b3_p, w4_p, b4_p)

    # slice the padding back off; .view(x.size()) is a no-op reshape here
    out = out[:B, :D].reshape(x.shape)
    mean = mean[:B, :z_size]
    logvar = logvar[:B, :z_size]

    # PyTorch forward calls self.decoder(z) twice -> output_2 is identical to output.
    return (out, out), mean, logvar


def init_params(key, D, z_size, hidden=1024):
    """Deterministic parameter init (shapes match the nn.Linear layers, [in, out])."""
    ks = jax.random.split(key, 4)

    def kaiming(k, fan_in, fan_out):
        scale = jnp.sqrt(2.0 / fan_in)
        return jax.random.normal(k, (fan_in, fan_out), jnp.float32) * scale

    w1 = kaiming(ks[0], D, hidden)
    b1 = jnp.zeros((1, hidden), jnp.float32)
    w2 = kaiming(ks[1], hidden, 2 * z_size)
    b2 = jnp.zeros((1, 2 * z_size), jnp.float32)
    w3 = kaiming(ks[2], z_size, hidden)
    b3 = jnp.zeros((1, hidden), jnp.float32)
    w4 = kaiming(ks[3], hidden, D)
    b4 = jnp.zeros((1, D), jnp.float32)
    return (w1, b1, w2, b2, w3, b3, w4, b4)


def vae_forward_ref_mixed(x, eps, params, *, z_size):
    """Pure-JAX reference with the SAME mixed precision as the kernel
    (bf16 matmul operands, f32 accumulation, f32 elementwise)."""
    w1, b1, w2, b2, w3, b3, w4, b4 = params
    bf16 = jnp.bfloat16

    def dot(a, b):
        return jnp.dot(a.astype(bf16), b.astype(bf16),
                       preferred_element_type=jnp.float32)

    h1 = jnp.maximum(dot(x, w1) + b1, 0.0)
    b2_flat = b2.reshape(-1)
    mean = dot(h1, w2[:, :z_size]) + b2_flat[:z_size]
    logvar = dot(h1, w2[:, z_size:]) + b2_flat[z_size:]
    z = eps * jnp.exp(0.5 * logvar) + mean
    h2 = jnp.maximum(dot(z, w3) + b3, 0.0)
    out = (dot(h2, w4) + b4).reshape(x.shape)
    return (out, out), mean, logvar


if __name__ == "__main__":
    D = 558
    z_size = 10
    B = 256          # batched so the weight DMA is amortized (kernel grid = 2 tiles)

    key = jax.random.PRNGKey(0)
    k_param, k_x, k_eps = jax.random.split(key, 3)

    params = init_params(k_param, D, z_size)
    x = jax.random.normal(k_x, (B, D), jnp.float32)
    # torch .normal_() inside reparametrize -> passed explicitly for determinism.
    eps = jax.random.normal(k_eps, (B, z_size), jnp.float32)

    fwd = jax.jit(functools.partial(vae_forward, z_size=z_size))
    (out, out2), mean, logvar = fwd(x, eps, params)
    jax.block_until_ready((out, out2, mean, logvar))

    # correctness vs precision-matched pure-JAX reference
    (out_r, _), mean_r, logvar_r = vae_forward_ref_mixed(x, eps, params, z_size=z_size)
    assert out.shape == x.shape and out2.shape == x.shape
    assert mean.shape == (B, z_size) and logvar.shape == (B, z_size)
    assert jnp.allclose(out, out_r, atol=2e-2, rtol=2e-2)
    assert jnp.allclose(out2, out_r, atol=2e-2, rtol=2e-2)
    assert jnp.allclose(mean, mean_r, atol=2e-2, rtol=2e-2)
    assert jnp.allclose(logvar, logvar_r, atol=2e-2, rtol=2e-2)

    print("KERNEL_OK")
</pallas_src>

<mosaic_0001>
module attributes {stable_mosaic.version = 11 : i64} {
  func.func @_vae_kernel(%arg0: i32, %arg1: memref<128x640xbf16, #tpu.memory_space<vmem>>, %arg2: memref<128x128xf32, #tpu.memory_space<vmem>>, %arg3: memref<640x1024xbf16, #tpu.memory_space<vmem>>, %arg4: memref<1x1024xf32, #tpu.memory_space<vmem>>, %arg5: memref<1024x128xbf16, #tpu.memory_space<vmem>>, %arg6: memref<1x128xf32, #tpu.memory_space<vmem>>, %arg7: memref<1024x128xbf16, #tpu.memory_space<vmem>>, %arg8: memref<1x128xf32, #tpu.memory_space<vmem>>, %arg9: memref<128x1024xbf16, #tpu.memory_space<vmem>>, %arg10: memref<1x1024xf32, #tpu.memory_space<vmem>>, %arg11: memref<1024x640xbf16, #tpu.memory_space<vmem>>, %arg12: memref<1x640xf32, #tpu.memory_space<vmem>>, %arg13: memref<128x640xf32, #tpu.memory_space<vmem>>, %arg14: memref<128x128xf32, #tpu.memory_space<vmem>>, %arg15: memref<128x128xf32, #tpu.memory_space<vmem>>) attributes {dimension_semantics = [#tpu.dimension_semantics<parallel>], iteration_bounds = array<i64: 2>, scalar_prefetch = 0 : i64, scratch_operands = 0 : i64, tpu.core_type = #tpu.core_type<tc>, window_params = [{transform_indices = @transform_0, window_bounds = array<i64: 128, 640>}, {transform_indices = @transform_1, window_bounds = array<i64: 128, 128>}, {pipeline_mode = #tpu.pipeline_mode<synchronous>, transform_indices = @transform_2, window_bounds = array<i64: 640, 1024>}, {pipeline_mode = #tpu.pipeline_mode<synchronous>, transform_indices = @transform_3, window_bounds = array<i64: 1, 1024>}, {pipeline_mode = #tpu.pipeline_mode<synchronous>, transform_indices = @transform_4, window_bounds = array<i64: 1024, 128>}, {pipeline_mode = #tpu.pipeline_mode<synchronous>, transform_indices = @transform_5, window_bounds = array<i64: 1, 128>}, {pipeline_mode = #tpu.pipeline_mode<synchronous>, transform_indices = @transform_6, window_bounds = array<i64: 1024, 128>}, {pipeline_mode = #tpu.pipeline_mode<synchronous>, transform_indices = @transform_7, window_bounds = array<i64: 1, 128>}, {pipeline_mode = #tpu.pipeline_mode<synchronous>, transform_indices = @transform_8, window_bounds = array<i64: 128, 1024>}, {pipeline_mode = #tpu.pipeline_mode<synchronous>, transform_indices = @transform_9, window_bounds = array<i64: 1, 1024>}, {pipeline_mode = #tpu.pipeline_mode<synchronous>, transform_indices = @transform_10, window_bounds = array<i64: 1024, 640>}, {pipeline_mode = #tpu.pipeline_mode<synchronous>, transform_indices = @transform_11, window_bounds = array<i64: 1, 640>}, {transform_indices = @transform_12, window_bounds = array<i64: 128, 640>}, {transform_indices = @transform_13, window_bounds = array<i64: 128, 128>}, {transform_indices = @transform_14, window_bounds = array<i64: 128, 128>}]} {
    %c0 = arith.constant 0 : index
    %c0_0 = arith.constant 0 : index
    %0 = vector.load %arg1[%c0, %c0_0] : memref<128x640xbf16, #tpu.memory_space<vmem>>, vector<128x640xbf16>
    %c0_1 = arith.constant 0 : index
    %c0_2 = arith.constant 0 : index
    %1 = vector.load %arg3[%c0_1, %c0_2] : memref<640x1024xbf16, #tpu.memory_space<vmem>>, vector<640x1024xbf16>
    %cst = arith.constant dense<0.000000e+00> : vector<128x1024xf32>
    %2 = tpu.matmul %0, %1, %cst {dimension_numbers = #tpu.dot_dimension_numbers<[1], [0], [0], [1], [0, 0, 1, 1], [], []>} : vector<128x640xbf16>, vector<640x1024xbf16>, vector<128x1024xf32> -> vector<128x1024xf32>
    %c0_3 = arith.constant 0 : index
    %c0_4 = arith.constant 0 : index
    %3 = vector.load %arg4[%c0_3, %c0_4] : memref<1x1024xf32, #tpu.memory_space<vmem>>, vector<1x1024xf32>
    %4 = vector.broadcast %3 : vector<1x1024xf32> to vector<128x1024xf32>
    %5 = arith.addf %2, %4 : vector<128x1024xf32>
    %cst_5 = arith.constant 0.000000e+00 : f32
    %6 = vector.broadcast %cst_5 : f32 to vector<128x1024xf32>
    %7 = arith.maximumf %5, %6 : vector<128x1024xf32>
    %8 = arith.truncf %7 : vector<128x1024xf32> to vector<128x1024xbf16>
    %c0_6 = arith.constant 0 : index
    %c0_7 = arith.constant 0 : index
    %9 = vector.load %arg5[%c0_6, %c0_7] : memref<1024x128xbf16, #tpu.memory_space<vmem>>, vector<1024x128xbf16>
    %cst_8 = arith.constant dense<0.000000e+00> : vector<128x128xf32>
    %10 = tpu.matmul %8, %9, %cst_8 {dimension_numbers = #tpu.dot_dimension_numbers<[1], [0], [0], [1], [0, 0, 1, 1], [], []>} : vector<128x1024xbf16>, vector<1024x128xbf16>, vector<128x128xf32> -> vector<128x128xf32>
    %c0_9 = arith.constant 0 : index
    %c0_10 = arith.constant 0 : index
    %11 = vector.load %arg6[%c0_9, %c0_10] : memref<1x128xf32, #tpu.memory_space<vmem>>, vector<1x128xf32>
    %12 = vector.broadcast %11 : vector<1x128xf32> to vector<128x128xf32>
    %13 = arith.addf %10, %12 : vector<128x128xf32>
    %c0_11 = arith.constant 0 : index
    %c0_12 = arith.constant 0 : index
    %14 = vector.load %arg7[%c0_11, %c0_12] : memref<1024x128xbf16, #tpu.memory_space<vmem>>, vector<1024x128xbf16>
    %cst_13 = arith.constant dense<0.000000e+00> : vector<128x128xf32>
    %15 = tpu.matmul %8, %14, %cst_13 {dimension_numbers = #tpu.dot_dimension_numbers<[1], [0], [0], [1], [0, 0, 1, 1], [], []>} : vector<128x1024xbf16>, vector<1024x128xbf16>, vector<128x128xf32> -> vector<128x128xf32>
    %c0_14 = arith.constant 0 : index
    %c0_15 = arith.constant 0 : index
    %16 = vector.load %arg8[%c0_14, %c0_15] : memref<1x128xf32, #tpu.memory_space<vmem>>, vector<1x128xf32>
    %17 = vector.broadcast %16 : vector<1x128xf32> to vector<128x128xf32>
    %18 = arith.addf %15, %17 : vector<128x128xf32>
    %cst_16 = arith.constant 5.000000e-01 : f32
    %19 = vector.broadcast %cst_16 : f32 to vector<128x128xf32>
    %20 = arith.mulf %18, %19 : vector<128x128xf32>
    %21 = math.exp %20 : vector<128x128xf32>
    %c0_17 = arith.constant 0 : index
    %c0_18 = arith.constant 0 : index
    %22 = vector.load %arg2[%c0_17, %c0_18] : memref<128x128xf32, #tpu.memory_space<vmem>>, vector<128x128xf32>
    %23 = arith.mulf %22, %21 : vector<128x128xf32>
    %24 = arith.addf %23, %13 : vector<128x128xf32>
    %25 = arith.truncf %24 : vector<128x128xf32> to vector<128x128xbf16>
    %c0_19 = arith.constant 0 : index
    %c0_20 = arith.constant 0 : index
    %26 = vector.load %arg9[%c0_19, %c0_20] : memref<128x1024xbf16, #tpu.memory_space<vmem>>, vector<128x1024xbf16>
    %cst_21 = arith.constant dense<0.000000e+00> : vector<128x1024xf32>
    %27 = tpu.matmul %25, %26, %cst_21 {dimension_numbers = #tpu.dot_dimension_numbers<[1], [0], [0], [1], [0, 0, 1, 1], [], []>} : vector<128x128xbf16>, vector<128x1024xbf16>, vector<128x1024xf32> -> vector<128x1024xf32>
    %c0_22 = arith.constant 0 : index
    %c0_23 = arith.constant 0 : index
    %28 = vector.load %arg10[%c0_22, %c0_23] : memref<1x1024xf32, #tpu.memory_space<vmem>>, vector<1x1024xf32>
    %29 = vector.broadcast %28 : vector<1x1024xf32> to vector<128x1024xf32>
    %30 = arith.addf %27, %29 : vector<128x1024xf32>
    %cst_24 = arith.constant 0.000000e+00 : f32
    %31 = vector.broadcast %cst_24 : f32 to vector<128x1024xf32>
    %32 = arith.maximumf %30, %31 : vector<128x1024xf32>
    %33 = arith.truncf %32 : vector<128x1024xf32> to vector<128x1024xbf16>
    %c0_25 = arith.constant 0 : index
    %c0_26 = arith.constant 0 : index
    %34 = vector.load %arg11[%c0_25, %c0_26] : memref<1024x640xbf16, #tpu.memory_space<vmem>>, vector<1024x640xbf16>
    %cst_27 = arith.constant dense<0.000000e+00> : vector<128x640xf32>
    %35 = tpu.matmul %33, %34, %cst_27 {dimension_numbers = #tpu.dot_dimension_numbers<[1], [0], [0], [1], [0, 0, 1, 1], [], []>} : vector<128x1024xbf16>, vector<1024x640xbf16>, vector<128x640xf32> -> vector<128x640xf32>
    %c0_28 = arith.constant 0 : index
    %c0_29 = arith.constant 0 : index
    %36 = vector.load %arg12[%c0_28, %c0_29] : memref<1x640xf32, #tpu.memory_space<vmem>>, vector<1x640xf32>
    %37 = vector.broadcast %36 : vector<1x640xf32> to vector<128x640xf32>
    %38 = arith.addf %35, %37 : vector<128x640xf32>
    %c0_30 = arith.constant 0 : index
    %c0_31 = arith.constant 0 : index
    %39 = vector.load %arg13[%c0_30, %c0_31] : memref<128x640xf32, #tpu.memory_space<vmem>>, vector<128x640xf32>
    tpu.vector_store %arg13[%c0_30, %c0_31], %38 {strides = array<i32>} : memref<128x640xf32, #tpu.memory_space<vmem>>, vector<128x640xf32>,
    %c0_32 = arith.constant 0 : index
    %c0_33 = arith.constant 0 : index
    %40 = vector.load %arg14[%c0_32, %c0_33] : memref<128x128xf32, #tpu.memory_space<vmem>>, vector<128x128xf32>
    tpu.vector_store %arg14[%c0_32, %c0_33], %13 {strides = array<i32>} : memref<128x128xf32, #tpu.memory_space<vmem>>, vector<128x128xf32>,
    %c0_34 = arith.constant 0 : index
    %c0_35 = arith.constant 0 : index
    %41 = vector.load %arg15[%c0_34, %c0_35] : memref<128x128xf32, #tpu.memory_space<vmem>>, vector<128x128xf32>
    tpu.vector_store %arg15[%c0_34, %c0_35], %18 {strides = array<i32>} : memref<128x128xf32, #tpu.memory_space<vmem>>, vector<128x128xf32>,
    return
  }
  func.func @transform_0(%arg0: i32) -> (i32, i32) {
    %c0_i32 = arith.constant 0 : i32
    %c0_i32_0 = arith.constant 0 : i32
    return %arg0, %c0_i32 : i32, i32
  }
  func.func @transform_1(%arg0: i32) -> (i32, i32) {
    %c0_i32 = arith.constant 0 : i32
    %c0_i32_0 = arith.constant 0 : i32
    return %arg0, %c0_i32 : i32, i32
  }
  func.func @transform_2(%arg0: i32) -> (i32, i32) {
    %c0_i32 = arith.constant 0 : i32
    %c0_i32_0 = arith.constant 0 : i32
    %c0_i32_1 = arith.constant 0 : i32
    return %c0_i32, %c0_i32_0 : i32, i32
  }
  func.func @transform_3(%arg0: i32) -> (i32, i32) {
    %c0_i32 = arith.constant 0 : i32
    %c0_i32_0 = arith.constant 0 : i32
    %c0_i32_1 = arith.constant 0 : i32
    return %c0_i32, %c0_i32_0 : i32, i32
  }
  func.func @transform_4(%arg0: i32) -> (i32, i32) {
    %c0_i32 = arith.constant 0 : i32
    %c0_i32_0 = arith.constant 0 : i32
    %c0_i32_1 = arith.constant 0 : i32
    return %c0_i32, %c0_i32_0 : i32, i32
  }
  func.func @transform_5(%arg0: i32) -> (i32, i32) {
    %c0_i32 = arith.constant 0 : i32
    %c0_i32_0 = arith.constant 0 : i32
    %c0_i32_1 = arith.constant 0 : i32
    return %c0_i32, %c0_i32_0 : i32, i32
  }
  func.func @transform_6(%arg0: i32) -> (i32, i32) {
    %c0_i32 = arith.constant 0 : i32
    %c0_i32_0 = arith.constant 0 : i32
    %c0_i32_1 = arith.constant 0 : i32
    return %c0_i32, %c0_i32_0 : i32, i32
  }
  func.func @transform_7(%arg0: i32) -> (i32, i32) {
    %c0_i32 = arith.constant 0 : i32
    %c0_i32_0 = arith.constant 0 : i32
    %c0_i32_1 = arith.constant 0 : i32
    return %c0_i32, %c0_i32_0 : i32, i32
  }
  func.func @transform_8(%arg0: i32) -> (i32, i32) {
    %c0_i32 = arith.constant 0 : i32
    %c0_i32_0 = arith.constant 0 : i32
    %c0_i32_1 = arith.constant 0 : i32
    return %c0_i32, %c0_i32_0 : i32, i32
  }
  func.func @transform_9(%arg0: i32) -> (i32, i32) {
    %c0_i32 = arith.constant 0 : i32
    %c0_i32_0 = arith.constant 0 : i32
    %c0_i32_1 = arith.constant 0 : i32
    return %c0_i32, %c0_i32_0 : i32, i32
  }
  func.func @transform_10(%arg0: i32) -> (i32, i32) {
    %c0_i32 = arith.constant 0 : i32
    %c0_i32_0 = arith.constant 0 : i32
    %c0_i32_1 = arith.constant 0 : i32
    return %c0_i32, %c0_i32_0 : i32, i32
  }
  func.func @transform_11(%arg0: i32) -> (i32, i32) {
    %c0_i32 = arith.constant 0 : i32
    %c0_i32_0 = arith.constant 0 : i32
    %c0_i32_1 = arith.constant 0 : i32
    return %c0_i32, %c0_i32_0 : i32, i32
  }
  func.func @transform_12(%arg0: i32) -> (i32, i32) {
    %c0_i32 = arith.constant 0 : i32
    %c0_i32_0 = arith.constant 0 : i32
    return %arg0, %c0_i32 : i32, i32
  }
  func.func @transform_13(%arg0: i32) -> (i32, i32) {
    %c0_i32 = arith.constant 0 : i32
    %c0_i32_0 = arith.constant 0 : i32
    return %arg0, %c0_i32 : i32, i32
  }
  func.func @transform_14(%arg0: i32) -> (i32, i32) {
    %c0_i32 = arith.constant 0 : i32
    %c0_i32_0 = arith.constant 0 : i32
    return %arg0, %c0_i32 : i32, i32
  }
}

</mosaic_0001>

<bundles_post_ra>
// kernel: vae_forward.1
= control target key start
LH: loop header
LB: loop body
LE: loop exit
PB: predicated region body
PF: predicated region fallthrough
CT: control target
= control target key end

     0   :  { %s14002_s29 = smov 0   ;;  %s18276_s0 = inlined_call_operand.vmem [shape: bf16[256,640], index: 0, kind: input, shape index: {}]   ;;  %s18277_s1 = inlined_call_operand.vmem [shape: f32[256,128], index: 1, kind: input, shape index: {}]   ;;  %s18278_s2 = inlined_call_operand.vmem [shape: bf16[640,1024], index: 2, kind: input, shape index: {}]   ;;  %s18279_s3 = inlined_call_operand.vmem [shape: f32[1,1024], index: 3, kind: input, shape index: {}]   ;;  %s18280_s4 = inlined_call_operand.vmem [shape: bf16[1024,128], index: 4, kind: input, shape index: {}]   ;;  %s18281_s5 = inlined_call_operand.vmem [shape: f32[1,128], index: 5, kind: input, shape index: {}]   ;;  %s18282_s6 = inlined_call_operand.vmem [shape: bf16[1024,128], index: 6, kind: input, shape index: {}]   ;;  %s18283_s7 = inlined_call_operand.vmem [shape: f32[1,128], index: 7, kind: input, shape index: {}]   ;;  %s18284_s8 = inlined_call_operand.vmem [shape: bf16[128,1024], index: 8, kind: input, shape index: {}]   ;;  %s18285_s9 = inlined_call_operand.vmem [shape: f32[1,1024], index: 9, kind: input, shape index: {}]   ;;  %s18286_s10 = inlined_call_operand.vmem [shape: bf16[1024,640], index: 10, kind: input, shape index: {}]   ;;  %s18287_s11 = inlined_call_operand.vmem [shape: f32[1,640], index: 11, kind: input, shape index: {}]   ;;  %s18288_s12 = inlined_call_operand.vmem [shape: f32[256,640], index: 12, kind: output, shape index: {0}]   ;;  %s18289_s13 = inlined_call_operand.vmem [shape: f32[256,128], index: 13, kind: output, shape index: {1}]   ;;  %s18290_s14 = inlined_call_operand.vmem [shape: f32[256,128], index: 14, kind: output, shape index: {2}]  }
   0x1 LB: > { %s10897_s30 = sadd.s32 4294967295, %s13924_s29   ;;  %p10901_p0 = scmp.ge.s32.totalorder %s13924_s29, 1  ;;  %s13924_s29 = sphi %s14002_s29, %s25_s29  }
   0x2   : > { %p430_p1 = scmp.lt.s32.totalorder %s13924_s29, 3 }
   0x4   : > { %p431_p2 = pnand %p10901_p0, %p430_p1 }
   0x6   : > { %434 = sbr.rel (%p431_p2) target bundleno = 1815 (0x717), region = 68 }
   0xd   : > { %v574_v0 = vld [vmem:[%s18278_s2] sm:$0xff]  ;;  %v575_v2 = vld [vmem:[%s18278_s2 + $0x8] sm:$0xff]  ;;  %s10902_s25 = sshll.u32 %s10897_s30, 4 }
   0xe   : > { %v578_v1 = vld [vmem:[%s18278_s2 + $0x20] sm:$0xff]  ;;  %v579_v4 = vld [vmem:[%s18278_s2 + $0x28] sm:$0xff]  ;;  %p494_p3 = scmp.lt.s32.totalorder %s10902_s25, 31 }
   0xf   : > { %v10953_v3 = vcombine.high %v574_v0, %v578_v1  ;;  %v10952_v5 = vcombine.low %v574_v0, %v578_v1  ;;  %v582_v6 = vld [vmem:[%s18278_s2 + $0x40] sm:$0xff]  ;;  %v10955_v8 = vcombine.high %v575_v2, %v579_v4  ;;  %v10954_v9 = vcombine.low %v575_v2, %v579_v4  ;;  %v583_v11 = vld [vmem:[%s18278_s2 + $0x48] sm:$0xff] }
  0x10   : > { %v586_v7 = vld [vmem:[%s18278_s2 + $0x60] sm:$0xff]  ;;  %v587_v12 = vld [vmem:[%s18278_s2 + $0x68] sm:$0xff]  ;;  %s18447_s25 = smov (!%p494_p3, %s10902_s25), 31 }
  0x11   : > { %v10961_v10 = vcombine.high %v582_v6, %v586_v7  ;;  %v590_v13 = vld [vmem:[%s18278_s2 + $0x80] sm:$0xff]  ;;  %2744 = vmatprep.subr.bf16.mxu0 %v10953_v3  ;;  %v10963_v14 = vcombine.high %v583_v11, %v587_v12  ;;  %v591_v16 = vld [vmem:[%s18278_s2 + $0x88] sm:$0xff]  ;;  %3083 = vmatprep.subr.bf16.mxu1 %v10955_v8  ;;  %v10960_v18 = vcombine.low %v582_v6, %v586_v7  ;;  %s13196_s21 = smul.u32 20, %s18447_s25  ;;  %s16028_s17 = sshll.u32 %s18447_s25, 3 }
  0x12   : > { %v594_v15 = vld [vmem:[%s18278_s2 + $0xa0] sm:$0xff]  ;;  %v595_v17 = vld [vmem:[%s18278_s2 + $0xa8] sm:$0xff]  ;;  %2745 = vmatpush1.bf16.msra.mxu0 %v10952_v5  ;;  %3084 = vmatpush1.bf16.msra.mxu1 %v10954_v9  ;;  %v10962_v19 = vcombine.low %v583_v11, %v587_v12  ;;  %s16035_s20 = scalar_lea.vmem %s18289_s13, %s16028_s17  ;;  %s16235_s22 = scalar_lea.vmem %s18290_s14, %s16028_s17 }
  0x13   : > { %2746 = vmatprep.subr.bf16.mxu0 %v10961_v10  ;;  %v10969_v20 = vcombine.high %v590_v13, %v594_v15  ;;  %3085 = vmatprep.subr.bf16.mxu1 %v10963_v14  ;;  %v10971_v21 = vcombine.high %v591_v16, %v595_v17  ;;  %v598_v22 = vld [vmem:[%s18278_s2 + $0xc0] sm:$0xff]  ;;  %v599_v24 = vld [vmem:[%s18278_s2 + $0xc8] sm:$0xff]  ;;  %v10968_v26 = vcombine.low %v590_v13, %v594_v15  ;;  %s14100_s30 = scalar_lea.vmem %s18276_s0, %s13196_s21  ;;  %s16247_s21 = scalar_lea.vmem %s18277_s1, %s16028_s17 }
  0x14   : > { %v602_v23 = vld [vmem:[%s18278_s2 + $0xe0] sm:$0xff]  ;;  %v603_v25 = vld [vmem:[%s18278_s2 + $0xe8] sm:$0xff]  ;;  %v10970_v27 = vcombine.low %v591_v16, %v595_v17  ;;  %s13197_s24 = smul.u32 40, %s18447_s25 }
  0x15   : > { %v10977_v28 = vcombine.high %v598_v22, %v602_v23  ;;  %v10979_v29 = vcombine.high %v599_v24, %v603_v25  ;;  %v606_v30 = vld [vmem:[%s18278_s2 + $0x100] sm:$0xff]  ;;  %v607_v32 = vld [vmem:[%s18278_s2 + $0x108] sm:$0xff]  ;;  %v10976_v34 = vcombine.low %v598_v22, %v602_v23  ;;  %v10978_v35 = vcombine.low %v599_v24, %v603_v25 }
  0x16   : > { %2747 = vmatpush1.bf16.msra.mxu0 %v10960_v18  ;;  %3086 = vmatpush1.bf16.msra.mxu1 %v10962_v19  ;;  %v610_v31 = vld [vmem:[%s18278_s2 + $0x120] sm:$0xff]  ;;  %v611_v33 = vld [vmem:[%s18278_s2 + $0x128] sm:$0xff]  ;;  %s18059_s25 = scalar_lea.vmem %s18288_s12, %s13197_s24 }
  0x17   : > { %2748 = vmatprep.subr.bf16.mxu0 %v10969_v20  ;;  %3087 = vmatprep.subr.bf16.mxu1 %v10971_v21  ;;  %v10985_v36 = vcombine.high %v606_v30, %v610_v31  ;;  %v10987_v37 = vcombine.high %v607_v32, %v611_v33  ;;  %v614_v38 = vld [vmem:[%s18278_s2 + $0x140] sm:$0xff]  ;;  %v615_v40 = vld [vmem:[%s18278_s2 + $0x148] sm:$0xff]  ;;  %v10984_v42 = vcombine.low %v606_v30, %v610_v31 }
  0x18   : > { %v618_v39 = vld [vmem:[%s18278_s2 + $0x160] sm:$0xff]  ;;  %v619_v41 = vld [vmem:[%s18278_s2 + $0x168] sm:$0xff]  ;;  %v10986_v43 = vcombine.low %v607_v32, %v611_v33 }
  0x19   : > { %v10993_v44 = vcombine.high %v614_v38, %v618_v39  ;;  %v10995_v45 = vcombine.high %v615_v40, %v619_v41  ;;  %v622_v46 = vld [vmem:[%s18278_s2 + $0x180] sm:$0xff]  ;;  %v623_v48 = vld [vmem:[%s18278_s2 + $0x188] sm:$0xff]  ;;  %v10992_v50 = vcombine.low %v614_v38, %v618_v39  ;;  %v10994_v51 = vcombine.low %v615_v40, %v619_v41 }
  0x1a   : > { %2749 = vmatpush1.bf16.msra.mxu0 %v10968_v26  ;;  %3088 = vmatpush1.bf16.msra.mxu1 %v10970_v27  ;;  %v626_v47 = vld [vmem:[%s18278_s2 + $0x1a0] sm:$0xff]  ;;  %v627_v49 = vld [vmem:[%s18278_s2 + $0x1a8] sm:$0xff] }
  0x1b   : > { %2750 = vmatprep.subr.bf16.mxu0 %v10977_v28  ;;  %3089 = vmatprep.subr.bf16.mxu1 %v10979_v29  ;;  %v11001_v52 = vcombine.high %v622_v46, %v626_v47  ;;  %v11003_v53 = vcombine.high %v623_v48, %v627_v49  ;;  %v630_v54 = vld [vmem:[%s18278_s2 + $0x1c0] sm:$0xff]  ;;  %v631_v57 = vld [vmem:[%s18278_s2 + $0x1c8] sm:$0xff]  ;;  %v11000_v59 = vcombine.low %v622_v46, %v626_v47 }
  0x1c   : > { %v634_v55 = vld [vmem:[%s18278_s2 + $0x1e0] sm:$0xff]  ;;  %v635_v58 = vld [vmem:[%s18278_s2 + $0x1e8] sm:$0xff]  ;;  %v11002_v60 = vcombine.low %v623_v48, %v627_v49 }
  0x1d   : > { %v13207_v56 = vld [vmem:[%s14100_s30 + $0x4] ss:$20 sps:$4 sm:$0xff]   ;;  %v11009_v61 = vcombine.high %v630_v54, %v634_v55  ;;  %v11011_v62 = vcombine.high %v631_v57, %v635_v58  ;;  %v639_v1 = vld [vmem:[%s18278_s2 + $0x208] sm:$0xff]  ;;  %v11008_v3 = vcombine.low %v630_v54, %v634_v55  ;;  %v11010_v4 = vcombine.low %v631_v57, %v635_v58 }
  0x1e   : > { %2751 = vmatpush1.bf16.msra.mxu0 %v10976_v34  ;;  %3090 = vmatpush1.bf16.msra.mxu1 %v10978_v35  ;;  %v638_v63 = vld [vmem:[%s18278_s2 + $0x200] sm:$0xff]  ;;  %v643_v2 = vld [vmem:[%s18278_s2 + $0x228] sm:$0xff] }
  0x1f   : > { %2752 = vmatprep.subr.bf16.mxu0 %v10985_v36  ;;  %3091 = vmatprep.subr.bf16.mxu1 %v10987_v37  ;;  %v642_v0 = vld [vmem:[%s18278_s2 + $0x220] sm:$0xff]  ;;  %v11019_v6 = vcombine.high %v639_v1, %v643_v2  ;;  %v647_v9 = vld [vmem:[%s18278_s2 + $0x248] sm:$0xff]  ;;  %v11018_v12 = vcombine.low %v639_v1, %v643_v2 }
  0x20   : > { %2776 = vmatprep.mubr.bf16.mxu0 %v13207_v56  ;;  %3115 = vmatprep.mubr.bf16.mxu1 %v13207_v56  ;;  %v11017_v5 = vcombine.high %v638_v63, %v642_v0  ;;  %v646_v7 = vld [vmem:[%s18278_s2 + $0x240] sm:$0xff]  ;;  %v651_v10 = vld [vmem:[%s18278_s2 + $0x268] sm:$0xff]  ;;  %v11016_v11 = vcombine.low %v638_v63, %v642_v0 }
  0x21   : > { %v650_v8 = vld [vmem:[%s18278_s2 + $0x260] sm:$0xff]  ;;  %v11027_v14 = vcombine.high %v647_v9, %v651_v10  ;;  %v655_v17 = vld [vmem:[%s18278_s2 + $0x288] sm:$0xff]  ;;  %v11026_v20 = vcombine.low %v647_v9, %v651_v10 }
  0x22   : > { %2753 = vmatpush1.bf16.msra.mxu0 %v10984_v42  ;;  %3092 = vmatpush1.bf16.msra.mxu1 %v10986_v43  ;;  %v11025_v13 = vcombine.high %v646_v7, %v650_v8  ;;  %v654_v15 = vld [vmem:[%s18278_s2 + $0x280] sm:$0xff]  ;;  %v659_v18 = vld [vmem:[%s18278_s2 + $0x2a8] sm:$0xff]  ;;  %v11024_v19 = vcombine.low %v646_v7, %v650_v8 }
  0x23   : > { %2754 = vmatprep.subr.bf16.mxu0 %v10993_v44  ;;  %3093 = vmatprep.subr.bf16.mxu1 %v10995_v45  ;;  %v658_v16 = vld [vmem:[%s18278_s2 + $0x2a0] sm:$0xff]  ;;  %v11035_v22 = vcombine.high %v655_v17, %v659_v18  ;;  %v663_v25 = vld [vmem:[%s18278_s2 + $0x2c8] sm:$0xff]  ;;  %v11034_v28 = vcombine.low %v655_v17, %v659_v18 }
  0x24   : > { %v11033_v21 = vcombine.high %v654_v15, %v658_v16  ;;  %v662_v23 = vld [vmem:[%s18278_s2 + $0x2c0] sm:$0xff]  ;;  %v667_v26 = vld [vmem:[%s18278_s2 + $0x2e8] sm:$0xff]  ;;  %v11032_v27 = vcombine.low %v654_v15, %v658_v16 }
  0x25   : > { %v666_v24 = vld [vmem:[%s18278_s2 + $0x2e0] sm:$0xff]  ;;  %v11043_v30 = vcombine.high %v663_v25, %v667_v26  ;;  %v671_v33 = vld [vmem:[%s18278_s2 + $0x308] sm:$0xff]  ;;  %v11042_v36 = vcombine.low %v663_v25, %v667_v26 }
  0x26   : > { %2755 = vmatpush1.bf16.msra.mxu0 %v10992_v50  ;;  %3094 = vmatpush1.bf16.msra.mxu1 %v10994_v51  ;;  %v11041_v29 = vcombine.high %v662_v23, %v666_v24  ;;  %v670_v31 = vld [vmem:[%s18278_s2 + $0x300] sm:$0xff]  ;;  %v675_v34 = vld [vmem:[%s18278_s2 + $0x328] sm:$0xff]  ;;  %v11040_v35 = vcombine.low %v662_v23, %v666_v24 }
  0x27   : > { %2756 = vmatprep.subr.bf16.mxu0 %v11001_v52  ;;  %3095 = vmatprep.subr.bf16.mxu1 %v11003_v53  ;;  %v674_v32 = vld [vmem:[%s18278_s2 + $0x320] sm:$0xff]  ;;  %v11051_v38 = vcombine.high %v671_v33, %v675_v34  ;;  %v679_v41 = vld [vmem:[%s18278_s2 + $0x348] sm:$0xff]  ;;  %v11050_v44 = vcombine.low %v671_v33, %v675_v34 }
  0x28   : > { %v11049_v37 = vcombine.high %v670_v31, %v674_v32  ;;  %v678_v39 = vld [vmem:[%s18278_s2 + $0x340] sm:$0xff]  ;;  %v683_v42 = vld [vmem:[%s18278_s2 + $0x368] sm:$0xff]  ;;  %v11048_v43 = vcombine.low %v670_v31, %v674_v32 }
  0x29   : > { %v682_v40 = vld [vmem:[%s18278_s2 + $0x360] sm:$0xff]  ;;  %v11059_v46 = vcombine.high %v679_v41, %v683_v42  ;;  %v687_v49 = vld [vmem:[%s18278_s2 + $0x388] sm:$0xff]  ;;  %v11058_v52 = vcombine.low %v679_v41, %v683_v42 }
  0x2a   : > { %2757 = vmatpush1.bf16.msra.mxu0 %v11000_v59  ;;  %3096 = vmatpush1.bf16.msra.mxu1 %v11002_v60  ;;  %v11057_v45 = vcombine.high %v678_v39, %v682_v40  ;;  %v686_v47 = vld [vmem:[%s18278_s2 + $0x380] sm:$0xff]  ;;  %v691_v50 = vld [vmem:[%s18278_s2 + $0x3a8] sm:$0xff]  ;;  %v11056_v51 = vcombine.low %v678_v39, %v682_v40 }
  0x2b   : > { %2758 = vmatprep.subr.bf16.mxu0 %v11009_v61  ;;  %3097 = vmatprep.subr.bf16.mxu1 %v11011_v62  ;;  %v690_v48 = vld [vmem:[%s18278_s2 + $0x3a0] sm:$0xff]  ;;  %v11067_v54 = vcombine.high %v687_v49, %v691_v50  ;;  %v695_v57 = vld [vmem:[%s18278_s2 + $0x3c8] sm:$0xff]  ;;  %v11066_v60 = vcombine.low %v687_v49, %v691_v50 }
  0x2c   : > { %v11065_v53 = vcombine.high %v686_v47, %v690_v48  ;;  %v694_v55 = vld [vmem:[%s18278_s2 + $0x3c0] sm:$0xff]  ;;  %v699_v58 = vld [vmem:[%s18278_s2 + $0x3e8] sm:$0xff]  ;;  %v11064_v59 = vcombine.low %v686_v47, %v690_v48 }
  0x2d   : > { %v698_v56 = vld [vmem:[%s18278_s2 + $0x3e0] sm:$0xff]  ;;  %v11075_v62 = vcombine.high %v695_v57, %v699_v58  ;;  %v703_v1 = vld [vmem:[%s18278_s2 + $0x408] sm:$0xff] }
  0x2e   : > { %2759 = vmatpush1.bf16.msra.mxu0 %v11008_v3  ;;  %3098 = vmatpush1.bf16.msra.mxu1 %v11010_v4  ;;  %v11073_v61 = vcombine.high %v694_v55, %v698_v56  ;;  %v702_v63 = vld [vmem:[%s18278_s2 + $0x400] sm:$0xff]  ;;  %v707_v2 = vld [vmem:[%s18278_s2 + $0x428] sm:$0xff]  ;;  %v11072_v3 = vcombine.low %v694_v55, %v698_v56  ;;  %v11074_v4 = vcombine.low %v695_v57, %v699_v58 }
  0x2f   : > { %2760 = vmatprep.subr.bf16.mxu0 %v11017_v5  ;;  %3099 = vmatprep.subr.bf16.mxu1 %v11019_v6  ;;  %v706_v0 = vld [vmem:[%s18278_s2 + $0x420] sm:$0xff]  ;;  %v11083_v6 = vcombine.high %v703_v1, %v707_v2  ;;  %v711_v10 = vld [vmem:[%s18278_s2 + $0x448] sm:$0xff] }
  0x30   : > { %v11081_v5 = vcombine.high %v702_v63, %v706_v0  ;;  %v710_v7 = vld [vmem:[%s18278_s2 + $0x440] sm:$0xff]  ;;  %v13213_v33 = vld [vmem:[%s14100_s30 + $0x54] ss:$20 sps:$4 sm:$0xff]  }
  0x31   : > { %v714_v8 = vld [vmem:[%s18278_s2 + $0x460] sm:$0xff]  ;;  %v747_v47 = vld [vmem:[%s18278_s2 + $0x568] sm:$0xff] }
  0x32   : > { %2761 = vmatpush1.bf16.msra.mxu0 %v11016_v11  ;;  %3100 = vmatpush1.bf16.msra.mxu1 %v11018_v12  ;;  %v13209_v9 = vld [vmem:[%s14100_s30] ss:$20 sps:$4 sm:$0xff]   ;;  %v715_v11 = vld [vmem:[%s18278_s2 + $0x468] sm:$0xff]  ;;  %v11080_v12 = vcombine.low %v702_v63, %v706_v0 }
  0x33   : > { %2762 = vmatprep.subr.bf16.mxu0 %v11025_v13  ;;  %3101 = vmatprep.subr.bf16.mxu1 %v11027_v14  ;;  %v11082_v13 = vcombine.low %v703_v1, %v707_v2  ;;  %v11089_v14 = vcombine.high %v710_v7, %v714_v8  ;;  %v13210_v15 = vld [vmem:[%s14100_s30 + $0x2c] ss:$20 sps:$4 sm:$0xff]   ;;  %v11091_v16 = vcombine.high %v711_v10, %v715_v11 }
  0x34   : > { %v718_v17 = vld [vmem:[%s18278_s2 + $0x480] sm:$0xff]  ;;  %v751_v55 = vld [vmem:[%s18278_s2 + $0x588] sm:$0xff] }
  0x35   : > { %v722_v18 = vld [vmem:[%s18278_s2 + $0x4a0] sm:$0xff]  ;;  %v755_v56 = vld [vmem:[%s18278_s2 + $0x5a8] sm:$0xff] }
  0x36   : > { %2763 = vmatpush1.bf16.msra.mxu0 %v11024_v19  ;;  %3102 = vmatpush1.bf16.msra.mxu1 %v11026_v20  ;;  %v719_v19 = vld [vmem:[%s18278_s2 + $0x488] sm:$0xff]  ;;  %v11097_v23 = vcombine.high %v718_v17, %v722_v18  ;;  %v726_v25 = vld [vmem:[%s18278_s2 + $0x4c0] sm:$0xff]  ;;  %v11131_v0 = vcombine.high %v751_v55, %v755_v56 }
  0x37   : > { %2764 = vmatprep.subr.bf16.mxu0 %v11033_v21  ;;  %3103 = vmatprep.subr.bf16.mxu1 %v11035_v22  ;;  %v723_v20 = vld [vmem:[%s18278_s2 + $0x4a8] sm:$0xff]  ;;  %v11088_v21 = vcombine.low %v710_v7, %v714_v8  ;;  %v11090_v22 = vcombine.low %v711_v10, %v715_v11  ;;  %v730_v26 = vld [vmem:[%s18278_s2 + $0x4e0] sm:$0xff] }
  0x38   : > { %v11099_v24 = vcombine.high %v719_v19, %v723_v20  ;;  %v11098_v31 = vcombine.low %v719_v19, %v723_v20  ;;  %v11105_v32 = vcombine.high %v726_v25, %v730_v26  ;;  %v11104_v39 = vcombine.low %v726_v25, %v730_v26  ;;  %v742_v42 = vld [vmem:[%s18278_s2 + $0x540] sm:$0xff]  ;;  %v759_v63 = vld [vmem:[%s18278_s2 + $0x5c8] sm:$0xff] }
  0x39   : > { %v763_v1 = vld [vmem:[%s18278_s2 + $0x5e8] sm:$0xff]  ;;  %v770_v7 = vld [vmem:[%s18278_s2 + $0x620] sm:$0xff] }
  0x3a   : > { %2765 = vmatpush1.bf16.msra.mxu0 %v11032_v27  ;;  %3104 = vmatpush1.bf16.msra.mxu1 %v11034_v28  ;;  %v13212_v27 = vld [vmem:[%s14100_s30 + $0x28] ss:$20 sps:$4 sm:$0xff]   ;;  %v11139_v8 = vcombine.high %v759_v63, %v763_v1  ;;  %v786_v25 = vld [vmem:[%s18278_s2 + $0x6a0] sm:$0xff] }
  0x3b   : > { %2766 = vmatprep.subr.bf16.mxu0 %v11041_v29  ;;  %3105 = vmatprep.subr.bf16.mxu1 %v11043_v30  ;;  %v727_v28 = vld [vmem:[%s18278_s2 + $0x4c8] sm:$0xff]  ;;  %v11096_v30 = vcombine.low %v718_v17, %v722_v18 }
  0x3c   : > { %v731_v29 = vld [vmem:[%s18278_s2 + $0x4e8] sm:$0xff] }
  0x3d   : > { %v11107_v34 = vcombine.high %v727_v28, %v731_v29  ;;  %v11106_v40 = vcombine.low %v727_v28, %v731_v29  ;;  %v771_v10 = vld [vmem:[%s18278_s2 + $0x628] sm:$0xff] }
  0x3e   : > { %2767 = vmatpush1.bf16.msra.mxu0 %v11040_v35  ;;  %3106 = vmatpush1.bf16.msra.mxu1 %v11042_v36  ;;  %v734_v35 = vld [vmem:[%s18278_s2 + $0x500] sm:$0xff]  ;;  %v775_v17 = vld [vmem:[%s18278_s2 + $0x648] sm:$0xff] }
  0x3f   : > { %2768 = vmatprep.subr.bf16.mxu0 %v11049_v37  ;;  %3107 = vmatprep.subr.bf16.mxu1 %v11051_v38  ;;  %v738_v36 = vld [vmem:[%s18278_s2 + $0x520] sm:$0xff]  ;;  %v735_v37 = vld [vmem:[%s18278_s2 + $0x508] sm:$0xff] }
  0x40   : > { %v739_v38 = vld [vmem:[%s18278_s2 + $0x528] sm:$0xff]  ;;  %v11113_v41 = vcombine.high %v734_v35, %v738_v36  ;;  %v11112_v48 = vcombine.low %v734_v35, %v738_v36 }
  0x41   : > { %v11114_v49 = vcombine.low %v735_v37, %v739_v38  ;;  %v779_v19 = vld [vmem:[%s18278_s2 + $0x668] sm:$0xff] }
  0x42   : > { %2769 = vmatpush1.bf16.msra.mxu0 %v11048_v43  ;;  %3108 = vmatpush1.bf16.msra.mxu1 %v11050_v44  ;;  %v11115_v43 = vcombine.high %v735_v37, %v739_v38  ;;  %v746_v44 = vld [vmem:[%s18278_s2 + $0x560] sm:$0xff]  ;;  %v11155_v26 = vcombine.high %v775_v17, %v779_v19  ;;  %v787_v28 = vld [vmem:[%s18278_s2 + $0x6a8] sm:$0xff] }
  0x43   : > { %2770 = vmatprep.subr.bf16.mxu0 %v11057_v45  ;;  %3109 = vmatprep.subr.bf16.mxu1 %v11059_v46  ;;  %v13215_v45 = vld [vmem:[%s14100_s30 + $0x50] ss:$20 sps:$4 sm:$0xff]   ;;  %v743_v46 = vld [vmem:[%s18278_s2 + $0x548] sm:$0xff]  ;;  %v11121_v50 = vcombine.high %v742_v42, %v746_v44  ;;  %v11120_v57 = vcombine.low %v742_v42, %v746_v44 }
  0x44   : > { %v11122_v58 = vcombine.low %v743_v46, %v747_v47  ;;  %v791_v35 = vld [vmem:[%s18278_s2 + $0x6c8] sm:$0xff]  ;;  %v798_v42 = vld [vmem:[%s18278_s2 + $0x700] sm:$0xff] }
  0x45   : > { %v795_v37 = vld [vmem:[%s18278_s2 + $0x6e8] sm:$0xff] }
  0x46   : > { %2771 = vmatpush1.bf16.msra.mxu0 %v11056_v51  ;;  %3110 = vmatpush1.bf16.msra.mxu1 %v11058_v52  ;;  %v13216_v51 = vld [vmem:[%s14100_s30 + $0x7c] ss:$20 sps:$4 sm:$0xff]   ;;  %v750_v52 = vld [vmem:[%s18278_s2 + $0x580] sm:$0xff]  ;;  %v11171_v44 = vcombine.high %v791_v35, %v795_v37 }
  0x47   : > { %2772 = vmatprep.subr.bf16.mxu0 %v11065_v53  ;;  %3111 = vmatprep.subr.bf16.mxu1 %v11067_v54  ;;  %v11123_v53 = vcombine.high %v743_v46, %v747_v47  ;;  %v754_v54 = vld [vmem:[%s18278_s2 + $0x5a0] sm:$0xff]  ;;  %v803_v46 = vld [vmem:[%s18278_s2 + $0x728] sm:$0xff] }
  0x48   : > { %v11128_v2 = vcombine.low %v750_v52, %v754_v54 }
  0x4a   : > { %2773 = vmatpush1.bf16.msra.mxu0 %v11064_v59  ;;  %3112 = vmatpush1.bf16.msra.mxu1 %v11066_v60  ;;  %v13218_v59 = vld [vmem:[%s14100_s30 + $0x78] ss:$20 sps:$4 sm:$0xff]   ;;  %v11129_v60 = vcombine.high %v750_v52, %v754_v54  ;;  %v810_v52 = vld [vmem:[%s18278_s2 + $0x760] sm:$0xff] }
  0x4b   : > { %2774 = vmatprep.subr.bf16.mxu0 %v11073_v61  ;;  %3113 = vmatprep.subr.bf16.mxu1 %v11075_v62  ;;  %v758_v61 = vld [vmem:[%s18278_s2 + $0x5c0] sm:$0xff] }
  0x4c   : > { %v762_v62 = vld [vmem:[%s18278_s2 + $0x5e0] sm:$0xff] }
  0x4d   : > { %v11136_v11 = vcombine.low %v758_v61, %v762_v62 }
  0x4e   : > { %2775 = vmatpush1.bf16.msra.mxu0 %v11072_v3  ;;  %3114 = vmatpush1.bf16.msra.mxu1 %v11074_v4  ;;  %v11130_v3 = vcombine.low %v751_v55, %v755_v56  ;;  %v11137_v4 = vcombine.high %v758_v61, %v762_v62  ;;  %v811_v55 = vld [vmem:[%s18278_s2 + $0x768] sm:$0xff]  ;;  %v818_v61 = vld [vmem:[%s18278_s2 + $0x7a0] sm:$0xff] }
  0x4f   : > { %2857 = vmatprep.subr.bf16.mxu0 %v11081_v5  ;;  %3196 = vmatprep.subr.bf16.mxu1 %v11083_v6  ;;  %v13219_v5 = vld [vmem:[%s14100_s30 + $0xa4] ss:$20 sps:$4 sm:$0xff]  }
  0x50   : > { %v766_v6 = vld [vmem:[%s18278_s2 + $0x600] sm:$0xff] }
  0x51   : > { %2777 = vmatmul.mubr.bf16.vlgmr.msra.gmra.mrb[0].mxu0 %v13209_v9  ;;  %3116 = vmatmul.mubr.bf16.vlgmr.msra.gmra.mrb[0].mxu1 %v13209_v9  ;;  %v767_v9 = vld [vmem:[%s18278_s2 + $0x608] sm:$0xff]  ;;  %v11144_v20 = vcombine.low %v766_v6, %v770_v7 }
  0x52   : > { %2858 = vmatpush1.bf16.msra.mxu0 %v11080_v12  ;;  %3197 = vmatpush1.bf16.msra.mxu1 %v11082_v13  ;;  %v11138_v12 = vcombine.low %v759_v63, %v763_v1  ;;  %v13221_v13 = vld [vmem:[%s14100_s30 + $0xa0] ss:$20 sps:$4 sm:$0xff]   ;;  %v11147_v18 = vcombine.high %v767_v9, %v771_v10  ;;  %v815_v63 = vld [vmem:[%s18278_s2 + $0x788] sm:$0xff] }
  0x53   : > { %2859 = vmatprep.subr.bf16.mxu0 %v11089_v14  ;;  %3198 = vmatprep.subr.bf16.mxu1 %v11091_v16  ;;  %v11145_v14 = vcombine.high %v766_v6, %v770_v7  ;;  %v778_v16 = vld [vmem:[%s18278_s2 + $0x660] sm:$0xff]  ;;  %v823_v7 = vld [vmem:[%s18278_s2 + $0x7c8] sm:$0xff] }
  0x54   : > { %2786 = vmatprep.mubr.bf16.mxu0 %v13210_v15  ;;  %3125 = vmatprep.mubr.bf16.mxu1 %v13210_v15  ;;  %v774_v15 = vld [vmem:[%s18278_s2 + $0x640] sm:$0xff] }
  0x55   : > { %v11152_v29 = vcombine.low %v774_v15, %v778_v16  ;;  %v826_v6 = vld [vmem:[%s18278_s2 + $0x7e0] sm:$0xff] }
  0x56   : > { %2860 = vmatpush1.bf16.msra.mxu0 %v11088_v21  ;;  %3199 = vmatpush1.bf16.msra.mxu1 %v11090_v22  ;;  %v11146_v21 = vcombine.low %v767_v9, %v771_v10  ;;  %v11153_v22 = vcombine.high %v774_v15, %v778_v16  ;;  %v827_v9 = vld [vmem:[%s18278_s2 + $0x7e8] sm:$0xff]  ;;  %v834_v15 = vld [vmem:[%s18278_s2 + $0x820] sm:$0xff] }
  0x57   : > { %2861 = vmatprep.subr.bf16.mxu0 %v11097_v23  ;;  %3200 = vmatprep.subr.bf16.mxu1 %v11099_v24  ;;  %v13222_v23 = vld [vmem:[%s14100_s30 + $0xcc] ss:$20 sps:$4 sm:$0xff]   ;;  %v11203_v16 = vcombine.high %v823_v7, %v827_v9 }
  0x58   : > { %v782_v24 = vld [vmem:[%s18278_s2 + $0x680] sm:$0xff] }
  0x59   : > { %2787 = vmatmul.mubr.bf16.gmra.mrb[4].mxu0 %v13212_v27  ;;  %3126 = vmatmul.mubr.bf16.gmra.mrb[4].mxu1 %v13212_v27  ;;  %v783_v27 = vld [vmem:[%s18278_s2 + $0x688] sm:$0xff]  ;;  %v11160_v38 = vcombine.low %v782_v24, %v786_v25 }
  0x5a   : > { %2862 = vmatpush1.bf16.msra.mxu0 %v11096_v30  ;;  %3201 = vmatpush1.bf16.msra.mxu1 %v11098_v31  ;;  %v11154_v30 = vcombine.low %v775_v17, %v779_v19  ;;  %v13224_v31 = vld [vmem:[%s14100_s30 + $0xc8] ss:$20 sps:$4 sm:$0xff]   ;;  %v11163_v36 = vcombine.high %v783_v27, %v787_v28 }
  0x5b   : > { %2863 = vmatprep.subr.bf16.mxu0 %v11105_v32  ;;  %3202 = vmatprep.subr.bf16.mxu1 %v11107_v34  ;;  %v11161_v32 = vcombine.high %v782_v24, %v786_v25  ;;  %v794_v34 = vld [vmem:[%s18278_s2 + $0x6e0] sm:$0xff]  ;;  %v831_v17 = vld [vmem:[%s18278_s2 + $0x808] sm:$0xff] }
  0x5c   : > { %2796 = vmatprep.mubr.bf16.mxu0 %v13213_v33  ;;  %3135 = vmatprep.mubr.bf16.mxu1 %v13213_v33  ;;  %v790_v33 = vld [vmem:[%s18278_s2 + $0x6c0] sm:$0xff] }
  0x5d   : > { %v11168_v47 = vcombine.low %v790_v33, %v794_v34  ;;  %v842_v24 = vld [vmem:[%s18278_s2 + $0x860] sm:$0xff] }
  0x5e   : > { %2864 = vmatpush1.bf16.msra.mxu0 %v11104_v39  ;;  %3203 = vmatpush1.bf16.msra.mxu1 %v11106_v40  ;;  %v11162_v39 = vcombine.low %v783_v27, %v787_v28  ;;  %v11169_v40 = vcombine.high %v790_v33, %v794_v34  ;;  %v843_v27 = vld [vmem:[%s18278_s2 + $0x868] sm:$0xff] }
  0x5f   : > { %2865 = vmatprep.subr.bf16.mxu0 %v11113_v41  ;;  %3204 = vmatprep.subr.bf16.mxu1 %v11115_v43  ;;  %v13225_v41 = vld [vmem:[%s14100_s30 + $0xf4] ss:$20 sps:$4 sm:$0xff]   ;;  %v802_v43 = vld [vmem:[%s18278_s2 + $0x720] sm:$0xff] }
  0x60   : > { %v11176_v56 = vcombine.low %v798_v42, %v802_v43  ;;  %v13234_v28 = vld [vmem:[%s14100_s30 + $0x34] ss:$20 sps:$4 sm:$0xff]  }
  0x61   : > { %2797 = vmatmul.mubr.bf16.gmra.mrb[8].mxu0 %v13215_v45  ;;  %3136 = vmatmul.mubr.bf16.gmra.mrb[8].mxu1 %v13215_v45  ;;  %v799_v45 = vld [vmem:[%s18278_s2 + $0x708] sm:$0xff] }
  0x62   : > { %2866 = vmatpush1.bf16.msra.mxu0 %v11112_v48  ;;  %3205 = vmatpush1.bf16.msra.mxu1 %v11114_v49  ;;  %v11170_v48 = vcombine.low %v791_v35, %v795_v37  ;;  %v13227_v49 = vld [vmem:[%s14100_s30 + $0xf0] ss:$20 sps:$4 sm:$0xff]   ;;  %v11179_v54 = vcombine.high %v799_v45, %v803_v46  ;;  %v847_v33 = vld [vmem:[%s18278_s2 + $0x888] sm:$0xff] }
  0x63   : > { %2867 = vmatprep.subr.bf16.mxu0 %v11121_v50  ;;  %3206 = vmatprep.subr.bf16.mxu1 %v11123_v53  ;;  %v11177_v50 = vcombine.high %v798_v42, %v802_v43  ;;  %v807_v53 = vld [vmem:[%s18278_s2 + $0x748] sm:$0xff]  ;;  %v858_v42 = vld [vmem:[%s18278_s2 + $0x8e0] sm:$0xff]  ;;  %v13237_v43 = vld [vmem:[%s14100_s30 + $0x5c] ss:$20 sps:$4 sm:$0xff]  }
  0x64   : > { %2806 = vmatprep.mubr.bf16.mxu0 %v13216_v51  ;;  %3145 = vmatprep.mubr.bf16.mxu1 %v13216_v51  ;;  %v806_v51 = vld [vmem:[%s18278_s2 + $0x740] sm:$0xff]  ;;  %v11187_v62 = vcombine.high %v807_v53, %v811_v55  ;;  %v851_v35 = vld [vmem:[%s18278_s2 + $0x8a8] sm:$0xff] }
  0x65   : > { %v11184_v1 = vcombine.low %v806_v51, %v810_v52 }
  0x66   : > { %2868 = vmatpush1.bf16.msra.mxu0 %v11120_v57  ;;  %3207 = vmatpush1.bf16.msra.mxu1 %v11122_v58  ;;  %v11178_v57 = vcombine.low %v799_v45, %v803_v46  ;;  %v11185_v58 = vcombine.high %v806_v51, %v810_v52  ;;  %v855_v45 = vld [vmem:[%s18278_s2 + $0x8c8] sm:$0xff] }
  0x67   : > { %2869 = vmatprep.subr.bf16.mxu0 %v11129_v60  ;;  %3208 = vmatprep.subr.bf16.mxu1 %v11131_v0  ;;  %v814_v60 = vld [vmem:[%s18278_s2 + $0x780] sm:$0xff]  ;;  %v819_v0 = vld [vmem:[%s18278_s2 + $0x7a8] sm:$0xff] }
  0x68   : > { %v11192_v10 = vcombine.low %v814_v60, %v818_v61  ;;  %v859_v46 = vld [vmem:[%s18278_s2 + $0x8e8] sm:$0xff] }
  0x69   : > { %2807 = vmatmul.mubr.bf16.gmra.mrb[12].mxu0 %v13218_v59  ;;  %3146 = vmatmul.mubr.bf16.gmra.mrb[12].mxu1 %v13218_v59  ;;  %v13228_v59 = vld [vmem:[%s14100_s30 + $0x11c] ss:$20 sps:$4 sm:$0xff]   ;;  %v863_v52 = vld [vmem:[%s18278_s2 + $0x908] sm:$0xff] }
  0x6a   : > { %2870 = vmatpush1.bf16.msra.mxu0 %v11128_v2  ;;  %3209 = vmatpush1.bf16.msra.mxu1 %v11130_v3  ;;  %v11186_v2 = vcombine.low %v807_v53, %v811_v55  ;;  %v13230_v3 = vld [vmem:[%s14100_s30 + $0x118] ss:$20 sps:$4 sm:$0xff]  }
  0x6b   : > { %2871 = vmatprep.subr.bf16.mxu0 %v11137_v4  ;;  %3210 = vmatprep.subr.bf16.mxu1 %v11139_v8  ;;  %v11193_v4 = vcombine.high %v814_v60, %v818_v61  ;;  %v11195_v8 = vcombine.high %v815_v63, %v819_v0  ;;  %v867_v53 = vld [vmem:[%s18278_s2 + $0x928] sm:$0xff]  ;;  %v11234_v60 = vcombine.low %v855_v45, %v859_v46 }
  0x6c   : > { %2816 = vmatprep.mubr.bf16.mxu0 %v13219_v5  ;;  %3155 = vmatprep.mubr.bf16.mxu1 %v13219_v5  ;;  %v822_v5 = vld [vmem:[%s18278_s2 + $0x7c0] sm:$0xff]  ;;  %v13239_v55 = vld [vmem:[%s14100_s30 + $0x58] ss:$20 sps:$4 sm:$0xff]  }
  0x6d   : > { %v11200_v19 = vcombine.low %v822_v5, %v826_v6 }
  0x6e   : > { %2872 = vmatpush1.bf16.msra.mxu0 %v11136_v11  ;;  %3211 = vmatpush1.bf16.msra.mxu1 %v11138_v12  ;;  %v11194_v11 = vcombine.low %v815_v63, %v819_v0  ;;  %v11201_v12 = vcombine.high %v822_v5, %v826_v6  ;;  %v875_v63 = vld [vmem:[%s18278_s2 + $0x968] sm:$0xff]  ;;  %v11243_v0 = vcombine.high %v863_v52, %v867_v53 }
  0x6f   : > { %2873 = vmatprep.subr.bf16.mxu0 %v11145_v14  ;;  %3212 = vmatprep.subr.bf16.mxu1 %v11147_v18  ;;  %v830_v14 = vld [vmem:[%s18278_s2 + $0x800] sm:$0xff]  ;;  %v835_v18 = vld [vmem:[%s18278_s2 + $0x828] sm:$0xff] }
  0x70   : > { %v11211_v25 = vcombine.high %v831_v17, %v835_v18  ;;  %v879_v6 = vld [vmem:[%s18278_s2 + $0x988] sm:$0xff] }
  0x71   : > { %2817 = vmatmul.mubr.bf16.gmra.mrb[16].mxu0 %v13221_v13  ;;  %3156 = vmatmul.mubr.bf16.gmra.mrb[16].mxu1 %v13221_v13  ;;  %v13233_v13 = vld [vmem:[%s14100_s30 + $0xc] ss:$20 sps:$4 sm:$0xff]  }
  0x72   : > { %2874 = vmatpush1.bf16.msra.mxu0 %v11144_v20  ;;  %3213 = vmatpush1.bf16.msra.mxu1 %v11146_v21  ;;  %v11202_v20 = vcombine.low %v823_v7, %v827_v9  ;;  %v13231_v21 = vld [vmem:[%s14100_s30 + $0x8] ss:$20 sps:$4 sm:$0xff]   ;;  %v13242_v9 = vld [vmem:[%s14100_s30 + $0x80] ss:$20 sps:$4 sm:$0xff]  }
  0x73   : > { %2875 = vmatprep.subr.bf16.mxu0 %v11153_v22  ;;  %3214 = vmatprep.subr.bf16.mxu1 %v11155_v26  ;;  %v11209_v22 = vcombine.high %v830_v14, %v834_v15  ;;  %v839_v26 = vld [vmem:[%s18278_s2 + $0x848] sm:$0xff] }
  0x74   : > { %2826 = vmatprep.mubr.bf16.mxu0 %v13222_v23  ;;  %3165 = vmatprep.mubr.bf16.mxu1 %v13222_v23  ;;  %v838_v23 = vld [vmem:[%s18278_s2 + $0x840] sm:$0xff]  ;;  %v883_v7 = vld [vmem:[%s18278_s2 + $0x9a8] sm:$0xff] }
  0x75   : > { %v11217_v34 = vcombine.high %v838_v23, %v842_v24  ;;  %v11216_v37 = vcombine.low %v838_v23, %v842_v24  ;;  %v14536_v24 = vld [vmem:[%s18278_s2 + $0x18] sm:$0xff] }
  0x76   : > { %2876 = vmatpush1.bf16.msra.mxu0 %v11152_v29  ;;  %3215 = vmatpush1.bf16.msra.mxu1 %v11154_v30  ;;  %v11208_v29 = vcombine.low %v830_v14, %v834_v15  ;;  %v11210_v30 = vcombine.low %v831_v17, %v835_v18  ;;  %v891_v17 = vld [vmem:[%s18278_s2 + $0x9e8] sm:$0xff]  ;;  %v11259_v18 = vcombine.high %v879_v6, %v883_v7 }
  0x77   : > { %2877 = vmatprep.subr.bf16.mxu0 %v11161_v32  ;;  %3216 = vmatprep.subr.bf16.mxu1 %v11163_v36  ;;  %v850_v32 = vld [vmem:[%s18278_s2 + $0x8a0] sm:$0xff]  ;;  %v11219_v36 = vcombine.high %v839_v26, %v843_v27 }
  0x79   : > { %2827 = vmatmul.mubr.bf16.gmra.mrb[20].mxu0 %v13224_v31  ;;  %3166 = vmatmul.mubr.bf16.gmra.mrb[20].mxu1 %v13224_v31  ;;  %v846_v31 = vld [vmem:[%s18278_s2 + $0x880] sm:$0xff] }
  0x7a   : > { %2878 = vmatpush1.bf16.msra.mxu0 %v11160_v38  ;;  %3217 = vmatpush1.bf16.msra.mxu1 %v11162_v39  ;;  %v13236_v38 = vld [vmem:[%s14100_s30 + $0x30] ss:$20 sps:$4 sm:$0xff]   ;;  %v11218_v39 = vcombine.low %v839_v26, %v843_v27  ;;  %v13245_v27 = vld [vmem:[%s14100_s30 + $0xa8] ss:$20 sps:$4 sm:$0xff]  }
  0x7b   : > { %2879 = vmatprep.subr.bf16.mxu0 %v11169_v40  ;;  %3218 = vmatprep.subr.bf16.mxu1 %v11171_v44  ;;  %v11225_v40 = vcombine.high %v846_v31, %v850_v32  ;;  %v11227_v44 = vcombine.high %v847_v33, %v851_v35 }
  0x7c   : > { %2836 = vmatprep.mubr.bf16.mxu0 %v13225_v41  ;;  %3175 = vmatprep.mubr.bf16.mxu1 %v13225_v41  ;;  %v854_v41 = vld [vmem:[%s18278_s2 + $0x8c0] sm:$0xff] }
  0x7d   : > { %v11233_v51 = vcombine.high %v854_v41, %v858_v42 }
  0x7e   : > { %2880 = vmatpush1.bf16.msra.mxu0 %v11168_v47  ;;  %3219 = vmatpush1.bf16.msra.mxu1 %v11170_v48  ;;  %v11224_v47 = vcombine.low %v846_v31, %v850_v32  ;;  %v862_v48 = vld [vmem:[%s18278_s2 + $0x900] sm:$0xff] }
  0x7f   : > { %2881 = vmatprep.subr.bf16.mxu0 %v11177_v50  ;;  %3220 = vmatprep.subr.bf16.mxu1 %v11179_v54  ;;  %v11226_v50 = vcombine.low %v847_v33, %v851_v35  ;;  %v11235_v54 = vcombine.high %v855_v45, %v859_v46  ;;  %v13248_v33 = vld [vmem:[%s14100_s30 + $0xd0] ss:$20 sps:$4 sm:$0xff]   ;;  %v13251_v35 = vld [vmem:[%s14100_s30 + $0xf8] ss:$20 sps:$4 sm:$0xff]  }
  0x80   : > { %v592_v45 = vld [vmem:[%s18278_s2 + $0x90] sm:$0xff] }
  0x81   : > { %2837 = vmatmul.mubr.bf16.gmra.mrb[24].mxu0 %v13227_v49  ;;  %3176 = vmatmul.mubr.bf16.gmra.mrb[24].mxu1 %v13227_v49  ;;  %v866_v49 = vld [vmem:[%s18278_s2 + $0x920] sm:$0xff]  ;;  %v596_v46 = vld [vmem:[%s18278_s2 + $0xb0] sm:$0xff] }
  0x82   : > { %2882 = vmatpush1.bf16.msra.mxu0 %v11176_v56  ;;  %3221 = vmatpush1.bf16.msra.mxu1 %v11178_v57  ;;  %v11232_v56 = vcombine.low %v854_v41, %v858_v42  ;;  %v870_v57 = vld [vmem:[%s18278_s2 + $0x940] sm:$0xff]  ;;  %v11241_v61 = vcombine.high %v862_v48, %v866_v49  ;;  %v588_v41 = vld [vmem:[%s18278_s2 + $0x70] sm:$0xff]  ;;  %v585_v42 = vld [vmem:[%s18278_s2 + $0x58] sm:$0xff] }
  0x83   : > { %2883 = vmatprep.subr.bf16.mxu0 %v11185_v58  ;;  %3222 = vmatprep.subr.bf16.mxu1 %v11187_v62  ;;  %v874_v58 = vld [vmem:[%s18278_s2 + $0x960] sm:$0xff]  ;;  %v871_v62 = vld [vmem:[%s18278_s2 + $0x948] sm:$0xff] }
  0x84   : > { %2846 = vmatprep.mubr.bf16.mxu0 %v13228_v59  ;;  %3185 = vmatprep.mubr.bf16.mxu1 %v13228_v59  ;;  %v13240_v59 = vld [vmem:[%s14100_s30 + $0x84] ss:$20 sps:$4 sm:$0xff]   ;;  %v11249_v5 = vcombine.high %v870_v57, %v874_v58  ;;  %v11250_v14 = vcombine.low %v871_v62, %v875_v63 }
  0x86   : > { %2884 = vmatpush1.bf16.msra.mxu0 %v11184_v1  ;;  %3223 = vmatpush1.bf16.msra.mxu1 %v11186_v2  ;;  %v11240_v1 = vcombine.low %v862_v48, %v866_v49  ;;  %v878_v2 = vld [vmem:[%s18278_s2 + $0x980] sm:$0xff] }
  0x87   : > { %2885 = vmatprep.subr.bf16.mxu0 %v11193_v4  ;;  %3224 = vmatprep.subr.bf16.mxu1 %v11195_v8  ;;  %v11242_v4 = vcombine.low %v863_v52, %v867_v53  ;;  %v11251_v8 = vcombine.high %v871_v62, %v875_v63  ;;  %v600_v53 = vld [vmem:[%s18278_s2 + $0xd0] sm:$0xff] }
  0x88   : > { %v608_v62 = vld [vmem:[%s18278_s2 + $0x110] sm:$0xff] }
  0x89   : > { %2847 = vmatmul.mubr.bf16.gmra.mrb[28].mxu0 %v13230_v3  ;;  %3186 = vmatmul.mubr.bf16.gmra.mrb[28].mxu1 %v13230_v3  ;;  %v882_v3 = vld [vmem:[%s18278_s2 + $0x9a0] sm:$0xff]  ;;  %v612_v63 = vld [vmem:[%s18278_s2 + $0x130] sm:$0xff] }
  0x8a   : > { %2886 = vmatpush1.bf16.msra.mxu0 %v11192_v10  ;;  %3225 = vmatpush1.bf16.msra.mxu1 %v11194_v11  ;;  %v11248_v10 = vcombine.low %v870_v57, %v874_v58  ;;  %v886_v11 = vld [vmem:[%s18278_s2 + $0x9c0] sm:$0xff]  ;;  %v11257_v15 = vcombine.high %v878_v2, %v882_v3  ;;  %v10973_v57 = vcombine.high %v592_v45, %v596_v46  ;;  %v601_v58 = vld [vmem:[%s18278_s2 + $0xd8] sm:$0xff] }
  0x8b   : > { %2887 = vmatprep.subr.bf16.mxu0 %v11201_v12  ;;  %3226 = vmatprep.subr.bf16.mxu1 %v11203_v16  ;;  %v890_v12 = vld [vmem:[%s18278_s2 + $0x9e0] sm:$0xff]  ;;  %v887_v16 = vld [vmem:[%s18278_s2 + $0x9c8] sm:$0xff] }
  0x8c   : > { %2889 = vmatprep.mubr.bf16.mxu0 %v13233_v13  ;;  %3228 = vmatprep.mubr.bf16.mxu1 %v13233_v13  ;;  %v13243_v13 = vld [vmem:[%s14100_s30 + $0xac] ss:$20 sps:$4 sm:$0xff]   ;;  %v11265_v23 = vcombine.high %v886_v11, %v890_v12  ;;  %v11267_v26 = vcombine.high %v887_v16, %v891_v17 }
  0x8e   : > { %2888 = vmatpush1.bf16.msra.mxu0 %v11200_v19  ;;  %3227 = vmatpush1.bf16.msra.mxu1 %v11202_v20  ;;  %v11256_v19 = vcombine.low %v878_v2, %v882_v3  ;;  %v14526_v20 = vld [vmem:[%s18278_s2 + $0x10] sm:$0xff]  ;;  %v609_v3 = vld [vmem:[%s18278_s2 + $0x118] sm:$0xff] }
  0x8f   : > { %2970 = vmatprep.subr.bf16.mxu0 %v11209_v22  ;;  %3309 = vmatprep.subr.bf16.mxu1 %v11211_v25  ;;  %v11258_v22 = vcombine.low %v879_v6, %v883_v7  ;;  %v581_v25 = vld [vmem:[%s18278_s2 + $0x38] sm:$0xff]  ;;  %v616_v6 = vld [vmem:[%s18278_s2 + $0x150] sm:$0xff] }
  0x90   : > { %v10959_v32 = vcombine.high %v14536_v24, %v581_v25  ;;  %v620_v7 = vld [vmem:[%s18278_s2 + $0x170] sm:$0xff] }
  0x91   : > { %2890 = vmatmul.mubr.bf16.vlgmr.msra.gmra.mrb[0].mxu0 %v13231_v21  ;;  %3229 = vmatmul.mubr.bf16.vlgmr.msra.gmra.mrb[0].mxu1 %v13231_v21  ;;  %v14531_v21 = vld [vmem:[%s18278_s2 + $0x30] sm:$0xff] }
  0x92   : > { %2971 = vmatpush1.bf16.msra.mxu0 %v11208_v29  ;;  %3310 = vmatpush1.bf16.msra.mxu1 %v11210_v30  ;;  %v13246_v29 = vld [vmem:[%s14100_s30 + $0xd4] ss:$20 sps:$4 sm:$0xff]   ;;  %v11266_v30 = vcombine.low %v887_v16, %v891_v17  ;;  %v10957_v31 = vcombine.high %v14526_v20, %v14531_v21 }
  0x93   : > { %2899 = vmatprep.mubr.bf16.mxu0 %v13234_v28  ;;  %3238 = vmatprep.mubr.bf16.mxu1 %v13234_v28  ;;  %v11264_v28 = vcombine.low %v886_v11, %v890_v12  ;;  %v617_v11 = vld [vmem:[%s18278_s2 + $0x158] sm:$0xff]  ;;  %v628_v16 = vld [vmem:[%s18278_s2 + $0x1b0] sm:$0xff] }
  0x94   : > { %2972 = vmatprep.subr.bf16.mxu0 %v11217_v34  ;;  %3311 = vmatprep.subr.bf16.mxu1 %v11219_v36  ;;  %v13249_v34 = vld [vmem:[%s14100_s30 + $0xfc] ss:$20 sps:$4 sm:$0xff]   ;;  %v13252_v36 = vld [vmem:[%s14100_s30 + $0x124] ss:$20 sps:$4 sm:$0xff]  }
  0x95   : > { %v621_v12 = vld [vmem:[%s18278_s2 + $0x178] sm:$0xff] }
  0x96   : > { %2973 = vmatpush1.bf16.msra.mxu0 %v11216_v37  ;;  %3312 = vmatpush1.bf16.msra.mxu1 %v11218_v39  ;;  %v13254_v37 = vld [vmem:[%s14100_s30 + $0x120] ss:$20 sps:$4 sm:$0xff]   ;;  %v13255_v39 = vld [vmem:[%s14100_s30 + $0x10] ss:$20 sps:$4 sm:$0xff]  }
  0x97   : > { %2974 = vmatprep.subr.bf16.mxu0 %v11225_v40  ;;  %3313 = vmatprep.subr.bf16.mxu1 %v11227_v44  ;;  %v584_v40 = vld [vmem:[%s18278_s2 + $0x50] sm:$0xff]  ;;  %v10956_v44 = vcombine.low %v14526_v20, %v14531_v21  ;;  %v625_v20 = vld [vmem:[%s18278_s2 + $0x198] sm:$0xff] }
  0x98   : > { %v10965_v48 = vcombine.high %v584_v40, %v588_v41  ;;  %v10964_v52 = vcombine.low %v584_v40, %v588_v41  ;;  %v629_v21 = vld [vmem:[%s18278_s2 + $0x1b8] sm:$0xff]  ;;  %v648_v41 = vld [vmem:[%s18278_s2 + $0x250] sm:$0xff] }
  0x99   : > { %2900 = vmatmul.mubr.bf16.gmra.mrb[4].mxu0 %v13236_v38  ;;  %3239 = vmatmul.mubr.bf16.gmra.mrb[4].mxu1 %v13236_v38  ;;  %v18294_v38 = vmov 0  }
  0x9a   : > { %2909 = vmatprep.mubr.bf16.mxu0 %v13237_v43  ;;  %3248 = vmatprep.mubr.bf16.mxu1 %v13237_v43  ;;  %v589_v43 = vld [vmem:[%s18278_s2 + $0x78] sm:$0xff] }
  0x9b   : > { %2975 = vmatpush1.bf16.msra.mxu0 %v11224_v47  ;;  %3314 = vmatpush1.bf16.msra.mxu1 %v11226_v50  ;;  %v10958_v47 = vcombine.low %v14536_v24, %v581_v25  ;;  %v10967_v49 = vcombine.high %v585_v42, %v589_v43  ;;  %v593_v50 = vld [vmem:[%s18278_s2 + $0x98] sm:$0xff]  ;;  %v636_v24 = vld [vmem:[%s18278_s2 + $0x1f0] sm:$0xff]  ;;  %v10998_v25 = vcombine.low %v617_v11, %v621_v12 }
  0x9c   : > { %2976 = vmatprep.subr.bf16.mxu0 %v11233_v51  ;;  %3315 = vmatprep.subr.bf16.mxu1 %v11235_v54  ;;  %v597_v51 = vld [vmem:[%s18278_s2 + $0xb8] sm:$0xff]  ;;  %v604_v54 = vld [vmem:[%s18278_s2 + $0xf0] sm:$0xff] }
  0x9f   : > { %2977 = vmatpush1.bf16.msra.mxu0 %v11232_v56  ;;  %3316 = vmatpush1.bf16.msra.mxu1 %v11234_v60  ;;  %v13256_v56 = vld [vmem:[%s14100_s30 + $0x38] ss:$20 sps:$4 sm:$0xff]   ;;  %v10975_v60 = vcombine.high %v593_v50, %v597_v51 }
  0xa0   : > { %2978 = vmatprep.subr.bf16.mxu0 %v11241_v61  ;;  %3317 = vmatprep.subr.bf16.mxu1 %v11243_v0  ;;  %v10972_v61 = vcombine.low %v592_v45, %v596_v46  ;;  %v10974_v0 = vcombine.low %v593_v50, %v597_v51  ;;  %v649_v46 = vld [vmem:[%s18278_s2 + $0x258] sm:$0xff]  ;;  %v656_v50 = vld [vmem:[%s18278_s2 + $0x290] sm:$0xff] }
  0xa1   : > { %2910 = vmatmul.mubr.bf16.gmra.mrb[8].mxu0 %v13239_v55  ;;  %3249 = vmatmul.mubr.bf16.gmra.mrb[8].mxu1 %v13239_v55  ;;  %v10966_v55 = vcombine.low %v585_v42, %v589_v43  ;;  %v652_v42 = vld [vmem:[%s18278_s2 + $0x270] sm:$0xff] }
  0xa2   : > { %2919 = vmatprep.mubr.bf16.mxu0 %v13240_v59  ;;  %3258 = vmatprep.mubr.bf16.mxu1 %v13240_v59  ;;  %v605_v59 = vld [vmem:[%s18278_s2 + $0xf8] sm:$0xff]  ;;  %v660_v51 = vld [vmem:[%s18278_s2 + $0x2b0] sm:$0xff] }
  0xa3   : > { %2979 = vmatpush1.bf16.msra.mxu0 %v11240_v1  ;;  %3318 = vmatpush1.bf16.msra.mxu1 %v11242_v4  ;;  %v10981_v1 = vcombine.high %v600_v53, %v604_v54  ;;  %v10983_v2 = vcombine.high %v601_v58, %v605_v59  ;;  %v613_v4 = vld [vmem:[%s18278_s2 + $0x138] sm:$0xff] }
  0xa4   : > { %2980 = vmatprep.subr.bf16.mxu0 %v11249_v5  ;;  %3319 = vmatprep.subr.bf16.mxu1 %v11251_v8  ;;  %v10980_v5 = vcombine.low %v600_v53, %v604_v54  ;;  %v10982_v8 = vcombine.low %v601_v58, %v605_v59  ;;  %v10990_v17 = vcombine.low %v609_v3, %v613_v4  ;;  %v664_v58 = vld [vmem:[%s18278_s2 + $0x2d0] sm:$0xff] }
  0xa5   : > { %v11029_v53 = vcombine.high %v648_v41, %v652_v42  ;;  %v668_v59 = vld [vmem:[%s18278_s2 + $0x2f0] sm:$0xff] }
  0xa7   : > { %2981 = vmatpush1.bf16.msra.mxu0 %v11248_v10  ;;  %3320 = vmatpush1.bf16.msra.mxu1 %v11250_v14  ;;  %v10989_v10 = vcombine.high %v608_v62, %v612_v63  ;;  %v10988_v14 = vcombine.low %v608_v62, %v612_v63  ;;  %v11037_v62 = vcombine.high %v656_v50, %v660_v51  ;;  %v665_v63 = vld [vmem:[%s18278_s2 + $0x2d8] sm:$0xff] }
  0xa8   : > { %2982 = vmatprep.subr.bf16.mxu0 %v11257_v15  ;;  %3321 = vmatprep.subr.bf16.mxu1 %v11259_v18  ;;  %v624_v15 = vld [vmem:[%s18278_s2 + $0x190] sm:$0xff]  ;;  %v10997_v18 = vcombine.high %v616_v6, %v620_v7 }
  0xa9   : > { %2920 = vmatmul.mubr.bf16.gmra.mrb[12].mxu0 %v13242_v9  ;;  %3259 = vmatmul.mubr.bf16.gmra.mrb[12].mxu1 %v13242_v9  ;;  %v13257_v9 = vld [vmem:[%s14100_s30 + $0x60] ss:$20 sps:$4 sm:$0xff]  }
  0xaa   : > { %2929 = vmatprep.mubr.bf16.mxu0 %v13243_v13  ;;  %3268 = vmatprep.mubr.bf16.mxu1 %v13243_v13  ;;  %v10991_v13 = vcombine.high %v609_v3, %v613_v4  ;;  %v672_v3 = vld [vmem:[%s18278_s2 + $0x310] sm:$0xff] }
  0xab   : > { %2983 = vmatpush1.bf16.msra.mxu0 %v11256_v19  ;;  %3322 = vmatpush1.bf16.msra.mxu1 %v11258_v22  ;;  %v10999_v19 = vcombine.high %v617_v11, %v621_v12  ;;  %v10996_v22 = vcombine.low %v616_v6, %v620_v7  ;;  %v676_v4 = vld [vmem:[%s18278_s2 + $0x330] sm:$0xff]  ;;  %v11045_v6 = vcombine.high %v664_v58, %v668_v59 }
  0xac   : > { %2984 = vmatprep.subr.bf16.mxu0 %v11265_v23  ;;  %3323 = vmatprep.subr.bf16.mxu1 %v11267_v26  ;;  %v632_v23 = vld [vmem:[%s18278_s2 + $0x1d0] sm:$0xff]  ;;  %v13258_v26 = vld [vmem:[%s14100_s30 + $0x88] ss:$20 sps:$4 sm:$0xff]  }
  0xad   : > { %v11012_v40 = vcombine.low %v632_v23, %v636_v24  ;;  %v680_v11 = vld [vmem:[%s18278_s2 + $0x350] sm:$0xff] }
  0xae   : > { %v684_v12 = vld [vmem:[%s18278_s2 + $0x370] sm:$0xff] }
  0xaf   : > { %2985 = vmatpush1.bf16.msra.mxu0 %v11264_v28  ;;  %3324 = vmatpush1.bf16.msra.mxu1 %v11266_v30  ;;  %v633_v28 = vld [vmem:[%s18278_s2 + $0x1d8] sm:$0xff]  ;;  %v11007_v30 = vcombine.high %v625_v20, %v629_v21 }
  0xb0   : > { %3422 = vmatprep.subr.bf16.mxu0 %v10957_v31  ;;  %3761 = vmatprep.subr.bf16.mxu1 %v10959_v32  ;;  %v11004_v31 = vcombine.low %v624_v15, %v628_v16  ;;  %v640_v32 = vld [vmem:[%s18278_s2 + $0x210] sm:$0xff] }
  0xb1   : > { %2930 = vmatmul.mubr.bf16.gmra.mrb[16].mxu0 %v13245_v27  ;;  %3269 = vmatmul.mubr.bf16.gmra.mrb[16].mxu1 %v13245_v27  ;;  %v11005_v27 = vcombine.high %v624_v15, %v628_v16  ;;  %v11053_v15 = vcombine.high %v672_v3, %v676_v4  ;;  %v681_v16 = vld [vmem:[%s18278_s2 + $0x358] sm:$0xff] }
  0xb2   : > { %2939 = vmatprep.mubr.bf16.mxu0 %v13246_v29  ;;  %3278 = vmatprep.mubr.bf16.mxu1 %v13246_v29  ;;  %v637_v29 = vld [vmem:[%s18278_s2 + $0x1f8] sm:$0xff] }
  0xb3   : > { %v11014_v43 = vcombine.low %v633_v28, %v637_v29 }
  0xb9   : > { %2940 = vmatmul.mubr.bf16.gmra.mrb[20].mxu0 %v13248_v33  ;;  %3279 = vmatmul.mubr.bf16.gmra.mrb[20].mxu1 %v13248_v33  ;;  %v644_v33 = vld [vmem:[%s18278_s2 + $0x230] sm:$0xff] }
  0xba   : > { %2949 = vmatprep.mubr.bf16.mxu0 %v13249_v34  ;;  %3288 = vmatprep.mubr.bf16.mxu1 %v13249_v34  ;;  %v11006_v34 = vcombine.low %v625_v20, %v629_v21  ;;  %v11021_v45 = vcombine.high %v640_v32, %v644_v33  ;;  %v688_v20 = vld [vmem:[%s18278_s2 + $0x390] sm:$0xff] }
  0xbb   : > { %v692_v21 = vld [vmem:[%s18278_s2 + $0x3b0] sm:$0xff] }
  0xc1   : > { %2950 = vmatmul.mubr.bf16.gmra.mrb[24].mxu0 %v13251_v35  ;;  %3289 = vmatmul.mubr.bf16.gmra.mrb[24].mxu1 %v13251_v35  ;;  %v11013_v35 = vcombine.high %v632_v23, %v636_v24  ;;  %v11061_v23 = vcombine.high %v680_v11, %v684_v12 }
  0xc2   : > { %2959 = vmatprep.mubr.bf16.mxu0 %v13252_v36  ;;  %3298 = vmatprep.mubr.bf16.mxu1 %v13252_v36  ;;  %v11015_v36 = vcombine.high %v633_v28, %v637_v29  ;;  %v696_v28 = vld [vmem:[%s18278_s2 + $0x3d0] sm:$0xff] }
  0xc3   : > { %v700_v29 = vld [vmem:[%s18278_s2 + $0x3f0] sm:$0xff] }
  0xc9   : > { %2960 = vmatmul.mubr.bf16.gmra.mrb[28].mxu0 %v13254_v37  ;;  %3299 = vmatmul.mubr.bf16.gmra.mrb[28].mxu1 %v13254_v37  ;;  %v641_v37 = vld [vmem:[%s18278_s2 + $0x218] sm:$0xff] }
  0xca   : > { %3002 = vmatprep.mubr.bf16.mxu0 %v18294_v38  ;;  %3341 = vmatprep.mubr.bf16.mxu1 %v18294_v38 }
  0xd1   : > { %3003 = vmatmul.mubr.bf16.vlgmr.msra.gmra.mrb[0].mxu0 %v13255_v39  ;;  %3342 = vmatmul.mubr.bf16.vlgmr.msra.gmra.mrb[0].mxu1 %v13255_v39  ;;  %v645_v39 = vld [vmem:[%s18278_s2 + $0x238] sm:$0xff] }
  0xd2   : > { %3423 = vmatpush1.bf16.msra.mxu0 %v10956_v44  ;;  %3762 = vmatpush1.bf16.msra.mxu1 %v10958_v47  ;;  %v13259_v44 = vld [vmem:[%s14100_s30 + $0xb0] ss:$20 sps:$4 sm:$0xff]   ;;  %v653_v47 = vld [vmem:[%s18278_s2 + $0x278] sm:$0xff] }
  0xd3   : > { %3424 = vmatprep.subr.bf16.mxu0 %v10965_v48  ;;  %3763 = vmatprep.subr.bf16.mxu1 %v10967_v49  ;;  %v11023_v48 = vcombine.high %v641_v37, %v645_v39  ;;  %v11020_v49 = vcombine.low %v640_v32, %v644_v33  ;;  %v11031_v54 = vcombine.high %v649_v46, %v653_v47  ;;  %v697_v33 = vld [vmem:[%s18278_s2 + $0x3d8] sm:$0xff] }
  0xd4   : > { %3012 = vmatprep.mubr.bf16.mxu0 %v18294_v38  ;;  %3351 = vmatprep.mubr.bf16.mxu1 %v18294_v38  ;;  %v11069_v32 = vcombine.high %v688_v20, %v692_v21 }
  0xd6   : > { %3425 = vmatpush1.bf16.msra.mxu0 %v10964_v52  ;;  %3764 = vmatpush1.bf16.msra.mxu1 %v10966_v55  ;;  %v11022_v52 = vcombine.low %v641_v37, %v645_v39  ;;  %v657_v55 = vld [vmem:[%s18278_s2 + $0x298] sm:$0xff]  ;;  %v704_v37 = vld [vmem:[%s18278_s2 + $0x410] sm:$0xff] }
  0xd7   : > { %3426 = vmatprep.subr.bf16.mxu0 %v10973_v57  ;;  %3765 = vmatprep.subr.bf16.mxu1 %v10975_v60  ;;  %v11028_v57 = vcombine.low %v648_v41, %v652_v42  ;;  %v11030_v60 = vcombine.low %v649_v46, %v653_v47  ;;  %v708_v39 = vld [vmem:[%s18278_s2 + $0x430] sm:$0xff]  ;;  %v11077_v41 = vcombine.high %v696_v28, %v700_v29 }
  0xd8   : > { %v712_v46 = vld [vmem:[%s18278_s2 + $0x450] sm:$0xff] }
  0xd9   : > { %3013 = vmatmul.mubr.bf16.gmra.mrb[4].mxu0 %v13256_v56  ;;  %3352 = vmatmul.mubr.bf16.gmra.mrb[4].mxu1 %v13256_v56  ;;  %v661_v56 = vld [vmem:[%s18278_s2 + $0x2b8] sm:$0xff]  ;;  %v716_v47 = vld [vmem:[%s18278_s2 + $0x470] sm:$0xff] }
  0xda   : > { %3427 = vmatpush1.bf16.msra.mxu0 %v10972_v61  ;;  %3766 = vmatpush1.bf16.msra.mxu1 %v10974_v0  ;;  %v13260_v61 = vld [vmem:[%s14100_s30 + $0xd8] ss:$20 sps:$4 sm:$0xff]  }
  0xdb   : > { %3428 = vmatprep.subr.bf16.mxu0 %v10981_v1  ;;  %3767 = vmatprep.subr.bf16.mxu1 %v10983_v2  ;;  %v669_v0 = vld [vmem:[%s18278_s2 + $0x2f8] sm:$0xff]  ;;  %v11039_v1 = vcombine.high %v657_v55, %v661_v56  ;;  %v11036_v2 = vcombine.low %v656_v50, %v660_v51 }
  0xdc   : > { %3022 = vmatprep.mubr.bf16.mxu0 %v18294_v38  ;;  %3361 = vmatprep.mubr.bf16.mxu1 %v18294_v38  ;;  %v11047_v7 = vcombine.high %v665_v63, %v669_v0  ;;  %v713_v50 = vld [vmem:[%s18278_s2 + $0x458] sm:$0xff] }
  0xdd   : > { %v717_v51 = vld [vmem:[%s18278_s2 + $0x478] sm:$0xff] }
  0xde   : > { %3429 = vmatpush1.bf16.msra.mxu0 %v10980_v5  ;;  %3768 = vmatpush1.bf16.msra.mxu1 %v10982_v8  ;;  %v11038_v5 = vcombine.low %v657_v55, %v661_v56  ;;  %v673_v8 = vld [vmem:[%s18278_s2 + $0x318] sm:$0xff]  ;;  %v720_v55 = vld [vmem:[%s18278_s2 + $0x490] sm:$0xff] }
  0xdf   : > { %3430 = vmatprep.subr.bf16.mxu0 %v10989_v10  ;;  %3769 = vmatprep.subr.bf16.mxu1 %v10991_v13  ;;  %v11044_v10 = vcombine.low %v664_v58, %v668_v59  ;;  %v11046_v13 = vcombine.low %v665_v63, %v669_v0  ;;  %v724_v56 = vld [vmem:[%s18278_s2 + $0x4b0] sm:$0xff]  ;;  %v11093_v58 = vcombine.high %v712_v46, %v716_v47  ;;  %v721_v59 = vld [vmem:[%s18278_s2 + $0x498] sm:$0xff] }
  0xe0   : > { %v11092_v63 = vcombine.low %v712_v46, %v716_v47  ;;  %v728_v0 = vld [vmem:[%s18278_s2 + $0x4d0] sm:$0xff] }
  0xe1   : > { %3023 = vmatmul.mubr.bf16.gmra.mrb[8].mxu0 %v13257_v9  ;;  %3362 = vmatmul.mubr.bf16.gmra.mrb[8].mxu1 %v13257_v9  ;;  %v677_v9 = vld [vmem:[%s18278_s2 + $0x338] sm:$0xff]  ;;  %v768_v46 = vld [vmem:[%s18278_s2 + $0x610] sm:$0xff] }
  0xe2   : > { %3431 = vmatpush1.bf16.msra.mxu0 %v10988_v14  ;;  %3770 = vmatpush1.bf16.msra.mxu1 %v10990_v17  ;;  %v13261_v14 = vld [vmem:[%s14100_s30 + $0x100] ss:$20 sps:$4 sm:$0xff]   ;;  %v685_v17 = vld [vmem:[%s18278_s2 + $0x378] sm:$0xff] }
  0xe3   : > { %3432 = vmatprep.subr.bf16.mxu0 %v10997_v18  ;;  %3771 = vmatprep.subr.bf16.mxu1 %v10999_v19  ;;  %v11055_v18 = vcombine.high %v673_v8, %v677_v9  ;;  %v11052_v19 = vcombine.low %v672_v3, %v676_v4  ;;  %v11063_v24 = vcombine.high %v681_v16, %v685_v17  ;;  %v729_v4 = vld [vmem:[%s18278_s2 + $0x4d8] sm:$0xff]  ;;  %v772_v47 = vld [vmem:[%s18278_s2 + $0x630] sm:$0xff] }
  0xe4   : > { %3032 = vmatprep.mubr.bf16.mxu0 %v18294_v38  ;;  %3371 = vmatprep.mubr.bf16.mxu1 %v18294_v38  ;;  %v11101_v3 = vcombine.high %v720_v55, %v724_v56 }
  0xe6   : > { %3433 = vmatpush1.bf16.msra.mxu0 %v10996_v22  ;;  %3772 = vmatpush1.bf16.msra.mxu1 %v10998_v25  ;;  %v11054_v22 = vcombine.low %v673_v8, %v677_v9  ;;  %v689_v25 = vld [vmem:[%s18278_s2 + $0x398] sm:$0xff]  ;;  %v11100_v8 = vcombine.low %v720_v55, %v724_v56  ;;  %v736_v9 = vld [vmem:[%s18278_s2 + $0x510] sm:$0xff] }
  0xe7   : > { %3434 = vmatprep.subr.bf16.mxu0 %v11005_v27  ;;  %3773 = vmatprep.subr.bf16.mxu1 %v11007_v30  ;;  %v11060_v27 = vcombine.low %v680_v11, %v684_v12  ;;  %v11062_v30 = vcombine.low %v681_v16, %v685_v17  ;;  %v13874_v16 = vld [vmem:[%s14100_s30 + $0x28] ss:$20 sps:$4 sm:$0xff]   ;;  %v776_v55 = vld [vmem:[%s18278_s2 + $0x650] sm:$0xff] }
  0xe8   : > { %v780_v56 = vld [vmem:[%s18278_s2 + $0x670] sm:$0xff] }
  0xe9   : > { %3033 = vmatmul.mubr.bf16.gmra.mrb[12].mxu0 %v13258_v26  ;;  %3372 = vmatmul.mubr.bf16.gmra.mrb[12].mxu1 %v13258_v26  ;;  %v693_v26 = vld [vmem:[%s18278_s2 + $0x3b8] sm:$0xff] }
  0xea   : > { %3435 = vmatpush1.bf16.msra.mxu0 %v11004_v31  ;;  %3774 = vmatpush1.bf16.msra.mxu1 %v11006_v34  ;;  %v13262_v31 = vld [vmem:[%s14100_s30 + $0x128] ss:$20 sps:$4 sm:$0xff]  }
  0xeb   : > { %3436 = vmatprep.subr.bf16.mxu0 %v11013_v35  ;;  %3775 = vmatprep.subr.bf16.mxu1 %v11015_v36  ;;  %v701_v34 = vld [vmem:[%s18278_s2 + $0x3f8] sm:$0xff]  ;;  %v11071_v35 = vcombine.high %v689_v25, %v693_v26  ;;  %v11068_v36 = vcombine.low %v688_v20, %v692_v21 }
  0xec   : > { %3042 = vmatprep.mubr.bf16.mxu0 %v18294_v38  ;;  %3381 = vmatprep.mubr.bf16.mxu1 %v18294_v38  ;;  %v11079_v42 = vcombine.high %v697_v33, %v701_v34 }
  0xee   : > { %3437 = vmatpush1.bf16.msra.mxu0 %v11012_v40  ;;  %3776 = vmatpush1.bf16.msra.mxu1 %v11014_v43  ;;  %v11070_v40 = vcombine.low %v689_v25, %v693_v26  ;;  %v705_v43 = vld [vmem:[%s18278_s2 + $0x418] sm:$0xff] }
  0xef   : > { %3438 = vmatprep.subr.bf16.mxu0 %v11021_v45  ;;  %3777 = vmatprep.subr.bf16.mxu1 %v11023_v48  ;;  %v11076_v45 = vcombine.low %v696_v28, %v700_v29  ;;  %v11078_v48 = vcombine.low %v697_v33, %v701_v34  ;;  %v756_v28 = vld [vmem:[%s18278_s2 + $0x5b0] sm:$0xff] }
  0xf0   : > { %v13876_v34 = vld [vmem:[%s14100_s30 + $0x50] ss:$20 sps:$4 sm:$0xff]  }
  0xf1   : > { %3043 = vmatmul.mubr.bf16.gmra.mrb[16].mxu0 %v13259_v44  ;;  %3382 = vmatmul.mubr.bf16.gmra.mrb[16].mxu1 %v13259_v44  ;;  %v709_v44 = vld [vmem:[%s18278_s2 + $0x438] sm:$0xff] }
  0xf2   : > { %3439 = vmatpush1.bf16.msra.mxu0 %v11020_v49  ;;  %3778 = vmatpush1.bf16.msra.mxu1 %v11022_v52  ;;  %v11085_v49 = vcombine.high %v704_v37, %v708_v39  ;;  %v13871_v52 = vld [vmem:[%s14100_s30 + $0x4] ss:$20 sps:$4 sm:$0xff]  }
  0xf3   : > { %3440 = vmatprep.subr.bf16.mxu0 %v11029_v53  ;;  %3779 = vmatprep.subr.bf16.mxu1 %v11031_v54  ;;  %v11087_v53 = vcombine.high %v705_v43, %v709_v44  ;;  %v11084_v54 = vcombine.low %v704_v37, %v708_v39  ;;  %v764_v37 = vld [vmem:[%s18278_s2 + $0x5f0] sm:$0xff] }
  0xf4   : > { %3052 = vmatprep.mubr.bf16.mxu0 %v18294_v38  ;;  %3391 = vmatprep.mubr.bf16.mxu1 %v18294_v38 }
  0xf6   : > { %3441 = vmatpush1.bf16.msra.mxu0 %v11028_v57  ;;  %3780 = vmatpush1.bf16.msra.mxu1 %v11030_v60  ;;  %v11086_v57 = vcombine.low %v705_v43, %v709_v44  ;;  %v725_v60 = vld [vmem:[%s18278_s2 + $0x4b8] sm:$0xff] }
  0xf7   : > { %3442 = vmatprep.subr.bf16.mxu0 %v11037_v62  ;;  %3781 = vmatprep.subr.bf16.mxu1 %v11039_v1  ;;  %v13872_v62 = vld [vmem:[%s14100_s30] ss:$20 sps:$4 sm:$0xff]   ;;  %v11102_v11 = vcombine.low %v721_v59, %v725_v60  ;;  %v13877_v43 = vld [vmem:[%s14100_s30 + $0x7c] ss:$20 sps:$4 sm:$0xff]  }
  0xf8   : > { %v732_v1 = vld [vmem:[%s18278_s2 + $0x4f0] sm:$0xff] }
  0xf9   : > { %3053 = vmatmul.mubr.bf16.gmra.mrb[20].mxu0 %v13260_v61  ;;  %3392 = vmatmul.mubr.bf16.gmra.mrb[20].mxu1 %v13260_v61  ;;  %v11095_v61 = vcombine.high %v713_v50, %v717_v51  ;;  %v11109_v12 = vcombine.high %v728_v0, %v732_v1  ;;  %v11108_v17 = vcombine.low %v728_v0, %v732_v1 }
  0xfa   : > { %3443 = vmatpush1.bf16.msra.mxu0 %v11036_v2  ;;  %3782 = vmatpush1.bf16.msra.mxu1 %v11038_v5  ;;  %v11094_v2 = vcombine.low %v713_v50, %v717_v51  ;;  %v733_v5 = vld [vmem:[%s18278_s2 + $0x4f8] sm:$0xff]  ;;  %v11157_v1 = vcombine.high %v776_v55, %v780_v56 }
  0xfb   : > { %3444 = vmatprep.subr.bf16.mxu0 %v11045_v6  ;;  %3783 = vmatprep.subr.bf16.mxu1 %v11047_v7  ;;  %v13873_v6 = vld [vmem:[%s14100_s30 + $0x2c] ss:$20 sps:$4 sm:$0xff]   ;;  %v11103_v7 = vcombine.high %v721_v59, %v725_v60  ;;  %v11110_v20 = vcombine.low %v729_v4, %v733_v5  ;;  %v769_v50 = vld [vmem:[%s18278_s2 + $0x618] sm:$0xff] }
  0xfc   : > { %3062 = vmatprep.mubr.bf16.mxu0 %v18294_v38  ;;  %3401 = vmatprep.mubr.bf16.mxu1 %v18294_v38  ;;  %v773_v51 = vld [vmem:[%s18278_s2 + $0x638] sm:$0xff] }
  0xfd   : > { %v777_v59 = vld [vmem:[%s18278_s2 + $0x658] sm:$0xff]  ;;  %v11150_v0 = vcombine.low %v769_v50, %v773_v51 }
  0xfe   : > { %3445 = vmatpush1.bf16.msra.mxu0 %v11044_v10  ;;  %3784 = vmatpush1.bf16.msra.mxu1 %v11046_v13  ;;  %v740_v10 = vld [vmem:[%s18278_s2 + $0x530] sm:$0xff]  ;;  %v737_v13 = vld [vmem:[%s18278_s2 + $0x518] sm:$0xff] }
  0xff   : > { %3446 = vmatprep.subr.bf16.mxu0 %v11053_v15  ;;  %3785 = vmatprep.subr.bf16.mxu1 %v11055_v18  ;;  %v11111_v15 = vcombine.high %v729_v4, %v733_v5  ;;  %v744_v18 = vld [vmem:[%s18278_s2 + $0x550] sm:$0xff]  ;;  %v11117_v21 = vcombine.high %v736_v9, %v740_v10  ;;  %v11116_v26 = vcombine.low %v736_v9, %v740_v10  ;;  %v781_v60 = vld [vmem:[%s18278_s2 + $0x678] sm:$0xff] }
 0x100   : > { %v788_v4 = vld [vmem:[%s18278_s2 + $0x6b0] sm:$0xff]  ;;  %v11158_v9 = vcombine.low %v777_v59, %v781_v60 }
 0x101   : > { %3063 = vmatmul.mubr.bf16.gmra.mrb[24].mxu0 %v13261_v14  ;;  %3402 = vmatmul.mubr.bf16.gmra.mrb[24].mxu1 %v13261_v14  ;;  %v741_v14 = vld [vmem:[%s18278_s2 + $0x538] sm:$0xff]  ;;  %v13880_v5 = vld [vmem:[%s14100_s30 + $0xa0] ss:$20 sps:$4 sm:$0xff]  }
 0x102   : > { %3447 = vmatpush1.bf16.msra.mxu0 %v11052_v19  ;;  %3786 = vmatpush1.bf16.msra.mxu1 %v11054_v22  ;;  %v748_v19 = vld [vmem:[%s18278_s2 + $0x570] sm:$0xff]  ;;  %v745_v22 = vld [vmem:[%s18278_s2 + $0x558] sm:$0xff]  ;;  %v11119_v25 = vcombine.high %v737_v13, %v741_v14  ;;  %v11118_v29 = vcombine.low %v737_v13, %v741_v14 }
 0x103   : > { %3448 = vmatprep.subr.bf16.mxu0 %v11061_v23  ;;  %3787 = vmatprep.subr.bf16.mxu1 %v11063_v24  ;;  %v749_v23 = vld [vmem:[%s18278_s2 + $0x578] sm:$0xff]  ;;  %v13875_v24 = vld [vmem:[%s14100_s30 + $0x54] ss:$20 sps:$4 sm:$0xff]  }
 0x104   : > { %3072 = vmatprep.mubr.bf16.mxu0 %v18294_v38  ;;  %3411 = vmatprep.mubr.bf16.mxu1 %v18294_v38  ;;  %v11127_v33 = vcombine.high %v745_v22, %v749_v23  ;;  %v11126_v39 = vcombine.low %v745_v22, %v749_v23  ;;  %v792_v13 = vld [vmem:[%s18278_s2 + $0x6d0] sm:$0xff]  ;;  %v13882_v23 = vld [vmem:[%s14100_s30 + $0xc8] ss:$20 sps:$4 sm:$0xff]  }
 0x105   : > { %v796_v14 = vld [vmem:[%s18278_s2 + $0x6f0] sm:$0xff] }
 0x106   : > { %3449 = vmatpush1.bf16.msra.mxu0 %v11060_v27  ;;  %3788 = vmatpush1.bf16.msra.mxu1 %v11062_v30  ;;  %v752_v27 = vld [vmem:[%s18278_s2 + $0x590] sm:$0xff]  ;;  %v11125_v30 = vcombine.high %v744_v18, %v748_v19 }
 0x107   : > { %3450 = vmatprep.subr.bf16.mxu0 %v11069_v32  ;;  %3789 = vmatprep.subr.bf16.mxu1 %v11071_v35  ;;  %v757_v32 = vld [vmem:[%s18278_s2 + $0x5b8] sm:$0xff]  ;;  %v11124_v35 = vcombine.low %v744_v18, %v748_v19  ;;  %v11173_v19 = vcombine.high %v792_v13, %v796_v14  ;;  %v804_v22 = vld [vmem:[%s18278_s2 + $0x730] sm:$0xff] }
 0x109   : > { %3073 = vmatmul.mubr.bf16.gmra.mrb[28].mxu0 %v13262_v31  ;;  %3412 = vmatmul.mubr.bf16.gmra.mrb[28].mxu1 %v13262_v31  ;;  %v753_v31 = vld [vmem:[%s18278_s2 + $0x598] sm:$0xff] }
 0x10a   : > { %3451 = vmatpush1.bf16.msra.mxu0 %v11068_v36  ;;  %3790 = vmatpush1.bf16.msra.mxu1 %v11070_v40  ;;  %v760_v36 = vld [vmem:[%s18278_s2 + $0x5d0] sm:$0xff]  ;;  %v11133_v40 = vcombine.high %v752_v27, %v756_v28  ;;  %v11135_v44 = vcombine.high %v753_v31, %v757_v32 }
 0x10b   : > { %3452 = vmatprep.subr.bf16.mxu0 %v11077_v41  ;;  %3791 = vmatprep.subr.bf16.mxu1 %v11079_v42  ;;  %v761_v41 = vld [vmem:[%s18278_s2 + $0x5d8] sm:$0xff] }
 0x10c   : > { %3454 = vmatprep.mubr.bf16.mxu0 %v13871_v52  ;;  %3793 = vmatprep.mubr.bf16.mxu1 %v13871_v52  ;;  %v765_v42 = vld [vmem:[%s18278_s2 + $0x5f8] sm:$0xff] }
 0x10d   : > { %v11143_v52 = vcombine.high %v761_v41, %v765_v42 }
 0x10e   : > { %3453 = vmatpush1.bf16.msra.mxu0 %v11076_v45  ;;  %3792 = vmatpush1.bf16.msra.mxu1 %v11078_v48  ;;  %v11132_v45 = vcombine.low %v752_v27, %v756_v28  ;;  %v11134_v48 = vcombine.low %v753_v31, %v757_v32  ;;  %v808_v31 = vld [vmem:[%s18278_s2 + $0x750] sm:$0xff] }
 0x10f   : > { %3535 = vmatprep.subr.bf16.mxu0 %v11085_v49  ;;  %3874 = vmatprep.subr.bf16.mxu1 %v11087_v53  ;;  %v11141_v49 = vcombine.high %v760_v36, %v764_v37  ;;  %v13878_v53 = vld [vmem:[%s14100_s30 + $0x78] ss:$20 sps:$4 sm:$0xff]   ;;  %v812_v32 = vld [vmem:[%s18278_s2 + $0x770] sm:$0xff] }
 0x111   : > { %3455 = vmatmul.mubr.bf16.vlgmr.msra.gmra.mrb[32].mxu0 %v13872_v62  ;;  %3794 = vmatmul.mubr.bf16.vlgmr.msra.gmra.mrb[32].mxu1 %v13872_v62  ;;  %v11151_v62 = vcombine.high %v769_v50, %v773_v51  ;;  %v824_v50 = vld [vmem:[%s18278_s2 + $0x7d0] sm:$0xff] }
 0x112   : > { %3536 = vmatpush1.bf16.msra.mxu0 %v11084_v54  ;;  %3875 = vmatpush1.bf16.msra.mxu1 %v11086_v57  ;;  %v11140_v54 = vcombine.low %v760_v36, %v764_v37  ;;  %v11142_v57 = vcombine.low %v761_v41, %v765_v42  ;;  %v11189_v37 = vcombine.high %v808_v31, %v812_v32  ;;  %v820_v41 = vld [vmem:[%s18278_s2 + $0x7b0] sm:$0xff] }
 0x113   : > { %3537 = vmatprep.subr.bf16.mxu0 %v11093_v58  ;;  %3876 = vmatprep.subr.bf16.mxu1 %v11095_v61  ;;  %v11149_v58 = vcombine.high %v768_v46, %v772_v47  ;;  %v13879_v61 = vld [vmem:[%s14100_s30 + $0xa4] ss:$20 sps:$4 sm:$0xff]   ;;  %v828_v51 = vld [vmem:[%s18278_s2 + $0x7f0] sm:$0xff] }
 0x114   : > { %3464 = vmatprep.mubr.bf16.mxu0 %v13873_v6  ;;  %3803 = vmatprep.mubr.bf16.mxu1 %v13873_v6  ;;  %v785_v6 = vld [vmem:[%s18278_s2 + $0x698] sm:$0xff]  ;;  %v13884_v42 = vld [vmem:[%s14100_s30 + $0xf0] ss:$20 sps:$4 sm:$0xff]  }
 0x116   : > { %3538 = vmatpush1.bf16.msra.mxu0 %v11092_v63  ;;  %3877 = vmatpush1.bf16.msra.mxu1 %v11094_v2  ;;  %v11148_v63 = vcombine.low %v768_v46, %v772_v47  ;;  %v11159_v2 = vcombine.high %v777_v59, %v781_v60  ;;  %v836_v59 = vld [vmem:[%s18278_s2 + $0x830] sm:$0xff]  ;;  %v13886_v60 = vld [vmem:[%s14100_s30 + $0x118] ss:$20 sps:$4 sm:$0xff]  }
 0x117   : > { %3539 = vmatprep.subr.bf16.mxu0 %v11101_v3  ;;  %3878 = vmatprep.subr.bf16.mxu1 %v11103_v7  ;;  %v784_v3 = vld [vmem:[%s18278_s2 + $0x690] sm:$0xff]  ;;  %v789_v7 = vld [vmem:[%s18278_s2 + $0x6b8] sm:$0xff] }
 0x118   : > { %v11165_v10 = vcombine.high %v784_v3, %v788_v4  ;;  %v11166_v18 = vcombine.low %v785_v6, %v789_v7 }
 0x119   : > { %3465 = vmatmul.mubr.bf16.gmra.mrb[36].mxu0 %v13874_v16  ;;  %3804 = vmatmul.mubr.bf16.gmra.mrb[36].mxu1 %v13874_v16  ;;  %v797_v16 = vld [vmem:[%s18278_s2 + $0x6f8] sm:$0xff] }
 0x11a   : > { %3540 = vmatpush1.bf16.msra.mxu0 %v11100_v8  ;;  %3879 = vmatpush1.bf16.msra.mxu1 %v11102_v11  ;;  %v11156_v8 = vcombine.low %v776_v55, %v780_v56  ;;  %v13881_v11 = vld [vmem:[%s14100_s30 + $0xcc] ss:$20 sps:$4 sm:$0xff]   ;;  %v11205_v56 = vcombine.high %v824_v50, %v828_v51 }
 0x11b   : > { %3541 = vmatprep.subr.bf16.mxu0 %v11109_v12  ;;  %3880 = vmatprep.subr.bf16.mxu1 %v11111_v15  ;;  %v11167_v12 = vcombine.high %v785_v6, %v789_v7  ;;  %v793_v15 = vld [vmem:[%s18278_s2 + $0x6d8] sm:$0xff] }
 0x11c   : > { %3474 = vmatprep.mubr.bf16.mxu0 %v13875_v24  ;;  %3813 = vmatprep.mubr.bf16.mxu1 %v13875_v24  ;;  %v801_v24 = vld [vmem:[%s18278_s2 + $0x718] sm:$0xff]  ;;  %v11174_v27 = vcombine.low %v793_v15, %v797_v16 }
 0x11d   : > { %v841_v6 = vld [vmem:[%s18278_s2 + $0x858] sm:$0xff] }
 0x11e   : > { %3542 = vmatpush1.bf16.msra.mxu0 %v11108_v17  ;;  %3881 = vmatpush1.bf16.msra.mxu1 %v11110_v20  ;;  %v11164_v17 = vcombine.low %v784_v3, %v788_v4  ;;  %v11175_v20 = vcombine.high %v793_v15, %v797_v16  ;;  %v840_v4 = vld [vmem:[%s18278_s2 + $0x850] sm:$0xff]  ;;  %v845_v7 = vld [vmem:[%s18278_s2 + $0x878] sm:$0xff] }
 0x11f   : > { %3543 = vmatprep.subr.bf16.mxu0 %v11117_v21  ;;  %3882 = vmatprep.subr.bf16.mxu1 %v11119_v25  ;;  %v800_v21 = vld [vmem:[%s18278_s2 + $0x710] sm:$0xff]  ;;  %v805_v25 = vld [vmem:[%s18278_s2 + $0x738] sm:$0xff]  ;;  %v11223_v16 = vcombine.high %v841_v6, %v845_v7 }
 0x120   : > { %v11181_v28 = vcombine.high %v800_v21, %v804_v22  ;;  %v11182_v36 = vcombine.low %v801_v24, %v805_v25  ;;  %v13888_v15 = vld [vmem:[%s14100_s30 + $0x8] ss:$20 sps:$4 sm:$0xff]  }
 0x121   : > { %3475 = vmatmul.mubr.bf16.gmra.mrb[40].mxu0 %v13876_v34  ;;  %3814 = vmatmul.mubr.bf16.gmra.mrb[40].mxu1 %v13876_v34  ;;  %v813_v34 = vld [vmem:[%s18278_s2 + $0x778] sm:$0xff] }
 0x122   : > { %3544 = vmatpush1.bf16.msra.mxu0 %v11116_v26  ;;  %3883 = vmatpush1.bf16.msra.mxu1 %v11118_v29  ;;  %v11172_v26 = vcombine.low %v792_v13, %v796_v14  ;;  %v13883_v29 = vld [vmem:[%s14100_s30 + $0xf4] ss:$20 sps:$4 sm:$0xff]   ;;  %v853_v13 = vld [vmem:[%s18278_s2 + $0x8b8] sm:$0xff] }
 0x123   : > { %3545 = vmatprep.subr.bf16.mxu0 %v11125_v30  ;;  %3884 = vmatprep.subr.bf16.mxu1 %v11127_v33  ;;  %v11183_v30 = vcombine.high %v801_v24, %v805_v25  ;;  %v809_v33 = vld [vmem:[%s18278_s2 + $0x758] sm:$0xff] }
 0x124   : > { %3484 = vmatprep.mubr.bf16.mxu0 %v13877_v43  ;;  %3823 = vmatprep.mubr.bf16.mxu1 %v13877_v43  ;;  %v817_v43 = vld [vmem:[%s18278_s2 + $0x798] sm:$0xff]  ;;  %v11190_v46 = vcombine.low %v809_v33, %v813_v34 }
 0x125   : > { %v857_v24 = vld [vmem:[%s18278_s2 + $0x8d8] sm:$0xff] }
 0x126   : > { %3546 = vmatpush1.bf16.msra.mxu0 %v11124_v35  ;;  %3885 = vmatpush1.bf16.msra.mxu1 %v11126_v39  ;;  %v11180_v35 = vcombine.low %v800_v21, %v804_v22  ;;  %v11191_v39 = vcombine.high %v809_v33, %v813_v34  ;;  %v856_v21 = vld [vmem:[%s18278_s2 + $0x8d0] sm:$0xff]  ;;  %v861_v25 = vld [vmem:[%s18278_s2 + $0x8f8] sm:$0xff] }
 0x127   : > { %3547 = vmatprep.subr.bf16.mxu0 %v11133_v40  ;;  %3886 = vmatprep.subr.bf16.mxu1 %v11135_v44  ;;  %v816_v40 = vld [vmem:[%s18278_s2 + $0x790] sm:$0xff]  ;;  %v821_v44 = vld [vmem:[%s18278_s2 + $0x7b8] sm:$0xff]  ;;  %v11239_v34 = vcombine.high %v857_v24, %v861_v25 }
 0x128   : > { %v11197_v47 = vcombine.high %v816_v40, %v820_v41  ;;  %v11198_v55 = vcombine.low %v817_v43, %v821_v44  ;;  %v860_v22 = vld [vmem:[%s18278_s2 + $0x8f0] sm:$0xff] }
 0x129   : > { %3485 = vmatmul.mubr.bf16.gmra.mrb[44].mxu0 %v13878_v53  ;;  %3824 = vmatmul.mubr.bf16.gmra.mrb[44].mxu1 %v13878_v53  ;;  %v829_v53 = vld [vmem:[%s18278_s2 + $0x7f8] sm:$0xff]  ;;  %v13890_v33 = vld [vmem:[%s14100_s30 + $0x30] ss:$20 sps:$4 sm:$0xff]  }
 0x12a   : > { %3548 = vmatpush1.bf16.msra.mxu0 %v11132_v45  ;;  %3887 = vmatpush1.bf16.msra.mxu1 %v11134_v48  ;;  %v11188_v45 = vcombine.low %v808_v31, %v812_v32  ;;  %v13885_v48 = vld [vmem:[%s14100_s30 + $0x11c] ss:$20 sps:$4 sm:$0xff]  }
 0x12b   : > { %3549 = vmatprep.subr.bf16.mxu0 %v11141_v49  ;;  %3888 = vmatprep.subr.bf16.mxu1 %v11143_v52  ;;  %v11199_v49 = vcombine.high %v817_v43, %v821_v44  ;;  %v825_v52 = vld [vmem:[%s18278_s2 + $0x7d8] sm:$0xff] }
 0x12c   : > { %3494 = vmatprep.mubr.bf16.mxu0 %v13879_v61  ;;  %3833 = vmatprep.mubr.bf16.mxu1 %v13879_v61  ;;  %v833_v61 = vld [vmem:[%s18278_s2 + $0x818] sm:$0xff] }
 0x12d   : > { %v865_v31 = vld [vmem:[%s18278_s2 + $0x918] sm:$0xff] }
 0x12e   : > { %3550 = vmatpush1.bf16.msra.mxu0 %v11140_v54  ;;  %3889 = vmatpush1.bf16.msra.mxu1 %v11142_v57  ;;  %v11196_v54 = vcombine.low %v816_v40, %v820_v41  ;;  %v11207_v57 = vcombine.high %v825_v52, %v829_v53  ;;  %v869_v32 = vld [vmem:[%s18278_s2 + $0x938] sm:$0xff]  ;;  %v11238_v40 = vcombine.low %v857_v24, %v861_v25  ;;  %v896_v24 = vlaneseq  ;;  %v13272_v25 = vld [vmem:[%s18280_s4 + $0xd0] sm:$0xff]  }
 0x12f   : > { %3551 = vmatprep.subr.bf16.mxu0 %v11149_v58  ;;  %3890 = vmatprep.subr.bf16.mxu1 %v11151_v62  ;;  %v832_v58 = vld [vmem:[%s18278_s2 + $0x810] sm:$0xff]  ;;  %v837_v62 = vld [vmem:[%s18278_s2 + $0x838] sm:$0xff]  ;;  %v11247_v44 = vcombine.high %v865_v31, %v869_v32 }
 0x130   : > { %v11215_v3 = vcombine.high %v833_v61, %v837_v62  ;;  %v877_v43 = vld [vmem:[%s18278_s2 + $0x978] sm:$0xff] }
 0x131   : > { %3495 = vmatmul.mubr.bf16.gmra.mrb[48].mxu0 %v13880_v5  ;;  %3834 = vmatmul.mubr.bf16.gmra.mrb[48].mxu1 %v13880_v5  ;;  %v844_v5 = vld [vmem:[%s18278_s2 + $0x870] sm:$0xff] }
 0x132   : > { %3552 = vmatpush1.bf16.msra.mxu0 %v11148_v63  ;;  %3891 = vmatpush1.bf16.msra.mxu1 %v11150_v0  ;;  %v11204_v63 = vcombine.low %v824_v50, %v828_v51  ;;  %v11206_v0 = vcombine.low %v825_v52, %v829_v53  ;;  %v11221_v14 = vcombine.high %v840_v4, %v844_v5  ;;  %v881_v50 = vld [vmem:[%s18278_s2 + $0x998] sm:$0xff] }
 0x133   : > { %3553 = vmatprep.subr.bf16.mxu0 %v11157_v1  ;;  %3892 = vmatprep.subr.bf16.mxu1 %v11159_v2  ;;  %v11213_v1 = vcombine.high %v832_v58, %v836_v59  ;;  %v13887_v2 = vld [vmem:[%s14100_s30 + $0xc] ss:$20 sps:$4 sm:$0xff]   ;;  %v885_v51 = vld [vmem:[%s18278_s2 + $0x9b8] sm:$0xff] }
 0x134   : > { %3504 = vmatprep.mubr.bf16.mxu0 %v13881_v11  ;;  %3843 = vmatprep.mubr.bf16.mxu1 %v13881_v11  ;;  %v11214_v11 = vcombine.low %v833_v61, %v837_v62  ;;  %v13892_v52 = vld [vmem:[%s14100_s30 + $0x58] ss:$20 sps:$4 sm:$0xff]   ;;  %v11263_v62 = vcombine.high %v881_v50, %v885_v51 }
 0x135   : > { %v893_v61 = vld [vmem:[%s18278_s2 + $0x9f8] sm:$0xff] }
 0x136   : > { %3554 = vmatpush1.bf16.msra.mxu0 %v11156_v8  ;;  %3893 = vmatpush1.bf16.msra.mxu1 %v11158_v9  ;;  %v11212_v8 = vcombine.low %v832_v58, %v836_v59  ;;  %v848_v9 = vld [vmem:[%s18278_s2 + $0x890] sm:$0xff] }
 0x137   : > { %3555 = vmatprep.subr.bf16.mxu0 %v11165_v10  ;;  %3894 = vmatprep.subr.bf16.mxu1 %v11167_v12  ;;  %v852_v10 = vld [vmem:[%s18278_s2 + $0x8b0] sm:$0xff]  ;;  %v849_v12 = vld [vmem:[%s18278_s2 + $0x898] sm:$0xff] }
 0x139   : > { %3505 = vmatmul.mubr.bf16.gmra.mrb[52].mxu0 %v13882_v23  ;;  %3844 = vmatmul.mubr.bf16.gmra.mrb[52].mxu1 %v13882_v23  ;;  %v11231_v23 = vcombine.high %v849_v12, %v853_v13 }
 0x13a   : > { %3556 = vmatpush1.bf16.msra.mxu0 %v11164_v17  ;;  %3895 = vmatpush1.bf16.msra.mxu1 %v11166_v18  ;;  %v11220_v17 = vcombine.low %v840_v4, %v844_v5  ;;  %v13889_v18 = vld [vmem:[%s14100_s30 + $0x34] ss:$20 sps:$4 sm:$0xff]   ;;  %v13895_v4 = vld [vmem:[%s14100_s30 + $0xac] ss:$20 sps:$4 sm:$0xff]  }
 0x13b   : > { %3557 = vmatprep.subr.bf16.mxu0 %v11173_v19  ;;  %3896 = vmatprep.subr.bf16.mxu1 %v11175_v20  ;;  %v11222_v19 = vcombine.low %v841_v6, %v845_v7  ;;  %v11229_v20 = vcombine.high %v848_v9, %v852_v10  ;;  %v13263_v5 = vld [vmem:[%s18280_s4 + $0x40] sm:$0xff]  }
 0x13c   : > { %3514 = vmatprep.mubr.bf16.mxu0 %v13883_v29  ;;  %3853 = vmatprep.mubr.bf16.mxu1 %v13883_v29  ;;  %v11230_v29 = vcombine.low %v849_v12, %v853_v13  ;;  %v13264_v7 = vld [vmem:[%s18280_s4 + $0xc0] sm:$0xff]   ;;  %v13899_v12 = vld [vmem:[%s14100_s30 + $0xfc] ss:$20 sps:$4 sm:$0xff]   ;;  %v13900_v13 = vld [vmem:[%s14100_s30 + $0xf8] ss:$20 sps:$4 sm:$0xff]  }
 0x13e   : > { %3558 = vmatpush1.bf16.msra.mxu0 %v11172_v26  ;;  %3897 = vmatpush1.bf16.msra.mxu1 %v11174_v27  ;;  %v11228_v26 = vcombine.low %v848_v9, %v852_v10  ;;  %v864_v27 = vld [vmem:[%s18278_s2 + $0x910] sm:$0xff]  ;;  %v13896_v9 = vld [vmem:[%s14100_s30 + $0xa8] ss:$20 sps:$4 sm:$0xff]  }
 0x13f   : > { %3559 = vmatprep.subr.bf16.mxu0 %v11181_v28  ;;  %3898 = vmatprep.subr.bf16.mxu1 %v11183_v30  ;;  %v868_v28 = vld [vmem:[%s18278_s2 + $0x930] sm:$0xff]  ;;  %v11237_v30 = vcombine.high %v856_v21, %v860_v22 }
 0x140   : > { %v11245_v41 = vcombine.high %v864_v27, %v868_v28  ;;  %v13897_v10 = vld [vmem:[%s14100_s30 + $0xd4] ss:$20 sps:$4 sm:$0xff]  }
 0x141   : > { %3515 = vmatmul.mubr.bf16.gmra.mrb[56].mxu0 %v13884_v42  ;;  %3854 = vmatmul.mubr.bf16.gmra.mrb[56].mxu1 %v13884_v42  ;;  %v873_v42 = vld [vmem:[%s18278_s2 + $0x958] sm:$0xff] }
 0x142   : > { %3560 = vmatpush1.bf16.msra.mxu0 %v11180_v35  ;;  %3899 = vmatpush1.bf16.msra.mxu1 %v11182_v36  ;;  %v13891_v35 = vld [vmem:[%s14100_s30 + $0x5c] ss:$20 sps:$4 sm:$0xff]   ;;  %v11236_v36 = vcombine.low %v856_v21, %v860_v22  ;;  %v11255_v53 = vcombine.high %v873_v42, %v877_v43  ;;  %v11254_v58 = vcombine.low %v873_v42, %v877_v43  ;;  %v13269_v21 = vld [vmem:[%s18280_s4 + $0x8] sm:$0xff]   ;;  %v13282_v43 = vld [vmem:[%s18280_s4 + $0xa0] sm:$0xff]  }
 0x143   : > { %3561 = vmatprep.subr.bf16.mxu0 %v11189_v37  ;;  %3900 = vmatprep.subr.bf16.mxu1 %v11191_v39  ;;  %v872_v37 = vld [vmem:[%s18278_s2 + $0x950] sm:$0xff]  ;;  %v13270_v22 = vld [vmem:[%s18280_s4 + $0x88] sm:$0xff]  }
 0x144   : > { %3524 = vmatprep.mubr.bf16.mxu0 %v13885_v48  ;;  %3863 = vmatprep.mubr.bf16.mxu1 %v13885_v48  ;;  %v876_v39 = vld [vmem:[%s18278_s2 + $0x970] sm:$0xff]  ;;  %v11246_v48 = vcombine.low %v865_v31, %v869_v32  ;;  %v13276_v31 = vld [vmem:[%s18280_s4 + $0xd8] sm:$0xff]  }
 0x145   : > { %v13277_v32 = vld [vmem:[%s18280_s4 + $0x18] sm:$0xff]  }
 0x146   : > { %3562 = vmatpush1.bf16.msra.mxu0 %v11188_v45  ;;  %3901 = vmatpush1.bf16.msra.mxu1 %v11190_v46  ;;  %v11244_v45 = vcombine.low %v864_v27, %v868_v28  ;;  %v880_v46 = vld [vmem:[%s18278_s2 + $0x990] sm:$0xff]  ;;  %v13275_v28 = vld [vmem:[%s18280_s4 + $0x58] sm:$0xff]  }
 0x147   : > { %3563 = vmatprep.subr.bf16.mxu0 %v11197_v47  ;;  %3902 = vmatprep.subr.bf16.mxu1 %v11199_v49  ;;  %v884_v47 = vld [vmem:[%s18278_s2 + $0x9b0] sm:$0xff]  ;;  %v11253_v49 = vcombine.high %v872_v37, %v876_v39 }
 0x148   : > { %v11261_v59 = vcombine.high %v880_v46, %v884_v47  ;;  %v13274_v27 = vld [vmem:[%s18280_s4 + $0x90] sm:$0xff]  }
 0x149   : > { %3525 = vmatmul.mubr.bf16.gmra.mrb[60].mxu0 %v13886_v60  ;;  %3864 = vmatmul.mubr.bf16.gmra.mrb[60].mxu1 %v13886_v60  ;;  %v889_v60 = vld [vmem:[%s18278_s2 + $0x9d8] sm:$0xff] }
 0x14a   : > { %3564 = vmatpush1.bf16.msra.mxu0 %v11196_v54  ;;  %3903 = vmatpush1.bf16.msra.mxu1 %v11198_v55  ;;  %v13893_v54 = vld [vmem:[%s14100_s30 + $0x84] ss:$20 sps:$4 sm:$0xff]   ;;  %v11252_v55 = vcombine.low %v872_v37, %v876_v39 }
 0x14b   : > { %3565 = vmatprep.subr.bf16.mxu0 %v11205_v56  ;;  %3904 = vmatprep.subr.bf16.mxu1 %v11207_v57  ;;  %v888_v56 = vld [vmem:[%s18278_s2 + $0x9d0] sm:$0xff]  ;;  %v15148_v37 = vld [vmem:[%s18279_s3] sm:$0xff] }
 0x14c   : > { %3567 = vmatprep.mubr.bf16.mxu0 %v13887_v2  ;;  %3906 = vmatprep.mubr.bf16.mxu1 %v13887_v2  ;;  %v892_v57 = vld [vmem:[%s18278_s2 + $0x9f0] sm:$0xff] }
 0x14d   : > { %v13894_v2 = vld [vmem:[%s14100_s30 + $0x80] ss:$20 sps:$4 sm:$0xff]   ;;  %v11268_v6 = vcombine.low %v888_v56, %v892_v57 }
 0x14e   : > { %3566 = vmatpush1.bf16.msra.mxu0 %v11204_v63  ;;  %3905 = vmatpush1.bf16.msra.mxu1 %v11206_v0  ;;  %v11260_v63 = vcombine.low %v880_v46, %v884_v47  ;;  %v11262_v0 = vcombine.low %v881_v50, %v885_v51  ;;  %v13284_v47 = vld [vmem:[%s18280_s4 + $0xe8] sm:$0xff]  }
 0x14f   : > { %3648 = vmatprep.subr.bf16.mxu0 %v11213_v1  ;;  %3987 = vmatprep.subr.bf16.mxu1 %v11215_v3  ;;  %v11269_v1 = vcombine.high %v888_v56, %v892_v57  ;;  %v11271_v3 = vcombine.high %v889_v60, %v893_v61  ;;  %v13285_v50 = vld [vmem:[%s18280_s4 + $0x28] sm:$0xff]  }
 0x151   : > { %3568 = vmatmul.mubr.bf16.vlgmr.msra.gmra.mrb[32].mxu0 %v13888_v15  ;;  %3907 = vmatmul.mubr.bf16.vlgmr.msra.gmra.mrb[32].mxu1 %v13888_v15  ;;  %v13902_v15 = vld [vmem:[%s14100_s30 + $0x120] ss:$20 sps:$4 sm:$0xff]  }
 0x152   : > { %3649 = vmatpush1.bf16.msra.mxu0 %v11212_v8  ;;  %3988 = vmatpush1.bf16.msra.mxu1 %v11214_v11  ;;  %v11270_v8 = vcombine.low %v889_v60, %v893_v61  ;;  %v13898_v11 = vld [vmem:[%s14100_s30 + $0xd0] ss:$20 sps:$4 sm:$0xff]  }
 0x153   : > { %3577 = vmatprep.mubr.bf16.mxu0 %v13889_v18  ;;  %3916 = vmatprep.mubr.bf16.mxu1 %v13889_v18  ;;  %v13267_v18 = vld [vmem:[%s18280_s4 + $0x48] sm:$0xff]  }
 0x154   : > { %3650 = vmatprep.subr.bf16.mxu0 %v11221_v14  ;;  %3989 = vmatprep.subr.bf16.mxu1 %v11223_v16  ;;  %v13901_v14 = vld [vmem:[%s14100_s30 + $0x124] ss:$20 sps:$4 sm:$0xff]  }
 0x155   : > { %v13265_v16 = vld [vmem:[%s18280_s4] sm:$0xff]  }
 0x156   : > { %3651 = vmatpush1.bf16.msra.mxu0 %v11220_v17  ;;  %3990 = vmatpush1.bf16.msra.mxu1 %v11222_v19  ;;  %v13266_v17 = vld [vmem:[%s18280_s4 + $0x80] sm:$0xff]  }
 0x157   : > { %3652 = vmatprep.subr.bf16.mxu0 %v11229_v20  ;;  %3991 = vmatprep.subr.bf16.mxu1 %v11231_v23  ;;  %v13903_v19 = vld [vmem:[%s14100_s30 + $0x10] ss:$20 sps:$4 sm:$0xff]   ;;  %v13268_v20 = vld [vmem:[%s18280_s4 + $0xc8] sm:$0xff]  }
 0x158   : > { %v13271_v23 = vld [vmem:[%s18280_s4 + $0x50] sm:$0xff]  }
 0x159   : > { %3578 = vmatmul.mubr.bf16.gmra.mrb[36].mxu0 %v13890_v33  ;;  %3917 = vmatmul.mubr.bf16.gmra.mrb[36].mxu1 %v13890_v33  ;;  %v13278_v33 = vld [vmem:[%s18280_s4 + $0x98] sm:$0xff]  }
 0x15a   : > { %3587 = vmatprep.mubr.bf16.mxu0 %v13891_v35  ;;  %3926 = vmatprep.mubr.bf16.mxu1 %v13891_v35 }
 0x15b   : > { %3653 = vmatpush1.bf16.msra.mxu0 %v11228_v26  ;;  %3992 = vmatpush1.bf16.msra.mxu1 %v11230_v29  ;;  %v13273_v26 = vld [vmem:[%s18280_s4 + $0x10] sm:$0xff]   ;;  %v13904_v29 = vld [vmem:[%s14100_s30 + $0x38] ss:$20 sps:$4 sm:$0xff]  }
 0x15c   : > { %3654 = vmatprep.subr.bf16.mxu0 %v11237_v30  ;;  %3993 = vmatprep.subr.bf16.mxu1 %v11239_v34  ;;  %v15123_v30 = vshrl.u32 %v896_v24, 7  ;;  %v13279_v34 = vld [vmem:[%s18280_s4 + $0x60] sm:$0xff]   ;;  %v13294_v24 = vld [vmem:[%s18280_s4 + $0xb8] sm:$0xff]  }
 0x15e   : > { %18347 = vst [vmem:[#allocation2_spill] sm:$0xff] %v15123_v30  ;;  %v15140_v35 = vsub.s32 0, %v15123_v30  ;;  %v15151_v39 = vsub.s32 2, %v15123_v30  ;;  %v15160_v42 = vsub.s32 3, %v15123_v30 }
 0x15f   : > { %3655 = vmatpush1.bf16.msra.mxu0 %v11236_v36  ;;  %3994 = vmatpush1.bf16.msra.mxu1 %v11238_v40  ;;  %v13280_v36 = vld [vmem:[%s18280_s4 + $0xe0] sm:$0xff]   ;;  %v15154_v40 = vsub.s32 1, %v15123_v30 }
 0x160   : > { %3656 = vmatprep.subr.bf16.mxu0 %v11245_v41  ;;  %3995 = vmatprep.subr.bf16.mxu1 %v11247_v44  ;;  %18348 = vst [vmem:[#allocation3_spill] sm:$0xff] %v15140_v35  ;;  %18349 = vst [vmem:[#allocation4_spill] sm:$0xff] %v15151_v39  ;;  %v13281_v41 = vld [vmem:[%s18280_s4 + $0x20] sm:$0xff]   ;;  %v13283_v44 = vld [vmem:[%s18280_s4 + $0x68] sm:$0xff]   ;;  %v15171_v46 = vrot.slane %v15148_v37, %v15140_v35  ;;  %v15191_v51 = vrot.slane %v15148_v37, %v15160_v42 }
 0x161   : > { %3588 = vmatmul.mubr.bf16.gmra.mrb[40].mxu0 %v13892_v52  ;;  %3927 = vmatmul.mubr.bf16.gmra.mrb[40].mxu1 %v13892_v52  ;;  %18350 = vst [vmem:[#allocation5_spill] sm:$0xff] %v15154_v40  ;;  %18351 = vst [vmem:[#allocation6_spill] sm:$0xff] %v15160_v42 }
 0x162   : > { %3597 = vmatprep.mubr.bf16.mxu0 %v13893_v54  ;;  %3936 = vmatprep.mubr.bf16.mxu1 %v13893_v54  ;;  %v13287_v54 = vld [vmem:[%s18280_s4 + $0x70] sm:$0xff]  }
 0x163   : > { %3657 = vmatpush1.bf16.msra.mxu0 %v11244_v45  ;;  %3996 = vmatpush1.bf16.msra.mxu1 %v11246_v48  ;;  %v13905_v45 = vld [vmem:[%s14100_s30 + $0x60] ss:$20 sps:$4 sm:$0xff]   ;;  %v15178_v48 = vrot.slane %v15148_v37, %v15151_v39 }
 0x164   : > { %3658 = vmatprep.subr.bf16.mxu0 %v11253_v49  ;;  %3997 = vmatprep.subr.bf16.mxu1 %v11255_v53  ;;  %v15183_v49 = vrot.slane %v15148_v37, %v15154_v40  ;;  %v13286_v53 = vld [vmem:[%s18280_s4 + $0xa8] sm:$0xff]  }
 0x167   : > { %3659 = vmatpush1.bf16.msra.mxu0 %v11252_v55  ;;  %3998 = vmatpush1.bf16.msra.mxu1 %v11254_v58  ;;  %v13288_v58 = vld [vmem:[%s18280_s4 + $0xf0] sm:$0xff]  }
 0x168   : > { %3660 = vmatprep.subr.bf16.mxu0 %v11261_v59  ;;  %3999 = vmatprep.subr.bf16.mxu1 %v11263_v62 }
 0x169   : > { %3598 = vmatmul.mubr.bf16.gmra.mrb[44].mxu0 %v13894_v2  ;;  %3937 = vmatmul.mubr.bf16.gmra.mrb[44].mxu1 %v13894_v2  ;;  %v13289_v2 = vld [vmem:[%s18280_s4 + $0x30] sm:$0xff]  }
 0x16a   : > { %3607 = vmatprep.mubr.bf16.mxu0 %v13895_v4  ;;  %3946 = vmatprep.mubr.bf16.mxu1 %v13895_v4 }
 0x16b   : > { %3661 = vmatpush1.bf16.msra.mxu0 %v11260_v63  ;;  %4000 = vmatpush1.bf16.msra.mxu1 %v11262_v0 }
 0x16c   : > { %3662 = vmatprep.subr.bf16.mxu0 %v11269_v1  ;;  %4001 = vmatprep.subr.bf16.mxu1 %v11271_v3 }
 0x16f   : > { %3663 = vmatpush1.bf16.msra.mxu0 %v11268_v6  ;;  %4002 = vmatpush1.bf16.msra.mxu1 %v11270_v8  ;;  %v13291_v8 = vld [vmem:[%s18280_s4 + $0x78] sm:$0xff]  }
 0x170   : > { %11788 = vmatprep.subr.bf16.mxu0 %v13263_v5  ;;  %11852 = vmatprep.subr.bf16.mxu1 %v13264_v7  ;;  %v13290_v7 = vld [vmem:[%s18280_s4 + $0xb0] sm:$0xff]  }
 0x171   : > { %3608 = vmatmul.mubr.bf16.gmra.mrb[48].mxu0 %v13896_v9  ;;  %3947 = vmatmul.mubr.bf16.gmra.mrb[48].mxu1 %v13896_v9 }
 0x172   : > { %3617 = vmatprep.mubr.bf16.mxu0 %v13897_v10  ;;  %3956 = vmatprep.mubr.bf16.mxu1 %v13897_v10 }
 0x179   : > { %3618 = vmatmul.mubr.bf16.gmra.mrb[52].mxu0 %v13898_v11  ;;  %3957 = vmatmul.mubr.bf16.gmra.mrb[52].mxu1 %v13898_v11  ;;  %v13906_v11 = vld [vmem:[%s14100_s30 + $0x88] ss:$20 sps:$4 sm:$0xff]  }
 0x17a   : > { %3627 = vmatprep.mubr.bf16.mxu0 %v13899_v12  ;;  %3966 = vmatprep.mubr.bf16.mxu1 %v13899_v12 }
 0x181   : > { %3628 = vmatmul.mubr.bf16.gmra.mrb[56].mxu0 %v13900_v13  ;;  %3967 = vmatmul.mubr.bf16.gmra.mrb[56].mxu1 %v13900_v13  ;;  %v13292_v13 = vld [vmem:[%s18280_s4 + $0xf8] sm:$0xff]  }
 0x182   : > { %3637 = vmatprep.mubr.bf16.mxu0 %v13901_v14  ;;  %3976 = vmatprep.mubr.bf16.mxu1 %v13901_v14 }
 0x189   : > { %3638 = vmatmul.mubr.bf16.gmra.mrb[60].mxu0 %v13902_v15  ;;  %3977 = vmatmul.mubr.bf16.gmra.mrb[60].mxu1 %v13902_v15 }
 0x18a   : > { %3680 = vmatprep.mubr.bf16.mxu0 %v18294_v38  ;;  %4019 = vmatprep.mubr.bf16.mxu1 %v18294_v38 }
 0x191   : > { %3681 = vmatmul.mubr.bf16.vlgmr.msra.gmra.mrb[32].mxu0 %v13903_v19  ;;  %4020 = vmatmul.mubr.bf16.vlgmr.msra.gmra.mrb[32].mxu1 %v13903_v19 }
 0x192   : > { %3690 = vmatprep.mubr.bf16.mxu0 %v18294_v38  ;;  %4029 = vmatprep.mubr.bf16.mxu1 %v18294_v38 }
 0x193   : > { %11789 = vmatpush3.bf16.msra.mxu0 %v13265_v16  ;;  %11853 = vmatpush3.bf16.msra.mxu1 %v13266_v17 }
 0x194   : > { %11790 = vmatprep.subr.bf16.mxu0 %v13267_v18  ;;  %11854 = vmatprep.subr.bf16.mxu1 %v13268_v20  ;;  %v13293_v20 = vld [vmem:[%s18280_s4 + $0x38] sm:$0xff]  }
 0x197   : > { %11791 = vmatpush3.bf16.msra.mxu0 %v13269_v21  ;;  %11855 = vmatpush3.bf16.msra.mxu1 %v13270_v22 }
 0x198   : > { %11792 = vmatprep.subr.bf16.mxu0 %v13271_v23  ;;  %11856 = vmatprep.subr.bf16.mxu1 %v13272_v25 }
 0x199   : > { %3691 = vmatmul.mubr.bf16.gmra.mrb[36].mxu0 %v13904_v29  ;;  %4030 = vmatmul.mubr.bf16.gmra.mrb[36].mxu1 %v13904_v29 }
 0x19a   : > { %3700 = vmatprep.mubr.bf16.mxu0 %v18294_v38  ;;  %4039 = vmatprep.mubr.bf16.mxu1 %v18294_v38 }
 0x19b   : > { %11793 = vmatpush3.bf16.msra.mxu0 %v13273_v26  ;;  %11857 = vmatpush3.bf16.msra.mxu1 %v13274_v27  ;;  %v13295_v26 = vld [vmem:[%s18280_s4 + $0x140] sm:$0xff]  }
 0x19c   : > { %11794 = vmatprep.subr.bf16.mxu0 %v13275_v28  ;;  %11858 = vmatprep.subr.bf16.mxu1 %v13276_v31 }
 0x19f   : > { %11795 = vmatpush3.bf16.msra.mxu0 %v13277_v32  ;;  %11859 = vmatpush3.bf16.msra.mxu1 %v13278_v33  ;;  %v13297_v32 = vld [vmem:[%s18280_s4 + $0x1c0] sm:$0xff]  }
 0x1a0   : > { %11796 = vmatprep.subr.bf16.mxu0 %v13279_v34  ;;  %11860 = vmatprep.subr.bf16.mxu1 %v13280_v36 }
 0x1a1   : > { %3701 = vmatmul.mubr.bf16.gmra.mrb[40].mxu0 %v13905_v45  ;;  %4040 = vmatmul.mubr.bf16.gmra.mrb[40].mxu1 %v13905_v45 }
 0x1a2   : > { %3710 = vmatprep.mubr.bf16.mxu0 %v18294_v38  ;;  %4049 = vmatprep.mubr.bf16.mxu1 %v18294_v38 }
 0x1a3   : > { %11797 = vmatpush3.bf16.msra.mxu0 %v13281_v41  ;;  %11861 = vmatpush3.bf16.msra.mxu1 %v13282_v43 }
 0x1a4   : > { %v3004_v52 = vpop.f32.mrb[0].mxu0  ;;  %11798 = vmatprep.subr.bf16.mxu0 %v13283_v44  ;;  %v3343_v56 = vpop.f32.mrb[0].mxu1  ;;  %11862 = vmatprep.subr.bf16.mxu1 %v13284_v47 }
 0x1a5   : > { %v12556_v55 = vadd.f32 %v3004_v52, %v15171_v46  ;;  %v3006_v57 = vpop.f32.mrb[1].mxu0  ;;  %v12588_v59 = vadd.f32 %v3343_v56, %v15178_v48  ;;  %v3345_v60 = vpop.f32.mrb[1].mxu1 }
 0x1a6   : > { %v3008_v61 = vpop.f32.mrb[2].mxu0  ;;  %v12557_v62 = vadd.f32 %v3006_v57, %v15183_v49  ;;  %v3347_v0 = vpop.f32.mrb[2].mxu1  ;;  %v12589_v3 = vadd.f32 %v3345_v60, %v15191_v51 }
 0x1a7   : > { %v12558_v63 = vadd.f32 %v3008_v61, %v15171_v46  ;;  %v3010_v1 = vpop.f32.mrb[3].mxu0  ;;  %11799 = vmatpush3.bf16.msra.mxu0 %v13285_v50  ;;  %v12590_v4 = vadd.f32 %v3347_v0, %v15178_v48  ;;  %v3349_v5 = vpop.f32.mrb[3].mxu1  ;;  %11863 = vmatpush3.bf16.msra.mxu1 %v13286_v53  ;;  %v4100_v9 = vmax.f32 %v12556_v55, 0.0  ;;  %v4102_v14 = vmax.f32 %v12588_v59, 0.0 }
 0x1a8   : > { %11800 = vmatprep.subr.bf16.mxu0 %v13287_v54  ;;  %v12559_v6 = vadd.f32 %v3010_v1, %v15183_v49  ;;  %11864 = vmatprep.subr.bf16.mxu1 %v13288_v58  ;;  %v12591_v12 = vadd.f32 %v3349_v5, %v15191_v51  ;;  %v4101_v16 = vmax.f32 %v12557_v62, 0.0  ;;  %v4103_v18 = vmax.f32 %v12589_v3, 0.0  ;;  %v13907_v54 = vld [vmem:[%s14100_s30 + $0xb0] ss:$20 sps:$4 sm:$0xff]  }
 0x1a9   : > { %v4108_v10 = vmax.f32 %v12558_v63, 0.0  ;;  %3711 = vmatmul.mubr.bf16.gmra.mrb[44].mxu0 %v13906_v11  ;;  %v4110_v15 = vmax.f32 %v12590_v4, 0.0  ;;  %4050 = vmatmul.mubr.bf16.gmra.mrb[44].mxu1 %v13906_v11 }
 0x1aa   : > { %3720 = vmatprep.mubr.bf16.mxu0 %v18294_v38  ;;  %v4109_v17 = vmax.f32 %v12559_v6, 0.0  ;;  %4059 = vmatprep.mubr.bf16.mxu1 %v18294_v38  ;;  %v4111_v19 = vmax.f32 %v12591_v12, 0.0 }
 0x1ab   : > { %11801 = vmatpush3.bf16.msra.mxu0 %v13289_v2  ;;  %v15228_v21 = vpack.c.bf16 %v4108_v10, %v4100_v9  ;;  %11865 = vmatpush3.bf16.msra.mxu1 %v13290_v7  ;;  %v15235_v25 = vpack.c.bf16 %v4110_v15, %v4102_v14 }
 0x1ac   : > { %v3014_v22 = vpop.f32.mrb[4].mxu0  ;;  %v15230_v23 = vpack.c.bf16 %v4109_v17, %v4101_v16  ;;  %11802 = vmatprep.subr.bf16.mxu0 %v13291_v8  ;;  %v3353_v27 = vpop.f32.mrb[4].mxu1  ;;  %v15240_v29 = vpack.c.bf16 %v4111_v19, %v4103_v18  ;;  %11866 = vmatprep.subr.bf16.mxu1 %v13292_v13  ;;  %v13908_v19 = vld [vmem:[%s14100_s30 + $0xd8] ss:$20 sps:$4 sm:$0xff]  }
 0x1ad   : > { %v3016_v28 = vpop.f32.mrb[5].mxu0  ;;  %v12560_v31 = vadd.f32 %v3014_v22, %v15171_v46  ;;  %v3355_v33 = vpop.f32.mrb[5].mxu1  ;;  %v12592_v41 = vadd.f32 %v3353_v27, %v15178_v48 }
 0x1ae   : > { %v3018_v34 = vpop.f32.mrb[6].mxu0  ;;  %v12561_v36 = vadd.f32 %v3016_v28, %v15183_v49  ;;  %v3357_v43 = vpop.f32.mrb[6].mxu1  ;;  %v12593_v45 = vadd.f32 %v3355_v33, %v15191_v51 }
 0x1af   : > { %v3020_v44 = vpop.f32.mrb[7].mxu0  ;;  %11803 = vmatpush3.bf16.msra.mxu0 %v13293_v20  ;;  %v12562_v47 = vadd.f32 %v3018_v34, %v15171_v46  ;;  %v3359_v50 = vpop.f32.mrb[7].mxu1  ;;  %11867 = vmatpush3.bf16.msra.mxu1 %v13294_v24  ;;  %v12594_v53 = vadd.f32 %v3357_v43, %v15178_v48  ;;  %v4116_v56 = vmax.f32 %v12560_v31, 0.0  ;;  %v4118_v60 = vmax.f32 %v12592_v41, 0.0 }
 0x1b0   : > { %v12563_v52 = vadd.f32 %v3020_v44, %v15183_v49  ;;  %11916 = vmatprep.subr.bf16.mxu0 %v13295_v26  ;;  %v12595_v55 = vadd.f32 %v3359_v50, %v15191_v51  ;;  %11980 = vmatprep.subr.bf16.mxu1 %v13297_v32  ;;  %v4117_v58 = vmax.f32 %v12561_v36, 0.0  ;;  %v4119_v62 = vmax.f32 %v12593_v45, 0.0 }
 0x1b1   : > { %3721 = vmatmul.mubr.bf16.gmra.mrb[48].mxu0 %v13907_v54  ;;  %v4124_v57 = vmax.f32 %v12562_v47, 0.0  ;;  %4060 = vmatmul.mubr.bf16.gmra.mrb[48].mxu1 %v13907_v54  ;;  %v4126_v61 = vmax.f32 %v12594_v53, 0.0 }
 0x1b2   : > { %3730 = vmatprep.mubr.bf16.mxu0 %v18294_v38  ;;  %v4125_v59 = vmax.f32 %v12563_v52, 0.0  ;;  %4069 = vmatprep.mubr.bf16.mxu1 %v18294_v38  ;;  %v4127_v63 = vmax.f32 %v12595_v55, 0.0 }
 0x1b3   : > { %v15256_v0 = vpack.c.bf16 %v4124_v57, %v4116_v56  ;;  %v15260_v3 = vpack.c.bf16 %v4126_v61, %v4118_v60 }
 0x1b4   : > { %v3024_v1 = vpop.f32.mrb[8].mxu0  ;;  %v15258_v2 = vpack.c.bf16 %v4125_v59, %v4117_v58  ;;  %v3363_v4 = vpop.f32.mrb[8].mxu1  ;;  %v15262_v6 = vpack.c.bf16 %v4127_v63, %v4119_v62  ;;  %v13909_v63 = vld [vmem:[%s14100_s30 + $0x100] ss:$20 sps:$4 sm:$0xff]  }
 0x1b5   : > { %v3026_v5 = vpop.f32.mrb[9].mxu0  ;;  %v12564_v7 = vadd.f32 %v3024_v1, %v15171_v46  ;;  %v3365_v8 = vpop.f32.mrb[9].mxu1  ;;  %v12596_v11 = vadd.f32 %v3363_v4, %v15178_v48 }
 0x1b6   : > { %v3028_v9 = vpop.f32.mrb[10].mxu0  ;;  %v12565_v10 = vadd.f32 %v3026_v5, %v15183_v49  ;;  %v3367_v12 = vpop.f32.mrb[10].mxu1  ;;  %v12597_v14 = vadd.f32 %v3365_v8, %v15191_v51 }
 0x1b7   : > { %v3030_v13 = vpop.f32.mrb[11].mxu0  ;;  %v12566_v15 = vadd.f32 %v3028_v9, %v15171_v46  ;;  %v3369_v16 = vpop.f32.mrb[11].mxu1  ;;  %v12598_v18 = vadd.f32 %v3367_v12, %v15178_v48  ;;  %v4132_v22 = vmax.f32 %v12564_v7, 0.0  ;;  %v4134_v28 = vmax.f32 %v12596_v11, 0.0 }
 0x1b8   : > { %v12567_v17 = vadd.f32 %v3030_v13, %v15183_v49  ;;  %v12599_v20 = vadd.f32 %v3369_v16, %v15191_v51  ;;  %v4133_v26 = vmax.f32 %v12565_v10, 0.0  ;;  %v4135_v32 = vmax.f32 %v12597_v14, 0.0 }
 0x1b9   : > { %3731 = vmatmul.mubr.bf16.gmra.mrb[52].mxu0 %v13908_v19  ;;  %v4140_v24 = vmax.f32 %v12566_v15, 0.0  ;;  %4070 = vmatmul.mubr.bf16.gmra.mrb[52].mxu1 %v13908_v19  ;;  %v4142_v31 = vmax.f32 %v12598_v18, 0.0 }
 0x1ba   : > { %3740 = vmatprep.mubr.bf16.mxu0 %v18294_v38  ;;  %v4141_v27 = vmax.f32 %v12567_v17, 0.0  ;;  %4079 = vmatprep.mubr.bf16.mxu1 %v18294_v38  ;;  %v4143_v33 = vmax.f32 %v12599_v20, 0.0 }
 0x1bb   : > { %v15275_v34 = vpack.c.bf16 %v4140_v24, %v4132_v22  ;;  %v15279_v43 = vpack.c.bf16 %v4142_v31, %v4134_v28 }
 0x1bc   : > { %v3034_v36 = vpop.f32.mrb[12].mxu0  ;;  %v15277_v41 = vpack.c.bf16 %v4141_v27, %v4133_v26  ;;  %v3373_v44 = vpop.f32.mrb[12].mxu1  ;;  %v15281_v47 = vpack.c.bf16 %v4143_v33, %v4135_v32 }
 0x1bd   : > { %v3036_v45 = vpop.f32.mrb[13].mxu0  ;;  %v12568_v50 = vadd.f32 %v3034_v36, %v15171_v46  ;;  %v3375_v52 = vpop.f32.mrb[13].mxu1  ;;  %v12600_v55 = vadd.f32 %v3373_v44, %v15178_v48 }
 0x1be   : > { %v3038_v53 = vpop.f32.mrb[14].mxu0  ;;  %v12569_v54 = vadd.f32 %v3036_v45, %v15183_v49  ;;  %v3377_v56 = vpop.f32.mrb[14].mxu1  ;;  %v12601_v58 = vadd.f32 %v3375_v52, %v15191_v51 }
 0x1bf   : > { %v3040_v57 = vpop.f32.mrb[15].mxu0  ;;  %v12570_v59 = vadd.f32 %v3038_v53, %v15171_v46  ;;  %v3379_v60 = vpop.f32.mrb[15].mxu1  ;;  %v12602_v62 = vadd.f32 %v3377_v56, %v15178_v48  ;;  %v4148_v4 = vmax.f32 %v12568_v50, 0.0  ;;  %v4150_v9 = vmax.f32 %v12600_v55, 0.0  ;;  %v13910_v50 = vld [vmem:[%s14100_s30 + $0x128] ss:$20 sps:$4 sm:$0xff]  }
 0x1c0   : > { %v12571_v61 = vadd.f32 %v3040_v57, %v15183_v49  ;;  %v12603_v1 = vadd.f32 %v3379_v60, %v15191_v51  ;;  %v4149_v7 = vmax.f32 %v12569_v54, 0.0  ;;  %v4151_v11 = vmax.f32 %v12601_v58, 0.0 }
 0x1c1   : > { %3741 = vmatmul.mubr.bf16.gmra.mrb[56].mxu0 %v13909_v63  ;;  %v4156_v5 = vmax.f32 %v12570_v59, 0.0  ;;  %4080 = vmatmul.mubr.bf16.gmra.mrb[56].mxu1 %v13909_v63  ;;  %v4158_v10 = vmax.f32 %v12602_v62, 0.0 }
 0x1c2   : > { %3750 = vmatprep.mubr.bf16.mxu0 %v18294_v38  ;;  %v4157_v8 = vmax.f32 %v12571_v61, 0.0  ;;  %4089 = vmatprep.mubr.bf16.mxu1 %v18294_v38  ;;  %v4159_v12 = vmax.f32 %v12603_v1, 0.0 }
 0x1c3   : > { %v15294_v13 = vpack.c.bf16 %v4156_v5, %v4148_v4  ;;  %v15298_v16 = vpack.c.bf16 %v4158_v10, %v4150_v9 }
 0x1c4   : > { %v3044_v14 = vpop.f32.mrb[16].mxu0  ;;  %v15296_v15 = vpack.c.bf16 %v4157_v8, %v4149_v7  ;;  %v3383_v17 = vpop.f32.mrb[16].mxu1  ;;  %v15300_v19 = vpack.c.bf16 %v4159_v12, %v4151_v11 }
 0x1c5   : > { %v3046_v18 = vpop.f32.mrb[17].mxu0  ;;  %v12572_v20 = vadd.f32 %v3044_v14, %v15171_v46  ;;  %v3385_v22 = vpop.f32.mrb[17].mxu1  ;;  %v12604_v27 = vadd.f32 %v3383_v17, %v15178_v48 }
 0x1c6   : > { %v3048_v24 = vpop.f32.mrb[18].mxu0  ;;  %v12573_v26 = vadd.f32 %v3046_v18, %v15183_v49  ;;  %v3387_v28 = vpop.f32.mrb[18].mxu1  ;;  %v12605_v32 = vadd.f32 %v3385_v22, %v15191_v51  ;;  %v13296_v22 = vld [vmem:[%s18280_s4 + $0x100] sm:$0xff]  }
 0x1c7   : > { %v3050_v31 = vpop.f32.mrb[19].mxu0  ;;  %v12574_v33 = vadd.f32 %v3048_v24, %v15171_v46  ;;  %v3389_v36 = vpop.f32.mrb[19].mxu1  ;;  %v12606_v45 = vadd.f32 %v3387_v28, %v15178_v48  ;;  %v4164_v53 = vmax.f32 %v12572_v20, 0.0  ;;  %v4166_v57 = vmax.f32 %v12604_v27, 0.0  ;;  %v13298_v28 = vld [vmem:[%s18280_s4 + $0x180] sm:$0xff]  }
 0x1c8   : > { %v12575_v44 = vadd.f32 %v3050_v31, %v15183_v49  ;;  %v12607_v52 = vadd.f32 %v3389_v36, %v15191_v51  ;;  %v4165_v55 = vmax.f32 %v12573_v26, 0.0  ;;  %v4167_v59 = vmax.f32 %v12605_v32, 0.0  ;;  %v13299_v31 = vld [vmem:[%s18280_s4 + $0x148] sm:$0xff]  }
 0x1c9   : > { %3751 = vmatmul.mubr.bf16.gmra.mrb[60].mxu0 %v13910_v50  ;;  %v4172_v54 = vmax.f32 %v12574_v33, 0.0  ;;  %4090 = vmatmul.mubr.bf16.gmra.mrb[60].mxu1 %v13910_v50  ;;  %v4174_v58 = vmax.f32 %v12606_v45, 0.0 }
 0x1ca   : > { %4843 = vmatprep.mubr.bf16.mxu0 %v15230_v23  ;;  %v4173_v56 = vmax.f32 %v12575_v44, 0.0  ;;  %4940 = vmatprep.mubr.bf16.mxu1 %v15240_v29  ;;  %v4175_v60 = vmax.f32 %v12607_v52, 0.0  ;;  %v13301_v44 = vld [vmem:[%s18280_s4 + $0x1c8] sm:$0xff]  }
 0x1cb   : > { %v15313_v61 = vpack.c.bf16 %v4172_v54, %v4164_v53  ;;  %v15317_v1 = vpack.c.bf16 %v4174_v58, %v4166_v57  ;;  %v13300_v57 = vld [vmem:[%s18280_s4 + $0x108] sm:$0xff]  }
 0x1cc   : > { %v3054_v62 = vpop.f32.mrb[20].mxu0  ;;  %v15315_v63 = vpack.c.bf16 %v4173_v56, %v4165_v55  ;;  %v3393_v4 = vpop.f32.mrb[20].mxu1  ;;  %v15319_v7 = vpack.c.bf16 %v4175_v60, %v4167_v59 }
 0x1cd   : > { %v3056_v5 = vpop.f32.mrb[21].mxu0  ;;  %v12576_v8 = vadd.f32 %v3054_v62, %v15171_v46  ;;  %v3395_v9 = vpop.f32.mrb[21].mxu1  ;;  %v12608_v12 = vadd.f32 %v3393_v4, %v15178_v48  ;;  %v13302_v62 = vld [vmem:[%s18280_s4 + $0x188] sm:$0xff]   ;;  %v13303_v4 = vld [vmem:[%s18280_s4 + $0x150] sm:$0xff]  }
 0x1ce   : > { %v3058_v10 = vpop.f32.mrb[22].mxu0  ;;  %v12577_v11 = vadd.f32 %v3056_v5, %v15183_v49  ;;  %v3397_v14 = vpop.f32.mrb[22].mxu1  ;;  %v12609_v18 = vadd.f32 %v3395_v9, %v15191_v51 }
 0x1cf   : > { %v3060_v17 = vpop.f32.mrb[23].mxu0  ;;  %v12578_v20 = vadd.f32 %v3058_v10, %v15171_v46  ;;  %v3399_v24 = vpop.f32.mrb[23].mxu1  ;;  %v12610_v27 = vadd.f32 %v3397_v14, %v15178_v48  ;;  %v4180_v33 = vmax.f32 %v12576_v8, 0.0  ;;  %v4182_v52 = vmax.f32 %v12608_v12, 0.0 }
 0x1d0   : > { %v12579_v26 = vadd.f32 %v3060_v17, %v15183_v49  ;;  %v12611_v32 = vadd.f32 %v3399_v24, %v15191_v51  ;;  %v4181_v45 = vmax.f32 %v12577_v11, 0.0  ;;  %v4183_v54 = vmax.f32 %v12609_v18, 0.0  ;;  %v13305_v11 = vld [vmem:[%s18280_s4 + $0x1d0] sm:$0xff]  }
 0x1d1   : > { %4844 = vmatmul.mubr.bf16.vlgmr.msra.gmra.mrb[64].mxu0 %v15228_v21  ;;  %v4188_v36 = vmax.f32 %v12578_v20, 0.0  ;;  %4941 = vmatmul.mubr.bf16.vlgmr.msra.gmra.mrb[64].mxu1 %v15235_v25  ;;  %v4190_v53 = vmax.f32 %v12610_v27, 0.0  ;;  %v13304_v27 = vld [vmem:[%s18280_s4 + $0x110] sm:$0xff]  }
 0x1d2   : > { %4851 = vmatprep.mubr.bf16.mxu0 %v15258_v2  ;;  %v4189_v50 = vmax.f32 %v12579_v26, 0.0  ;;  %4948 = vmatprep.mubr.bf16.mxu1 %v15262_v6  ;;  %v4191_v55 = vmax.f32 %v12611_v32, 0.0 }
 0x1d3   : > { %v15345_v56 = vpack.c.bf16 %v4188_v36, %v4180_v33  ;;  %11917 = vmatpush3.bf16.msra.mxu0 %v13296_v22  ;;  %v15352_v60 = vpack.c.bf16 %v4190_v53, %v4182_v52  ;;  %11981 = vmatpush3.bf16.msra.mxu1 %v13298_v28  ;;  %v13306_v33 = vld [vmem:[%s18280_s4 + $0x190] sm:$0xff]   ;;  %v13307_v36 = vld [vmem:[%s18280_s4 + $0x158] sm:$0xff]  }
 0x1d4   : > { %v3064_v58 = vpop.f32.mrb[24].mxu0  ;;  %v15350_v59 = vpack.c.bf16 %v4189_v50, %v4181_v45  ;;  %11918 = vmatprep.subr.bf16.mxu0 %v13299_v31  ;;  %v3403_v5 = vpop.f32.mrb[24].mxu1  ;;  %v15360_v9 = vpack.c.bf16 %v4191_v55, %v4183_v54  ;;  %11982 = vmatprep.subr.bf16.mxu1 %v13301_v44  ;;  %v13309_v52 = vld [vmem:[%s18280_s4 + $0x1d8] sm:$0xff]  }
 0x1d5   : > { %v3066_v8 = vpop.f32.mrb[25].mxu0  ;;  %v12580_v10 = vadd.f32 %v3064_v58, %v15171_v46  ;;  %v3405_v12 = vpop.f32.mrb[25].mxu1  ;;  %v12612_v18 = vadd.f32 %v3403_v5, %v15178_v48  ;;  %v13308_v5 = vld [vmem:[%s18280_s4 + $0x118] sm:$0xff]  }
 0x1d6   : > { %v3068_v14 = vpop.f32.mrb[26].mxu0  ;;  %v12581_v17 = vadd.f32 %v3066_v8, %v15183_v49  ;;  %v3407_v20 = vpop.f32.mrb[26].mxu1  ;;  %v12613_v24 = vadd.f32 %v3405_v12, %v15191_v51  ;;  %v13310_v12 = vld [vmem:[%s18280_s4 + $0x198] sm:$0xff]  }
 0x1d7   : > { %v3070_v22 = vpop.f32.mrb[27].mxu0  ;;  %v12582_v26 = vadd.f32 %v3068_v14, %v15171_v46  ;;  %11919 = vmatpush3.bf16.msra.mxu0 %v13300_v57  ;;  %v3409_v28 = vpop.f32.mrb[27].mxu1  ;;  %v12614_v32 = vadd.f32 %v3407_v20, %v15178_v48  ;;  %11983 = vmatpush3.bf16.msra.mxu1 %v13302_v62  ;;  %v4196_v45 = vmax.f32 %v12580_v10, 0.0  ;;  %v4198_v55 = vmax.f32 %v12612_v18, 0.0  ;;  %v13311_v14 = vld [vmem:[%s18280_s4 + $0x160] sm:$0xff]  }
 0x1d8   : > { %v12583_v31 = vadd.f32 %v3070_v22, %v15183_v49  ;;  %11920 = vmatprep.subr.bf16.mxu0 %v13303_v4  ;;  %v12615_v44 = vadd.f32 %v3409_v28, %v15191_v51  ;;  %11984 = vmatprep.subr.bf16.mxu1 %v13305_v11  ;;  %v4197_v53 = vmax.f32 %v12581_v17, 0.0  ;;  %v4199_v58 = vmax.f32 %v12613_v24, 0.0  ;;  %v13313_v24 = vld [vmem:[%s18280_s4 + $0x1e0] sm:$0xff]  }
 0x1d9   : > { %4852 = vmatmul.mubr.bf16.gmra.mrb[68].mxu0 %v15256_v0  ;;  %v4204_v50 = vmax.f32 %v12582_v26, 0.0  ;;  %4949 = vmatmul.mubr.bf16.gmra.mrb[68].mxu1 %v15260_v3  ;;  %v4206_v57 = vmax.f32 %v12614_v32, 0.0 }
 0x1da   : > { %4859 = vmatprep.mubr.bf16.mxu0 %v15277_v41  ;;  %v4205_v54 = vmax.f32 %v12583_v31, 0.0  ;;  %4956 = vmatprep.mubr.bf16.mxu1 %v15281_v47  ;;  %v4207_v62 = vmax.f32 %v12615_v44, 0.0 }
 0x1db   : > { %v15389_v4 = vpack.c.bf16 %v4204_v50, %v4196_v45  ;;  %11921 = vmatpush3.bf16.msra.mxu0 %v13304_v27  ;;  %v15396_v11 = vpack.c.bf16 %v4206_v57, %v4198_v55  ;;  %11985 = vmatpush3.bf16.msra.mxu1 %v13306_v33  ;;  %v13312_v45 = vld [vmem:[%s18280_s4 + $0x120] sm:$0xff]  }
 0x1dc   : > { %v3074_v8 = vpop.f32.mrb[28].mxu0  ;;  %v15394_v10 = vpack.c.bf16 %v4205_v54, %v4197_v53  ;;  %11922 = vmatprep.subr.bf16.mxu0 %v13307_v36  ;;  %v3413_v17 = vpop.f32.mrb[28].mxu1  ;;  %v15404_v20 = vpack.c.bf16 %v4207_v62, %v4199_v58  ;;  %11986 = vmatprep.subr.bf16.mxu1 %v13309_v52  ;;  %v13314_v54 = vld [vmem:[%s18280_s4 + $0x1a0] sm:$0xff]  }
 0x1dd   : > { %v3076_v18 = vpop.f32.mrb[29].mxu0  ;;  %v12584_v22 = vadd.f32 %v3074_v8, %v15171_v46  ;;  %v3415_v26 = vpop.f32.mrb[29].mxu1  ;;  %v12616_v31 = vadd.f32 %v3413_v17, %v15178_v48  ;;  %v13316_v17 = vld [vmem:[%s18280_s4 + $0x128] sm:$0xff]  }
 0x1de   : > { %v3078_v27 = vpop.f32.mrb[30].mxu0  ;;  %v12585_v28 = vadd.f32 %v3076_v18, %v15183_v49  ;;  %v3417_v32 = vpop.f32.mrb[30].mxu1  ;;  %v12617_v36 = vadd.f32 %v3415_v26, %v15191_v51  ;;  %v13319_v26 = vld [vmem:[%s18280_s4 + $0x170] sm:$0xff]  }
 0x1df   : > { %v3080_v33 = vpop.f32.mrb[31].mxu0  ;;  %v12586_v44 = vadd.f32 %v3078_v27, %v15171_v46  ;;  %11923 = vmatpush3.bf16.msra.mxu0 %v13308_v5  ;;  %v3419_v50 = vpop.f32.mrb[31].mxu1  ;;  %v12618_v53 = vadd.f32 %v3417_v32, %v15178_v48  ;;  %11987 = vmatpush3.bf16.msra.mxu1 %v13310_v12  ;;  %v13315_v46 = vld [vmem:[%s18280_s4 + $0x168] sm:$0xff]   ;;  %v4212_v57 = vmax.f32 %v12584_v22, 0.0  ;;  %v4214_v5 = vmax.f32 %v12616_v31, 0.0  ;;  %v13320_v31 = vld [vmem:[%s18280_s4 + $0x130] sm:$0xff]  }
 0x1e0   : > { %v12587_v52 = vadd.f32 %v3080_v33, %v15183_v49  ;;  %11924 = vmatprep.subr.bf16.mxu0 %v13311_v14  ;;  %v12619_v55 = vadd.f32 %v3419_v50, %v15191_v51  ;;  %11988 = vmatprep.subr.bf16.mxu1 %v13313_v24  ;;  %v13317_v48 = vld [vmem:[%s18280_s4 + $0x1e8] sm:$0xff]   ;;  %v4213_v49 = vmax.f32 %v12585_v28, 0.0  ;;  %v4215_v12 = vmax.f32 %v12617_v36, 0.0  ;;  %v13321_v28 = vld [vmem:[%s18280_s4 + $0x1f0] sm:$0xff]   ;;  %v13323_v33 = vld [vmem:[%s18280_s4 + $0x178] sm:$0xff]  }
 0x1e1   : > { %4860 = vmatmul.mubr.bf16.gmra.mrb[72].mxu0 %v15275_v34  ;;  %v4220_v58 = vmax.f32 %v12586_v44, 0.0  ;;  %4957 = vmatmul.mubr.bf16.gmra.mrb[72].mxu1 %v15279_v43  ;;  %v4222_v8 = vmax.f32 %v12618_v53, 0.0  ;;  %v13318_v24 = vld [vmem:[%s18280_s4 + $0x1a8] sm:$0xff]   ;;  %v13322_v32 = vld [vmem:[%s18280_s4 + $0x1b0] sm:$0xff]   ;;  %v13325_v36 = vld [vmem:[%s18280_s4 + $0x1f8] sm:$0xff]   ;;  %v15496_v53 = vsub.s32 4, %v15123_v30 }
 0x1e2   : > { %4867 = vmatprep.mubr.bf16.mxu0 %v15296_v15  ;;  %v4221_v62 = vmax.f32 %v12587_v52, 0.0  ;;  %4964 = vmatprep.mubr.bf16.mxu1 %v15300_v19  ;;  %v4223_v14 = vmax.f32 %v12619_v55, 0.0  ;;  %v13324_v44 = vld [vmem:[%s18280_s4 + $0x138] sm:$0xff]   ;;  %v13327_v50 = vld [vmem:[%s18282_s6 + $0x40] sm:$0xff]   ;;  %v18291_v55 = vsub.s32 7, %v15123_v30 }
 0x1e3   : > { %v15433_v51 = vpack.c.bf16 %v4220_v58, %v4212_v57  ;;  %11925 = vmatpush3.bf16.msra.mxu0 %v13312_v45  ;;  %v15440_v22 = vpack.c.bf16 %v4222_v8, %v4214_v5  ;;  %11989 = vmatpush3.bf16.msra.mxu1 %v13314_v54  ;;  %v13326_v45 = vld [vmem:[%s18280_s4 + $0x1b8] sm:$0xff]   ;;  %v13329_v52 = vld [vmem:[%s18282_s6 + $0xc0] sm:$0xff]   ;;  %18352 = vst [vmem:[#allocation7_spill] sm:$0xff] %v15496_v53  ;;  %v18293_v54 = vsub.s32 6, %v15123_v30 }
 0x1e4   : > { %v15438_v18 = vpack.c.bf16 %v4221_v62, %v4213_v49  ;;  %11926 = vmatprep.subr.bf16.mxu0 %v13315_v46  ;;  %v15448_v27 = vpack.c.bf16 %v4223_v14, %v4215_v12  ;;  %11990 = vmatprep.subr.bf16.mxu1 %v13317_v48  ;;  %v18292_v46 = vsub.s32 5, %v15123_v30  ;;  %v15503_v57 = vrot.slane %v15148_v37, %v15496_v53 }
 0x1e5   : > { %v15508_v58 = vrot.slane %v15148_v37, %v18293_v54  ;;  %v15518_v49 = vrot.slane %v15148_v37, %v18291_v55 }
 0x1e6   : > { %v15513_v48 = vrot.slane %v15148_v37, %v18292_v46 }
 0x1e7   : > { %11927 = vmatpush3.bf16.msra.mxu0 %v13316_v17  ;;  %11991 = vmatpush3.bf16.msra.mxu1 %v13318_v24 }
 0x1e8   : > { %11928 = vmatprep.subr.bf16.mxu0 %v13319_v26  ;;  %11992 = vmatprep.subr.bf16.mxu1 %v13321_v28 }
 0x1e9   : > { %4868 = vmatmul.mubr.bf16.gmra.mrb[76].mxu0 %v15294_v13  ;;  %4965 = vmatmul.mubr.bf16.gmra.mrb[76].mxu1 %v15298_v16 }
 0x1ea   : > { %4875 = vmatprep.mubr.bf16.mxu0 %v15315_v63  ;;  %4972 = vmatprep.mubr.bf16.mxu1 %v15319_v7 }
 0x1eb   : > { %11929 = vmatpush3.bf16.msra.mxu0 %v13320_v31  ;;  %11993 = vmatpush3.bf16.msra.mxu1 %v13322_v32 }
 0x1ec   : > { %11930 = vmatprep.subr.bf16.mxu0 %v13323_v33  ;;  %11994 = vmatprep.subr.bf16.mxu1 %v13325_v36 }
 0x1ef   : > { %11931 = vmatpush3.bf16.msra.mxu0 %v13324_v44  ;;  %11995 = vmatpush3.bf16.msra.mxu1 %v13326_v45 }
 0x1f0   : > { %12044 = vmatprep.subr.bf16.mxu0 %v13327_v50  ;;  %12108 = vmatprep.subr.bf16.mxu1 %v13329_v52 }
 0x1f1   : > { %4876 = vmatmul.mubr.bf16.gmra.mrb[80].mxu0 %v15313_v61  ;;  %4973 = vmatmul.mubr.bf16.gmra.mrb[80].mxu1 %v15317_v1 }
 0x1f2   : > { %4883 = vmatprep.mubr.bf16.mxu0 %v15350_v59  ;;  %4980 = vmatprep.mubr.bf16.mxu1 %v15360_v9 }
 0x1f9   : > { %4884 = vmatmul.mubr.bf16.gmra.mrb[84].mxu0 %v15345_v56  ;;  %4981 = vmatmul.mubr.bf16.gmra.mrb[84].mxu1 %v15352_v60 }
 0x1fa   : > { %4891 = vmatprep.mubr.bf16.mxu0 %v15394_v10  ;;  %4988 = vmatprep.mubr.bf16.mxu1 %v15404_v20 }
 0x201   : > { %4892 = vmatmul.mubr.bf16.gmra.mrb[88].mxu0 %v15389_v4  ;;  %4989 = vmatmul.mubr.bf16.gmra.mrb[88].mxu1 %v15396_v11 }
 0x202   : > { %4899 = vmatprep.mubr.bf16.mxu0 %v15438_v18  ;;  %4996 = vmatprep.mubr.bf16.mxu1 %v15448_v27 }
 0x209   : > { %4900 = vmatmul.mubr.bf16.gmra.mrb[92].mxu0 %v15433_v51  ;;  %4997 = vmatmul.mubr.bf16.gmra.mrb[92].mxu1 %v15440_v22 }
 0x264   : > { %v3682_v62 = vpop.f32.mrb[32].mxu0  ;;  %v4021_v8 = vpop.f32.mrb[32].mxu1 }
 0x265   : > { %v12620_v5 = vadd.f32 %v3682_v62, %v15503_v57  ;;  %v3684_v12 = vpop.f32.mrb[33].mxu0  ;;  %v12652_v14 = vadd.f32 %v4021_v8, %v15508_v58  ;;  %v4023_v24 = vpop.f32.mrb[33].mxu1 }
 0x266   : > { %v12621_v17 = vadd.f32 %v3684_v12, %v15513_v48  ;;  %v3686_v26 = vpop.f32.mrb[34].mxu0  ;;  %v12653_v28 = vadd.f32 %v4023_v24, %v15518_v49  ;;  %v4025_v32 = vpop.f32.mrb[34].mxu1 }
 0x267   : > { %v12622_v31 = vadd.f32 %v3686_v26, %v15503_v57  ;;  %v3688_v33 = vpop.f32.mrb[35].mxu0  ;;  %v12654_v37 = vadd.f32 %v4025_v32, %v15508_v58  ;;  %v4027_v44 = vpop.f32.mrb[35].mxu1  ;;  %v4104_v45 = vmax.f32 %v12620_v5, 0.0  ;;  %v4106_v62 = vmax.f32 %v12652_v14, 0.0  ;;  %v13328_v5 = vld [vmem:[%s18282_s6] sm:$0xff]  }
 0x268   : > { %v12623_v36 = vadd.f32 %v3688_v33, %v15513_v48  ;;  %v12655_v52 = vadd.f32 %v4027_v44, %v15518_v49  ;;  %v4105_v8 = vmax.f32 %v12621_v17, 0.0  ;;  %v4107_v46 = vmax.f32 %v12653_v28, 0.0  ;;  %v13330_v28 = vld [vmem:[%s18282_s6 + $0x80] sm:$0xff]   ;;  %v13331_v33 = vld [vmem:[%s18282_s6 + $0x48] sm:$0xff]  }
 0x269   : > { %v4112_v50 = vmax.f32 %v12622_v31, 0.0  ;;  %v4114_v12 = vmax.f32 %v12654_v37, 0.0 }
 0x26a   : > { %v4113_v55 = vmax.f32 %v12623_v36, 0.0  ;;  %v4115_v24 = vmax.f32 %v12655_v52, 0.0 }
 0x26b   : > { %v15528_v54 = vpack.c.bf16 %v4112_v50, %v4104_v45  ;;  %v15530_v26 = vpack.c.bf16 %v4114_v12, %v4106_v62 }
 0x26c   : > { %v3692_v38 = vpop.f32.mrb[36].mxu0  ;;  %v15532_v30 = vpack.c.bf16 %v4113_v55, %v4105_v8  ;;  %v4031_v32 = vpop.f32.mrb[36].mxu1  ;;  %v15538_v17 = vpack.c.bf16 %v4115_v24, %v4107_v46  ;;  %v13332_v24 = vld [vmem:[%s18282_s6 + $0x8] sm:$0xff]  }
 0x26d   : > { %v12624_v31 = vadd.f32 %v3692_v38, %v15503_v57  ;;  %v3694_v14 = vpop.f32.mrb[37].mxu0  ;;  %v12656_v55 = vadd.f32 %v4031_v32, %v15508_v58  ;;  %v4033_v36 = vpop.f32.mrb[37].mxu1  ;;  %v13333_v38 = vld [vmem:[%s18282_s6 + $0xc8] sm:$0xff]  }
 0x26e   : > { %v12625_v37 = vadd.f32 %v3694_v14, %v15513_v48  ;;  %v3696_v44 = vpop.f32.mrb[38].mxu0  ;;  %5037 = vmatprep.mubr.bf16.mxu0 %v15532_v30  ;;  %v12657_v46 = vadd.f32 %v4033_v36, %v15518_v49  ;;  %v4035_v50 = vpop.f32.mrb[38].mxu1  ;;  %5134 = vmatprep.mubr.bf16.mxu1 %v15538_v17 }
 0x26f   : > { %v12626_v45 = vadd.f32 %v3696_v44, %v15503_v57  ;;  %v3698_v52 = vpop.f32.mrb[39].mxu0  ;;  %5038 = vmatmul.mubr.bf16.vlgmr.msra.gmra.mrb[96].mxu0 %v15528_v54  ;;  %v12658_v62 = vadd.f32 %v4035_v50, %v15508_v58  ;;  %v4037_v12 = vpop.f32.mrb[39].mxu1  ;;  %5135 = vmatmul.mubr.bf16.vlgmr.msra.gmra.mrb[96].mxu1 %v15530_v26  ;;  %v4120_v32 = vmax.f32 %v12624_v31, 0.0  ;;  %v13334_v44 = vld [vmem:[%s18282_s6 + $0x88] sm:$0xff]   ;;  %v13335_v50 = vld [vmem:[%s18282_s6 + $0x50] sm:$0xff]  }
 0x270   : > { %v12627_v8 = vadd.f32 %v3698_v52, %v15513_v48  ;;  %12045 = vmatpush3.bf16.msra.mxu0 %v13328_v5  ;;  %v12659_v36 = vadd.f32 %v4037_v12, %v15518_v49  ;;  %12109 = vmatpush3.bf16.msra.mxu1 %v13330_v28  ;;  %v4122_v52 = vmax.f32 %v12656_v55, 0.0  ;;  %v4121_v5 = vmax.f32 %v12625_v37, 0.0  ;;  %v13337_v31 = vld [vmem:[%s18282_s6 + $0xd0] sm:$0xff]  }
 0x271   : > { %v4128_v14 = vmax.f32 %v12626_v45, 0.0  ;;  %12046 = vmatprep.subr.bf16.mxu0 %v13331_v33  ;;  %v4130_v53 = vmax.f32 %v12658_v62, 0.0  ;;  %12110 = vmatprep.subr.bf16.mxu1 %v13333_v38  ;;  %v4123_v45 = vmax.f32 %v12657_v46, 0.0  ;;  %v13336_v55 = vld [vmem:[%s18282_s6 + $0x10] sm:$0xff]  }
 0x272   : > { %v4129_v42 = vmax.f32 %v12627_v8, 0.0  ;;  %v4131_v28 = vmax.f32 %v12659_v36, 0.0  ;;  %v13341_v36 = vld [vmem:[%s18282_s6 + $0xd8] sm:$0xff]  }
 0x273   : > { %v15572_v33 = vpack.c.bf16 %v4128_v14, %v4120_v32  ;;  %v15576_v39 = vpack.c.bf16 %v4130_v53, %v4122_v52  ;;  %v13339_v53 = vld [vmem:[%s18282_s6 + $0x58] sm:$0xff]  }
 0x274   : > { %v3702_v12 = vpop.f32.mrb[40].mxu0  ;;  %v15574_v40 = vpack.c.bf16 %v4129_v42, %v4121_v5  ;;  %12047 = vmatpush3.bf16.msra.mxu0 %v13332_v24  ;;  %v4041_v38 = vpop.f32.mrb[40].mxu1  ;;  %v15582_v8 = vpack.c.bf16 %v4131_v28, %v4123_v45  ;;  %12111 = vmatpush3.bf16.msra.mxu1 %v13334_v44  ;;  %v13338_v42 = vld [vmem:[%s18282_s6 + $0x90] sm:$0xff]  }
 0x275   : > { %18353 = vst [vmem:[#allocation8_spill] sm:$0xff] %v15572_v33  ;;  %18354 = vst [vmem:[#allocation9_spill] sm:$0xff] %v15576_v39  ;;  %v12628_v37 = vadd.f32 %v3702_v12, %v15503_v57  ;;  %v3704_v62 = vpop.f32.mrb[41].mxu0  ;;  %12048 = vmatprep.subr.bf16.mxu0 %v13335_v50  ;;  %v12660_v46 = vadd.f32 %v4041_v38, %v15508_v58  ;;  %v4043_v32 = vpop.f32.mrb[41].mxu1  ;;  %12112 = vmatprep.subr.bf16.mxu1 %v13337_v31  ;;  %v13340_v31 = vld [vmem:[%s18282_s6 + $0x18] sm:$0xff]  }
 0x276   : > { %18355 = vst [vmem:[#allocation10_spill] sm:$0xff] %v15582_v8  ;;  %v12629_v24 = vadd.f32 %v3704_v62, %v15513_v48  ;;  %v3706_v14 = vpop.f32.mrb[42].mxu0  ;;  %5045 = vmatprep.mubr.bf16.mxu0 %v15574_v40  ;;  %v12661_v44 = vadd.f32 %v4043_v32, %v15518_v49  ;;  %v4045_v52 = vpop.f32.mrb[42].mxu1  ;;  %5142 = vmatprep.mubr.bf16.mxu1 %v15582_v8 }
 0x277   : > { %v12630_v50 = vadd.f32 %v3706_v14, %v15503_v57  ;;  %v3708_v5 = vpop.f32.mrb[43].mxu0  ;;  %5046 = vmatmul.mubr.bf16.gmra.mrb[100].mxu0 %v15572_v33  ;;  %v12662_v45 = vadd.f32 %v4045_v52, %v15508_v58  ;;  %v4047_v12 = vpop.f32.mrb[43].mxu1  ;;  %5143 = vmatmul.mubr.bf16.gmra.mrb[100].mxu1 %v15576_v39  ;;  %v4136_v38 = vmax.f32 %v12628_v37, 0.0  ;;  %v13342_v14 = vld [vmem:[%s18282_s6 + $0x98] sm:$0xff]   ;;  %v13343_v52 = vld [vmem:[%s18282_s6 + $0x60] sm:$0xff]  }
 0x278   : > { %v12631_v28 = vadd.f32 %v3708_v5, %v15513_v48  ;;  %12049 = vmatpush3.bf16.msra.mxu0 %v13336_v55  ;;  %v12663_v32 = vadd.f32 %v4047_v12, %v15518_v49  ;;  %12113 = vmatpush3.bf16.msra.mxu1 %v13338_v42  ;;  %v4138_v5 = vmax.f32 %v12660_v46, 0.0  ;;  %v4137_v55 = vmax.f32 %v12629_v24, 0.0  ;;  %v13345_v37 = vld [vmem:[%s18282_s6 + $0xe0] sm:$0xff]  }
 0x279   : > { %v4144_v62 = vmax.f32 %v12630_v50, 0.0  ;;  %12050 = vmatprep.subr.bf16.mxu0 %v13339_v53  ;;  %v4146_v35 = vmax.f32 %v12662_v45, 0.0  ;;  %12114 = vmatprep.subr.bf16.mxu1 %v13341_v36  ;;  %v4139_v50 = vmax.f32 %v12661_v44, 0.0  ;;  %v13344_v46 = vld [vmem:[%s18282_s6 + $0x20] sm:$0xff]  }
 0x27a   : > { %v4145_v39 = vmax.f32 %v12631_v28, 0.0  ;;  %v4147_v42 = vmax.f32 %v12663_v32, 0.0  ;;  %v13349_v32 = vld [vmem:[%s18282_s6 + $0xe8] sm:$0xff]  }
 0x27b   : > { %v15616_v53 = vpack.c.bf16 %v4144_v62, %v4136_v38  ;;  %v15620_v8 = vpack.c.bf16 %v4146_v35, %v4138_v5  ;;  %v13347_v35 = vld [vmem:[%s18282_s6 + $0x68] sm:$0xff]  }
 0x27c   : > { %v3712_v12 = vpop.f32.mrb[44].mxu0  ;;  %v15618_v33 = vpack.c.bf16 %v4145_v39, %v4137_v55  ;;  %12051 = vmatpush3.bf16.msra.mxu0 %v13340_v31  ;;  %v4051_v36 = vpop.f32.mrb[44].mxu1  ;;  %v15626_v28 = vpack.c.bf16 %v4147_v42, %v4139_v50  ;;  %12115 = vmatpush3.bf16.msra.mxu1 %v13342_v14  ;;  %v13346_v39 = vld [vmem:[%s18282_s6 + $0xa0] sm:$0xff]  }
 0x27d   : > { %18356 = vst [vmem:[#allocation11_spill] sm:$0xff] %v15616_v53  ;;  %18358 = vst [vmem:[#allocation13_spill] sm:$0xff] %v15620_v8  ;;  %v12632_v24 = vadd.f32 %v3712_v12, %v15503_v57  ;;  %v3714_v45 = vpop.f32.mrb[45].mxu0  ;;  %12052 = vmatprep.subr.bf16.mxu0 %v13343_v52  ;;  %v12664_v44 = vadd.f32 %v4051_v36, %v15508_v58  ;;  %v4053_v38 = vpop.f32.mrb[45].mxu1  ;;  %12116 = vmatprep.subr.bf16.mxu1 %v13345_v37  ;;  %v13348_v37 = vld [vmem:[%s18282_s6 + $0x28] sm:$0xff]  }
 0x27e   : > { %18357 = vst [vmem:[#allocation12_spill] sm:$0xff] %v15618_v33  ;;  %18359 = vst [vmem:[#allocation14_spill] sm:$0xff] %v15626_v28  ;;  %v12633_v31 = vadd.f32 %v3714_v45, %v15513_v48  ;;  %v3716_v62 = vpop.f32.mrb[46].mxu0  ;;  %5053 = vmatprep.mubr.bf16.mxu0 %v15618_v33  ;;  %v12665_v14 = vadd.f32 %v4053_v38, %v15518_v49  ;;  %v4055_v5 = vpop.f32.mrb[46].mxu1  ;;  %5150 = vmatprep.mubr.bf16.mxu1 %v15626_v28 }
 0x27f   : > { %v12634_v52 = vadd.f32 %v3716_v62, %v15503_v57  ;;  %v3718_v55 = vpop.f32.mrb[47].mxu0  ;;  %5054 = vmatmul.mubr.bf16.gmra.mrb[104].mxu0 %v15616_v53  ;;  %v12666_v50 = vadd.f32 %v4055_v5, %v15508_v58  ;;  %v4057_v12 = vpop.f32.mrb[47].mxu1  ;;  %5151 = vmatmul.mubr.bf16.gmra.mrb[104].mxu1 %v15620_v8  ;;  %v4152_v36 = vmax.f32 %v12632_v24, 0.0  ;;  %v13350_v62 = vld [vmem:[%s18282_s6 + $0xa8] sm:$0xff]   ;;  %v13351_v5 = vld [vmem:[%s18282_s6 + $0x70] sm:$0xff]  }
 0x280   : > { %v12635_v42 = vadd.f32 %v3718_v55, %v15513_v48  ;;  %12053 = vmatpush3.bf16.msra.mxu0 %v13344_v46  ;;  %v12667_v38 = vadd.f32 %v4057_v12, %v15518_v49  ;;  %12117 = vmatpush3.bf16.msra.mxu1 %v13346_v39  ;;  %v4154_v55 = vmax.f32 %v12664_v44, 0.0  ;;  %v4153_v46 = vmax.f32 %v12633_v31, 0.0  ;;  %v13353_v24 = vld [vmem:[%s18282_s6 + $0xf0] sm:$0xff]  }
 0x281   : > { %v4160_v45 = vmax.f32 %v12634_v52, 0.0  ;;  %12054 = vmatprep.subr.bf16.mxu0 %v13347_v35  ;;  %v4162_v8 = vmax.f32 %v12666_v50, 0.0  ;;  %12118 = vmatprep.subr.bf16.mxu1 %v13349_v32  ;;  %v4155_v52 = vmax.f32 %v12665_v14, 0.0  ;;  %v13352_v44 = vld [vmem:[%s18282_s6 + $0x30] sm:$0xff]  }
 0x282   : > { %v4161_v53 = vmax.f32 %v12635_v42, 0.0  ;;  %v4163_v39 = vmax.f32 %v12667_v38, 0.0  ;;  %v13357_v38 = vld [vmem:[%s18282_s6 + $0xf8] sm:$0xff]  }
 0x283   : > { %v15660_v35 = vpack.c.bf16 %v4160_v45, %v4152_v36  ;;  %v15664_v33 = vpack.c.bf16 %v4162_v8, %v4154_v55  ;;  %v13355_v8 = vld [vmem:[%s18282_s6 + $0x78] sm:$0xff]  }
 0x284   : > { %v3722_v12 = vpop.f32.mrb[48].mxu0  ;;  %v15662_v28 = vpack.c.bf16 %v4161_v53, %v4153_v46  ;;  %12055 = vmatpush3.bf16.msra.mxu0 %v13348_v37  ;;  %v4061_v32 = vpop.f32.mrb[48].mxu1  ;;  %v15670_v42 = vpack.c.bf16 %v4163_v39, %v4155_v52  ;;  %12119 = vmatpush3.bf16.msra.mxu1 %v13350_v62  ;;  %v13354_v53 = vld [vmem:[%s18282_s6 + $0xb0] sm:$0xff]  }
 0x285   : > { %18360 = vst [vmem:[#allocation15_spill] sm:$0xff] %v15660_v35  ;;  %18362 = vst [vmem:[#allocation17_spill] sm:$0xff] %v15664_v33  ;;  %v12636_v31 = vadd.f32 %v3722_v12, %v15503_v57  ;;  %v3724_v50 = vpop.f32.mrb[49].mxu0  ;;  %12056 = vmatprep.subr.bf16.mxu0 %v13351_v5  ;;  %v12668_v14 = vadd.f32 %v4061_v32, %v15508_v58  ;;  %v4063_v36 = vpop.f32.mrb[49].mxu1  ;;  %12120 = vmatprep.subr.bf16.mxu1 %v13353_v24  ;;  %v13356_v24 = vld [vmem:[%s18282_s6 + $0x38] sm:$0xff]  }
 0x286   : > { %18361 = vst [vmem:[#allocation16_spill] sm:$0xff] %v15662_v28  ;;  %18363 = vst [vmem:[#allocation18_spill] sm:$0xff] %v15670_v42  ;;  %v12637_v37 = vadd.f32 %v3724_v50, %v15513_v48  ;;  %v3726_v45 = vpop.f32.mrb[50].mxu0  ;;  %5061 = vmatprep.mubr.bf16.mxu0 %v15662_v28  ;;  %v12669_v62 = vadd.f32 %v4063_v36, %v15518_v49  ;;  %v4065_v55 = vpop.f32.mrb[50].mxu1  ;;  %5158 = vmatprep.mubr.bf16.mxu1 %v15670_v42 }
 0x287   : > { %v12638_v5 = vadd.f32 %v3726_v45, %v15503_v57  ;;  %v3728_v46 = vpop.f32.mrb[51].mxu0  ;;  %5062 = vmatmul.mubr.bf16.gmra.mrb[108].mxu0 %v15660_v35  ;;  %v12670_v52 = vadd.f32 %v4065_v55, %v15508_v58  ;;  %v4067_v12 = vpop.f32.mrb[51].mxu1  ;;  %5159 = vmatmul.mubr.bf16.gmra.mrb[108].mxu1 %v15664_v33  ;;  %v4168_v32 = vmax.f32 %v12636_v31, 0.0  ;;  %v13358_v45 = vld [vmem:[%s18282_s6 + $0xb8] sm:$0xff]   ;;  %v13359_v55 = vld [vmem:[%s18282_s6 + $0x140] sm:$0xff]  }
 0x288   : > { %v12639_v39 = vadd.f32 %v3728_v46, %v15513_v48  ;;  %12057 = vmatpush3.bf16.msra.mxu0 %v13352_v44  ;;  %v12671_v36 = vadd.f32 %v4067_v12, %v15518_v49  ;;  %12121 = vmatpush3.bf16.msra.mxu1 %v13354_v53  ;;  %v4170_v46 = vmax.f32 %v12668_v14, 0.0  ;;  %v4169_v44 = vmax.f32 %v12637_v37, 0.0  ;;  %v13361_v31 = vld [vmem:[%s18282_s6 + $0x1c0] sm:$0xff]  }
 0x289   : > { %v4176_v50 = vmax.f32 %v12638_v5, 0.0  ;;  %12058 = vmatprep.subr.bf16.mxu0 %v13355_v8  ;;  %v4178_v33 = vmax.f32 %v12670_v52, 0.0  ;;  %12122 = vmatprep.subr.bf16.mxu1 %v13357_v38  ;;  %v4171_v5 = vmax.f32 %v12669_v62, 0.0 }
 0x28a   : > { %v4177_v35 = vmax.f32 %v12639_v39, 0.0  ;;  %v4179_v53 = vmax.f32 %v12671_v36, 0.0 }
 0x28b   : > { %v15704_v8 = vpack.c.bf16 %v4176_v50, %v4168_v32  ;;  %v15708_v28 = vpack.c.bf16 %v4178_v33, %v4170_v46 }
 0x28c   : > { %v3732_v12 = vpop.f32.mrb[52].mxu0  ;;  %v15706_v42 = vpack.c.bf16 %v4177_v35, %v4169_v44  ;;  %12059 = vmatpush3.bf16.msra.mxu0 %v13356_v24  ;;  %v4071_v37 = vpop.f32.mrb[52].mxu1  ;;  %v15711_v39 = vpack.c.bf16 %v4179_v53, %v4171_v5  ;;  %12123 = vmatpush3.bf16.msra.mxu1 %v13358_v45 }
 0x28d   : > { %18364 = vst [vmem:[#allocation19_spill] sm:$0xff] %v15704_v8  ;;  %18366 = vst [vmem:[#allocation21_spill] sm:$0xff] %v15708_v28  ;;  %v12640_v14 = vadd.f32 %v3732_v12, %v15503_v57  ;;  %v3734_v52 = vpop.f32.mrb[53].mxu0  ;;  %12172 = vmatprep.subr.bf16.mxu0 %v13359_v55  ;;  %v12672_v38 = vadd.f32 %v4071_v37, %v15508_v58  ;;  %v4073_v32 = vpop.f32.mrb[53].mxu1  ;;  %12236 = vmatprep.subr.bf16.mxu1 %v13361_v31 }
 0x28e   : > { %18365 = vst [vmem:[#allocation20_spill] sm:$0xff] %v15706_v42  ;;  %18367 = vst [vmem:[#allocation22_spill] sm:$0xff] %v15711_v39  ;;  %v12641_v62 = vadd.f32 %v3734_v52, %v15513_v48  ;;  %v3736_v50 = vpop.f32.mrb[54].mxu0  ;;  %5069 = vmatprep.mubr.bf16.mxu0 %v15706_v42  ;;  %v12673_v33 = vadd.f32 %v4073_v32, %v15518_v49  ;;  %v4075_v24 = vpop.f32.mrb[54].mxu1  ;;  %5166 = vmatprep.mubr.bf16.mxu1 %v15711_v39 }
 0x28f   : > { %v12642_v35 = vadd.f32 %v3736_v50, %v15503_v57  ;;  %v3738_v36 = vpop.f32.mrb[55].mxu0  ;;  %5070 = vmatmul.mubr.bf16.gmra.mrb[112].mxu0 %v15704_v8  ;;  %v12674_v45 = vadd.f32 %v4075_v24, %v15508_v58  ;;  %v4077_v46 = vpop.f32.mrb[55].mxu1  ;;  %5167 = vmatmul.mubr.bf16.gmra.mrb[112].mxu1 %v15708_v28  ;;  %v4184_v44 = vmax.f32 %v12640_v14, 0.0  ;;  %v4186_v53 = vmax.f32 %v12672_v38, 0.0 }
 0x290   : > { %v12643_v55 = vadd.f32 %v3738_v36, %v15513_v48  ;;  %v12675_v31 = vadd.f32 %v4077_v46, %v15518_v49  ;;  %v4185_v12 = vmax.f32 %v12641_v62, 0.0  ;;  %v4187_v32 = vmax.f32 %v12673_v33, 0.0 }
 0x291   : > { %v4192_v5 = vmax.f32 %v12642_v35, 0.0  ;;  %v4194_v37 = vmax.f32 %v12674_v45, 0.0 }
 0x292   : > { %v4193_v52 = vmax.f32 %v12643_v55, 0.0  ;;  %v4195_v50 = vmax.f32 %v12675_v31, 0.0 }
 0x293   : > { %v15724_v39 = vpack.c.bf16 %v4192_v5, %v4184_v44  ;;  %v15728_v24 = vpack.c.bf16 %v4194_v37, %v4186_v53 }
 0x294   : > { %v3742_v8 = vpop.f32.mrb[56].mxu0  ;;  %v15726_v42 = vpack.c.bf16 %v4193_v52, %v4185_v12  ;;  %v4081_v28 = vpop.f32.mrb[56].mxu1  ;;  %v15731_v35 = vpack.c.bf16 %v4195_v50, %v4187_v32 }
 0x295   : > { %18368 = vst [vmem:[#allocation23_spill] sm:$0xff] %v15724_v39  ;;  %18370 = vst [vmem:[#allocation25_spill] sm:$0xff] %v15728_v24  ;;  %v12644_v36 = vadd.f32 %v3742_v8, %v15503_v57  ;;  %v3744_v14 = vpop.f32.mrb[57].mxu0  ;;  %v12676_v38 = vadd.f32 %v4081_v28, %v15508_v58  ;;  %v4083_v45 = vpop.f32.mrb[57].mxu1 }
 0x296   : > { %18369 = vst [vmem:[#allocation24_spill] sm:$0xff] %v15726_v42  ;;  %18371 = vst [vmem:[#allocation26_spill] sm:$0xff] %v15731_v35  ;;  %v12645_v62 = vadd.f32 %v3744_v14, %v15513_v48  ;;  %v3746_v33 = vpop.f32.mrb[58].mxu0  ;;  %5077 = vmatprep.mubr.bf16.mxu0 %v15726_v42  ;;  %v12677_v55 = vadd.f32 %v4083_v45, %v15518_v49  ;;  %v4085_v44 = vpop.f32.mrb[58].mxu1  ;;  %5174 = vmatprep.mubr.bf16.mxu1 %v15731_v35 }
 0x297   : > { %v12646_v46 = vadd.f32 %v3746_v33, %v15503_v57  ;;  %v3748_v8 = vpop.f32.mrb[59].mxu0  ;;  %5078 = vmatmul.mubr.bf16.gmra.mrb[116].mxu0 %v15724_v39  ;;  %v12678_v5 = vadd.f32 %v4085_v44, %v15508_v58  ;;  %v4087_v31 = vpop.f32.mrb[59].mxu1  ;;  %5175 = vmatmul.mubr.bf16.gmra.mrb[116].mxu1 %v15728_v24  ;;  %v4200_v53 = vmax.f32 %v12644_v36, 0.0  ;;  %v4202_v52 = vmax.f32 %v12676_v38, 0.0 }
 0x298   : > { %v12647_v28 = vadd.f32 %v3748_v8, %v15513_v48  ;;  %v12679_v37 = vadd.f32 %v4087_v31, %v15518_v49  ;;  %v4201_v32 = vmax.f32 %v12645_v62, 0.0  ;;  %v4203_v45 = vmax.f32 %v12677_v55, 0.0 }
 0x299   : > { %v4208_v12 = vmax.f32 %v12646_v46, 0.0  ;;  %v4210_v50 = vmax.f32 %v12678_v5, 0.0 }
 0x29a   : > { %v4209_v14 = vmax.f32 %v12647_v28, 0.0  ;;  %v4211_v33 = vmax.f32 %v12679_v37, 0.0 }
 0x29b   : > { %v15744_v35 = vpack.c.bf16 %v4208_v12, %v4200_v53  ;;  %v15748_v44 = vpack.c.bf16 %v4210_v50, %v4202_v52 }
 0x29c   : > { %v3752_v39 = vpop.f32.mrb[60].mxu0  ;;  %v15746_v42 = vpack.c.bf16 %v4209_v14, %v4201_v32  ;;  %v4091_v24 = vpop.f32.mrb[60].mxu1  ;;  %v15751_v46 = vpack.c.bf16 %v4211_v33, %v4203_v45 }
 0x29d   : > { %18372 = vst [vmem:[#allocation27_spill] sm:$0xff] %v15744_v35  ;;  %v12648_v8 = vadd.f32 %v3752_v39, %v15503_v57  ;;  %v3754_v36 = vpop.f32.mrb[61].mxu0  ;;  %v12680_v38 = vadd.f32 %v4091_v24, %v15508_v58  ;;  %v4093_v5 = vpop.f32.mrb[61].mxu1 }
 0x29e   : > { %18373 = vst [vmem:[#allocation28_spill] sm:$0xff] %v15751_v46  ;;  %v12649_v62 = vadd.f32 %v3754_v36, %v15513_v48  ;;  %v3756_v55 = vpop.f32.mrb[62].mxu0  ;;  %5085 = vmatprep.mubr.bf16.mxu0 %v15746_v42  ;;  %v12681_v28 = vadd.f32 %v4093_v5, %v15518_v49  ;;  %v4095_v53 = vpop.f32.mrb[62].mxu1  ;;  %5182 = vmatprep.mubr.bf16.mxu1 %v15751_v46 }
 0x29f   : > { %v12650_v31 = vadd.f32 %v3756_v55, %v15503_v57  ;;  %v3758_v39 = vpop.f32.mrb[63].mxu0  ;;  %5086 = vmatmul.mubr.bf16.gmra.mrb[120].mxu0 %v15744_v35  ;;  %v12682_v12 = vadd.f32 %v4095_v53, %v15508_v58  ;;  %v4097_v37 = vpop.f32.mrb[63].mxu1  ;;  %5183 = vmatmul.mubr.bf16.gmra.mrb[120].mxu1 %v15748_v44  ;;  %v4216_v52 = vmax.f32 %v12648_v8, 0.0  ;;  %v4218_v14 = vmax.f32 %v12680_v38, 0.0  ;;  %v15773_v8 = vld [vmem:[%s18281_s5] ss:$0 sm:$0xff] }
 0x2a0   : > { %v12651_v24 = vadd.f32 %v3758_v39, %v15513_v48  ;;  %v12683_v50 = vadd.f32 %v4097_v37, %v15518_v49  ;;  %v4217_v45 = vmax.f32 %v12649_v62, 0.0  ;;  %v4219_v36 = vmax.f32 %v12681_v28, 0.0 }
 0x2a1   : > { %v4224_v32 = vmax.f32 %v12650_v31, 0.0  ;;  %v4226_v57 = vmax.f32 %v12682_v12, 0.0 }
 0x2a2   : > { %v4225_v33 = vmax.f32 %v12651_v24, 0.0  ;;  %v4227_v5 = vmax.f32 %v12683_v50, 0.0 }
 0x2a3   : > { %v15764_v55 = vpack.c.bf16 %v4224_v32, %v4216_v52  ;;  %v15768_v58 = vpack.c.bf16 %v4226_v57, %v4218_v14 }
 0x2a4   : > { %v11804_v35 = vpop.f32.mrb[64].mxu0  ;;  %v15766_v46 = vpack.c.bf16 %v4225_v33, %v4217_v45  ;;  %v11868_v48 = vpop.f32.mrb[64].mxu1  ;;  %v15775_v38 = vpack.c.bf16 %v4227_v5, %v4219_v36  ;;  %v13360_v36 = vld [vmem:[%s18282_s6 + $0x100] sm:$0xff]  }
 0x2a5   : > { %v11805_v49 = vpop.f32.mrb[65].mxu0  ;;  %v11869_v31 = vpop.f32.mrb[65].mxu1 }
 0x2a6   : > { %v11806_v62 = vadd.f32 %v11805_v49, %v11804_v35  ;;  %v11807_v28 = vpop.f32.mrb[66].mxu0  ;;  %5093 = vmatprep.mubr.bf16.mxu0 %v15766_v46  ;;  %v11870_v53 = vadd.f32 %v11869_v31, %v11868_v48  ;;  %v11871_v39 = vpop.f32.mrb[66].mxu1  ;;  %5190 = vmatprep.mubr.bf16.mxu1 %v15775_v38 }
 0x2a7   : > { %v11808_v12 = vpop.f32.mrb[67].mxu0  ;;  %5094 = vmatmul.mubr.bf16.gmra.mrb[124].mxu0 %v15764_v55  ;;  %v11872_v52 = vpop.f32.mrb[67].mxu1  ;;  %5191 = vmatmul.mubr.bf16.gmra.mrb[124].mxu1 %v15768_v58 }
 0x2a8   : > { %v4846_v24 = vadd.f32 %v11806_v62, %v15773_v8  ;;  %v11809_v37 = vadd.f32 %v11808_v12, %v11807_v28  ;;  %5750 = vmatprep.mubr.bf16.mxu0 %v15230_v23  ;;  %v11873_v35 = vadd.f32 %v11872_v52, %v11871_v39  ;;  %5847 = vmatprep.mubr.bf16.mxu1 %v15240_v29  ;;  %v13362_v23 = vld [vmem:[%s18282_s6 + $0x180] sm:$0xff]   ;;  %v13363_v29 = vld [vmem:[%s18282_s6 + $0x148] sm:$0xff]  }
 0x2aa   : > { %v4849_v32 = vadd.f32 %v11809_v37, %v15773_v8  ;;  %v15785_v50 = vadd.f32 %v11870_v53, %v4846_v24  ;;  %v13365_v53 = vld [vmem:[%s18282_s6 + $0x1c8] sm:$0xff]  }
 0x2ac   : > { %v11810_v14 = vpop.f32.mrb[68].mxu0  ;;  %v15787_v45 = vadd.f32 %v11873_v35, %v4849_v32  ;;  %v11874_v57 = vpop.f32.mrb[68].mxu1  ;;  %v13366_v35 = vld [vmem:[%s18282_s6 + $0x188] sm:$0xff]  }
 0x2ad   : > { %v11811_v33 = vpop.f32.mrb[69].mxu0  ;;  %v11875_v48 = vpop.f32.mrb[69].mxu1 }
 0x2ae   : > { %v11812_v5 = vadd.f32 %v11811_v33, %v11810_v14  ;;  %v11813_v49 = vpop.f32.mrb[70].mxu0  ;;  %v11876_v62 = vadd.f32 %v11875_v48, %v11874_v57  ;;  %v11877_v31 = vpop.f32.mrb[70].mxu1 }
 0x2af   : > { %v11814_v28 = vpop.f32.mrb[71].mxu0  ;;  %5751 = vmatmul.mubr.bf16.vlgmr.msra.gmra.mrb[128].mxu0 %v15228_v21  ;;  %v11878_v24 = vpop.f32.mrb[71].mxu1  ;;  %5848 = vmatmul.mubr.bf16.vlgmr.msra.gmra.mrb[128].mxu1 %v15235_v25  ;;  %v13364_v21 = vld [vmem:[%s18282_s6 + $0x108] sm:$0xff]   ;;  %v13367_v25 = vld [vmem:[%s18282_s6 + $0x150] sm:$0xff]  }
 0x2b0   : > { %v4854_v39 = vadd.f32 %v11812_v5, %v15773_v8  ;;  %v11815_v12 = vadd.f32 %v11814_v28, %v11813_v49  ;;  %5758 = vmatprep.mubr.bf16.mxu0 %v15258_v2  ;;  %v11879_v37 = vadd.f32 %v11878_v24, %v11877_v31  ;;  %5855 = vmatprep.mubr.bf16.mxu1 %v15262_v6  ;;  %v13369_v6 = vld [vmem:[%s18282_s6 + $0x1d0] sm:$0xff]  }
 0x2b1   : > { %12173 = vmatpush3.bf16.msra.mxu0 %v13360_v36  ;;  %12237 = vmatpush3.bf16.msra.mxu1 %v13362_v23  ;;  %v13368_v36 = vld [vmem:[%s18282_s6 + $0x110] sm:$0xff]  }
 0x2b2   : > { %v4857_v52 = vadd.f32 %v11815_v12, %v15773_v8  ;;  %12174 = vmatprep.subr.bf16.mxu0 %v13363_v29  ;;  %v15816_v2 = vadd.f32 %v11876_v62, %v4854_v39  ;;  %12238 = vmatprep.subr.bf16.mxu1 %v13365_v53  ;;  %v13370_v23 = vld [vmem:[%s18282_s6 + $0x190] sm:$0xff]   ;;  %v13371_v29 = vld [vmem:[%s18282_s6 + $0x158] sm:$0xff]  }
 0x2b3   : > { %v13373_v53 = vld [vmem:[%s18282_s6 + $0x1d8] sm:$0xff]  }
 0x2b4   : > { %v11816_v32 = vpop.f32.mrb[72].mxu0  ;;  %v15821_v14 = vadd.f32 %v11879_v37, %v4857_v52  ;;  %v11880_v57 = vpop.f32.mrb[72].mxu1  ;;  %v13374_v52 = vld [vmem:[%s18282_s6 + $0x198] sm:$0xff]  }
 0x2b5   : > { %v11817_v33 = vpop.f32.mrb[73].mxu0  ;;  %12175 = vmatpush3.bf16.msra.mxu0 %v13364_v21  ;;  %v11881_v48 = vpop.f32.mrb[73].mxu1  ;;  %12239 = vmatpush3.bf16.msra.mxu1 %v13366_v35 }
 0x2b6   : > { %v11818_v5 = vadd.f32 %v11817_v33, %v11816_v32  ;;  %v11819_v49 = vpop.f32.mrb[74].mxu0  ;;  %12176 = vmatprep.subr.bf16.mxu0 %v13367_v25  ;;  %v11882_v62 = vadd.f32 %v11881_v48, %v11880_v57  ;;  %v11883_v31 = vpop.f32.mrb[74].mxu1  ;;  %12240 = vmatprep.subr.bf16.mxu1 %v13369_v6  ;;  %v13376_v57 = vld [vmem:[%s18282_s6 + $0x120] sm:$0xff]  }
 0x2b7   : > { %v11820_v28 = vpop.f32.mrb[75].mxu0  ;;  %5759 = vmatmul.mubr.bf16.gmra.mrb[132].mxu0 %v15256_v0  ;;  %v11884_v24 = vpop.f32.mrb[75].mxu1  ;;  %5856 = vmatmul.mubr.bf16.gmra.mrb[132].mxu1 %v15260_v3  ;;  %v13372_v0 = vld [vmem:[%s18282_s6 + $0x118] sm:$0xff]   ;;  %v13375_v3 = vld [vmem:[%s18282_s6 + $0x160] sm:$0xff]  }
 0x2b8   : > { %v4862_v39 = vadd.f32 %v11818_v5, %v15773_v8  ;;  %v11821_v12 = vadd.f32 %v11820_v28, %v11819_v49  ;;  %5766 = vmatprep.mubr.bf16.mxu0 %v15277_v41  ;;  %v11885_v37 = vadd.f32 %v11884_v24, %v11883_v31  ;;  %5863 = vmatprep.mubr.bf16.mxu1 %v15281_v47  ;;  %v13377_v47 = vld [vmem:[%s18282_s6 + $0x1e0] sm:$0xff]   ;;  %v13379_v49 = vld [vmem:[%s18282_s6 + $0x168] sm:$0xff]  }
 0x2b9   : > { %12177 = vmatpush3.bf16.msra.mxu0 %v13368_v36  ;;  %12241 = vmatpush3.bf16.msra.mxu1 %v13370_v23  ;;  %v13378_v48 = vld [vmem:[%s18282_s6 + $0x1a0] sm:$0xff]   ;;  %v13381_v31 = vld [vmem:[%s18282_s6 + $0x1e8] sm:$0xff]  }
 0x2ba   : > { %v4865_v21 = vadd.f32 %v11821_v12, %v15773_v8  ;;  %12178 = vmatprep.subr.bf16.mxu0 %v13371_v29  ;;  %v15850_v41 = vadd.f32 %v11882_v62, %v4862_v39  ;;  %12242 = vmatprep.subr.bf16.mxu1 %v13373_v53 }
 0x2bc   : > { %v11822_v35 = vpop.f32.mrb[76].mxu0  ;;  %v15855_v25 = vadd.f32 %v11885_v37, %v4865_v21  ;;  %v11886_v6 = vpop.f32.mrb[76].mxu1  ;;  %v13382_v37 = vld [vmem:[%s18282_s6 + $0x1a8] sm:$0xff]  }
 0x2bd   : > { %v11823_v32 = vpop.f32.mrb[77].mxu0  ;;  %12179 = vmatpush3.bf16.msra.mxu0 %v13372_v0  ;;  %v11887_v36 = vpop.f32.mrb[77].mxu1  ;;  %12243 = vmatpush3.bf16.msra.mxu1 %v13374_v52 }
 0x2be   : > { %v11824_v33 = vadd.f32 %v11823_v32, %v11822_v35  ;;  %v11825_v5 = vpop.f32.mrb[78].mxu0  ;;  %12180 = vmatprep.subr.bf16.mxu0 %v13375_v3  ;;  %v11888_v23 = vadd.f32 %v11887_v36, %v11886_v6  ;;  %v11889_v29 = vpop.f32.mrb[78].mxu1  ;;  %12244 = vmatprep.subr.bf16.mxu1 %v13377_v47  ;;  %v13384_v47 = vld [vmem:[%s18282_s6 + $0x130] sm:$0xff]  }
 0x2bf   : > { %v11826_v62 = vpop.f32.mrb[79].mxu0  ;;  %5767 = vmatmul.mubr.bf16.gmra.mrb[136].mxu0 %v15275_v34  ;;  %v11890_v39 = vpop.f32.mrb[79].mxu1  ;;  %5864 = vmatmul.mubr.bf16.gmra.mrb[136].mxu1 %v15279_v43  ;;  %v13380_v34 = vld [vmem:[%s18282_s6 + $0x128] sm:$0xff]   ;;  %v13383_v43 = vld [vmem:[%s18282_s6 + $0x170] sm:$0xff]  }
 0x2c0   : > { %v4870_v28 = vadd.f32 %v11824_v33, %v15773_v8  ;;  %v11827_v53 = vadd.f32 %v11826_v62, %v11825_v5  ;;  %5774 = vmatprep.mubr.bf16.mxu0 %v15296_v15  ;;  %v11891_v12 = vadd.f32 %v11890_v39, %v11889_v29  ;;  %5871 = vmatprep.mubr.bf16.mxu1 %v15300_v19  ;;  %v13385_v19 = vld [vmem:[%s18282_s6 + $0x1f0] sm:$0xff]   ;;  %v13387_v33 = vld [vmem:[%s18282_s6 + $0x178] sm:$0xff]  }
 0x2c1   : > { %12181 = vmatpush3.bf16.msra.mxu0 %v13376_v57  ;;  %12245 = vmatpush3.bf16.msra.mxu1 %v13378_v48  ;;  %v13386_v57 = vld [vmem:[%s18282_s6 + $0x1b0] sm:$0xff]  }
 0x2c2   : > { %v4873_v24 = vadd.f32 %v11827_v53, %v15773_v8  ;;  %12182 = vmatprep.subr.bf16.mxu0 %v13379_v49  ;;  %v15884_v15 = vadd.f32 %v11888_v23, %v4870_v28  ;;  %12246 = vmatprep.subr.bf16.mxu1 %v13381_v31  ;;  %v13389_v49 = vld [vmem:[%s18282_s6 + $0x1f8] sm:$0xff]  }
 0x2c3   : > { %v13390_v53 = vld [vmem:[%s18282_s6 + $0x1b8] sm:$0xff]  }
 0x2c4   : > { %v11828_v0 = vpop.f32.mrb[80].mxu0  ;;  %v15889_v21 = vadd.f32 %v11891_v12, %v4873_v24  ;;  %v11892_v52 = vpop.f32.mrb[80].mxu1 }
 0x2c5   : > { %v11829_v3 = vpop.f32.mrb[81].mxu0  ;;  %12183 = vmatpush3.bf16.msra.mxu0 %v13380_v34  ;;  %v11893_v6 = vpop.f32.mrb[81].mxu1  ;;  %12247 = vmatpush3.bf16.msra.mxu1 %v13382_v37 }
 0x2c6   : > { %v11830_v35 = vadd.f32 %v11829_v3, %v11828_v0  ;;  %v11831_v32 = vpop.f32.mrb[82].mxu0  ;;  %12184 = vmatprep.subr.bf16.mxu0 %v13383_v43  ;;  %v11894_v36 = vadd.f32 %v11893_v6, %v11892_v52  ;;  %v11895_v5 = vpop.f32.mrb[82].mxu1  ;;  %12248 = vmatprep.subr.bf16.mxu1 %v13385_v19 }
 0x2c7   : > { %v11832_v48 = vpop.f32.mrb[83].mxu0  ;;  %5775 = vmatmul.mubr.bf16.gmra.mrb[140].mxu0 %v15294_v13  ;;  %v11896_v62 = vpop.f32.mrb[83].mxu1  ;;  %5872 = vmatmul.mubr.bf16.gmra.mrb[140].mxu1 %v15298_v16  ;;  %v13388_v13 = vld [vmem:[%s18282_s6 + $0x138] sm:$0xff]  }
 0x2c8   : > { %v4878_v23 = vadd.f32 %v11830_v35, %v15773_v8  ;;  %v11833_v29 = vadd.f32 %v11832_v48, %v11831_v32  ;;  %5782 = vmatprep.mubr.bf16.mxu0 %v15315_v63  ;;  %v11897_v31 = vadd.f32 %v11896_v62, %v11895_v5  ;;  %5879 = vmatprep.mubr.bf16.mxu1 %v15319_v7 }
 0x2c9   : > { %12185 = vmatpush3.bf16.msra.mxu0 %v13384_v47  ;;  %12249 = vmatpush3.bf16.msra.mxu1 %v13386_v57 }
 0x2ca   : > { %v4881_v28 = vadd.f32 %v11833_v29, %v15773_v8  ;;  %12186 = vmatprep.subr.bf16.mxu0 %v13387_v33  ;;  %v15915_v39 = vadd.f32 %v11894_v36, %v4878_v23  ;;  %12250 = vmatprep.subr.bf16.mxu1 %v13389_v49 }
 0x2cc   : > { %v11834_v16 = vpop.f32.mrb[84].mxu0  ;;  %v15917_v63 = vadd.f32 %v11897_v31, %v4881_v28  ;;  %v11898_v7 = vpop.f32.mrb[84].mxu1 }
 0x2cd   : > { %v11835_v12 = vpop.f32.mrb[85].mxu0  ;;  %12187 = vmatpush3.bf16.msra.mxu0 %v13388_v13  ;;  %v11899_v24 = vpop.f32.mrb[85].mxu1  ;;  %12251 = vmatpush3.bf16.msra.mxu1 %v13390_v53 }
 0x2ce   : > { %v11836_v34 = vadd.f32 %v11835_v12, %v11834_v16  ;;  %v11837_v37 = vpop.f32.mrb[86].mxu0  ;;  %v11900_v43 = vadd.f32 %v11899_v24, %v11898_v7  ;;  %v11901_v19 = vpop.f32.mrb[86].mxu1 }
 0x2cf   : > { %v11838_v0 = vpop.f32.mrb[87].mxu0  ;;  %5783 = vmatmul.mubr.bf16.gmra.mrb[144].mxu0 %v15313_v61  ;;  %v11902_v47 = vpop.f32.mrb[87].mxu1  ;;  %5880 = vmatmul.mubr.bf16.gmra.mrb[144].mxu1 %v15317_v1 }
 0x2d0   : > { %v4886_v52 = vadd.f32 %v11836_v34, %v15773_v8  ;;  %v11839_v3 = vadd.f32 %v11838_v0, %v11837_v37  ;;  %5790 = vmatprep.mubr.bf16.mxu0 %v15350_v59  ;;  %v11903_v35 = vadd.f32 %v11902_v47, %v11901_v19  ;;  %5887 = vmatprep.mubr.bf16.mxu1 %v15360_v9 }
 0x2d2   : > { %v4889_v6 = vadd.f32 %v11839_v3, %v15773_v8  ;;  %v15925_v32 = vadd.f32 %v11900_v43, %v4886_v52 }
 0x2d4   : > { %v11840_v57 = vpop.f32.mrb[88].mxu0  ;;  %v15927_v33 = vadd.f32 %v11903_v35, %v4889_v6  ;;  %v11904_v36 = vpop.f32.mrb[88].mxu1  ;;  %v18386_v35 = vld [vmem:[#allocation22_spill] sm:$0xff]  ;;  %v18387_v6 = vld [vmem:[#allocation19_spill] sm:$0xff] }
 0x2d5   : > { %v11841_v61 = vpop.f32.mrb[89].mxu0  ;;  %v11905_v48 = vpop.f32.mrb[89].mxu1 }
 0x2d6   : > { %v11842_v5 = vadd.f32 %v11841_v61, %v11840_v57  ;;  %v11843_v49 = vpop.f32.mrb[90].mxu0  ;;  %v11906_v23 = vadd.f32 %v11905_v48, %v11904_v36  ;;  %v11907_v29 = vpop.f32.mrb[90].mxu1  ;;  %v18388_v57 = vld [vmem:[#allocation21_spill] sm:$0xff]  ;;  %v18389_v36 = vld [vmem:[#allocation24_spill] sm:$0xff]  ;;  %v18390_v61 = vld [vmem:[#allocation26_spill] sm:$0xff] }
 0x2d7   : > { %v11844_v1 = vpop.f32.mrb[91].mxu0  ;;  %5791 = vmatmul.mubr.bf16.gmra.mrb[148].mxu0 %v15345_v56  ;;  %v11908_v62 = vpop.f32.mrb[91].mxu1  ;;  %5888 = vmatmul.mubr.bf16.gmra.mrb[148].mxu1 %v15352_v60  ;;  %v18392_v48 = vld [vmem:[#allocation25_spill] sm:$0xff] }
 0x2d8   : > { %v4894_v59 = vadd.f32 %v11842_v5, %v15773_v8  ;;  %v11845_v9 = vadd.f32 %v11844_v1, %v11843_v49  ;;  %5798 = vmatprep.mubr.bf16.mxu0 %v15394_v10  ;;  %v11909_v31 = vadd.f32 %v11908_v62, %v11907_v29  ;;  %5895 = vmatprep.mubr.bf16.mxu1 %v15404_v20  ;;  %v18391_v5 = vld [vmem:[#allocation23_spill] sm:$0xff]  ;;  %v18393_v49 = vld [vmem:[#allocation28_spill] sm:$0xff]  ;;  %v6210_v29 = vld [vmem:[%s18284_s8] sm:$0xff] }
 0x2d9   : > { %v6214_v1 = vld [vmem:[%s18284_s8 + $0x20] sm:$0xff] }
 0x2da   : > { %v4897_v13 = vadd.f32 %v11845_v9, %v15773_v8  ;;  %v15935_v28 = vadd.f32 %v11906_v23, %v4894_v59  ;;  %v18394_v23 = vld [vmem:[#allocation27_spill] sm:$0xff]  ;;  %v11402_v59 = vcombine.low %v6210_v29, %v6214_v1 }
 0x2dc   : > { %v11846_v53 = vpop.f32.mrb[92].mxu0  ;;  %v15937_v16 = vadd.f32 %v11909_v31, %v4897_v13  ;;  %v11910_v7 = vpop.f32.mrb[92].mxu1 }
 0x2dd   : > { %v11847_v56 = vpop.f32.mrb[93].mxu0  ;;  %v11911_v34 = vpop.f32.mrb[93].mxu1 }
 0x2de   : > { %v11848_v12 = vadd.f32 %v11847_v56, %v11846_v53  ;;  %v11849_v24 = vpop.f32.mrb[94].mxu0  ;;  %v11912_v37 = vadd.f32 %v11911_v34, %v11910_v7  ;;  %v11913_v43 = vpop.f32.mrb[94].mxu1  ;;  %v6234_v53 = vld [vmem:[%s18284_s8 + $0xc0] sm:$0xff]  ;;  %v6211_v34 = vld [vmem:[%s18284_s8 + $0x8] sm:$0xff] }
 0x2df   : > { %v11850_v60 = vpop.f32.mrb[95].mxu0  ;;  %5799 = vmatmul.mubr.bf16.gmra.mrb[152].mxu0 %v15389_v4  ;;  %v11914_v19 = vpop.f32.mrb[95].mxu1  ;;  %5896 = vmatmul.mubr.bf16.gmra.mrb[152].mxu1 %v15396_v11  ;;  %v18374_v4 = vld [vmem:[#allocation10_spill] sm:$0xff]  ;;  %v18375_v11 = vld [vmem:[#allocation8_spill] sm:$0xff] }
 0x2e0   : > { %v4902_v10 = vadd.f32 %v11848_v12, %v15773_v8  ;;  %v11851_v20 = vadd.f32 %v11850_v60, %v11849_v24  ;;  %5806 = vmatprep.mubr.bf16.mxu0 %v15438_v18  ;;  %v11915_v0 = vadd.f32 %v11914_v19, %v11913_v43  ;;  %5903 = vmatprep.mubr.bf16.mxu1 %v15448_v27  ;;  %v18376_v18 = vld [vmem:[#allocation9_spill] sm:$0xff]  ;;  %v18377_v27 = vld [vmem:[#allocation12_spill] sm:$0xff]  ;;  %v6238_v7 = vld [vmem:[%s18284_s8 + $0xe0] sm:$0xff] }
 0x2e1   : > { %v11426_v56 = vcombine.low %v6234_v53, %v6238_v7  ;;  %v11427_v12 = vcombine.high %v6234_v53, %v6238_v7  ;;  %v6215_v24 = vld [vmem:[%s18284_s8 + $0x28] sm:$0xff] }
 0x2e2   : > { %v4905_v52 = vadd.f32 %v11851_v20, %v15773_v8  ;;  %v15945_v3 = vadd.f32 %v11912_v37, %v4902_v10  ;;  %v18385_v8 = vld [vmem:[#allocation20_spill] sm:$0xff]  ;;  %v11405_v37 = vcombine.high %v6211_v34, %v6215_v24  ;;  %v11404_v43 = vcombine.low %v6211_v34, %v6215_v24  ;;  %v6242_v10 = vld [vmem:[%s18284_s8 + $0x100] sm:$0xff]  ;;  %v6243_v34 = vld [vmem:[%s18284_s8 + $0x108] sm:$0xff] }
 0x2e3   : > { %v6246_v20 = vld [vmem:[%s18284_s8 + $0x120] sm:$0xff]  ;;  %v6247_v24 = vld [vmem:[%s18284_s8 + $0x128] sm:$0xff] }
 0x2e4   : > { %v15947_v47 = vadd.f32 %v11915_v0, %v4905_v52  ;;  %6749 = vmatprep.subr.bf16.mxu1 %v11405_v37  ;;  %v11434_v52 = vcombine.low %v6242_v10, %v6246_v20 }
 0x2e7   : > { %5807 = vmatmul.mubr.bf16.gmra.mrb[156].mxu0 %v15433_v51  ;;  %5904 = vmatmul.mubr.bf16.gmra.mrb[156].mxu1 %v15440_v22  ;;  %v18378_v51 = vld [vmem:[#allocation14_spill] sm:$0xff]  ;;  %v18379_v22 = vld [vmem:[#allocation11_spill] sm:$0xff] }
 0x2e8   : > { %5944 = vmatprep.mubr.bf16.mxu0 %v15532_v30  ;;  %6041 = vmatprep.mubr.bf16.mxu1 %v15538_v17  ;;  %v18380_v30 = vld [vmem:[#allocation13_spill] sm:$0xff]  ;;  %v18381_v17 = vld [vmem:[#allocation16_spill] sm:$0xff] }
 0x2ef   : > { %5945 = vmatmul.mubr.bf16.vlgmr.msra.gmra.mrb[160].mxu0 %v15528_v54  ;;  %6042 = vmatmul.mubr.bf16.vlgmr.msra.gmra.mrb[160].mxu1 %v15530_v26  ;;  %v18382_v54 = vld [vmem:[#allocation18_spill] sm:$0xff]  ;;  %v18383_v26 = vld [vmem:[#allocation15_spill] sm:$0xff] }
 0x2f0   : > { %5952 = vmatprep.mubr.bf16.mxu0 %v15574_v40  ;;  %6049 = vmatprep.mubr.bf16.mxu1 %v18374_v4  ;;  %v18384_v40 = vld [vmem:[#allocation17_spill] sm:$0xff]  ;;  %v11435_v4 = vcombine.high %v6242_v10, %v6246_v20  ;;  %v11437_v10 = vcombine.high %v6243_v34, %v6247_v24 }
 0x2f1   : > { %6750 = vmatpush1.bf16.msra.mxu1 %v11404_v43 }
 0x2f7   : > { %5953 = vmatmul.mubr.bf16.gmra.mrb[164].mxu0 %v18375_v11  ;;  %6050 = vmatmul.mubr.bf16.gmra.mrb[164].mxu1 %v18376_v18  ;;  %v6219_v11 = vld [vmem:[%s18284_s8 + $0x48] sm:$0xff] }
 0x2f8   : > { %5960 = vmatprep.mubr.bf16.mxu0 %v18377_v27  ;;  %6057 = vmatprep.mubr.bf16.mxu1 %v18378_v51  ;;  %v6223_v18 = vld [vmem:[%s18284_s8 + $0x68] sm:$0xff] }
 0x2ff   : > { %5961 = vmatmul.mubr.bf16.gmra.mrb[168].mxu0 %v18379_v22  ;;  %6058 = vmatmul.mubr.bf16.gmra.mrb[168].mxu1 %v18380_v30  ;;  %v11413_v30 = vcombine.high %v6219_v11, %v6223_v18 }
 0x300   : > { %5968 = vmatprep.mubr.bf16.mxu0 %v18381_v17  ;;  %6065 = vmatprep.mubr.bf16.mxu1 %v18382_v54 }
 0x301   : > { %6751 = vmatprep.subr.bf16.mxu1 %v11413_v30 }
 0x307   : > { %5969 = vmatmul.mubr.bf16.gmra.mrb[172].mxu0 %v18383_v26  ;;  %6066 = vmatmul.mubr.bf16.gmra.mrb[172].mxu1 %v18384_v40  ;;  %v11412_v40 = vcombine.low %v6219_v11, %v6223_v18  ;;  %v6251_v18 = vld [vmem:[%s18284_s8 + $0x148] sm:$0xff] }
 0x308   : > { %5976 = vmatprep.mubr.bf16.mxu0 %v18385_v8  ;;  %6073 = vmatprep.mubr.bf16.mxu1 %v18386_v35 }
 0x309   : > { %6752 = vmatpush1.bf16.msra.mxu1 %v11412_v40 }
 0x30f   : > { %5977 = vmatmul.mubr.bf16.gmra.mrb[176].mxu0 %v18387_v6  ;;  %6074 = vmatmul.mubr.bf16.gmra.mrb[176].mxu1 %v18388_v57 }
 0x310   : > { %5984 = vmatprep.mubr.bf16.mxu0 %v18389_v36  ;;  %6081 = vmatprep.mubr.bf16.mxu1 %v18390_v61  ;;  %v6227_v36 = vld [vmem:[%s18284_s8 + $0x88] sm:$0xff] }
 0x317   : > { %5985 = vmatmul.mubr.bf16.gmra.mrb[180].mxu0 %v18391_v5  ;;  %6082 = vmatmul.mubr.bf16.gmra.mrb[180].mxu1 %v18392_v48 }
 0x318   : > { %5992 = vmatprep.mubr.bf16.mxu0 %v15746_v42  ;;  %6089 = vmatprep.mubr.bf16.mxu1 %v18393_v49  ;;  %v11403_v42 = vcombine.high %v6210_v29, %v6214_v1 }
 0x31a   : > { %6636 = vmatprep.subr.bf16.mxu0 %v11403_v42  ;;  %v6235_v42 = vld [vmem:[%s18284_s8 + $0xc8] sm:$0xff] }
 0x31b   : > { %6637 = vmatpush1.bf16.msra.mxu0 %v11402_v59 }
 0x31f   : > { %5993 = vmatmul.mubr.bf16.gmra.mrb[184].mxu0 %v18394_v23  ;;  %6090 = vmatmul.mubr.bf16.gmra.mrb[184].mxu1 %v15748_v44  ;;  %v18395_v44 = vmov 0  }
 0x320   : > { %6000 = vmatprep.mubr.bf16.mxu0 %v15766_v46  ;;  %6097 = vmatprep.mubr.bf16.mxu1 %v15775_v38  ;;  %v6218_v46 = vld [vmem:[%s18284_s8 + $0x40] sm:$0xff] }
 0x321   : > { %v6222_v38 = vld [vmem:[%s18284_s8 + $0x60] sm:$0xff] }
 0x322   : > { %v11410_v9 = vcombine.low %v6218_v46, %v6222_v38  ;;  %v11411_v62 = vcombine.high %v6218_v46, %v6222_v38  ;;  %v6239_v46 = vld [vmem:[%s18284_s8 + $0xe8] sm:$0xff] }
 0x324   : > { %6638 = vmatprep.subr.bf16.mxu0 %v11411_v62  ;;  %v11429_v62 = vcombine.high %v6235_v42, %v6239_v46 }
 0x325   : > { %6639 = vmatpush1.bf16.msra.mxu0 %v11410_v9 }
 0x327   : > { %6001 = vmatmul.mubr.bf16.gmra.mrb[188].mxu0 %v15764_v55  ;;  %6098 = vmatmul.mubr.bf16.gmra.mrb[188].mxu1 %v15768_v58  ;;  %v6226_v55 = vld [vmem:[%s18284_s8 + $0x80] sm:$0xff] }
 0x328   : > { %6668 = vmatprep.mubr.bf16.mxu0 %v18395_v44  ;;  %6781 = vmatprep.mubr.bf16.mxu1 %v18395_v44  ;;  %v6230_v58 = vld [vmem:[%s18284_s8 + $0xa0] sm:$0xff] }
 0x329   : > { %v11418_v31 = vcombine.low %v6226_v55, %v6230_v58  ;;  %v11419_v13 = vcombine.high %v6226_v55, %v6230_v58 }
 0x32b   : > { %6640 = vmatprep.subr.bf16.mxu0 %v11419_v13  ;;  %v11428_v13 = vcombine.low %v6235_v42, %v6239_v46 }
 0x32c   : > { %6641 = vmatpush1.bf16.msra.mxu0 %v11418_v31 }
 0x32d   : > { %6642 = vmatprep.subr.bf16.mxu0 %v11427_v12 }
 0x330   : > { %6643 = vmatpush1.bf16.msra.mxu0 %v11426_v56 }
 0x331   : > { %6644 = vmatprep.subr.bf16.mxu0 %v11435_v4 }
 0x334   : > { %6645 = vmatpush1.bf16.msra.mxu0 %v11434_v52 }
 0x342   : > { %v11932_v60 = vpop.f32.mrb[96].mxu0  ;;  %v11996_v19 = vpop.f32.mrb[96].mxu1 }
 0x343   : > { %v11933_v0 = vpop.f32.mrb[97].mxu0  ;;  %v11997_v51 = vpop.f32.mrb[97].mxu1 }
 0x344   : > { %v11934_v27 = vadd.f32 %v11933_v0, %v11932_v60  ;;  %v11935_v22 = vpop.f32.mrb[98].mxu0  ;;  %v11998_v17 = vadd.f32 %v11997_v51, %v11996_v19  ;;  %v11999_v54 = vpop.f32.mrb[98].mxu1  ;;  %v6254_v60 = vld [vmem:[%s18284_s8 + $0x160] sm:$0xff]  ;;  %v11436_v0 = vcombine.low %v6243_v34, %v6247_v24 }
 0x345   : > { %v11936_v26 = vpop.f32.mrb[99].mxu0  ;;  %v12000_v6 = vpop.f32.mrb[99].mxu1 }
 0x346   : > { %v5040_v8 = vadd.f32 %v11934_v27, %v15785_v50  ;;  %v11937_v35 = vadd.f32 %v11936_v26, %v11935_v22  ;;  %v12001_v57 = vadd.f32 %v12000_v6, %v11999_v54  ;;  %v6231_v50 = vld [vmem:[%s18284_s8 + $0xa8] sm:$0xff] }
 0x347   : > { %v11421_v48 = vcombine.high %v6227_v36, %v6231_v50  ;;  %v11420_v49 = vcombine.low %v6227_v36, %v6231_v50  ;;  %v6255_v27 = vld [vmem:[%s18284_s8 + $0x168] sm:$0xff]  ;;  %v6258_v50 = vld [vmem:[%s18284_s8 + $0x180] sm:$0xff] }
 0x348   : > { %v16043_v61 = vadd.f32 %v11998_v17, %v5040_v8  ;;  %v5043_v5 = vadd.f32 %v11937_v35, %v15787_v45  ;;  %v11445_v17 = vcombine.high %v6251_v18, %v6255_v27  ;;  %v11444_v8 = vcombine.low %v6251_v18, %v6255_v27 }
 0x349   : > { %6753 = vmatprep.subr.bf16.mxu1 %v11421_v48  ;;  %v6259_v48 = vld [vmem:[%s18284_s8 + $0x188] sm:$0xff] }
 0x34a   : > { %10727 = vst [vmem:[%s16035_s20] sm:$0xff] %v16043_v61  ;;  %v16048_v23 = vadd.f32 %v12001_v57, %v5043_v5  ;;  %v11938_v29 = vpop.f32.mrb[100].mxu0  ;;  %v12002_v1 = vpop.f32.mrb[100].mxu1  ;;  %6754 = vmatpush1.bf16.msra.mxu1 %v11420_v49  ;;  %v6262_v5 = vld [vmem:[%s18284_s8 + $0x1a0] sm:$0xff] }
 0x34b   : > { %v11939_v59 = vpop.f32.mrb[101].mxu0  ;;  %v12003_v38 = vpop.f32.mrb[101].mxu1  ;;  %6755 = vmatprep.subr.bf16.mxu1 %v11429_v62 }
 0x34c   : > { %10728 = vst [vmem:[%s16035_s20 + $0x8] sm:$0xff] %v16048_v23  ;;  %v11940_v45 = vadd.f32 %v11939_v59, %v11938_v29  ;;  %v11941_v9 = vpop.f32.mrb[102].mxu0  ;;  %v12004_v55 = vadd.f32 %v12003_v38, %v12002_v1  ;;  %v12005_v58 = vpop.f32.mrb[102].mxu1  ;;  %v11450_v29 = vcombine.low %v6258_v50, %v6262_v5  ;;  %v11451_v1 = vcombine.high %v6258_v50, %v6262_v5  ;;  %v6263_v59 = vld [vmem:[%s18284_s8 + $0x1a8] sm:$0xff] }
 0x34d   : > { %v11942_v31 = vpop.f32.mrb[103].mxu0  ;;  %v12006_v56 = vpop.f32.mrb[103].mxu1  ;;  %v11452_v42 = vcombine.low %v6259_v48, %v6263_v59  ;;  %v11453_v46 = vcombine.high %v6259_v48, %v6263_v59 }
 0x34e   : > { %v5048_v53 = vadd.f32 %v11940_v45, %v15816_v2  ;;  %v11943_v7 = vadd.f32 %v11942_v31, %v11941_v9  ;;  %v12007_v12 = vadd.f32 %v12006_v56, %v12005_v58  ;;  %6756 = vmatpush1.bf16.msra.mxu1 %v11428_v13  ;;  %v6250_v2 = vld [vmem:[%s18284_s8 + $0x140] sm:$0xff]  ;;  %v6267_v58 = vld [vmem:[%s18284_s8 + $0x1c8] sm:$0xff] }
 0x34f   : > { %v11442_v20 = vcombine.low %v6250_v2, %v6254_v60  ;;  %v11443_v19 = vcombine.high %v6250_v2, %v6254_v60  ;;  %6757 = vmatprep.subr.bf16.mxu1 %v11437_v10  ;;  %v6271_v56 = vld [vmem:[%s18284_s8 + $0x1e8] sm:$0xff] }
 0x350   : > { %v16065_v37 = vadd.f32 %v12004_v55, %v5048_v53  ;;  %v5051_v43 = vadd.f32 %v11943_v7, %v15821_v14  ;;  %v6270_v55 = vld [vmem:[%s18284_s8 + $0x1e0] sm:$0xff]  ;;  %v11460_v2 = vcombine.low %v6267_v58, %v6271_v56  ;;  %v11461_v60 = vcombine.high %v6267_v58, %v6271_v56 }
 0x351   : > { %6646 = vmatprep.subr.bf16.mxu0 %v11443_v19 }
 0x352   : > { %10729 = vst [vmem:[%s16035_s20 + $0x10] sm:$0xff] %v16065_v37  ;;  %v16076_v52 = vadd.f32 %v12007_v12, %v5051_v43  ;;  %v11944_v4 = vpop.f32.mrb[104].mxu0  ;;  %v12008_v14 = vpop.f32.mrb[104].mxu1  ;;  %6758 = vmatpush1.bf16.msra.mxu1 %v11436_v0  ;;  %6647 = vmatpush1.bf16.msra.mxu0 %v11442_v20 }
 0x353   : > { %v11945_v11 = vpop.f32.mrb[105].mxu0  ;;  %v12009_v22 = vpop.f32.mrb[105].mxu1  ;;  %6759 = vmatprep.subr.bf16.mxu1 %v11445_v17  ;;  %6648 = vmatprep.subr.bf16.mxu0 %v11451_v1 }
 0x354   : > { %10730 = vst [vmem:[%s16035_s20 + $0x18] sm:$0xff] %v16076_v52  ;;  %v11946_v51 = vadd.f32 %v11945_v11, %v11944_v4  ;;  %v11947_v30 = vpop.f32.mrb[106].mxu0  ;;  %v12010_v54 = vadd.f32 %v12009_v22, %v12008_v14  ;;  %v12011_v26 = vpop.f32.mrb[106].mxu1 }
 0x355   : > { %v11948_v40 = vpop.f32.mrb[107].mxu0  ;;  %v12012_v57 = vpop.f32.mrb[107].mxu1 }
 0x356   : > { %v5056_v35 = vadd.f32 %v11946_v51, %v15850_v41  ;;  %v11949_v6 = vadd.f32 %v11948_v40, %v11947_v30  ;;  %v12013_v36 = vadd.f32 %v12012_v57, %v12011_v26  ;;  %6760 = vmatpush1.bf16.msra.mxu1 %v11444_v8  ;;  %6649 = vmatpush1.bf16.msra.mxu0 %v11450_v29 }
 0x357   : > { %6761 = vmatprep.subr.bf16.mxu1 %v11453_v46 }
 0x358   : > { %v16096_v49 = vadd.f32 %v12010_v54, %v5056_v35  ;;  %v5059_v41 = vadd.f32 %v11949_v6, %v15855_v25  ;;  %v6266_v25 = vld [vmem:[%s18284_s8 + $0x1c0] sm:$0xff] }
 0x359   : > { %v11459_v7 = vcombine.high %v6266_v25, %v6270_v55  ;;  %v11458_v43 = vcombine.low %v6266_v25, %v6270_v55 }
 0x35a   : > { %10731 = vst [vmem:[%s16035_s20 + $0x20] sm:$0xff] %v16096_v49  ;;  %v16104_v45 = vadd.f32 %v12013_v36, %v5059_v41  ;;  %v11950_v38 = vpop.f32.mrb[108].mxu0  ;;  %v12014_v9 = vpop.f32.mrb[108].mxu1  ;;  %6762 = vmatpush1.bf16.msra.mxu1 %v11452_v42 }
 0x35b   : > { %v11951_v62 = vpop.f32.mrb[109].mxu0  ;;  %v12015_v13 = vpop.f32.mrb[109].mxu1  ;;  %6650 = vmatprep.subr.bf16.mxu0 %v11459_v7  ;;  %6763 = vmatprep.subr.bf16.mxu1 %v11461_v60 }
 0x35c   : > { %10732 = vst [vmem:[%s16035_s20 + $0x28] sm:$0xff] %v16104_v45  ;;  %v11952_v31 = vadd.f32 %v11951_v62, %v11950_v38  ;;  %v11953_v53 = vpop.f32.mrb[110].mxu0  ;;  %v12016_v12 = vadd.f32 %v12015_v13, %v12014_v9  ;;  %v12017_v34 = vpop.f32.mrb[110].mxu1  ;;  %6651 = vmatpush1.bf16.msra.mxu0 %v11458_v43 }
 0x35d   : > { %v11954_v24 = vpop.f32.mrb[111].mxu0  ;;  %v12018_v19 = vpop.f32.mrb[111].mxu1 }
 0x35e   : > { %v5064_v10 = vadd.f32 %v11952_v31, %v15884_v15  ;;  %v11955_v20 = vadd.f32 %v11954_v24, %v11953_v53  ;;  %v12019_v0 = vadd.f32 %v12018_v19, %v12017_v34  ;;  %6764 = vmatpush1.bf16.msra.mxu1 %v11460_v2 }
 0x360   : > { %v16121_v4 = vadd.f32 %v12016_v12, %v5064_v10  ;;  %v5067_v14 = vadd.f32 %v11955_v20, %v15889_v21 }
 0x362   : > { %10733 = vst [vmem:[%s16035_s20 + $0x30] sm:$0xff] %v16121_v4  ;;  %v16126_v11 = vadd.f32 %v12019_v0, %v5067_v14  ;;  %v11956_v18 = vpop.f32.mrb[112].mxu0  ;;  %v12020_v27 = vpop.f32.mrb[112].mxu1 }
 0x363   : > { %v11957_v51 = vpop.f32.mrb[113].mxu0  ;;  %v12021_v22 = vpop.f32.mrb[113].mxu1 }
 0x364   : > { %10734 = vst [vmem:[%s16035_s20 + $0x38] sm:$0xff] %v16126_v11  ;;  %v11958_v15 = vadd.f32 %v11957_v51, %v11956_v18  ;;  %v11959_v30 = vpop.f32.mrb[114].mxu0  ;;  %v12022_v17 = vadd.f32 %v12021_v22, %v12020_v27  ;;  %v12023_v54 = vpop.f32.mrb[114].mxu1 }
 0x365   : > { %v11960_v26 = vpop.f32.mrb[115].mxu0  ;;  %v12024_v8 = vpop.f32.mrb[115].mxu1 }
 0x366   : > { %v5072_v21 = vadd.f32 %v11958_v15, %v15915_v39  ;;  %v11961_v40 = vadd.f32 %v11960_v26, %v11959_v30  ;;  %v12025_v35 = vadd.f32 %v12024_v8, %v12023_v54 }
 0x368   : > { %v5169_v6 = vadd.f32 %v12022_v17, %v5072_v21  ;;  %v5075_v57 = vadd.f32 %v11961_v40, %v15917_v63  ;;  %v16151_v21 = vld [vmem:[%s18284_s8 + $0x30] sm:$0xff]  ;;  %v16156_v40 = vld [vmem:[%s18284_s8 + $0x18] sm:$0xff] }
 0x36a   : > { %10735 = vst [vmem:[%s16035_s20 + $0x40] sm:$0xff] %v5169_v6  ;;  %v5172_v36 = vadd.f32 %v12025_v35, %v5075_v57  ;;  %v11962_v50 = vpop.f32.mrb[116].mxu0  ;;  %v12026_v5 = vpop.f32.mrb[116].mxu1  ;;  %v16164_v6 = vld [vmem:[%s18284_s8 + $0x38] sm:$0xff] }
 0x36b   : > { %v11963_v48 = vpop.f32.mrb[117].mxu0  ;;  %v12027_v29 = vpop.f32.mrb[117].mxu1 }
 0x36c   : > { %10736 = vst [vmem:[%s16035_s20 + $0x48] sm:$0xff] %v5172_v36  ;;  %v11964_v41 = vadd.f32 %v11963_v48, %v11962_v50  ;;  %v11965_v1 = vpop.f32.mrb[118].mxu0  ;;  %v12028_v59 = vadd.f32 %v12027_v29, %v12026_v5  ;;  %v12029_v42 = vpop.f32.mrb[118].mxu1  ;;  %v11408_v36 = vcombine.low %v16156_v40, %v16164_v6  ;;  %v11409_v50 = vcombine.high %v16156_v40, %v16164_v6  ;;  %v16338_v6 = vld [vmem:[%s18284_s8 + $0xf0] sm:$0xff] }
 0x36d   : > { %v11966_v39 = vpop.f32.mrb[119].mxu0  ;;  %v12030_v9 = vpop.f32.mrb[119].mxu1 }
 0x36e   : > { %v5080_v46 = vadd.f32 %v11964_v41, %v15925_v32  ;;  %v11967_v38 = vadd.f32 %v11966_v39, %v11965_v1  ;;  %v12031_v62 = vadd.f32 %v12030_v9, %v12029_v42  ;;  %v16178_v41 = vld [vmem:[%s18283_s7] ss:$0 sm:$0xff]  ;;  %6975 = vmatprep.subr.bf16.mxu1 %v11409_v50 }
 0x370   : > { %v5177_v63 = vadd.f32 %v12028_v59, %v5080_v46  ;;  %v5083_v25 = vadd.f32 %v11967_v38, %v15927_v33 }
 0x372   : > { %10737 = vst [vmem:[%s16035_s20 + $0x50] sm:$0xff] %v5177_v63  ;;  %v5180_v55 = vadd.f32 %v12031_v62, %v5083_v25  ;;  %v11968_v58 = vpop.f32.mrb[120].mxu0  ;;  %v12032_v31 = vpop.f32.mrb[120].mxu1 }
 0x373   : > { %v11969_v13 = vpop.f32.mrb[121].mxu0  ;;  %v12033_v7 = vpop.f32.mrb[121].mxu1 }
 0x374   : > { %10738 = vst [vmem:[%s16035_s20 + $0x58] sm:$0xff] %v5180_v55  ;;  %v11970_v53 = vadd.f32 %v11969_v13, %v11968_v58  ;;  %v11971_v56 = vpop.f32.mrb[122].mxu0  ;;  %v12034_v12 = vadd.f32 %v12033_v7, %v12032_v31  ;;  %v12035_v34 = vpop.f32.mrb[122].mxu1 }
 0x375   : > { %v11972_v32 = vpop.f32.mrb[123].mxu0  ;;  %v12036_v2 = vpop.f32.mrb[123].mxu1 }
 0x376   : > { %v5088_v24 = vadd.f32 %v11970_v53, %v15935_v28  ;;  %v11973_v43 = vadd.f32 %v11972_v32, %v11971_v56  ;;  %v12037_v60 = vadd.f32 %v12036_v2, %v12035_v34 }
 0x378   : > { %v5185_v33 = vadd.f32 %v12034_v12, %v5088_v24  ;;  %v5091_v10 = vadd.f32 %v11973_v43, %v15937_v16  ;;  %v16146_v16 = vld [vmem:[%s18284_s8 + $0x10] sm:$0xff] }
 0x379   : > { %v11407_v35 = vcombine.high %v16146_v16, %v16151_v21  ;;  %v11406_v57 = vcombine.low %v16146_v16, %v16151_v21 }
 0x37a   : > { %10739 = vst [vmem:[%s16035_s20 + $0x60] sm:$0xff] %v5185_v33  ;;  %v5188_v20 = vadd.f32 %v12037_v60, %v5091_v10  ;;  %v11974_v19 = vpop.f32.mrb[124].mxu0  ;;  %v12038_v0 = vpop.f32.mrb[124].mxu1 }
 0x37b   : > { %v11975_v14 = vpop.f32.mrb[125].mxu0  ;;  %v12039_v27 = vpop.f32.mrb[125].mxu1  ;;  %6862 = vmatprep.subr.bf16.mxu0 %v11407_v35 }
 0x37c   : > { %10740 = vst [vmem:[%s16035_s20 + $0x68] sm:$0xff] %v5188_v20  ;;  %v11976_v18 = vadd.f32 %v11975_v14, %v11974_v19  ;;  %v11977_v51 = vpop.f32.mrb[126].mxu0  ;;  %v12040_v15 = vadd.f32 %v12039_v27, %v12038_v0  ;;  %v12041_v22 = vpop.f32.mrb[126].mxu1 }
 0x37d   : > { %v11978_v30 = vpop.f32.mrb[127].mxu0  ;;  %v12042_v54 = vpop.f32.mrb[127].mxu1 }
 0x37e   : > { %v5096_v28 = vadd.f32 %v11976_v18, %v15945_v3  ;;  %v11979_v17 = vadd.f32 %v11978_v30, %v11977_v51  ;;  %v12043_v26 = vadd.f32 %v12042_v54, %v12041_v22 }
 0x380   : > { %v5193_v3 = vadd.f32 %v12040_v15, %v5096_v28  ;;  %v5099_v8 = vadd.f32 %v11979_v17, %v15947_v47 }
 0x382   : > { %10741 = vst [vmem:[%s16035_s20 + $0x70] sm:$0xff] %v5193_v3  ;;  %v16173_v5 = vadd.f32 %v12043_v26, %v5099_v8  ;;  %v12060_v47 = vpop.f32.mrb[128].mxu0  ;;  %v12124_v48 = vpop.f32.mrb[128].mxu1 }
 0x383   : > { %v12061_v29 = vpop.f32.mrb[129].mxu0  ;;  %v12125_v59 = vpop.f32.mrb[129].mxu1 }
 0x384   : > { %10742 = vst [vmem:[%s16035_s20 + $0x78] sm:$0xff] %v16173_v5  ;;  %v12062_v1 = vadd.f32 %v12061_v29, %v12060_v47  ;;  %v12063_v42 = vpop.f32.mrb[130].mxu0  ;;  %v12126_v39 = vadd.f32 %v12125_v59, %v12124_v48  ;;  %v12127_v46 = vpop.f32.mrb[130].mxu1 }
 0x385   : > { %v12064_v38 = vpop.f32.mrb[131].mxu0  ;;  %v12128_v63 = vpop.f32.mrb[131].mxu1 }
 0x386   : > { %v5753_v9 = vadd.f32 %v12062_v1, %v16178_v41  ;;  %v12065_v62 = vadd.f32 %v12064_v38, %v12063_v42  ;;  %v12129_v25 = vadd.f32 %v12128_v63, %v12127_v46 }
 0x388   : > { %v16183_v55 = vadd.f32 %v12126_v39, %v5753_v9  ;;  %v5756_v58 = vadd.f32 %v12065_v62, %v16178_v41 }
 0x38a   : > { %v16186_v31 = vadd.f32 %v12129_v25, %v5756_v58  ;;  %v12066_v13 = vpop.f32.mrb[132].mxu0  ;;  %v12130_v53 = vpop.f32.mrb[132].mxu1 }
 0x38b   : > { %v12067_v7 = vpop.f32.mrb[133].mxu0  ;;  %v12131_v12 = vpop.f32.mrb[133].mxu1 }
 0x38c   : > { %v12068_v56 = vadd.f32 %v12067_v7, %v12066_v13  ;;  %v12069_v34 = vpop.f32.mrb[134].mxu0  ;;  %v12132_v32 = vadd.f32 %v12131_v12, %v12130_v53  ;;  %v12133_v24 = vpop.f32.mrb[134].mxu1 }
 0x38d   : > { %v12070_v43 = vpop.f32.mrb[135].mxu0  ;;  %v12134_v33 = vpop.f32.mrb[135].mxu1 }
 0x38e   : > { %v5761_v2 = vadd.f32 %v12068_v56, %v16178_v41  ;;  %v12071_v60 = vadd.f32 %v12070_v43, %v12069_v34  ;;  %v12135_v10 = vadd.f32 %v12134_v33, %v12133_v24 }
 0x390   : > { %v16189_v20 = vadd.f32 %v12132_v32, %v5761_v2  ;;  %v5764_v19 = vadd.f32 %v12071_v60, %v16178_v41 }
 0x392   : > { %v16192_v0 = vadd.f32 %v12135_v10, %v5764_v19  ;;  %v12072_v14 = vpop.f32.mrb[136].mxu0  ;;  %v12136_v18 = vpop.f32.mrb[136].mxu1 }
 0x393   : > { %v12073_v27 = vpop.f32.mrb[137].mxu0  ;;  %v12137_v15 = vpop.f32.mrb[137].mxu1 }
 0x394   : > { %v12074_v51 = vadd.f32 %v12073_v27, %v12072_v14  ;;  %v12075_v22 = vpop.f32.mrb[138].mxu0  ;;  %v12138_v30 = vadd.f32 %v12137_v15, %v12136_v18  ;;  %v12139_v28 = vpop.f32.mrb[138].mxu1 }
 0x395   : > { %v12076_v17 = vpop.f32.mrb[139].mxu0  ;;  %v12140_v3 = vpop.f32.mrb[139].mxu1 }
 0x396   : > { %v5769_v54 = vadd.f32 %v12074_v51, %v16178_v41  ;;  %v12077_v26 = vadd.f32 %v12076_v17, %v12075_v22  ;;  %v12141_v8 = vadd.f32 %v12140_v3, %v12139_v28 }
 0x398   : > { %v16195_v35 = vadd.f32 %v12138_v30, %v5769_v54  ;;  %v5772_v50 = vadd.f32 %v12077_v26, %v16178_v41 }
 0x39a   : > { %v16198_v47 = vadd.f32 %v12141_v8, %v5772_v50  ;;  %v12078_v48 = vpop.f32.mrb[140].mxu0  ;;  %v12142_v29 = vpop.f32.mrb[140].mxu1 }
 0x39b   : > { %v12079_v1 = vpop.f32.mrb[141].mxu0  ;;  %v12143_v42 = vpop.f32.mrb[141].mxu1 }
 0x39c   : > { %v12080_v59 = vadd.f32 %v12079_v1, %v12078_v48  ;;  %v12081_v39 = vpop.f32.mrb[142].mxu0  ;;  %v12144_v46 = vadd.f32 %v12143_v42, %v12142_v29  ;;  %v12145_v38 = vpop.f32.mrb[142].mxu1 }
 0x39d   : > { %v12082_v9 = vpop.f32.mrb[143].mxu0  ;;  %v12146_v25 = vpop.f32.mrb[143].mxu1 }
 0x39e   : > { %v5777_v62 = vadd.f32 %v12080_v59, %v16178_v41  ;;  %v12083_v63 = vadd.f32 %v12082_v9, %v12081_v39  ;;  %v12147_v58 = vadd.f32 %v12146_v25, %v12145_v38 }
 0x3a0   : > { %v16201_v13 = vadd.f32 %v12144_v46, %v5777_v62  ;;  %v5780_v53 = vadd.f32 %v12083_v63, %v16178_v41 }
 0x3a2   : > { %v16204_v7 = vadd.f32 %v12147_v58, %v5780_v53  ;;  %v12084_v56 = vpop.f32.mrb[144].mxu0  ;;  %v12148_v12 = vpop.f32.mrb[144].mxu1 }
 0x3a3   : > { %v12085_v34 = vpop.f32.mrb[145].mxu0  ;;  %v12149_v24 = vpop.f32.mrb[145].mxu1 }
 0x3a4   : > { %v12086_v32 = vadd.f32 %v12085_v34, %v12084_v56  ;;  %v12087_v43 = vpop.f32.mrb[146].mxu0  ;;  %v12150_v2 = vadd.f32 %v12149_v24, %v12148_v12  ;;  %v12151_v60 = vpop.f32.mrb[146].mxu1 }
 0x3a5   : > { %v12088_v33 = vpop.f32.mrb[147].mxu0  ;;  %v12152_v14 = vpop.f32.mrb[147].mxu1 }
 0x3a6   : > { %v5785_v10 = vadd.f32 %v12086_v32, %v16178_v41  ;;  %v12089_v19 = vadd.f32 %v12088_v33, %v12087_v43  ;;  %v12153_v18 = vadd.f32 %v12152_v14, %v12151_v60 }
 0x3a8   : > { %v16207_v27 = vadd.f32 %v12150_v2, %v5785_v10  ;;  %v5788_v51 = vadd.f32 %v12089_v19, %v16178_v41 }
 0x3aa   : > { %v16210_v15 = vadd.f32 %v12153_v18, %v5788_v51  ;;  %v12090_v22 = vpop.f32.mrb[148].mxu0  ;;  %v12154_v30 = vpop.f32.mrb[148].mxu1 }
 0x3ab   : > { %v12091_v28 = vpop.f32.mrb[149].mxu0  ;;  %v12155_v54 = vpop.f32.mrb[149].mxu1 }
 0x3ac   : > { %v12092_v17 = vadd.f32 %v12091_v28, %v12090_v22  ;;  %v12093_v26 = vpop.f32.mrb[150].mxu0  ;;  %v12156_v3 = vadd.f32 %v12155_v54, %v12154_v30  ;;  %v12157_v8 = vpop.f32.mrb[150].mxu1 }
 0x3ad   : > { %v12094_v50 = vpop.f32.mrb[151].mxu0  ;;  %v12158_v1 = vpop.f32.mrb[151].mxu1 }
 0x3ae   : > { %v5793_v48 = vadd.f32 %v12092_v17, %v16178_v41  ;;  %v12095_v29 = vadd.f32 %v12094_v50, %v12093_v26  ;;  %v12159_v59 = vadd.f32 %v12158_v1, %v12157_v8 }
 0x3b0   : > { %v16213_v42 = vadd.f32 %v12156_v3, %v5793_v48  ;;  %v5796_v39 = vadd.f32 %v12095_v29, %v16178_v41 }
 0x3b2   : > { %v16216_v46 = vadd.f32 %v12159_v59, %v5796_v39  ;;  %v12096_v38 = vpop.f32.mrb[152].mxu0  ;;  %v12160_v9 = vpop.f32.mrb[152].mxu1 }
 0x3b3   : > { %v12097_v62 = vpop.f32.mrb[153].mxu0  ;;  %v12161_v25 = vpop.f32.mrb[153].mxu1 }
 0x3b4   : > { %v12098_v63 = vadd.f32 %v12097_v62, %v12096_v38  ;;  %v12099_v58 = vpop.f32.mrb[154].mxu0  ;;  %v12162_v53 = vadd.f32 %v12161_v25, %v12160_v9  ;;  %v12163_v56 = vpop.f32.mrb[154].mxu1 }
 0x3b5   : > { %v12100_v12 = vpop.f32.mrb[155].mxu0  ;;  %v12164_v24 = vpop.f32.mrb[155].mxu1 }
 0x3b6   : > { %v5801_v34 = vadd.f32 %v12098_v63, %v16178_v41  ;;  %v12101_v32 = vadd.f32 %v12100_v12, %v12099_v58  ;;  %v12165_v43 = vadd.f32 %v12164_v24, %v12163_v56 }
 0x3b8   : > { %v16219_v2 = vadd.f32 %v12162_v53, %v5801_v34  ;;  %v5804_v60 = vadd.f32 %v12101_v32, %v16178_v41 }
 0x3ba   : > { %v16222_v33 = vadd.f32 %v12165_v43, %v5804_v60  ;;  %v12102_v10 = vpop.f32.mrb[156].mxu0  ;;  %v12166_v19 = vpop.f32.mrb[156].mxu1 }
 0x3bb   : > { %v12103_v14 = vpop.f32.mrb[157].mxu0  ;;  %v12167_v51 = vpop.f32.mrb[157].mxu1 }
 0x3bc   : > { %v12104_v18 = vadd.f32 %v12103_v14, %v12102_v10  ;;  %v12105_v22 = vpop.f32.mrb[158].mxu0  ;;  %v12168_v30 = vadd.f32 %v12167_v51, %v12166_v19  ;;  %v12169_v28 = vpop.f32.mrb[158].mxu1 }
 0x3bd   : > { %v12106_v17 = vpop.f32.mrb[159].mxu0  ;;  %v12170_v3 = vpop.f32.mrb[159].mxu1 }
 0x3be   : > { %v5809_v54 = vadd.f32 %v12104_v18, %v16178_v41  ;;  %v12107_v26 = vadd.f32 %v12106_v17, %v12105_v22  ;;  %v12171_v8 = vadd.f32 %v12170_v3, %v12169_v28 }
 0x3c0   : > { %v16225_v50 = vadd.f32 %v12168_v30, %v5809_v54  ;;  %v5812_v48 = vadd.f32 %v12107_v26, %v16178_v41 }
 0x3c2   : > { %v16228_v29 = vadd.f32 %v12171_v8, %v5812_v48  ;;  %v12188_v1 = vpop.f32.mrb[160].mxu0  ;;  %v12252_v59 = vpop.f32.mrb[160].mxu1 }
 0x3c3   : > { %v12189_v39 = vpop.f32.mrb[161].mxu0  ;;  %v12253_v9 = vpop.f32.mrb[161].mxu1 }
 0x3c4   : > { %v12190_v38 = vadd.f32 %v12189_v39, %v12188_v1  ;;  %v12191_v62 = vpop.f32.mrb[162].mxu0  ;;  %v12254_v63 = vadd.f32 %v12253_v9, %v12252_v59  ;;  %v12255_v25 = vpop.f32.mrb[162].mxu1 }
 0x3c5   : > { %v12192_v58 = vpop.f32.mrb[163].mxu0  ;;  %v12256_v12 = vpop.f32.mrb[163].mxu1 }
 0x3c6   : > { %v5947_v53 = vadd.f32 %v12190_v38, %v16183_v55  ;;  %v12193_v56 = vadd.f32 %v12192_v58, %v12191_v62  ;;  %v12257_v41 = vadd.f32 %v12256_v12, %v12255_v25 }
 0x3c8   : > { %v6044_v34 = vadd.f32 %v12254_v63, %v5947_v53  ;;  %v5950_v32 = vadd.f32 %v12193_v56, %v16186_v31 }
 0x3ca   : > { %v6106_v24 = vmul.f32 0.5, %v6044_v34  ;;  %10743 = vst [vmem:[%s16235_s22] sm:$0xff] %v6044_v34  ;;  %v6047_v43 = vadd.f32 %v12257_v41, %v5950_v32  ;;  %v12194_v60 = vpop.f32.mrb[164].mxu0  ;;  %v12258_v10 = vpop.f32.mrb[164].mxu1 }
 0x3cb   : > { %v12195_v19 = vpop.f32.mrb[165].mxu0  ;;  %v12259_v51 = vpop.f32.mrb[165].mxu1 }
 0x3cc   : > { %v6122_v55 = vmul.f32 1.442695, %v6106_v24  ;;  %v6107_v14 = vmul.f32 0.5, %v6047_v43  ;;  %10744 = vst [vmem:[%s16235_s22 + $0x8] sm:$0xff] %v6047_v43  ;;  %v12196_v18 = vadd.f32 %v12195_v19, %v12194_v60  ;;  %v12197_v22 = vpop.f32.mrb[166].mxu0  ;;  %v12260_v30 = vadd.f32 %v12259_v51, %v12258_v10  ;;  %v12261_v28 = vpop.f32.mrb[166].mxu1 }
 0x3cd   : > { %v12198_v17 = vpop.f32.mrb[167].mxu0  ;;  %v12262_v3 = vpop.f32.mrb[167].mxu1  ;;  %v6154_v43 = vld [vmem:[%s16247_s21] sm:$0xff] }
 0x3ce   : > { %13839 = vpow2.f32 %v6122_v55  ;;  %v6124_v54 = vmul.f32 1.442695, %v6107_v14  ;;  %v5955_v31 = vadd.f32 %v12196_v18, %v16189_v20  ;;  %v12199_v26 = vadd.f32 %v12198_v17, %v12197_v22  ;;  %v6155_v14 = vld [vmem:[%s16247_s21 + $0x8] sm:$0xff] }
 0x3cf   : > { %v12263_v8 = vadd.f32 %v12262_v3, %v12261_v28 }
 0x3d0   : > { %13841 = vpow2.f32 %v6124_v54  ;;  %v6052_v48 = vadd.f32 %v12260_v30, %v5955_v31  ;;  %v5958_v1 = vadd.f32 %v12199_v26, %v16192_v0  ;;  %v16258_v31 = vld [vmem:[%s18284_s8 + $0x50] sm:$0xff] }
 0x3d2   : > { %v6108_v59 = vmul.f32 0.5, %v6052_v48  ;;  %10745 = vst [vmem:[%s16235_s22 + $0x10] sm:$0xff] %v6052_v48  ;;  %v6055_v39 = vadd.f32 %v12263_v8, %v5958_v1  ;;  %v12200_v38 = vpop.f32.mrb[168].mxu0  ;;  %v12264_v9 = vpop.f32.mrb[168].mxu1  ;;  %v16264_v1 = vld [vmem:[%s18284_s8 + $0x70] sm:$0xff] }
 0x3d3   : > { %v12201_v62 = vpop.f32.mrb[169].mxu0  ;;  %v12265_v58 = vpop.f32.mrb[169].mxu1 }
 0x3d4   : > { %v6126_v20 = vmul.f32 1.442695, %v6108_v59  ;;  %v6109_v63 = vmul.f32 0.5, %v6055_v39  ;;  %10746 = vst [vmem:[%s16235_s22 + $0x18] sm:$0xff] %v6055_v39  ;;  %v12202_v25 = vadd.f32 %v12201_v62, %v12200_v38  ;;  %v12203_v53 = vpop.f32.mrb[170].mxu0  ;;  %v12266_v0 = vadd.f32 %v12265_v58, %v12264_v9  ;;  %v12267_v56 = vpop.f32.mrb[170].mxu1 }
 0x3d5   : > { %v12204_v12 = vpop.f32.mrb[171].mxu0  ;;  %v12268_v24 = vpop.f32.mrb[171].mxu1 }
 0x3d6   : > { %13843 = vpow2.f32 %v6126_v20  ;;  %v6128_v41 = vmul.f32 1.442695, %v6109_v63  ;;  %v5963_v34 = vadd.f32 %v12202_v25, %v16195_v35  ;;  %v12205_v32 = vadd.f32 %v12204_v12, %v12203_v53  ;;  %v16271_v20 = vld [vmem:[%s18284_s8 + $0x58] sm:$0xff] }
 0x3d7   : > { %v12269_v60 = vadd.f32 %v12268_v24, %v12267_v56  ;;  %v16276_v63 = vld [vmem:[%s18284_s8 + $0x78] sm:$0xff]  ;;  %v11415_v12 = vcombine.high %v16258_v31, %v16264_v1 }
 0x3d8   : > { %v13840_v10 = vpop.eup %13839  ;;  %13845 = vpow2.f32 %v6128_v41  ;;  %v6060_v19 = vadd.f32 %v12266_v0, %v5963_v34  ;;  %v5966_v55 = vadd.f32 %v12205_v32, %v16198_v47  ;;  %v6157_v24 = vld [vmem:[%s16247_s21 + $0x18] sm:$0xff] }
 0x3d9   : > { %v6170_v18 = vmul.f32 %v13840_v10, %v6154_v43  ;;  %v11417_v43 = vcombine.high %v16271_v20, %v16276_v63 }
 0x3da   : > { %v13842_v51 = vpop.eup %13841  ;;  %v6110_v22 = vmul.f32 0.5, %v6060_v19  ;;  %10747 = vst [vmem:[%s16235_s22 + $0x20] sm:$0xff] %v6060_v19  ;;  %v6063_v30 = vadd.f32 %v12269_v60, %v5966_v55  ;;  %v12206_v28 = vpop.f32.mrb[172].mxu0  ;;  %v16296_v60 = vld [vmem:[%s18284_s8 + $0xb0] sm:$0xff]  ;;  %v16308_v19 = vld [vmem:[%s18284_s8 + $0xb8] sm:$0xff] }
 0x3db   : > { %v12270_v17 = vpop.f32.mrb[172].mxu1  ;;  %v12207_v54 = vpop.f32.mrb[173].mxu0  ;;  %v6171_v35 = vmul.f32 %v13842_v51, %v6155_v14  ;;  %v6186_v9 = vadd.f32 %v6170_v18, %v16043_v61  ;;  %v6156_v61 = vld [vmem:[%s16247_s21 + $0x10] sm:$0xff] }
 0x3dc   : > { %v6130_v26 = vmul.f32 1.442695, %v6110_v22  ;;  %v6111_v3 = vmul.f32 0.5, %v6063_v30  ;;  %10748 = vst [vmem:[%s16235_s22 + $0x28] sm:$0xff] %v6063_v30  ;;  %v12208_v8 = vadd.f32 %v12207_v54, %v12206_v28  ;;  %v12271_v47 = vpop.f32.mrb[173].mxu1  ;;  %v12209_v48 = vpop.f32.mrb[174].mxu0  ;;  %v11414_v22 = vcombine.low %v16258_v31, %v16264_v1 }
 0x3dd   : > { %v12272_v59 = vadd.f32 %v12271_v47, %v12270_v17  ;;  %v12273_v39 = vpop.f32.mrb[174].mxu1  ;;  %v12210_v38 = vpop.f32.mrb[175].mxu0  ;;  %v6187_v62 = vadd.f32 %v6171_v35, %v16048_v23  ;;  %v11416_v30 = vcombine.low %v16271_v20, %v16276_v63  ;;  %v6158_v63 = vld [vmem:[%s16247_s21 + $0x20] sm:$0xff] }
 0x3de   : > { %13847 = vpow2.f32 %v6130_v26  ;;  %v6132_v25 = vmul.f32 1.442695, %v6111_v3  ;;  %v5971_v58 = vadd.f32 %v12208_v8, %v16201_v13  ;;  %v12211_v53 = vadd.f32 %v12210_v38, %v12209_v48  ;;  %v12274_v0 = vpop.f32.mrb[175].mxu1  ;;  %v16291_v13 = vld [vmem:[%s18284_s8 + $0x90] sm:$0xff]  ;;  %v16347_v38 = vld [vmem:[%s18284_s8 + $0xd8] sm:$0xff] }
 0x3df   : > { %v12275_v56 = vadd.f32 %v12274_v0, %v12273_v39  ;;  %v16280_v23 = vpack.c.bf16 %v6187_v62, %v6186_v9  ;;  %v11422_v35 = vcombine.low %v16291_v13, %v16296_v60  ;;  %v11423_v31 = vcombine.high %v16291_v13, %v16296_v60  ;;  %v16330_v26 = vld [vmem:[%s18284_s8 + $0xd0] sm:$0xff]  ;;  %v16352_v9 = vld [vmem:[%s18284_s8 + $0xf8] sm:$0xff] }
 0x3e0   : > { %v13844_v41 = vpop.eup %13843  ;;  %13849 = vpow2.f32 %v6132_v25  ;;  %v6068_v34 = vadd.f32 %v12272_v59, %v5971_v58  ;;  %v5974_v32 = vadd.f32 %v12211_v53, %v16204_v7  ;;  %v16303_v7 = vld [vmem:[%s18284_s8 + $0x98] sm:$0xff]  ;;  %v11431_v53 = vcombine.high %v16330_v26, %v16338_v6 }
 0x3e1   : > { %6669 = vmatmul.mubr.bf16.vlgmr.msra.gmra.mrb[192].mxu0 %v16280_v23  ;;  %6782 = vmatmul.mubr.bf16.vlgmr.msra.gmra.mrb[192].mxu1 %v16280_v23  ;;  %v6172_v10 = vmul.f32 %v13844_v41, %v6156_v61  ;;  %v11425_v40 = vcombine.high %v16303_v7, %v16308_v19  ;;  %v11424_v39 = vcombine.low %v16303_v7, %v16308_v19  ;;  %v16367_v41 = vld [vmem:[%s18284_s8 + $0x110] sm:$0xff] }
 0x3e2   : > { %v13846_v55 = vpop.eup %13845  ;;  %v6112_v14 = vmul.f32 0.5, %v6068_v34  ;;  %10749 = vst [vmem:[%s16235_s22 + $0x30] sm:$0xff] %v6068_v34  ;;  %v6071_v18 = vadd.f32 %v12275_v56, %v5974_v32  ;;  %v12212_v51 = vpop.f32.mrb[176].mxu0  ;;  %6678 = vmatprep.mubr.bf16.mxu0 %v18395_v44  ;;  %6791 = vmatprep.mubr.bf16.mxu1 %v18395_v44  ;;  %v16372_v34 = vld [vmem:[%s18284_s8 + $0x130] sm:$0xff]  ;;  %v16379_v32 = vld [vmem:[%s18284_s8 + $0x118] sm:$0xff]  ;;  %v11430_v7 = vcombine.low %v16330_v26, %v16338_v6 }
 0x3e3   : > { %v12276_v28 = vpop.f32.mrb[176].mxu1  ;;  %v12213_v17 = vpop.f32.mrb[177].mxu0  ;;  %v6173_v54 = vmul.f32 %v13846_v55, %v6157_v24  ;;  %6863 = vmatpush1.bf16.msra.mxu0 %v11406_v57  ;;  %6976 = vmatpush1.bf16.msra.mxu1 %v11408_v36  ;;  %v6188_v1 = vadd.f32 %v6172_v10, %v16065_v37  ;;  %v16384_v24 = vld [vmem:[%s18284_s8 + $0x138] sm:$0xff]  ;;  %v11432_v19 = vcombine.low %v16347_v38, %v16352_v9 }
 0x3e4   : > { %v6134_v3 = vmul.f32 1.442695, %v6112_v14  ;;  %v6113_v8 = vmul.f32 0.5, %v6071_v18  ;;  %10750 = vst [vmem:[%s16235_s22 + $0x38] sm:$0xff] %v6071_v18  ;;  %v12214_v16 = vadd.f32 %v12213_v17, %v12212_v51  ;;  %v12277_v21 = vpop.f32.mrb[177].mxu1  ;;  %v12215_v57 = vpop.f32.mrb[178].mxu0  ;;  %6864 = vmatprep.subr.bf16.mxu0 %v11415_v12  ;;  %6977 = vmatprep.subr.bf16.mxu1 %v11417_v43  ;;  %v11438_v51 = vcombine.low %v16367_v41, %v16372_v34 }
 0x3e5   : > { %v12278_v36 = vadd.f32 %v12277_v21, %v12276_v28  ;;  %v12279_v47 = vpop.f32.mrb[178].mxu1  ;;  %v12216_v48 = vpop.f32.mrb[179].mxu0  ;;  %v6189_v59 = vadd.f32 %v6173_v54, %v16076_v52  ;;  %v6159_v12 = vld [vmem:[%s16247_s21 + $0x28] sm:$0xff]  ;;  %v11440_v6 = vcombine.low %v16379_v32, %v16384_v24 }
 0x3e6   : > { %13851 = vpow2.f32 %v6134_v3  ;;  %v6136_v62 = vmul.f32 1.442695, %v6113_v8  ;;  %v5979_v37 = vadd.f32 %v12214_v16, %v16207_v27  ;;  %v12217_v20 = vadd.f32 %v12216_v48, %v12215_v57  ;;  %v12280_v52 = vpop.f32.mrb[179].mxu1  ;;  %v16408_v3 = vld [vmem:[%s18284_s8 + $0x170] sm:$0xff] }
 0x3e7   : > { %v12281_v25 = vadd.f32 %v12280_v52, %v12279_v47  ;;  %v16356_v58 = vpack.c.bf16 %v6189_v59, %v6188_v1  ;;  %6865 = vmatpush1.bf16.msra.mxu0 %v11414_v22  ;;  %6978 = vmatpush1.bf16.msra.mxu1 %v11416_v30  ;;  %v11433_v27 = vcombine.high %v16347_v38, %v16352_v9  ;;  %v16400_v30 = vld [vmem:[%s18284_s8 + $0x150] sm:$0xff]  ;;  %v16422_v47 = vld [vmem:[%s18284_s8 + $0x178] sm:$0xff] }
 0x3e8   : > { %v13848_v0 = vpop.eup %13847  ;;  %13853 = vpow2.f32 %v6136_v62  ;;  %v6076_v61 = vadd.f32 %v12278_v36, %v5979_v37  ;;  %v5982_v56 = vadd.f32 %v12217_v20, %v16210_v15  ;;  %6866 = vmatprep.subr.bf16.mxu0 %v11423_v31  ;;  %6979 = vmatprep.subr.bf16.mxu1 %v11425_v40  ;;  %v11439_v22 = vcombine.high %v16367_v41, %v16372_v34  ;;  %v16417_v36 = vld [vmem:[%s18284_s8 + $0x158] sm:$0xff]  ;;  %v6160_v59 = vld [vmem:[%s16247_s21 + $0x30] sm:$0xff] }
 0x3e9   : > { %6679 = vmatmul.mubr.bf16.gmra.mrb[196].mxu0 %v16356_v58  ;;  %6792 = vmatmul.mubr.bf16.gmra.mrb[196].mxu1 %v16356_v58  ;;  %v6174_v15 = vmul.f32 %v13848_v0, %v6158_v63  ;;  %v11447_v9 = vcombine.high %v16400_v30, %v16408_v3  ;;  %v6161_v52 = vld [vmem:[%s16247_s21 + $0x38] sm:$0xff]  ;;  %v16437_v63 = vld [vmem:[%s18284_s8 + $0x190] sm:$0xff]  ;;  %v11446_v41 = vcombine.low %v16400_v30, %v16408_v3 }
 0x3ea   : > { %v13850_v43 = vpop.eup %13849  ;;  %v6114_v13 = vmul.f32 0.5, %v6076_v61  ;;  %10751 = vst [vmem:[%s16235_s22 + $0x40] sm:$0xff] %v6076_v61  ;;  %v6079_v60 = vadd.f32 %v12281_v25, %v5982_v56  ;;  %v12218_v10 = vpop.f32.mrb[180].mxu0  ;;  %6688 = vmatprep.mubr.bf16.mxu0 %v18395_v44  ;;  %6801 = vmatprep.mubr.bf16.mxu1 %v18395_v44  ;;  %v16442_v25 = vld [vmem:[%s18284_s8 + $0x1b0] sm:$0xff]  ;;  %v16454_v0 = vld [vmem:[%s18284_s8 + $0x1b8] sm:$0xff]  ;;  %v11448_v34 = vcombine.low %v16417_v36, %v16422_v47 }
 0x3eb   : > { %v12282_v55 = vpop.f32.mrb[180].mxu1  ;;  %v12219_v14 = vpop.f32.mrb[181].mxu0  ;;  %v6175_v18 = vmul.f32 %v13850_v43, %v6159_v12  ;;  %6867 = vmatpush1.bf16.msra.mxu0 %v11422_v35  ;;  %6980 = vmatpush1.bf16.msra.mxu1 %v11424_v39  ;;  %v11441_v35 = vcombine.high %v16379_v32, %v16384_v24  ;;  %v6190_v57 = vadd.f32 %v6174_v15, %v16096_v49 }
 0x3ec   : > { %v6138_v28 = vmul.f32 1.442695, %v6114_v13  ;;  %v6115_v17 = vmul.f32 0.5, %v6079_v60  ;;  %10752 = vst [vmem:[%s16235_s22 + $0x48] sm:$0xff] %v6079_v60  ;;  %v12220_v54 = vadd.f32 %v12219_v14, %v12218_v10  ;;  %v12283_v31 = vpop.f32.mrb[181].mxu1  ;;  %v12221_v26 = vpop.f32.mrb[182].mxu0  ;;  %6868 = vmatprep.subr.bf16.mxu0 %v11431_v53  ;;  %6981 = vmatprep.subr.bf16.mxu1 %v11433_v27  ;;  %v11454_v43 = vcombine.low %v16437_v63, %v16442_v25 }
 0x3ed   : > { %v12284_v8 = vadd.f32 %v12283_v31, %v12282_v55  ;;  %v12285_v16 = vpop.f32.mrb[182].mxu1  ;;  %v12222_v21 = vpop.f32.mrb[183].mxu0  ;;  %v6191_v40 = vadd.f32 %v6175_v18, %v16104_v45  ;;  %v16449_v53 = vld [vmem:[%s18284_s8 + $0x198] sm:$0xff]  ;;  %v11455_v13 = vcombine.high %v16437_v63, %v16442_v25  ;;  %v16470_v60 = vld [vmem:[%s18284_s8 + $0x1d0] sm:$0xff] }
 0x3ee   : > { %13855 = vpow2.f32 %v6138_v28  ;;  %v6140_v48 = vmul.f32 1.442695, %v6115_v17  ;;  %v5987_v49 = vadd.f32 %v12220_v54, %v16213_v42  ;;  %v12223_v1 = vadd.f32 %v12222_v21, %v12221_v26  ;;  %v12286_v45 = vpop.f32.mrb[183].mxu1  ;;  %v16487_v26 = vld [vmem:[%s18284_s8 + $0x1d8] sm:$0xff] }
 0x3ef   : > { %v12287_v39 = vadd.f32 %v12286_v45, %v12285_v16  ;;  %v16426_v38 = vpack.c.bf16 %v6191_v40, %v6190_v57  ;;  %6869 = vmatpush1.bf16.msra.mxu0 %v11430_v7  ;;  %6982 = vmatpush1.bf16.msra.mxu1 %v11432_v19  ;;  %v11449_v42 = vcombine.high %v16417_v36, %v16422_v47  ;;  %v6162_v16 = vld [vmem:[%s16247_s21 + $0x40] sm:$0xff] }
 0x3f0   : > { %v13852_v62 = vpop.eup %13851  ;;  %13857 = vpow2.f32 %v6140_v48  ;;  %v6084_v37 = vadd.f32 %v12284_v8, %v5987_v49  ;;  %v5990_v20 = vadd.f32 %v12223_v1, %v16216_v46  ;;  %6870 = vmatprep.subr.bf16.mxu0 %v11439_v22  ;;  %6983 = vmatprep.subr.bf16.mxu1 %v11441_v35  ;;  %v11457_v18 = vcombine.high %v16449_v53, %v16454_v0  ;;  %v16492_v35 = vld [vmem:[%s18284_s8 + $0x1f8] sm:$0xff]  ;;  %v6163_v48 = vld [vmem:[%s16247_s21 + $0x48] sm:$0xff] }
 0x3f1   : > { %6689 = vmatmul.mubr.bf16.gmra.mrb[200].mxu0 %v16426_v38  ;;  %6802 = vmatmul.mubr.bf16.gmra.mrb[200].mxu1 %v16426_v38  ;;  %v6176_v46 = vmul.f32 %v13852_v62, %v6160_v59  ;;  %v11456_v31 = vcombine.low %v16449_v53, %v16454_v0 }
 0x3f2   : > { %v13854_v61 = vpop.eup %13853  ;;  %v6116_v56 = vmul.f32 0.5, %v6084_v37  ;;  %10753 = vst [vmem:[%s16235_s22 + $0x50] sm:$0xff] %v6084_v37  ;;  %v6087_v12 = vadd.f32 %v12287_v39, %v5990_v20  ;;  %v12224_v27 = vpop.f32.mrb[184].mxu0  ;;  %6698 = vmatprep.mubr.bf16.mxu0 %v18395_v44  ;;  %6811 = vmatprep.mubr.bf16.mxu1 %v18395_v44  ;;  %v11464_v20 = vcombine.low %v16487_v26, %v16492_v35 }
 0x3f3   : > { %v12288_v15 = vpop.f32.mrb[184].mxu1  ;;  %v12225_v32 = vpop.f32.mrb[185].mxu0  ;;  %v6177_v24 = vmul.f32 %v13854_v61, %v6161_v52  ;;  %6871 = vmatpush1.bf16.msra.mxu0 %v11438_v51  ;;  %6984 = vmatpush1.bf16.msra.mxu1 %v11440_v6  ;;  %v16478_v51 = vld [vmem:[%s18284_s8 + $0x1f0] sm:$0xff]  ;;  %v6192_v17 = vadd.f32 %v6176_v46, %v16121_v4  ;;  %v13393_v52 = vld [vmem:[%s18286_s10 + $0x4] ss:$20 sps:$4 sm:$0xff]  }
 0x3f4   : > { %v6142_v10 = vmul.f32 1.442695, %v6116_v56  ;;  %v6117_v7 = vmul.f32 0.5, %v6087_v12  ;;  %10754 = vst [vmem:[%s16235_s22 + $0x58] sm:$0xff] %v6087_v12  ;;  %v12226_v19 = vadd.f32 %v12225_v32, %v12224_v27  ;;  %v12289_v55 = vpop.f32.mrb[185].mxu1  ;;  %v12227_v14 = vpop.f32.mrb[186].mxu0  ;;  %6872 = vmatprep.subr.bf16.mxu0 %v11447_v9  ;;  %6985 = vmatprep.subr.bf16.mxu1 %v11449_v42  ;;  %v11463_v40 = vcombine.high %v16470_v60, %v16478_v51 }
 0x3f5   : > { %v12290_v22 = vadd.f32 %v12289_v55, %v12288_v15  ;;  %v12291_v30 = vpop.f32.mrb[186].mxu1  ;;  %v12228_v28 = vpop.f32.mrb[187].mxu0  ;;  %v6193_v54 = vadd.f32 %v6177_v24, %v16126_v11  ;;  %v11462_v37 = vcombine.low %v16470_v60, %v16478_v51  ;;  %v13396_v42 = vld [vmem:[%s18286_s10 + $0xc] ss:$20 sps:$4 sm:$0xff]   ;;  %v6164_v60 = vld [vmem:[%s16247_s21 + $0x50] sm:$0xff] }
 0x3f6   : > { %13859 = vpow2.f32 %v6142_v10  ;;  %v6144_v3 = vmul.f32 1.442695, %v6117_v7  ;;  %v5995_v4 = vadd.f32 %v12226_v19, %v16219_v2  ;;  %v12229_v8 = vadd.f32 %v12228_v28, %v12227_v14  ;;  %v12292_v11 = vpop.f32.mrb[187].mxu1  ;;  %v13911_v27 = vld [vmem:[%s16035_s20 + $0x40] sm:$0xff] }
 0x3f7   : > { %v12293_v21 = vadd.f32 %v12292_v11, %v12291_v30  ;;  %v16496_v57 = vpack.c.bf16 %v6193_v54, %v6192_v17  ;;  %6873 = vmatpush1.bf16.msra.mxu0 %v11446_v41  ;;  %6986 = vmatpush1.bf16.msra.mxu1 %v11448_v34  ;;  %v11465_v2 = vcombine.high %v16487_v26, %v16492_v35  ;;  %v13912_v34 = vld [vmem:[%s16035_s20 + $0x48] sm:$0xff]  ;;  %v13913_v54 = vld [vmem:[%s16035_s20 + $0x50] sm:$0xff]  ;;  %v13914_v26 = vld [vmem:[%s16035_s20 + $0x58] sm:$0xff] }
 0x3f8   : > { %v13856_v6 = vpop.eup %13855  ;;  %13861 = vpow2.f32 %v6144_v3  ;;  %v6092_v36 = vadd.f32 %v12290_v22, %v5995_v4  ;;  %v5998_v47 = vadd.f32 %v12229_v8, %v16222_v33  ;;  %6874 = vmatprep.subr.bf16.mxu0 %v11455_v13  ;;  %6987 = vmatprep.subr.bf16.mxu1 %v11457_v18  ;;  %v6165_v18 = vld [vmem:[%s16247_s21 + $0x58] sm:$0xff]  ;;  %v6166_v4 = vld [vmem:[%s16247_s21 + $0x60] sm:$0xff] }
 0x3f9   : > { %6699 = vmatmul.mubr.bf16.gmra.mrb[204].mxu0 %v16496_v57  ;;  %6812 = vmatmul.mubr.bf16.gmra.mrb[204].mxu1 %v16496_v57  ;;  %v6178_v49 = vmul.f32 %v13856_v6, %v6162_v16  ;;  %v6167_v16 = vld [vmem:[%s16247_s21 + $0x68] sm:$0xff] }
 0x3fa   : > { %v13858_v1 = vpop.eup %13857  ;;  %v6118_v45 = vmul.f32 0.5, %v6092_v36  ;;  %10755 = vst [vmem:[%s16235_s22 + $0x60] sm:$0xff] %v6092_v36  ;;  %v6095_v59 = vadd.f32 %v12293_v21, %v5998_v47  ;;  %v12230_v39 = vpop.f32.mrb[188].mxu0  ;;  %6708 = vmatprep.mubr.bf16.mxu0 %v18395_v44  ;;  %6821 = vmatprep.mubr.bf16.mxu1 %v18395_v44  ;;  %v13915_v36 = vld [vmem:[%s16035_s20 + $0x60] sm:$0xff] }
 0x3fb   : > { %v12294_v33 = vpop.f32.mrb[188].mxu1  ;;  %v12231_v9 = vpop.f32.mrb[189].mxu0  ;;  %v6179_v62 = vmul.f32 %v13858_v1, %v6163_v48  ;;  %6875 = vmatpush1.bf16.msra.mxu0 %v11454_v43  ;;  %6988 = vmatpush1.bf16.msra.mxu1 %v11456_v31  ;;  %v6194_v41 = vadd.f32 %v13911_v27, %v6178_v49  ;;  %v13916_v48 = vld [vmem:[%s16035_s20 + $0x68] sm:$0xff]  ;;  %v6168_v49 = vld [vmem:[%s16247_s21 + $0x70] sm:$0xff]  ;;  %v13414_v27 = vld [vmem:[%s18286_s10 + $0x84] ss:$20 sps:$4 sm:$0xff]  }
 0x3fc   : > { %v6146_v63 = vmul.f32 1.442695, %v6118_v45  ;;  %v6119_v25 = vmul.f32 0.5, %v6095_v59  ;;  %10756 = vst [vmem:[%s16235_s22 + $0x68] sm:$0xff] %v6095_v59  ;;  %v12232_v46 = vadd.f32 %v12231_v9, %v12230_v39  ;;  %v12295_v53 = vpop.f32.mrb[189].mxu1  ;;  %v12233_v0 = vpop.f32.mrb[190].mxu0  ;;  %6876 = vmatprep.subr.bf16.mxu0 %v11463_v40  ;;  %6989 = vmatprep.subr.bf16.mxu1 %v11465_v2 }
 0x3fd   : > { %v12296_v61 = vadd.f32 %v12295_v53, %v12294_v33  ;;  %v12297_v56 = vpop.f32.mrb[190].mxu1  ;;  %v12234_v12 = vpop.f32.mrb[191].mxu0  ;;  %v6195_v15 = vadd.f32 %v13912_v34, %v6179_v62  ;;  %v6169_v59 = vld [vmem:[%s16247_s21 + $0x78] sm:$0xff]  ;;  %v13917_v62 = vld [vmem:[%s16035_s20 + $0x70] sm:$0xff] }
 0x3fe   : > { %13863 = vpow2.f32 %v6146_v63  ;;  %v6148_v32 = vmul.f32 1.442695, %v6119_v25  ;;  %v6003_v24 = vadd.f32 %v12232_v46, %v16225_v50  ;;  %v12235_v43 = vadd.f32 %v12234_v12, %v12233_v0  ;;  %v12298_v13 = vpop.f32.mrb[191].mxu1  ;;  %v13394_v63 = vld [vmem:[%s18286_s10 + $0x8] ss:$20 sps:$4 sm:$0xff]  }
 0x3ff   : > { %v12299_v10 = vadd.f32 %v12298_v13, %v12297_v56  ;;  %v16524_v7 = vpack.c.bf16 %v6195_v15, %v6194_v41  ;;  %6877 = vmatpush1.bf16.msra.mxu0 %v11462_v37  ;;  %6990 = vmatpush1.bf16.msra.mxu1 %v11464_v20  ;;  %v13402_v25 = vld [vmem:[%s18286_s10 + $0x34] ss:$20 sps:$4 sm:$0xff]   ;;  %v13400_v53 = vld [vmem:[%s18286_s10 + $0x30] ss:$20 sps:$4 sm:$0xff]   ;;  %v13406_v56 = vld [vmem:[%s18286_s10 + $0x58] ss:$20 sps:$4 sm:$0xff]  }
 0x400   : > { %v13860_v19 = vpop.eup %13859  ;;  %13865 = vpow2.f32 %v6148_v32  ;;  %v6100_v55 = vadd.f32 %v12296_v61, %v6003_v24  ;;  %v6006_v14 = vadd.f32 %v12235_v43, %v16228_v29  ;;  %9355 = vmatprep.subr.bf16.mxu0 %v13393_v52  ;;  %9807 = vmatprep.subr.bf16.mxu1 %v13396_v42  ;;  %v13391_v42 = vld [vmem:[%s18286_s10] ss:$20 sps:$4 sm:$0xff]   ;;  %v13397_v46 = vld [vmem:[%s18286_s10 + $0x28] ss:$20 sps:$4 sm:$0xff]   ;;  %v13403_v61 = vld [vmem:[%s18286_s10 + $0x50] ss:$20 sps:$4 sm:$0xff]  }
 0x401   : > { %6709 = vmatmul.mubr.bf16.gmra.mrb[208].mxu0 %v16524_v7  ;;  %6822 = vmatmul.mubr.bf16.gmra.mrb[208].mxu1 %v16524_v7  ;;  %v6180_v50 = vmul.f32 %v13860_v19, %v6164_v60  ;;  %v13408_v0 = vld [vmem:[%s18286_s10 + $0x5c] ss:$20 sps:$4 sm:$0xff]   ;;  %v13409_v41 = vld [vmem:[%s18286_s10 + $0x78] ss:$20 sps:$4 sm:$0xff]   ;;  %v13412_v34 = vld [vmem:[%s18286_s10 + $0x80] ss:$20 sps:$4 sm:$0xff]  }
 0x402   : > { %v13862_v51 = vpop.eup %13861  ;;  %v6120_v22 = vmul.f32 0.5, %v6100_v55  ;;  %10757 = vst [vmem:[%s16235_s22 + $0x70] sm:$0xff] %v6100_v55  ;;  %v6103_v30 = vadd.f32 %v12299_v10, %v6006_v14  ;;  %6718 = vmatprep.mubr.bf16.mxu0 %v18395_v44  ;;  %6831 = vmatprep.mubr.bf16.mxu1 %v18395_v44  ;;  %v13411_v12 = vld [vmem:[%s18286_s10 + $0x7c] ss:$20 sps:$4 sm:$0xff]   ;;  %v13420_v15 = vld [vmem:[%s18286_s10 + $0xac] ss:$20 sps:$4 sm:$0xff]  }
 0x403   : > { %v6181_v29 = vmul.f32 %v13862_v51, %v6165_v18  ;;  %v6196_v31 = vadd.f32 %v13913_v54, %v6180_v50  ;;  %v13415_v32 = vld [vmem:[%s18286_s10 + $0xa0] ss:$20 sps:$4 sm:$0xff]   ;;  %v13418_v24 = vld [vmem:[%s18286_s10 + $0xa8] ss:$20 sps:$4 sm:$0xff]   ;;  %v13424_v10 = vld [vmem:[%s18286_s10 + $0xd0] ss:$20 sps:$4 sm:$0xff]  }
 0x404   : > { %v6150_v28 = vmul.f32 1.442695, %v6120_v22  ;;  %v6121_v17 = vmul.f32 0.5, %v6103_v30  ;;  %10758 = vst [vmem:[%s16235_s22 + $0x78] sm:$0xff] %v6103_v30  ;;  %v13423_v43 = vld [vmem:[%s18286_s10 + $0xcc] ss:$20 sps:$4 sm:$0xff]  }
 0x405   : > { %v6197_v35 = vadd.f32 %v13914_v26, %v6181_v29  ;;  %v13426_v13 = vld [vmem:[%s18286_s10 + $0xd4] ss:$20 sps:$4 sm:$0xff]   ;;  %v13432_v19 = vld [vmem:[%s18286_s10 + $0xfc] ss:$20 sps:$4 sm:$0xff]   ;;  %v13430_v14 = vld [vmem:[%s18286_s10 + $0xf8] ss:$20 sps:$4 sm:$0xff]  }
 0x406   : > { %13867 = vpow2.f32 %v6150_v28  ;;  %v6152_v3 = vmul.f32 1.442695, %v6121_v17  ;;  %v13421_v60 = vld [vmem:[%s18286_s10 + $0xc8] ss:$20 sps:$4 sm:$0xff]   ;;  %v13427_v55 = vld [vmem:[%s18286_s10 + $0xf0] ss:$20 sps:$4 sm:$0xff]  }
 0x407   : > { %v16537_v8 = vpack.c.bf16 %v6197_v35, %v6196_v31  ;;  %v13435_v18 = vld [vmem:[%s18286_s10 + $0x11c] ss:$20 sps:$4 sm:$0xff]   ;;  %v13438_v50 = vld [vmem:[%s18286_s10 + $0x124] ss:$20 sps:$4 sm:$0xff]   ;;  %v13436_v22 = vld [vmem:[%s18286_s10 + $0x120] ss:$20 sps:$4 sm:$0xff]  }
 0x408   : > { %v13864_v11 = vpop.eup %13863  ;;  %13869 = vpow2.f32 %v6152_v3  ;;  %v13433_v51 = vld [vmem:[%s18286_s10 + $0x118] ss:$20 sps:$4 sm:$0xff]   ;;  %v13439_v29 = vld [vmem:[%s18286_s10 + $0x140] ss:$20 sps:$4 sm:$0xff]   ;;  %v13442_v28 = vld [vmem:[%s18286_s10 + $0x148] ss:$20 sps:$4 sm:$0xff]  }
 0x409   : > { %6719 = vmatmul.mubr.bf16.gmra.mrb[212].mxu0 %v16537_v8  ;;  %6832 = vmatmul.mubr.bf16.gmra.mrb[212].mxu1 %v16537_v8  ;;  %v6182_v21 = vmul.f32 %v13864_v11, %v6166_v4  ;;  %v13444_v30 = vld [vmem:[%s18286_s10 + $0x14c] ss:$20 sps:$4 sm:$0xff]   ;;  %v13450_v54 = vld [vmem:[%s18286_s10 + $0x174] ss:$20 sps:$4 sm:$0xff]   ;;  %v13448_v26 = vld [vmem:[%s18286_s10 + $0x170] ss:$20 sps:$4 sm:$0xff]  }
 0x40a   : > { %v13866_v40 = vpop.eup %13865  ;;  %6728 = vmatprep.mubr.bf16.mxu0 %v18395_v44  ;;  %6841 = vmatprep.mubr.bf16.mxu1 %v18395_v44  ;;  %v13447_v17 = vld [vmem:[%s18286_s10 + $0x16c] ss:$20 sps:$4 sm:$0xff]   ;;  %v13445_v31 = vld [vmem:[%s18286_s10 + $0x168] ss:$20 sps:$4 sm:$0xff]   ;;  %v13451_v3 = vld [vmem:[%s18286_s10 + $0x190] ss:$20 sps:$4 sm:$0xff]  }
 0x40b   : > { %v6183_v6 = vmul.f32 %v13866_v40, %v6167_v16  ;;  %v6198_v47 = vadd.f32 %v13915_v36, %v6182_v21  ;;  %v13456_v35 = vld [vmem:[%s18286_s10 + $0x19c] ss:$20 sps:$4 sm:$0xff]   ;;  %v13454_v4 = vld [vmem:[%s18286_s10 + $0x198] ss:$20 sps:$4 sm:$0xff]   ;;  %v13460_v40 = vld [vmem:[%s18286_s10 + $0x1c0] ss:$20 sps:$4 sm:$0xff]  }
 0x40c   : > { %v13459_v11 = vld [vmem:[%s18286_s10 + $0x1bc] ss:$20 sps:$4 sm:$0xff]   ;;  %v13462_v16 = vld [vmem:[%s18286_s10 + $0x1c4] ss:$20 sps:$4 sm:$0xff]   ;;  %v13463_v36 = vld [vmem:[%s18286_s10 + $0x1e0] ss:$20 sps:$4 sm:$0xff]  }
 0x40d   : > { %v6199_v2 = vadd.f32 %v13916_v48, %v6183_v6  ;;  %v13457_v21 = vld [vmem:[%s18286_s10 + $0x1b8] ss:$20 sps:$4 sm:$0xff]  }
 0x40e   : > { %v13468_v6 = vld [vmem:[%s18286_s10 + $0x1ec] ss:$20 sps:$4 sm:$0xff]  }
 0x40f   : > { %v16547_v1 = vpack.c.bf16 %v6199_v2, %v6198_v47  ;;  %v13466_v47 = vld [vmem:[%s18286_s10 + $0x1e8] ss:$20 sps:$4 sm:$0xff]   ;;  %v13471_v48 = vld [vmem:[%s18286_s10 + $0x20c] ss:$20 sps:$4 sm:$0xff]  }
 0x410   : > { %v13868_v45 = vpop.eup %13867  ;;  %v13474_v2 = vld [vmem:[%s18286_s10 + $0x214] ss:$20 sps:$4 sm:$0xff]  }
 0x411   : > { %6729 = vmatmul.mubr.bf16.gmra.mrb[216].mxu0 %v16547_v1  ;;  %6842 = vmatmul.mubr.bf16.gmra.mrb[216].mxu1 %v16547_v1  ;;  %v6184_v39 = vmul.f32 %v13868_v45, %v6168_v49  ;;  %v13469_v49 = vld [vmem:[%s18286_s10 + $0x208] ss:$20 sps:$4 sm:$0xff]   ;;  %v13472_v45 = vld [vmem:[%s18286_s10 + $0x210] ss:$20 sps:$4 sm:$0xff]  }
 0x412   : > { %v13870_v33 = vpop.eup %13869  ;;  %6738 = vmatprep.mubr.bf16.mxu0 %v18395_v44  ;;  %6851 = vmatprep.mubr.bf16.mxu1 %v18395_v44 }
 0x413   : > { %v6185_v9 = vmul.f32 %v13870_v33, %v6169_v59  ;;  %v6200_v37 = vadd.f32 %v13917_v62, %v6184_v39  ;;  %v13475_v59 = vld [vmem:[%s18286_s10 + $0x230] ss:$20 sps:$4 sm:$0xff]   ;;  %v13478_v39 = vld [vmem:[%s18286_s10 + $0x238] ss:$20 sps:$4 sm:$0xff]  }
 0x414   : > { %v13483_v33 = vld [vmem:[%s18286_s10 + $0x25c] ss:$20 sps:$4 sm:$0xff]   ;;  %v13481_v62 = vld [vmem:[%s18286_s10 + $0x258] ss:$20 sps:$4 sm:$0xff]  }
 0x415   : > { %v6201_v20 = vadd.f32 %v6185_v9, %v16173_v5  ;;  %v13399_v5 = vld [vmem:[%s18286_s10 + $0x2c] ss:$20 sps:$4 sm:$0xff]   ;;  %v13486_v9 = vld [vmem:[%s18286_s10 + $0x264] ss:$20 sps:$4 sm:$0xff]  }
 0x417   : > { %v16556_v52 = vpack.c.bf16 %v6201_v20, %v6200_v37  ;;  %v13484_v37 = vld [vmem:[%s18286_s10 + $0x260] ss:$20 sps:$4 sm:$0xff]   ;;  %v13489_v20 = vld [vmem:[%s18286_s10 + $0x284] ss:$20 sps:$4 sm:$0xff]  }
 0x419   : > { %6739 = vmatmul.mubr.bf16.gmra.mrb[220].mxu0 %v16556_v52  ;;  %6852 = vmatmul.mubr.bf16.gmra.mrb[220].mxu1 %v16556_v52 }
 0x41a   : > { %6894 = vmatprep.mubr.bf16.mxu0 %v18395_v44  ;;  %7007 = vmatprep.mubr.bf16.mxu1 %v18395_v44 }
 0x421   : > { %6895 = vmatmul.mubr.bf16.vlgmr.msra.gmra.mrb[224].mxu0 %v16280_v23  ;;  %7008 = vmatmul.mubr.bf16.vlgmr.msra.gmra.mrb[224].mxu1 %v16280_v23  ;;  %v13405_v23 = vld [vmem:[%s18286_s10 + $0x54] ss:$20 sps:$4 sm:$0xff]  }
 0x422   : > { %6904 = vmatprep.mubr.bf16.mxu0 %v18395_v44  ;;  %7017 = vmatprep.mubr.bf16.mxu1 %v18395_v44 }
 0x423   : > { %9356 = vmatpush1.bf16.msra.mxu0 %v13391_v42  ;;  %9808 = vmatpush1.bf16.msra.mxu1 %v13394_v63  ;;  %v16787_v42 = vld [vmem:[%s18285_s9] sm:$0xff]  ;;  %v18396_v63 = vld [vmem:[#allocation3_spill] sm:$0xff] }
 0x424   : > { %9357 = vmatprep.subr.bf16.mxu0 %v13399_v5  ;;  %9809 = vmatprep.subr.bf16.mxu1 %v13402_v25  ;;  %v16791_v5 = vrot.slane %v16787_v42, %v18396_v63  ;;  %v18397_v25 = vld [vmem:[#allocation4_spill] sm:$0xff] }
 0x427   : > { %9358 = vmatpush1.bf16.msra.mxu0 %v13397_v46  ;;  %9810 = vmatpush1.bf16.msra.mxu1 %v13400_v53  ;;  %v16795_v46 = vrot.slane %v16787_v42, %v18397_v25  ;;  %v18398_v53 = vld [vmem:[#allocation5_spill] sm:$0xff] }
 0x428   : > { %9359 = vmatprep.subr.bf16.mxu0 %v13405_v23  ;;  %9811 = vmatprep.subr.bf16.mxu1 %v13408_v0  ;;  %v16799_v23 = vrot.slane %v16787_v42, %v18398_v53  ;;  %v18399_v0 = vld [vmem:[#allocation6_spill] sm:$0xff] }
 0x429   : > { %6905 = vmatmul.mubr.bf16.gmra.mrb[228].mxu0 %v16356_v58  ;;  %7018 = vmatmul.mubr.bf16.gmra.mrb[228].mxu1 %v16356_v58  ;;  %v13417_v58 = vld [vmem:[%s18286_s10 + $0xa4] ss:$20 sps:$4 sm:$0xff]  }
 0x42a   : > { %6914 = vmatprep.mubr.bf16.mxu0 %v18395_v44  ;;  %7027 = vmatprep.mubr.bf16.mxu1 %v18395_v44 }
 0x42b   : > { %9360 = vmatpush1.bf16.msra.mxu0 %v13403_v61  ;;  %9812 = vmatpush1.bf16.msra.mxu1 %v13406_v56  ;;  %v16803_v61 = vrot.slane %v16787_v42, %v18399_v0 }
 0x42c   : > { %9361 = vmatprep.subr.bf16.mxu0 %v13411_v12  ;;  %9813 = vmatprep.subr.bf16.mxu1 %v13414_v27 }
 0x42f   : > { %9362 = vmatpush1.bf16.msra.mxu0 %v13409_v41  ;;  %9814 = vmatpush1.bf16.msra.mxu1 %v13412_v34 }
 0x430   : > { %9363 = vmatprep.subr.bf16.mxu0 %v13417_v58  ;;  %9815 = vmatprep.subr.bf16.mxu1 %v13420_v15 }
 0x431   : > { %6915 = vmatmul.mubr.bf16.gmra.mrb[232].mxu0 %v16426_v38  ;;  %7028 = vmatmul.mubr.bf16.gmra.mrb[232].mxu1 %v16426_v38  ;;  %v13429_v38 = vld [vmem:[%s18286_s10 + $0xf4] ss:$20 sps:$4 sm:$0xff]  }
 0x432   : > { %6924 = vmatprep.mubr.bf16.mxu0 %v18395_v44  ;;  %7037 = vmatprep.mubr.bf16.mxu1 %v18395_v44 }
 0x433   : > { %9364 = vmatpush1.bf16.msra.mxu0 %v13415_v32  ;;  %9816 = vmatpush1.bf16.msra.mxu1 %v13418_v24 }
 0x434   : > { %9365 = vmatprep.subr.bf16.mxu0 %v13423_v43  ;;  %9817 = vmatprep.subr.bf16.mxu1 %v13426_v13 }
 0x437   : > { %9366 = vmatpush1.bf16.msra.mxu0 %v13421_v60  ;;  %9818 = vmatpush1.bf16.msra.mxu1 %v13424_v10 }
 0x438   : > { %9367 = vmatprep.subr.bf16.mxu0 %v13429_v38  ;;  %9819 = vmatprep.subr.bf16.mxu1 %v13432_v19 }
 0x439   : > { %6925 = vmatmul.mubr.bf16.gmra.mrb[236].mxu0 %v16496_v57  ;;  %7038 = vmatmul.mubr.bf16.gmra.mrb[236].mxu1 %v16496_v57  ;;  %v13441_v57 = vld [vmem:[%s18286_s10 + $0x144] ss:$20 sps:$4 sm:$0xff]  }
 0x43a   : > { %6934 = vmatprep.mubr.bf16.mxu0 %v18395_v44  ;;  %7047 = vmatprep.mubr.bf16.mxu1 %v18395_v44 }
 0x43b   : > { %9368 = vmatpush1.bf16.msra.mxu0 %v13427_v55  ;;  %9820 = vmatpush1.bf16.msra.mxu1 %v13430_v14 }
 0x43c   : > { %9369 = vmatprep.subr.bf16.mxu0 %v13435_v18  ;;  %9821 = vmatprep.subr.bf16.mxu1 %v13438_v50 }
 0x43f   : > { %9370 = vmatpush1.bf16.msra.mxu0 %v13433_v51  ;;  %9822 = vmatpush1.bf16.msra.mxu1 %v13436_v22 }
 0x440   : > { %9371 = vmatprep.subr.bf16.mxu0 %v13441_v57  ;;  %9823 = vmatprep.subr.bf16.mxu1 %v13444_v30 }
 0x441   : > { %6935 = vmatmul.mubr.bf16.gmra.mrb[240].mxu0 %v16524_v7  ;;  %7048 = vmatmul.mubr.bf16.gmra.mrb[240].mxu1 %v16524_v7  ;;  %v13453_v7 = vld [vmem:[%s18286_s10 + $0x194] ss:$20 sps:$4 sm:$0xff]  }
 0x442   : > { %6944 = vmatprep.mubr.bf16.mxu0 %v18395_v44  ;;  %7057 = vmatprep.mubr.bf16.mxu1 %v18395_v44 }
 0x443   : > { %9372 = vmatpush1.bf16.msra.mxu0 %v13439_v29  ;;  %9824 = vmatpush1.bf16.msra.mxu1 %v13442_v28 }
 0x444   : > { %9373 = vmatprep.subr.bf16.mxu0 %v13447_v17  ;;  %9825 = vmatprep.subr.bf16.mxu1 %v13450_v54 }
 0x447   : > { %9374 = vmatpush1.bf16.msra.mxu0 %v13445_v31  ;;  %9826 = vmatpush1.bf16.msra.mxu1 %v13448_v26 }
 0x448   : > { %9375 = vmatprep.subr.bf16.mxu0 %v13453_v7  ;;  %9827 = vmatprep.subr.bf16.mxu1 %v13456_v35  ;;  %v13487_v35 = vld [vmem:[%s18286_s10 + $0x280] ss:$20 sps:$4 sm:$0xff]  }
 0x449   : > { %6945 = vmatmul.mubr.bf16.gmra.mrb[244].mxu0 %v16537_v8  ;;  %7058 = vmatmul.mubr.bf16.gmra.mrb[244].mxu1 %v16537_v8  ;;  %v13465_v8 = vld [vmem:[%s18286_s10 + $0x1e4] ss:$20 sps:$4 sm:$0xff]  }
 0x44a   : > { %6954 = vmatprep.mubr.bf16.mxu0 %v18395_v44  ;;  %7067 = vmatprep.mubr.bf16.mxu1 %v18395_v44 }
 0x44b   : > { %9376 = vmatpush1.bf16.msra.mxu0 %v13451_v3  ;;  %9828 = vmatpush1.bf16.msra.mxu1 %v13454_v4  ;;  %v13490_v3 = vld [vmem:[%s18286_s10 + $0x288] ss:$20 sps:$4 sm:$0xff]  }
 0x44c   : > { %9377 = vmatprep.subr.bf16.mxu0 %v13459_v11  ;;  %9829 = vmatprep.subr.bf16.mxu1 %v13462_v16 }
 0x44f   : > { %9378 = vmatpush1.bf16.msra.mxu0 %v13457_v21  ;;  %9830 = vmatpush1.bf16.msra.mxu1 %v13460_v40  ;;  %v13495_v40 = vld [vmem:[%s18286_s10 + $0x2ac] ss:$20 sps:$4 sm:$0xff]  }
 0x450   : > { %9379 = vmatprep.subr.bf16.mxu0 %v13465_v8  ;;  %9831 = vmatprep.subr.bf16.mxu1 %v13468_v6  ;;  %v13498_v8 = vld [vmem:[%s18286_s10 + $0x2b4] ss:$20 sps:$4 sm:$0xff]  }
 0x451   : > { %6955 = vmatmul.mubr.bf16.gmra.mrb[248].mxu0 %v16547_v1  ;;  %7068 = vmatmul.mubr.bf16.gmra.mrb[248].mxu1 %v16547_v1  ;;  %v13477_v1 = vld [vmem:[%s18286_s10 + $0x234] ss:$20 sps:$4 sm:$0xff]  }
 0x452   : > { %6964 = vmatprep.mubr.bf16.mxu0 %v18395_v44  ;;  %7077 = vmatprep.mubr.bf16.mxu1 %v18395_v44  ;;  %v13480_v44 = vld [vmem:[%s18286_s10 + $0x23c] ss:$20 sps:$4 sm:$0xff]  }
 0x453   : > { %9380 = vmatpush1.bf16.msra.mxu0 %v13463_v36  ;;  %9832 = vmatpush1.bf16.msra.mxu1 %v13466_v47 }
 0x454   : > { %9381 = vmatprep.subr.bf16.mxu0 %v13471_v48  ;;  %9833 = vmatprep.subr.bf16.mxu1 %v13474_v2 }
 0x457   : > { %9382 = vmatpush1.bf16.msra.mxu0 %v13469_v49  ;;  %9834 = vmatpush1.bf16.msra.mxu1 %v13472_v45 }
 0x458   : > { %9383 = vmatprep.subr.bf16.mxu0 %v13477_v1  ;;  %9835 = vmatprep.subr.bf16.mxu1 %v13480_v44 }
 0x459   : > { %6965 = vmatmul.mubr.bf16.gmra.mrb[252].mxu0 %v16556_v52  ;;  %7078 = vmatmul.mubr.bf16.gmra.mrb[252].mxu1 %v16556_v52  ;;  %v13492_v52 = vld [vmem:[%s18286_s10 + $0x28c] ss:$20 sps:$4 sm:$0xff]  }
 0x45b   : > { %9384 = vmatpush1.bf16.msra.mxu0 %v13475_v59  ;;  %9836 = vmatpush1.bf16.msra.mxu1 %v13478_v39  ;;  %v13493_v39 = vld [vmem:[%s18286_s10 + $0x2a8] ss:$20 sps:$4 sm:$0xff]  }
 0x45c   : > { %9385 = vmatprep.subr.bf16.mxu0 %v13483_v33  ;;  %9837 = vmatprep.subr.bf16.mxu1 %v13486_v9  ;;  %v13496_v33 = vld [vmem:[%s18286_s10 + $0x2b0] ss:$20 sps:$4 sm:$0xff]   ;;  %v13501_v9 = vld [vmem:[%s18286_s10 + $0x2d4] ss:$20 sps:$4 sm:$0xff]  }
 0x45f   : > { %9386 = vmatpush1.bf16.msra.mxu0 %v13481_v62  ;;  %9838 = vmatpush1.bf16.msra.mxu1 %v13484_v37 }
 0x460   : > { %9468 = vmatprep.subr.bf16.mxu0 %v13489_v20  ;;  %9920 = vmatprep.subr.bf16.mxu1 %v13492_v52 }
 0x4b4   : > { %v6670_v56 = vpop.f32.mrb[192].mxu0  ;;  %v6783_v12 = vpop.f32.mrb[192].mxu1 }
 0x4b5   : > { %v6671_v27 = vadd.f32 %v6670_v56, %v16791_v5  ;;  %v6784_v41 = vadd.f32 %v6783_v12, %v16795_v46  ;;  %v6672_v34 = vpop.f32.mrb[193].mxu0  ;;  %v6785_v58 = vpop.f32.mrb[193].mxu1  ;;  %v13504_v56 = vld [vmem:[%s18286_s10 + $0x2dc] ss:$20 sps:$4 sm:$0xff]  }
 0x4b6   : > { %v6673_v15 = vadd.f32 %v6672_v34, %v16799_v23  ;;  %v6786_v32 = vadd.f32 %v6785_v58, %v16803_v61  ;;  %v6674_v24 = vpop.f32.mrb[194].mxu0  ;;  %v6787_v43 = vpop.f32.mrb[194].mxu1 }
 0x4b7   : > { %v6675_v13 = vadd.f32 %v6674_v24, %v16791_v5  ;;  %v6788_v60 = vadd.f32 %v6787_v43, %v16795_v46  ;;  %v6676_v10 = vpop.f32.mrb[195].mxu0  ;;  %v6789_v38 = vpop.f32.mrb[195].mxu1  ;;  %v7088_v14 = vmax.f32 %v6671_v27, 0.0  ;;  %v7090_v18 = vmax.f32 %v6784_v41, 0.0 }
 0x4b8   : > { %v6677_v19 = vadd.f32 %v6676_v10, %v16799_v23  ;;  %v6790_v55 = vadd.f32 %v6789_v38, %v16803_v61  ;;  %v7089_v22 = vmax.f32 %v6673_v15, 0.0  ;;  %v7091_v57 = vmax.f32 %v6786_v32, 0.0  ;;  %v13502_v10 = vld [vmem:[%s18286_s10 + $0x2d8] ss:$20 sps:$4 sm:$0xff]  }
 0x4b9   : > { %v7096_v50 = vmax.f32 %v6675_v13, 0.0  ;;  %v7098_v51 = vmax.f32 %v6788_v60, 0.0  ;;  %v13499_v60 = vld [vmem:[%s18286_s10 + $0x2d0] ss:$20 sps:$4 sm:$0xff]  }
 0x4ba   : > { %v7097_v30 = vmax.f32 %v6677_v19, 0.0  ;;  %v7099_v29 = vmax.f32 %v6790_v55, 0.0 }
 0x4bb   : > { %v16813_v28 = vpack.c.bf16 %v7096_v50, %v7088_v14  ;;  %v16815_v17 = vpack.c.bf16 %v7098_v51, %v7090_v18  ;;  %v13507_v18 = vld [vmem:[%s18286_s10 + $0x2fc] ss:$20 sps:$4 sm:$0xff]   ;;  %v13510_v50 = vld [vmem:[%s18286_s10 + $0x304] ss:$20 sps:$4 sm:$0xff]  }
 0x4bc   : > { %v16817_v54 = vpack.c.bf16 %v7097_v30, %v7089_v22  ;;  %v16819_v31 = vpack.c.bf16 %v7099_v29, %v7091_v57  ;;  %v6680_v26 = vpop.f32.mrb[196].mxu0  ;;  %v6793_v7 = vpop.f32.mrb[196].mxu1 }
 0x4bd   : > { %v6681_v4 = vadd.f32 %v6680_v26, %v16791_v5  ;;  %v6794_v11 = vadd.f32 %v6793_v7, %v16795_v46  ;;  %v6682_v16 = vpop.f32.mrb[197].mxu0  ;;  %v6795_v21 = vpop.f32.mrb[197].mxu1 }
 0x4be   : > { %v6683_v6 = vadd.f32 %v6682_v16, %v16799_v23  ;;  %v6796_v36 = vadd.f32 %v6795_v21, %v16803_v61  ;;  %v6684_v47 = vpop.f32.mrb[198].mxu0  ;;  %v6797_v48 = vpop.f32.mrb[198].mxu1  ;;  %9387 = vmatprep.mubr.bf16.mxu0 %v16817_v54  ;;  %9839 = vmatprep.mubr.bf16.mxu1 %v16817_v54  ;;  %v13508_v16 = vld [vmem:[%s18286_s10 + $0x300] ss:$20 sps:$4 sm:$0xff]   ;;  %v13513_v21 = vld [vmem:[%s18286_s10 + $0x324] ss:$20 sps:$4 sm:$0xff]  }
 0x4bf   : > { %v6685_v2 = vadd.f32 %v6684_v47, %v16791_v5  ;;  %v6798_v49 = vadd.f32 %v6797_v48, %v16795_v46  ;;  %v6686_v45 = vpop.f32.mrb[199].mxu0  ;;  %v6799_v1 = vpop.f32.mrb[199].mxu1  ;;  %9388 = vmatmul.mubr.bf16.vlgmr.msra.gmra.mrb[0].mxu0 %v16813_v28  ;;  %9840 = vmatmul.mubr.bf16.vlgmr.msra.gmra.mrb[0].mxu1 %v16813_v28  ;;  %v7104_v62 = vmax.f32 %v6681_v4, 0.0  ;;  %v7106_v37 = vmax.f32 %v6794_v11, 0.0  ;;  %v13505_v11 = vld [vmem:[%s18286_s10 + $0x2f8] ss:$20 sps:$4 sm:$0xff]  }
 0x4c0   : > { %v6687_v44 = vadd.f32 %v6686_v45, %v16799_v23  ;;  %v6800_v59 = vadd.f32 %v6799_v1, %v16803_v61  ;;  %9469 = vmatpush1.bf16.msra.mxu0 %v13487_v35  ;;  %9921 = vmatpush1.bf16.msra.mxu1 %v13490_v3  ;;  %v7105_v12 = vmax.f32 %v6683_v6, 0.0  ;;  %v7107_v27 = vmax.f32 %v6796_v36, 0.0  ;;  %v13516_v47 = vld [vmem:[%s18286_s10 + $0x32c] ss:$20 sps:$4 sm:$0xff]  }
 0x4c1   : > { %v7112_v20 = vmax.f32 %v6685_v2, 0.0  ;;  %v7114_v52 = vmax.f32 %v6798_v49, 0.0  ;;  %9470 = vmatprep.subr.bf16.mxu0 %v13495_v40  ;;  %9922 = vmatprep.subr.bf16.mxu1 %v13498_v8 }
 0x4c2   : > { %v7113_v41 = vmax.f32 %v6687_v44, 0.0  ;;  %v7115_v34 = vmax.f32 %v6800_v59, 0.0 }
 0x4c3   : > { %v16857_v58 = vpack.c.bf16 %v7112_v20, %v7104_v62  ;;  %v16859_v15 = vpack.c.bf16 %v7114_v52, %v7106_v37  ;;  %v13511_v62 = vld [vmem:[%s18286_s10 + $0x320] ss:$20 sps:$4 sm:$0xff]   ;;  %v13514_v37 = vld [vmem:[%s18286_s10 + $0x328] ss:$20 sps:$4 sm:$0xff]  }
 0x4c4   : > { %v16861_v32 = vpack.c.bf16 %v7113_v41, %v7105_v12  ;;  %v16863_v24 = vpack.c.bf16 %v7115_v34, %v7107_v27  ;;  %v6690_v43 = vpop.f32.mrb[200].mxu0  ;;  %v6803_v13 = vpop.f32.mrb[200].mxu1  ;;  %9471 = vmatpush1.bf16.msra.mxu0 %v13493_v39  ;;  %9923 = vmatpush1.bf16.msra.mxu1 %v13496_v33  ;;  %v13519_v27 = vld [vmem:[%s18286_s10 + $0x34c] ss:$20 sps:$4 sm:$0xff]   ;;  %v13522_v41 = vld [vmem:[%s18286_s10 + $0x354] ss:$20 sps:$4 sm:$0xff]  }
 0x4c5   : > { %v6691_v38 = vadd.f32 %v6690_v43, %v16791_v5  ;;  %v6804_v19 = vadd.f32 %v6803_v13, %v16795_v46  ;;  %v6692_v55 = vpop.f32.mrb[201].mxu0  ;;  %v6805_v14 = vpop.f32.mrb[201].mxu1  ;;  %9472 = vmatprep.subr.bf16.mxu0 %v13501_v9  ;;  %9924 = vmatprep.subr.bf16.mxu1 %v13504_v56 }
 0x4c6   : > { %v6693_v51 = vadd.f32 %v6692_v55, %v16799_v23  ;;  %v6806_v22 = vadd.f32 %v6805_v14, %v16803_v61  ;;  %v6694_v57 = vpop.f32.mrb[202].mxu0  ;;  %v6807_v30 = vpop.f32.mrb[202].mxu1  ;;  %9397 = vmatprep.mubr.bf16.mxu0 %v16861_v32  ;;  %9849 = vmatprep.mubr.bf16.mxu1 %v16861_v32 }
 0x4c7   : > { %v6695_v29 = vadd.f32 %v6694_v57, %v16791_v5  ;;  %v6808_v26 = vadd.f32 %v6807_v30, %v16795_v46  ;;  %v6696_v7 = vpop.f32.mrb[203].mxu0  ;;  %v6809_v35 = vpop.f32.mrb[203].mxu1  ;;  %9398 = vmatmul.mubr.bf16.gmra.mrb[4].mxu0 %v16857_v58  ;;  %9850 = vmatmul.mubr.bf16.gmra.mrb[4].mxu1 %v16857_v58  ;;  %v7120_v40 = vmax.f32 %v6691_v38, 0.0  ;;  %v7122_v8 = vmax.f32 %v6804_v19, 0.0 }
 0x4c8   : > { %v6697_v3 = vadd.f32 %v6696_v7, %v16799_v23  ;;  %v6810_v4 = vadd.f32 %v6809_v35, %v16803_v61  ;;  %9473 = vmatpush1.bf16.msra.mxu0 %v13499_v60  ;;  %9925 = vmatpush1.bf16.msra.mxu1 %v13502_v10  ;;  %v7121_v48 = vmax.f32 %v6693_v51, 0.0  ;;  %v7123_v2 = vmax.f32 %v6806_v22, 0.0  ;;  %v13520_v51 = vld [vmem:[%s18286_s10 + $0x350] ss:$20 sps:$4 sm:$0xff]   ;;  %v13525_v22 = vld [vmem:[%s18286_s10 + $0x374] ss:$20 sps:$4 sm:$0xff]  }
 0x4c9   : > { %v7128_v6 = vmax.f32 %v6695_v29, 0.0  ;;  %v7130_v36 = vmax.f32 %v6808_v26, 0.0  ;;  %9474 = vmatprep.subr.bf16.mxu0 %v13507_v18  ;;  %9926 = vmatprep.subr.bf16.mxu1 %v13510_v50  ;;  %v13517_v50 = vld [vmem:[%s18286_s10 + $0x348] ss:$20 sps:$4 sm:$0xff]  }
 0x4ca   : > { %v7129_v49 = vmax.f32 %v6697_v3, 0.0  ;;  %v7131_v45 = vmax.f32 %v6810_v4, 0.0  ;;  %v13528_v7 = vld [vmem:[%s18286_s10 + $0x37c] ss:$20 sps:$4 sm:$0xff]  }
 0x4cb   : > { %v16901_v1 = vpack.c.bf16 %v7128_v6, %v7120_v40  ;;  %v16903_v44 = vpack.c.bf16 %v7130_v36, %v7122_v8 }
 0x4cc   : > { %v16905_v59 = vpack.c.bf16 %v7129_v49, %v7121_v48  ;;  %v16907_v39 = vpack.c.bf16 %v7131_v45, %v7123_v2  ;;  %v6700_v33 = vpop.f32.mrb[204].mxu0  ;;  %v6813_v9 = vpop.f32.mrb[204].mxu1  ;;  %9475 = vmatpush1.bf16.msra.mxu0 %v13505_v11  ;;  %9927 = vmatpush1.bf16.msra.mxu1 %v13508_v16  ;;  %v13526_v48 = vld [vmem:[%s18286_s10 + $0x378] ss:$20 sps:$4 sm:$0xff]  }
 0x4cd   : > { %18400 = vst [vmem:[#allocation10_spill] sm:$0xff] %v16901_v1  ;;  %18401 = vst [vmem:[#allocation8_spill] sm:$0xff] %v16903_v44  ;;  %v6701_v20 = vadd.f32 %v6700_v33, %v16791_v5  ;;  %v6814_v52 = vadd.f32 %v6813_v9, %v16795_v46  ;;  %v6702_v56 = vpop.f32.mrb[205].mxu0  ;;  %v6815_v12 = vpop.f32.mrb[205].mxu1  ;;  %9476 = vmatprep.subr.bf16.mxu0 %v13513_v21  ;;  %9928 = vmatprep.subr.bf16.mxu1 %v13516_v47  ;;  %v13523_v47 = vld [vmem:[%s18286_s10 + $0x370] ss:$20 sps:$4 sm:$0xff]  }
 0x4ce   : > { %v6703_v34 = vadd.f32 %v6702_v56, %v16799_v23  ;;  %v6816_v43 = vadd.f32 %v6815_v12, %v16803_v61  ;;  %v6704_v13 = vpop.f32.mrb[206].mxu0  ;;  %v6817_v60 = vpop.f32.mrb[206].mxu1  ;;  %9407 = vmatprep.mubr.bf16.mxu0 %v16905_v59  ;;  %9859 = vmatprep.mubr.bf16.mxu1 %v16905_v59  ;;  %v13531_v9 = vld [vmem:[%s18286_s10 + $0x39c] ss:$20 sps:$4 sm:$0xff]  }
 0x4cf   : > { %v6705_v10 = vadd.f32 %v6704_v13, %v16791_v5  ;;  %v6818_v38 = vadd.f32 %v6817_v60, %v16795_v46  ;;  %v6706_v19 = vpop.f32.mrb[207].mxu0  ;;  %v6819_v55 = vpop.f32.mrb[207].mxu1  ;;  %9408 = vmatmul.mubr.bf16.gmra.mrb[8].mxu0 %v16901_v1  ;;  %9860 = vmatmul.mubr.bf16.gmra.mrb[8].mxu1 %v16901_v1  ;;  %v7136_v57 = vmax.f32 %v6701_v20, 0.0  ;;  %v7138_v30 = vmax.f32 %v6814_v52, 0.0  ;;  %v13529_v60 = vld [vmem:[%s18286_s10 + $0x398] ss:$20 sps:$4 sm:$0xff]  }
 0x4d0   : > { %v6707_v14 = vadd.f32 %v6706_v19, %v16799_v23  ;;  %v6820_v18 = vadd.f32 %v6819_v55, %v16803_v61  ;;  %9477 = vmatpush1.bf16.msra.mxu0 %v13511_v62  ;;  %9929 = vmatpush1.bf16.msra.mxu1 %v13514_v37  ;;  %v7137_v35 = vmax.f32 %v6703_v34, 0.0  ;;  %v7139_v3 = vmax.f32 %v6816_v43, 0.0  ;;  %v13534_v62 = vld [vmem:[%s18286_s10 + $0x3a4] ss:$20 sps:$4 sm:$0xff]  }
 0x4d1   : > { %v7144_v29 = vmax.f32 %v6705_v10, 0.0  ;;  %v7146_v26 = vmax.f32 %v6818_v38, 0.0  ;;  %9478 = vmatprep.subr.bf16.mxu0 %v13519_v27  ;;  %9930 = vmatprep.subr.bf16.mxu1 %v13522_v41  ;;  %v13532_v10 = vld [vmem:[%s18286_s10 + $0x3a0] ss:$20 sps:$4 sm:$0xff]   ;;  %v13537_v38 = vld [vmem:[%s18286_s10 + $0x3c4] ss:$20 sps:$4 sm:$0xff]  }
 0x4d2   : > { %v7145_v4 = vmax.f32 %v6707_v14, 0.0  ;;  %v7147_v11 = vmax.f32 %v6820_v18, 0.0 }
 0x4d3   : > { %v16945_v16 = vpack.c.bf16 %v7144_v29, %v7136_v57  ;;  %v16947_v21 = vpack.c.bf16 %v7146_v26, %v7138_v30 }
 0x4d4   : > { %v16949_v40 = vpack.c.bf16 %v7145_v4, %v7137_v35  ;;  %v16951_v8 = vpack.c.bf16 %v7147_v11, %v7139_v3  ;;  %v6710_v6 = vpop.f32.mrb[208].mxu0  ;;  %v6823_v36 = vpop.f32.mrb[208].mxu1  ;;  %9479 = vmatpush1.bf16.msra.mxu0 %v13517_v50  ;;  %9931 = vmatpush1.bf16.msra.mxu1 %v13520_v51  ;;  %v13540_v50 = vld [vmem:[%s18286_s10 + $0x3cc] ss:$20 sps:$4 sm:$0xff]  }
 0x4d5   : > { %18402 = vst [vmem:[#allocation9_spill] sm:$0xff] %v16945_v16  ;;  %18403 = vst [vmem:[#allocation12_spill] sm:$0xff] %v16947_v21  ;;  %v6711_v2 = vadd.f32 %v6710_v6, %v16791_v5  ;;  %v6824_v49 = vadd.f32 %v6823_v36, %v16795_v46  ;;  %v6712_v45 = vpop.f32.mrb[209].mxu0  ;;  %v6825_v33 = vpop.f32.mrb[209].mxu1  ;;  %9480 = vmatprep.subr.bf16.mxu0 %v13525_v22  ;;  %9932 = vmatprep.subr.bf16.mxu1 %v13528_v7  ;;  %v13535_v11 = vld [vmem:[%s18286_s10 + $0x3c0] ss:$20 sps:$4 sm:$0xff]  }
 0x4d6   : > { %18404 = vst [vmem:[#allocation14_spill] sm:$0xff] %v16949_v40  ;;  %18405 = vst [vmem:[#allocation11_spill] sm:$0xff] %v16951_v8  ;;  %v6713_v37 = vadd.f32 %v6712_v45, %v16799_v23  ;;  %v6826_v20 = vadd.f32 %v6825_v33, %v16803_v61  ;;  %v6714_v52 = vpop.f32.mrb[210].mxu0  ;;  %v6827_v56 = vpop.f32.mrb[210].mxu1  ;;  %9417 = vmatprep.mubr.bf16.mxu0 %v16949_v40  ;;  %9869 = vmatprep.mubr.bf16.mxu1 %v16949_v40  ;;  %v13538_v6 = vld [vmem:[%s18286_s10 + $0x3c8] ss:$20 sps:$4 sm:$0xff]  }
 0x4d7   : > { %v6715_v12 = vadd.f32 %v6714_v52, %v16791_v5  ;;  %v6828_v27 = vadd.f32 %v6827_v56, %v16795_v46  ;;  %v6716_v41 = vpop.f32.mrb[211].mxu0  ;;  %v6829_v34 = vpop.f32.mrb[211].mxu1  ;;  %9418 = vmatmul.mubr.bf16.gmra.mrb[12].mxu0 %v16945_v16  ;;  %9870 = vmatmul.mubr.bf16.gmra.mrb[12].mxu1 %v16945_v16  ;;  %v7152_v19 = vmax.f32 %v6711_v2, 0.0  ;;  %v7154_v55 = vmax.f32 %v6824_v49, 0.0  ;;  %v13543_v49 = vld [vmem:[%s18286_s10 + $0x3ec] ss:$20 sps:$4 sm:$0xff]  }
 0x4d8   : > { %v6717_v43 = vadd.f32 %v6716_v41, %v16799_v23  ;;  %v6830_v13 = vadd.f32 %v6829_v34, %v16803_v61  ;;  %9481 = vmatpush1.bf16.msra.mxu0 %v13523_v47  ;;  %9933 = vmatpush1.bf16.msra.mxu1 %v13526_v48  ;;  %v7153_v51 = vmax.f32 %v6713_v37, 0.0  ;;  %v7155_v22 = vmax.f32 %v6826_v20, 0.0  ;;  %v13546_v45 = vld [vmem:[%s18286_s10 + $0x3f4] ss:$20 sps:$4 sm:$0xff]  }
 0x4d9   : > { %v7160_v14 = vmax.f32 %v6715_v12, 0.0  ;;  %v7162_v18 = vmax.f32 %v6828_v27, 0.0  ;;  %9482 = vmatprep.subr.bf16.mxu0 %v13531_v9  ;;  %9934 = vmatprep.subr.bf16.mxu1 %v13534_v62  ;;  %v13541_v34 = vld [vmem:[%s18286_s10 + $0x3e8] ss:$20 sps:$4 sm:$0xff]  }
 0x4da   : > { %v7161_v57 = vmax.f32 %v6717_v43, 0.0  ;;  %v7163_v30 = vmax.f32 %v6830_v13, 0.0  ;;  %v13544_v43 = vld [vmem:[%s18286_s10 + $0x3f0] ss:$20 sps:$4 sm:$0xff]   ;;  %v13549_v13 = vld [vmem:[%s18286_s10 + $0x414] ss:$20 sps:$4 sm:$0xff]  }
 0x4db   : > { %v16989_v29 = vpack.c.bf16 %v7160_v14, %v7152_v19  ;;  %v16991_v26 = vpack.c.bf16 %v7162_v18, %v7154_v55  ;;  %v13552_v55 = vld [vmem:[%s18286_s10 + $0x41c] ss:$20 sps:$4 sm:$0xff]  }
 0x4dc   : > { %v16993_v7 = vpack.c.bf16 %v7161_v57, %v7153_v51  ;;  %v16995_v35 = vpack.c.bf16 %v7163_v30, %v7155_v22  ;;  %v6720_v3 = vpop.f32.mrb[212].mxu0  ;;  %v6833_v4 = vpop.f32.mrb[212].mxu1  ;;  %9483 = vmatpush1.bf16.msra.mxu0 %v13529_v60  ;;  %9935 = vmatpush1.bf16.msra.mxu1 %v13532_v10 }
 0x4dd   : > { %18406 = vst [vmem:[#allocation13_spill] sm:$0xff] %v16989_v29  ;;  %18407 = vst [vmem:[#allocation16_spill] sm:$0xff] %v16991_v26  ;;  %v6721_v36 = vadd.f32 %v6720_v3, %v16791_v5  ;;  %v6834_v47 = vadd.f32 %v6833_v4, %v16795_v46  ;;  %v6722_v48 = vpop.f32.mrb[213].mxu0  ;;  %v6835_v2 = vpop.f32.mrb[213].mxu1  ;;  %9484 = vmatprep.subr.bf16.mxu0 %v13537_v38  ;;  %9936 = vmatprep.subr.bf16.mxu1 %v13540_v50 }
 0x4de   : > { %18408 = vst [vmem:[#allocation18_spill] sm:$0xff] %v16993_v7  ;;  %18409 = vst [vmem:[#allocation15_spill] sm:$0xff] %v16995_v35  ;;  %v6723_v33 = vadd.f32 %v6722_v48, %v16799_v23  ;;  %v6836_v9 = vadd.f32 %v6835_v2, %v16803_v61  ;;  %v6724_v62 = vpop.f32.mrb[214].mxu0  ;;  %v6837_v37 = vpop.f32.mrb[214].mxu1  ;;  %9427 = vmatprep.mubr.bf16.mxu0 %v16993_v7  ;;  %9879 = vmatprep.mubr.bf16.mxu1 %v16993_v7 }
 0x4df   : > { %v6725_v20 = vadd.f32 %v6724_v62, %v16791_v5  ;;  %v6838_v52 = vadd.f32 %v6837_v37, %v16795_v46  ;;  %v6726_v56 = vpop.f32.mrb[215].mxu0  ;;  %v6839_v12 = vpop.f32.mrb[215].mxu1  ;;  %9428 = vmatmul.mubr.bf16.gmra.mrb[16].mxu0 %v16989_v29  ;;  %9880 = vmatmul.mubr.bf16.gmra.mrb[16].mxu1 %v16989_v29  ;;  %v7168_v60 = vmax.f32 %v6721_v36, 0.0  ;;  %v7170_v10 = vmax.f32 %v6834_v47, 0.0  ;;  %v13550_v36 = vld [vmem:[%s18286_s10 + $0x418] ss:$20 sps:$4 sm:$0xff]  }
 0x4e0   : > { %v6727_v27 = vadd.f32 %v6726_v56, %v16799_v23  ;;  %v6840_v41 = vadd.f32 %v6839_v12, %v16803_v61  ;;  %9485 = vmatpush1.bf16.msra.mxu0 %v13535_v11  ;;  %9937 = vmatpush1.bf16.msra.mxu1 %v13538_v6  ;;  %v7169_v14 = vmax.f32 %v6723_v33, 0.0  ;;  %v7171_v18 = vmax.f32 %v6836_v9, 0.0  ;;  %v13547_v6 = vld [vmem:[%s18286_s10 + $0x410] ss:$20 sps:$4 sm:$0xff]  }
 0x4e1   : > { %v7176_v38 = vmax.f32 %v6725_v20, 0.0  ;;  %v7178_v19 = vmax.f32 %v6838_v52, 0.0  ;;  %9486 = vmatprep.subr.bf16.mxu0 %v13543_v49  ;;  %9938 = vmatprep.subr.bf16.mxu1 %v13546_v45  ;;  %v13555_v45 = vld [vmem:[%s18286_s10 + $0x43c] ss:$20 sps:$4 sm:$0xff]   ;;  %v13558_v33 = vld [vmem:[%s18286_s10 + $0x444] ss:$20 sps:$4 sm:$0xff]  }
 0x4e2   : > { %v7177_v50 = vmax.f32 %v6727_v27, 0.0  ;;  %v7179_v51 = vmax.f32 %v6840_v41, 0.0 }
 0x4e3   : > { %v17033_v22 = vpack.c.bf16 %v7176_v38, %v7168_v60  ;;  %v17035_v57 = vpack.c.bf16 %v7178_v19, %v7170_v10  ;;  %v13561_v60 = vld [vmem:[%s18286_s10 + $0x464] ss:$20 sps:$4 sm:$0xff]  }
 0x4e4   : > { %v17037_v30 = vpack.c.bf16 %v7177_v50, %v7169_v14  ;;  %v17039_v3 = vpack.c.bf16 %v7179_v51, %v7171_v18  ;;  %v6730_v4 = vpop.f32.mrb[216].mxu0  ;;  %v6843_v11 = vpop.f32.mrb[216].mxu1  ;;  %9487 = vmatpush1.bf16.msra.mxu0 %v13541_v34  ;;  %9939 = vmatpush1.bf16.msra.mxu1 %v13544_v43  ;;  %v13553_v43 = vld [vmem:[%s18286_s10 + $0x438] ss:$20 sps:$4 sm:$0xff]  }
 0x4e5   : > { %18410 = vst [vmem:[#allocation17_spill] sm:$0xff] %v17033_v22  ;;  %18411 = vst [vmem:[#allocation20_spill] sm:$0xff] %v17035_v57  ;;  %v6731_v47 = vadd.f32 %v6730_v4, %v16791_v5  ;;  %v6844_v48 = vadd.f32 %v6843_v11, %v16795_v46  ;;  %v6732_v2 = vpop.f32.mrb[217].mxu0  ;;  %v6845_v49 = vpop.f32.mrb[217].mxu1  ;;  %9488 = vmatprep.subr.bf16.mxu0 %v13549_v13  ;;  %9940 = vmatprep.subr.bf16.mxu1 %v13552_v55  ;;  %v13556_v13 = vld [vmem:[%s18286_s10 + $0x440] ss:$20 sps:$4 sm:$0xff]  }
 0x4e6   : > { %18412 = vst [vmem:[#allocation22_spill] sm:$0xff] %v17037_v30  ;;  %18413 = vst [vmem:[#allocation19_spill] sm:$0xff] %v17039_v3  ;;  %v6733_v9 = vadd.f32 %v6732_v2, %v16799_v23  ;;  %v6846_v62 = vadd.f32 %v6845_v49, %v16803_v61  ;;  %v6734_v37 = vpop.f32.mrb[218].mxu0  ;;  %v6847_v20 = vpop.f32.mrb[218].mxu1  ;;  %9437 = vmatprep.mubr.bf16.mxu0 %v17037_v30  ;;  %9889 = vmatprep.mubr.bf16.mxu1 %v17037_v30  ;;  %v13564_v14 = vld [vmem:[%s18286_s10 + $0x46c] ss:$20 sps:$4 sm:$0xff]  }
 0x4e7   : > { %v6735_v52 = vadd.f32 %v6734_v37, %v16791_v5  ;;  %v6848_v56 = vadd.f32 %v6847_v20, %v16795_v46  ;;  %v6736_v12 = vpop.f32.mrb[219].mxu0  ;;  %v6849_v27 = vpop.f32.mrb[219].mxu1  ;;  %9438 = vmatmul.mubr.bf16.gmra.mrb[20].mxu0 %v17033_v22  ;;  %9890 = vmatmul.mubr.bf16.gmra.mrb[20].mxu1 %v17033_v22  ;;  %v7184_v10 = vmax.f32 %v6731_v47, 0.0  ;;  %v7186_v38 = vmax.f32 %v6844_v48, 0.0  ;;  %v13559_v49 = vld [vmem:[%s18286_s10 + $0x460] ss:$20 sps:$4 sm:$0xff]  }
 0x4e8   : > { %v6737_v41 = vadd.f32 %v6736_v12, %v16799_v23  ;;  %v6850_v34 = vadd.f32 %v6849_v27, %v16803_v61  ;;  %9489 = vmatpush1.bf16.msra.mxu0 %v13547_v6  ;;  %9941 = vmatpush1.bf16.msra.mxu1 %v13550_v36  ;;  %v7185_v18 = vmax.f32 %v6733_v9, 0.0  ;;  %v7187_v50 = vmax.f32 %v6846_v62, 0.0  ;;  %v13567_v20 = vld [vmem:[%s18286_s10 + $0x48c] ss:$20 sps:$4 sm:$0xff]  }
 0x4e9   : > { %v7192_v19 = vmax.f32 %v6735_v52, 0.0  ;;  %v7194_v55 = vmax.f32 %v6848_v56, 0.0  ;;  %9490 = vmatprep.subr.bf16.mxu0 %v13555_v45  ;;  %9942 = vmatprep.subr.bf16.mxu1 %v13558_v33  ;;  %v13562_v45 = vld [vmem:[%s18286_s10 + $0x468] ss:$20 sps:$4 sm:$0xff]  }
 0x4ea   : > { %v7193_v51 = vmax.f32 %v6737_v41, 0.0  ;;  %v7195_v4 = vmax.f32 %v6850_v34, 0.0  ;;  %v13570_v52 = vld [vmem:[%s18286_s10 + $0x494] ss:$20 sps:$4 sm:$0xff]  }
 0x4eb   : > { %v17077_v11 = vpack.c.bf16 %v7192_v19, %v7184_v10  ;;  %v17079_v6 = vpack.c.bf16 %v7194_v55, %v7186_v38  ;;  %v18416_v56 = vld [vmem:[#allocation7_spill] sm:$0xff] }
 0x4ec   : > { %v17081_v36 = vpack.c.bf16 %v7193_v51, %v7185_v18  ;;  %v17083_v47 = vpack.c.bf16 %v7195_v4, %v7187_v50  ;;  %v6740_v48 = vpop.f32.mrb[220].mxu0  ;;  %v6853_v2 = vpop.f32.mrb[220].mxu1  ;;  %9491 = vmatpush1.bf16.msra.mxu0 %v13553_v43  ;;  %9943 = vmatpush1.bf16.msra.mxu1 %v13556_v13  ;;  %v17101_v12 = vrot.slane %v16787_v42, %v18416_v56  ;;  %v18417_v13 = vld [vmem:[#allocation2_spill] sm:$0xff] }
 0x4ed   : > { %18414 = vst [vmem:[#allocation21_spill] sm:$0xff] %v17077_v11  ;;  %v6741_v33 = vadd.f32 %v6740_v48, %v16791_v5  ;;  %v6854_v9 = vadd.f32 %v6853_v2, %v16795_v46  ;;  %v6742_v62 = vpop.f32.mrb[221].mxu0  ;;  %v6855_v37 = vpop.f32.mrb[221].mxu1  ;;  %9492 = vmatprep.subr.bf16.mxu0 %v13561_v60  ;;  %9944 = vmatprep.subr.bf16.mxu1 %v13564_v14  ;;  %v18418_v60 = vsub.s32 6, %v18417_v13  ;;  %v18419_v18 = vsub.s32 5, %v18417_v13 }
 0x4ee   : > { %18415 = vst [vmem:[#allocation24_spill] sm:$0xff] %v17081_v36  ;;  %v6743_v27 = vadd.f32 %v6742_v62, %v16799_v23  ;;  %v6856_v41 = vadd.f32 %v6855_v37, %v16803_v61  ;;  %v6744_v34 = vpop.f32.mrb[222].mxu0  ;;  %v6857_v43 = vpop.f32.mrb[222].mxu1  ;;  %9447 = vmatprep.mubr.bf16.mxu0 %v17081_v36  ;;  %9899 = vmatprep.mubr.bf16.mxu1 %v17081_v36  ;;  %v18420_v48 = vsub.s32 7, %v18417_v13  ;;  %v13576_v37 = vld [vmem:[%s18286_s10 + $0x4bc] ss:$20 sps:$4 sm:$0xff]  }
 0x4ef   : > { %v17110_v10 = vrot.slane %v16787_v42, %v18418_v60  ;;  %v6745_v38 = vadd.f32 %v6744_v34, %v16791_v5  ;;  %v6858_v19 = vadd.f32 %v6857_v43, %v16795_v46  ;;  %v6746_v55 = vpop.f32.mrb[223].mxu0  ;;  %v6859_v14 = vpop.f32.mrb[223].mxu1  ;;  %9448 = vmatmul.mubr.bf16.gmra.mrb[24].mxu0 %v17077_v11  ;;  %9900 = vmatmul.mubr.bf16.gmra.mrb[24].mxu1 %v17077_v11  ;;  %v13565_v5 = vld [vmem:[%s18286_s10 + $0x488] ss:$20 sps:$4 sm:$0xff]   ;;  %v13568_v46 = vld [vmem:[%s18286_s10 + $0x490] ss:$20 sps:$4 sm:$0xff]  }
 0x4f0   : > { %v17119_v50 = vrot.slane %v16787_v42, %v18419_v18  ;;  %v6747_v51 = vadd.f32 %v6746_v55, %v16799_v23  ;;  %v6860_v4 = vadd.f32 %v6859_v14, %v16803_v61  ;;  %9493 = vmatpush1.bf16.msra.mxu0 %v13559_v49  ;;  %9945 = vmatpush1.bf16.msra.mxu1 %v13562_v45  ;;  %v13573_v23 = vld [vmem:[%s18286_s10 + $0x4b4] ss:$20 sps:$4 sm:$0xff]   ;;  %v7200_v61 = vmax.f32 %v6741_v33, 0.0  ;;  %v13574_v18 = vld [vmem:[%s18286_s10 + $0x4b8] ss:$20 sps:$4 sm:$0xff]  }
 0x4f1   : > { %v17132_v2 = vrot.slane %v16787_v42, %v18420_v48  ;;  %v7202_v49 = vmax.f32 %v6854_v9, 0.0  ;;  %v7208_v45 = vmax.f32 %v6745_v38, 0.0  ;;  %v7210_v62 = vmax.f32 %v6858_v19, 0.0  ;;  %9494 = vmatprep.subr.bf16.mxu0 %v13567_v20  ;;  %9946 = vmatprep.subr.bf16.mxu1 %v13570_v52  ;;  %v13571_v20 = vld [vmem:[%s18286_s10 + $0x4b0] ss:$20 sps:$4 sm:$0xff]  }
 0x4f2   : > { %v7201_v34 = vmax.f32 %v6743_v27, 0.0  ;;  %v7203_v43 = vmax.f32 %v6856_v41, 0.0  ;;  %v7209_v13 = vmax.f32 %v6747_v51, 0.0  ;;  %v7211_v60 = vmax.f32 %v6860_v4, 0.0  ;;  %v13579_v48 = vld [vmem:[%s18286_s10 + $0x4dc] ss:$20 sps:$4 sm:$0xff]  }
 0x4f3   : > { %v17140_v42 = vpack.c.bf16 %v7208_v45, %v7200_v61  ;;  %v17142_v55 = vpack.c.bf16 %v7210_v62, %v7202_v49 }
 0x4f4   : > { %v17144_v14 = vpack.c.bf16 %v7209_v13, %v7201_v34  ;;  %v17146_v33 = vpack.c.bf16 %v7211_v60, %v7203_v43  ;;  %v6896_v9 = vpop.f32.mrb[224].mxu0  ;;  %v7009_v38 = vpop.f32.mrb[224].mxu1  ;;  %9495 = vmatpush1.bf16.msra.mxu0 %v13565_v5  ;;  %9947 = vmatpush1.bf16.msra.mxu1 %v13568_v46  ;;  %v13577_v43 = vld [vmem:[%s18286_s10 + $0x4d8] ss:$20 sps:$4 sm:$0xff]   ;;  %v13580_v13 = vld [vmem:[%s18286_s10 + $0x4e0] ss:$20 sps:$4 sm:$0xff]  }
 0x4f5   : > { %18421 = vst [vmem:[#allocation26_spill] sm:$0xff] %v17140_v42  ;;  %v6897_v52 = vadd.f32 %v6896_v9, %v17101_v12  ;;  %v7010_v27 = vadd.f32 %v7009_v38, %v17110_v10  ;;  %v6898_v41 = vpop.f32.mrb[225].mxu0  ;;  %v7011_v19 = vpop.f32.mrb[225].mxu1  ;;  %9496 = vmatprep.subr.bf16.mxu0 %v13573_v23  ;;  %9948 = vmatprep.subr.bf16.mxu1 %v13576_v37  ;;  %v13582_v23 = vld [vmem:[%s18286_s10 + $0x4e4] ss:$20 sps:$4 sm:$0xff]  }
 0x4f6   : > { %18422 = vst [vmem:[#allocation23_spill] sm:$0xff] %v17144_v14  ;;  %v6899_v51 = vadd.f32 %v6898_v41, %v17119_v50  ;;  %v7012_v4 = vadd.f32 %v7011_v19, %v17132_v2  ;;  %v6900_v5 = vpop.f32.mrb[226].mxu0  ;;  %v7013_v46 = vpop.f32.mrb[226].mxu1  ;;  %9457 = vmatprep.mubr.bf16.mxu0 %v17144_v14  ;;  %9909 = vmatprep.mubr.bf16.mxu1 %v17144_v14 }
 0x4f7   : > { %v6901_v61 = vadd.f32 %v6900_v5, %v17101_v12  ;;  %v7014_v49 = vadd.f32 %v7013_v46, %v17110_v10  ;;  %v6902_v45 = vpop.f32.mrb[227].mxu0  ;;  %v7015_v62 = vpop.f32.mrb[227].mxu1  ;;  %9458 = vmatmul.mubr.bf16.gmra.mrb[28].mxu0 %v17140_v42  ;;  %9910 = vmatmul.mubr.bf16.gmra.mrb[28].mxu1 %v17140_v42  ;;  %v7092_v60 = vmax.f32 %v6897_v52, 0.0  ;;  %v7094_v9 = vmax.f32 %v7010_v27, 0.0  ;;  %v13588_v52 = vld [vmem:[%s18286_s10 + $0x50c] ss:$20 sps:$4 sm:$0xff]  }
 0x4f8   : > { %v6903_v37 = vadd.f32 %v6902_v45, %v17119_v50  ;;  %v7016_v34 = vadd.f32 %v7015_v62, %v17132_v2  ;;  %9497 = vmatpush1.bf16.msra.mxu0 %v13571_v20  ;;  %9500 = vmatprep.mubr.bf16.mxu0 %v16819_v31  ;;  %v13585_v20 = vld [vmem:[%s18286_s10 + $0x504] ss:$20 sps:$4 sm:$0xff]   ;;  %v7093_v19 = vmax.f32 %v6899_v51, 0.0  ;;  %v7095_v5 = vmax.f32 %v7012_v4, 0.0 }
 0x4f9   : > { %v7100_v38 = vmax.f32 %v6901_v61, 0.0  ;;  %v7102_v41 = vmax.f32 %v7014_v49, 0.0  ;;  %9949 = vmatpush1.bf16.msra.mxu1 %v13574_v18  ;;  %9952 = vmatprep.mubr.bf16.mxu1 %v16819_v31 }
 0x4fa   : > { %v7101_v46 = vmax.f32 %v6903_v37, 0.0  ;;  %v7103_v45 = vmax.f32 %v7016_v34, 0.0  ;;  %9498 = vmatprep.subr.bf16.mxu0 %v13579_v48  ;;  %9950 = vmatprep.subr.bf16.mxu1 %v13582_v23  ;;  %v13583_v37 = vld [vmem:[%s18286_s10 + $0x500] ss:$20 sps:$4 sm:$0xff]  }
 0x4fb   : > { %v17186_v27 = vpack.c.bf16 %v7100_v38, %v7092_v60  ;;  %v17188_v61 = vpack.c.bf16 %v7102_v41, %v7094_v9 }
 0x4fc   : > { %v17190_v18 = vpack.c.bf16 %v7101_v46, %v7093_v19  ;;  %v17192_v49 = vpack.c.bf16 %v7103_v45, %v7095_v5  ;;  %v6906_v62 = vpop.f32.mrb[228].mxu0  ;;  %v7019_v56 = vpop.f32.mrb[228].mxu1  ;;  %9499 = vmatpush1.bf16.msra.mxu0 %v13577_v43  ;;  %v13586_v43 = vld [vmem:[%s18286_s10 + $0x508] ss:$20 sps:$4 sm:$0xff]  }
 0x4fd   : > { %v6907_v51 = vadd.f32 %v6906_v62, %v17101_v12  ;;  %v7020_v4 = vadd.f32 %v7019_v56, %v17110_v10  ;;  %9951 = vmatpush1.bf16.msra.mxu1 %v13580_v13  ;;  %v6908_v48 = vpop.f32.mrb[229].mxu0  ;;  %v7021_v23 = vpop.f32.mrb[229].mxu1  ;;  %9581 = vmatprep.subr.bf16.mxu0 %v13585_v20  ;;  %v13591_v56 = vld [vmem:[%s18286_s10 + $0x52c] ss:$20 sps:$4 sm:$0xff]   ;;  %v13594_v5 = vld [vmem:[%s18286_s10 + $0x534] ss:$20 sps:$4 sm:$0xff]  }
 0x4fe   : > { %v6909_v34 = vadd.f32 %v6908_v48, %v17119_v50  ;;  %v7022_v60 = vadd.f32 %v7021_v23, %v17132_v2  ;;  %v6910_v9 = vpop.f32.mrb[230].mxu0  ;;  %v7023_v38 = vpop.f32.mrb[230].mxu1  ;;  %10033 = vmatprep.subr.bf16.mxu1 %v13588_v52  ;;  %v13589_v52 = vld [vmem:[%s18286_s10 + $0x528] ss:$20 sps:$4 sm:$0xff]  }
 0x4ff   : > { %v6911_v13 = vadd.f32 %v6910_v9, %v17101_v12  ;;  %v7024_v41 = vadd.f32 %v7023_v38, %v17110_v10  ;;  %v6912_v20 = vpop.f32.mrb[231].mxu0  ;;  %v7025_v19 = vpop.f32.mrb[231].mxu1  ;;  %9501 = vmatmul.mubr.bf16.vlgmr.msra.gmra.mrb[0].mxu0 %v16815_v17  ;;  %v7108_v62 = vmax.f32 %v6907_v51, 0.0  ;;  %v7110_v48 = vmax.f32 %v7020_v4, 0.0  ;;  %v13592_v38 = vld [vmem:[%s18286_s10 + $0x530] ss:$20 sps:$4 sm:$0xff]  }
 0x500   : > { %v6913_v46 = vadd.f32 %v6912_v20, %v17119_v50  ;;  %v7026_v45 = vadd.f32 %v7025_v19, %v17132_v2  ;;  %9953 = vmatmul.mubr.bf16.vlgmr.msra.gmra.mrb[0].mxu1 %v16815_v17  ;;  %9510 = vmatprep.mubr.bf16.mxu0 %v16863_v24  ;;  %v7109_v20 = vmax.f32 %v6909_v34, 0.0  ;;  %v7111_v19 = vmax.f32 %v7022_v60, 0.0  ;;  %v13597_v51 = vld [vmem:[%s18286_s10 + $0x554] ss:$20 sps:$4 sm:$0xff]  }
 0x501   : > { %v7116_v23 = vmax.f32 %v6911_v13, 0.0  ;;  %v7118_v9 = vmax.f32 %v7024_v41, 0.0  ;;  %9582 = vmatpush1.bf16.msra.mxu0 %v13583_v37  ;;  %9962 = vmatprep.mubr.bf16.mxu1 %v16863_v24  ;;  %v13600_v37 = vld [vmem:[%s18286_s10 + $0x55c] ss:$20 sps:$4 sm:$0xff]  }
 0x502   : > { %v7117_v0 = vmax.f32 %v6913_v46, 0.0  ;;  %v7119_v53 = vmax.f32 %v7026_v45, 0.0  ;;  %10034 = vmatpush1.bf16.msra.mxu1 %v13586_v43  ;;  %9583 = vmatprep.subr.bf16.mxu0 %v13591_v56 }
 0x503   : > { %v17227_v4 = vpack.c.bf16 %v7116_v23, %v7108_v62  ;;  %v17229_v13 = vpack.c.bf16 %v7118_v9, %v7110_v48  ;;  %10035 = vmatprep.subr.bf16.mxu1 %v13594_v5  ;;  %v13595_v5 = vld [vmem:[%s18286_s10 + $0x550] ss:$20 sps:$4 sm:$0xff]   ;;  %v13598_v9 = vld [vmem:[%s18286_s10 + $0x558] ss:$20 sps:$4 sm:$0xff]  }
 0x504   : > { %v17234_v41 = vpack.c.bf16 %v7117_v0, %v7109_v20  ;;  %v17236_v34 = vpack.c.bf16 %v7119_v53, %v7111_v19  ;;  %v6916_v60 = vpop.f32.mrb[232].mxu0  ;;  %v7029_v43 = vpop.f32.mrb[232].mxu1 }
 0x505   : > { %v6917_v56 = vadd.f32 %v6916_v60, %v17101_v12  ;;  %v7030_v46 = vadd.f32 %v7029_v43, %v17110_v10  ;;  %9584 = vmatpush1.bf16.msra.mxu0 %v13589_v52  ;;  %v6918_v45 = vpop.f32.mrb[233].mxu0  ;;  %v7031_v62 = vpop.f32.mrb[233].mxu1  ;;  %v13603_v52 = vld [vmem:[%s18286_s10 + $0x57c] ss:$20 sps:$4 sm:$0xff]  }
 0x506   : > { %10036 = vmatpush1.bf16.msra.mxu1 %v13592_v38  ;;  %v6919_v48 = vadd.f32 %v6918_v45, %v17119_v50  ;;  %v7032_v0 = vadd.f32 %v7031_v62, %v17132_v2  ;;  %v6920_v53 = vpop.f32.mrb[234].mxu0  ;;  %v7033_v23 = vpop.f32.mrb[234].mxu1  ;;  %9585 = vmatprep.subr.bf16.mxu0 %v13597_v51  ;;  %v13606_v51 = vld [vmem:[%s18286_s10 + $0x584] ss:$20 sps:$4 sm:$0xff]  }
 0x507   : > { %v6921_v20 = vadd.f32 %v6920_v53, %v17101_v12  ;;  %v7034_v19 = vadd.f32 %v7033_v23, %v17110_v10  ;;  %v6922_v38 = vpop.f32.mrb[235].mxu0  ;;  %v7035_v60 = vpop.f32.mrb[235].mxu1  ;;  %9511 = vmatmul.mubr.bf16.gmra.mrb[4].mxu0 %v16859_v15  ;;  %10037 = vmatprep.subr.bf16.mxu1 %v13600_v37  ;;  %v13601_v62 = vld [vmem:[%s18286_s10 + $0x578] ss:$20 sps:$4 sm:$0xff]   ;;  %v7124_v53 = vmax.f32 %v6917_v56, 0.0  ;;  %v7126_v23 = vmax.f32 %v7030_v46, 0.0 }
 0x508   : > { %v6923_v43 = vadd.f32 %v6922_v38, %v17119_v50  ;;  %v7036_v45 = vadd.f32 %v7035_v60, %v17132_v2  ;;  %9963 = vmatmul.mubr.bf16.gmra.mrb[4].mxu1 %v16859_v15  ;;  %9520 = vmatprep.mubr.bf16.mxu0 %v16907_v39  ;;  %v13604_v38 = vld [vmem:[%s18286_s10 + $0x580] ss:$20 sps:$4 sm:$0xff]   ;;  %v7125_v60 = vmax.f32 %v6919_v48, 0.0  ;;  %v7127_v63 = vmax.f32 %v7032_v0, 0.0  ;;  %v13609_v56 = vld [vmem:[%s18286_s10 + $0x5a4] ss:$20 sps:$4 sm:$0xff]  }
 0x509   : > { %v7132_v25 = vmax.f32 %v6921_v20, 0.0  ;;  %v7134_v37 = vmax.f32 %v7034_v19, 0.0  ;;  %9586 = vmatpush1.bf16.msra.mxu0 %v13595_v5  ;;  %9972 = vmatprep.mubr.bf16.mxu1 %v16907_v39  ;;  %v13612_v5 = vld [vmem:[%s18286_s10 + $0x5ac] ss:$20 sps:$4 sm:$0xff]  }
 0x50a   : > { %v7133_v42 = vmax.f32 %v6923_v43, 0.0  ;;  %v7135_v14 = vmax.f32 %v7036_v45, 0.0  ;;  %10038 = vmatpush1.bf16.msra.mxu1 %v13598_v9  ;;  %9587 = vmatprep.subr.bf16.mxu0 %v13603_v52 }
 0x50b   : > { %v17271_v46 = vpack.c.bf16 %v7132_v25, %v7124_v53  ;;  %v17273_v20 = vpack.c.bf16 %v7134_v37, %v7126_v23  ;;  %10039 = vmatprep.subr.bf16.mxu1 %v13606_v51  ;;  %v13607_v51 = vld [vmem:[%s18286_s10 + $0x5a0] ss:$20 sps:$4 sm:$0xff]   ;;  %v13610_v23 = vld [vmem:[%s18286_s10 + $0x5a8] ss:$20 sps:$4 sm:$0xff]  }
 0x50c   : > { %v17278_v19 = vpack.c.bf16 %v7133_v42, %v7125_v60  ;;  %v17280_v48 = vpack.c.bf16 %v7135_v14, %v7127_v63  ;;  %v6926_v0 = vpop.f32.mrb[236].mxu0  ;;  %v7039_v9 = vpop.f32.mrb[236].mxu1 }
 0x50d   : > { %v6927_v52 = vadd.f32 %v6926_v0, %v17101_v12  ;;  %v7040_v43 = vadd.f32 %v7039_v9, %v17110_v10  ;;  %9588 = vmatpush1.bf16.msra.mxu0 %v13601_v62  ;;  %v6928_v25 = vpop.f32.mrb[237].mxu0  ;;  %v7041_v45 = vpop.f32.mrb[237].mxu1  ;;  %v13615_v62 = vld [vmem:[%s18286_s10 + $0x5cc] ss:$20 sps:$4 sm:$0xff]  }
 0x50e   : > { %10040 = vmatpush1.bf16.msra.mxu1 %v13604_v38  ;;  %v6929_v53 = vadd.f32 %v6928_v25, %v17119_v50  ;;  %v7042_v42 = vadd.f32 %v7041_v45, %v17132_v2  ;;  %v6930_v63 = vpop.f32.mrb[238].mxu0  ;;  %v7043_v14 = vpop.f32.mrb[238].mxu1  ;;  %9589 = vmatprep.subr.bf16.mxu0 %v13609_v56  ;;  %v13618_v56 = vld [vmem:[%s18286_s10 + $0x5d4] ss:$20 sps:$4 sm:$0xff]  }
 0x50f   : > { %v6931_v37 = vadd.f32 %v6930_v63, %v17101_v12  ;;  %v7044_v60 = vadd.f32 %v7043_v14, %v17110_v10  ;;  %v6932_v38 = vpop.f32.mrb[239].mxu0  ;;  %v7045_v0 = vpop.f32.mrb[239].mxu1  ;;  %9521 = vmatmul.mubr.bf16.gmra.mrb[8].mxu0 %v16903_v44  ;;  %10041 = vmatprep.subr.bf16.mxu1 %v13612_v5  ;;  %v13613_v45 = vld [vmem:[%s18286_s10 + $0x5c8] ss:$20 sps:$4 sm:$0xff]   ;;  %v7140_v63 = vmax.f32 %v6927_v52, 0.0  ;;  %v7142_v14 = vmax.f32 %v7040_v43, 0.0 }
 0x510   : > { %v6933_v9 = vadd.f32 %v6932_v38, %v17119_v50  ;;  %v7046_v25 = vadd.f32 %v7045_v0, %v17132_v2  ;;  %9973 = vmatmul.mubr.bf16.gmra.mrb[8].mxu1 %v16903_v44  ;;  %9530 = vmatprep.mubr.bf16.mxu0 %v16951_v8  ;;  %v13616_v38 = vld [vmem:[%s18286_s10 + $0x5d0] ss:$20 sps:$4 sm:$0xff]   ;;  %v7141_v0 = vmax.f32 %v6929_v53, 0.0  ;;  %v7143_v36 = vmax.f32 %v7042_v42, 0.0  ;;  %v13621_v52 = vld [vmem:[%s18286_s10 + $0x5f4] ss:$20 sps:$4 sm:$0xff]  }
 0x511   : > { %v7148_v11 = vmax.f32 %v6931_v37, 0.0  ;;  %v7150_v5 = vmax.f32 %v7044_v60, 0.0  ;;  %9590 = vmatpush1.bf16.msra.mxu0 %v13607_v51  ;;  %9982 = vmatprep.mubr.bf16.mxu1 %v16951_v8  ;;  %v13624_v51 = vld [vmem:[%s18286_s10 + $0x5fc] ss:$20 sps:$4 sm:$0xff]  }
 0x512   : > { %v7149_v22 = vmax.f32 %v6933_v9, 0.0  ;;  %v7151_v30 = vmax.f32 %v7046_v25, 0.0  ;;  %10042 = vmatpush1.bf16.msra.mxu1 %v13610_v23  ;;  %9591 = vmatprep.subr.bf16.mxu0 %v13615_v62 }
 0x513   : > { %v17315_v43 = vpack.c.bf16 %v7148_v11, %v7140_v63  ;;  %v17317_v37 = vpack.c.bf16 %v7150_v5, %v7142_v14  ;;  %10043 = vmatprep.subr.bf16.mxu1 %v13618_v56  ;;  %v13619_v56 = vld [vmem:[%s18286_s10 + $0x5f0] ss:$20 sps:$4 sm:$0xff]   ;;  %v13622_v14 = vld [vmem:[%s18286_s10 + $0x5f8] ss:$20 sps:$4 sm:$0xff]  }
 0x514   : > { %v17322_v60 = vpack.c.bf16 %v7149_v22, %v7141_v0  ;;  %v17324_v53 = vpack.c.bf16 %v7151_v30, %v7143_v36  ;;  %v6936_v42 = vpop.f32.mrb[240].mxu0  ;;  %v7049_v23 = vpop.f32.mrb[240].mxu1 }
 0x515   : > { %v6937_v62 = vadd.f32 %v6936_v42, %v17101_v12  ;;  %v7050_v9 = vadd.f32 %v7049_v23, %v17110_v10  ;;  %9592 = vmatpush1.bf16.msra.mxu0 %v13613_v45  ;;  %v6938_v11 = vpop.f32.mrb[241].mxu0  ;;  %v7051_v25 = vpop.f32.mrb[241].mxu1  ;;  %v13627_v45 = vld [vmem:[%s18286_s10 + $0x61c] ss:$20 sps:$4 sm:$0xff]  }
 0x516   : > { %10044 = vmatpush1.bf16.msra.mxu1 %v13616_v38  ;;  %v6939_v63 = vadd.f32 %v6938_v11, %v17119_v50  ;;  %v7052_v22 = vadd.f32 %v7051_v25, %v17132_v2  ;;  %v6940_v30 = vpop.f32.mrb[242].mxu0  ;;  %v7053_v36 = vpop.f32.mrb[242].mxu1  ;;  %9593 = vmatprep.subr.bf16.mxu0 %v13621_v52  ;;  %v13630_v52 = vld [vmem:[%s18286_s10 + $0x624] ss:$20 sps:$4 sm:$0xff]  }
 0x517   : > { %v6941_v5 = vadd.f32 %v6940_v30, %v17101_v12  ;;  %v7054_v0 = vadd.f32 %v7053_v36, %v17110_v10  ;;  %v6942_v38 = vpop.f32.mrb[243].mxu0  ;;  %v7055_v42 = vpop.f32.mrb[243].mxu1  ;;  %9531 = vmatmul.mubr.bf16.gmra.mrb[12].mxu0 %v16947_v21  ;;  %10045 = vmatprep.subr.bf16.mxu1 %v13624_v51  ;;  %v13625_v25 = vld [vmem:[%s18286_s10 + $0x618] ss:$20 sps:$4 sm:$0xff]   ;;  %v7156_v30 = vmax.f32 %v6937_v62, 0.0  ;;  %v7158_v36 = vmax.f32 %v7050_v9, 0.0 }
 0x518   : > { %v6943_v23 = vadd.f32 %v6942_v38, %v17119_v50  ;;  %v7056_v11 = vadd.f32 %v7055_v42, %v17132_v2  ;;  %9983 = vmatmul.mubr.bf16.gmra.mrb[12].mxu1 %v16947_v21  ;;  %9540 = vmatprep.mubr.bf16.mxu0 %v16995_v35  ;;  %v13628_v38 = vld [vmem:[%s18286_s10 + $0x620] ss:$20 sps:$4 sm:$0xff]   ;;  %v7157_v42 = vmax.f32 %v6939_v63, 0.0  ;;  %v7159_v7 = vmax.f32 %v7052_v22, 0.0  ;;  %v13633_v62 = vld [vmem:[%s18286_s10 + $0x644] ss:$20 sps:$4 sm:$0xff]  }
 0x519   : > { %v7164_v29 = vmax.f32 %v6941_v5, 0.0  ;;  %v7166_v51 = vmax.f32 %v7054_v0, 0.0  ;;  %9594 = vmatpush1.bf16.msra.mxu0 %v13619_v56  ;;  %9992 = vmatprep.mubr.bf16.mxu1 %v16995_v35  ;;  %v13636_v56 = vld [vmem:[%s18286_s10 + $0x64c] ss:$20 sps:$4 sm:$0xff]  }
 0x51a   : > { %v7165_v21 = vmax.f32 %v6943_v23, 0.0  ;;  %v7167_v16 = vmax.f32 %v7056_v11, 0.0  ;;  %10046 = vmatpush1.bf16.msra.mxu1 %v13622_v14  ;;  %9595 = vmatprep.subr.bf16.mxu0 %v13627_v45 }
 0x51b   : > { %v17359_v9 = vpack.c.bf16 %v7164_v29, %v7156_v30  ;;  %v17361_v5 = vpack.c.bf16 %v7166_v51, %v7158_v36  ;;  %10047 = vmatprep.subr.bf16.mxu1 %v13630_v52  ;;  %v13631_v52 = vld [vmem:[%s18286_s10 + $0x640] ss:$20 sps:$4 sm:$0xff]   ;;  %v13634_v36 = vld [vmem:[%s18286_s10 + $0x648] ss:$20 sps:$4 sm:$0xff]  }
 0x51c   : > { %v17366_v0 = vpack.c.bf16 %v7165_v21, %v7157_v42  ;;  %v17368_v63 = vpack.c.bf16 %v7167_v16, %v7159_v7  ;;  %v6946_v22 = vpop.f32.mrb[244].mxu0  ;;  %v7059_v14 = vpop.f32.mrb[244].mxu1 }
 0x51d   : > { %v6947_v45 = vadd.f32 %v6946_v22, %v17101_v12  ;;  %v7060_v23 = vadd.f32 %v7059_v14, %v17110_v10  ;;  %9596 = vmatpush1.bf16.msra.mxu0 %v13625_v25  ;;  %v6948_v29 = vpop.f32.mrb[245].mxu0  ;;  %v7061_v11 = vpop.f32.mrb[245].mxu1  ;;  %v13639_v25 = vld [vmem:[%s18286_s10 + $0x66c] ss:$20 sps:$4 sm:$0xff]  }
 0x51e   : > { %10048 = vmatpush1.bf16.msra.mxu1 %v13628_v38  ;;  %v6949_v30 = vadd.f32 %v6948_v29, %v17119_v50  ;;  %v7062_v21 = vadd.f32 %v7061_v11, %v17132_v2  ;;  %v6950_v16 = vpop.f32.mrb[246].mxu0  ;;  %v7063_v7 = vpop.f32.mrb[246].mxu1  ;;  %9597 = vmatprep.subr.bf16.mxu0 %v13633_v62  ;;  %v13642_v62 = vld [vmem:[%s18286_s10 + $0x674] ss:$20 sps:$4 sm:$0xff]  }
 0x51f   : > { %v6951_v51 = vadd.f32 %v6950_v16, %v17101_v12  ;;  %v7064_v42 = vadd.f32 %v7063_v7, %v17110_v10  ;;  %v6952_v38 = vpop.f32.mrb[247].mxu0  ;;  %v7065_v22 = vpop.f32.mrb[247].mxu1  ;;  %9541 = vmatmul.mubr.bf16.gmra.mrb[16].mxu0 %v16991_v26  ;;  %10049 = vmatprep.subr.bf16.mxu1 %v13636_v56  ;;  %v13637_v11 = vld [vmem:[%s18286_s10 + $0x668] ss:$20 sps:$4 sm:$0xff]   ;;  %v7172_v16 = vmax.f32 %v6947_v45, 0.0  ;;  %v7174_v7 = vmax.f32 %v7060_v23, 0.0 }
 0x520   : > { %v6953_v14 = vadd.f32 %v6952_v38, %v17119_v50  ;;  %v7066_v29 = vadd.f32 %v7065_v22, %v17132_v2  ;;  %9993 = vmatmul.mubr.bf16.gmra.mrb[16].mxu1 %v16991_v26  ;;  %9550 = vmatprep.mubr.bf16.mxu0 %v17039_v3  ;;  %v13640_v38 = vld [vmem:[%s18286_s10 + $0x670] ss:$20 sps:$4 sm:$0xff]   ;;  %v7173_v22 = vmax.f32 %v6949_v30, 0.0  ;;  %v7175_v8 = vmax.f32 %v7062_v21, 0.0  ;;  %v13645_v45 = vld [vmem:[%s18286_s10 + $0x694] ss:$20 sps:$4 sm:$0xff]  }
 0x521   : > { %v7180_v35 = vmax.f32 %v6951_v51, 0.0  ;;  %v7182_v56 = vmax.f32 %v7064_v42, 0.0  ;;  %9598 = vmatpush1.bf16.msra.mxu0 %v13631_v52  ;;  %10002 = vmatprep.mubr.bf16.mxu1 %v17039_v3  ;;  %v13648_v52 = vld [vmem:[%s18286_s10 + $0x69c] ss:$20 sps:$4 sm:$0xff]  }
 0x522   : > { %v7181_v26 = vmax.f32 %v6953_v14, 0.0  ;;  %v7183_v40 = vmax.f32 %v7066_v29, 0.0  ;;  %10050 = vmatpush1.bf16.msra.mxu1 %v13634_v36  ;;  %9599 = vmatprep.subr.bf16.mxu0 %v13639_v25 }
 0x523   : > { %v17403_v23 = vpack.c.bf16 %v7180_v35, %v7172_v16  ;;  %v17405_v51 = vpack.c.bf16 %v7182_v56, %v7174_v7  ;;  %10051 = vmatprep.subr.bf16.mxu1 %v13642_v62  ;;  %v13643_v62 = vld [vmem:[%s18286_s10 + $0x690] ss:$20 sps:$4 sm:$0xff]   ;;  %v13646_v7 = vld [vmem:[%s18286_s10 + $0x698] ss:$20 sps:$4 sm:$0xff]  }
 0x524   : > { %v17410_v42 = vpack.c.bf16 %v7181_v26, %v7173_v22  ;;  %v17412_v30 = vpack.c.bf16 %v7183_v40, %v7175_v8  ;;  %v6956_v21 = vpop.f32.mrb[248].mxu0  ;;  %v7069_v36 = vpop.f32.mrb[248].mxu1 }
 0x525   : > { %v6957_v25 = vadd.f32 %v6956_v21, %v17101_v12  ;;  %v7070_v14 = vadd.f32 %v7069_v36, %v17110_v10  ;;  %9600 = vmatpush1.bf16.msra.mxu0 %v13637_v11  ;;  %v6958_v35 = vpop.f32.mrb[249].mxu0  ;;  %v7071_v29 = vpop.f32.mrb[249].mxu1  ;;  %v13651_v11 = vld [vmem:[%s18286_s10 + $0x6bc] ss:$20 sps:$4 sm:$0xff]  }
 0x526   : > { %10052 = vmatpush1.bf16.msra.mxu1 %v13640_v38  ;;  %v6959_v16 = vadd.f32 %v6958_v35, %v17119_v50  ;;  %v7072_v26 = vadd.f32 %v7071_v29, %v17132_v2  ;;  %v6960_v40 = vpop.f32.mrb[250].mxu0  ;;  %v7073_v8 = vpop.f32.mrb[250].mxu1  ;;  %9601 = vmatprep.subr.bf16.mxu0 %v13645_v45  ;;  %v13654_v45 = vld [vmem:[%s18286_s10 + $0x6c4] ss:$20 sps:$4 sm:$0xff]  }
 0x527   : > { %v6961_v56 = vadd.f32 %v6960_v40, %v17101_v12  ;;  %v7074_v22 = vadd.f32 %v7073_v8, %v17110_v10  ;;  %v6962_v38 = vpop.f32.mrb[251].mxu0  ;;  %v7075_v21 = vpop.f32.mrb[251].mxu1  ;;  %9551 = vmatmul.mubr.bf16.gmra.mrb[20].mxu0 %v17035_v57  ;;  %10053 = vmatprep.subr.bf16.mxu1 %v13648_v52  ;;  %v13649_v29 = vld [vmem:[%s18286_s10 + $0x6b8] ss:$20 sps:$4 sm:$0xff]   ;;  %v7188_v40 = vmax.f32 %v6957_v25, 0.0  ;;  %v7190_v8 = vmax.f32 %v7070_v14, 0.0 }
 0x528   : > { %v6963_v36 = vadd.f32 %v6962_v38, %v17119_v50  ;;  %v7076_v35 = vadd.f32 %v7075_v21, %v17132_v2  ;;  %10003 = vmatmul.mubr.bf16.gmra.mrb[20].mxu1 %v17035_v57  ;;  %9560 = vmatprep.mubr.bf16.mxu0 %v17083_v47  ;;  %v13652_v38 = vld [vmem:[%s18286_s10 + $0x6c0] ss:$20 sps:$4 sm:$0xff]   ;;  %v7189_v21 = vmax.f32 %v6959_v16, 0.0  ;;  %v7191_v44 = vmax.f32 %v7072_v26, 0.0  ;;  %v13657_v25 = vld [vmem:[%s18286_s10 + $0x6e4] ss:$20 sps:$4 sm:$0xff]  }
 0x529   : > { %v7196_v3 = vmax.f32 %v6961_v56, 0.0  ;;  %v7198_v52 = vmax.f32 %v7074_v22, 0.0  ;;  %9602 = vmatpush1.bf16.msra.mxu0 %v13643_v62  ;;  %10012 = vmatprep.mubr.bf16.mxu1 %v17083_v47  ;;  %v13660_v62 = vld [vmem:[%s18286_s10 + $0x6ec] ss:$20 sps:$4 sm:$0xff]  }
 0x52a   : > { %v7197_v57 = vmax.f32 %v6963_v36, 0.0  ;;  %v7199_v1 = vmax.f32 %v7076_v35, 0.0  ;;  %10054 = vmatpush1.bf16.msra.mxu1 %v13646_v7  ;;  %9603 = vmatprep.subr.bf16.mxu0 %v13651_v11 }
 0x52b   : > { %v17447_v14 = vpack.c.bf16 %v7196_v3, %v7188_v40  ;;  %v17449_v56 = vpack.c.bf16 %v7198_v52, %v7190_v8  ;;  %10055 = vmatprep.subr.bf16.mxu1 %v13654_v45  ;;  %v13655_v45 = vld [vmem:[%s18286_s10 + $0x6e0] ss:$20 sps:$4 sm:$0xff]   ;;  %v13658_v8 = vld [vmem:[%s18286_s10 + $0x6e8] ss:$20 sps:$4 sm:$0xff]  }
 0x52c   : > { %v17454_v22 = vpack.c.bf16 %v7197_v57, %v7189_v21  ;;  %v17456_v16 = vpack.c.bf16 %v7199_v1, %v7191_v44  ;;  %v6966_v26 = vpop.f32.mrb[252].mxu0  ;;  %v7079_v7 = vpop.f32.mrb[252].mxu1 }
 0x52d   : > { %v6967_v11 = vadd.f32 %v6966_v26, %v17101_v12  ;;  %v7080_v36 = vadd.f32 %v7079_v7, %v17110_v10  ;;  %9604 = vmatpush1.bf16.msra.mxu0 %v13649_v29  ;;  %v6968_v3 = vpop.f32.mrb[253].mxu0  ;;  %v7081_v35 = vpop.f32.mrb[253].mxu1  ;;  %v13663_v29 = vld [vmem:[%s18286_s10 + $0x70c] ss:$20 sps:$4 sm:$0xff]  }
 0x52e   : > { %10056 = vmatpush1.bf16.msra.mxu1 %v13652_v38  ;;  %v6969_v40 = vadd.f32 %v6968_v3, %v17119_v50  ;;  %v7082_v57 = vadd.f32 %v7081_v35, %v17132_v2  ;;  %v6970_v1 = vpop.f32.mrb[254].mxu0  ;;  %v7083_v44 = vpop.f32.mrb[254].mxu1  ;;  %9605 = vmatprep.subr.bf16.mxu0 %v13657_v25  ;;  %v13666_v25 = vld [vmem:[%s18286_s10 + $0x714] ss:$20 sps:$4 sm:$0xff]  }
 0x52f   : > { %v6971_v52 = vadd.f32 %v6970_v1, %v17101_v12  ;;  %v7084_v21 = vadd.f32 %v7083_v44, %v17110_v10  ;;  %v6972_v38 = vpop.f32.mrb[255].mxu0  ;;  %v7085_v26 = vpop.f32.mrb[255].mxu1  ;;  %9561 = vmatmul.mubr.bf16.gmra.mrb[24].mxu0 %v17079_v6  ;;  %10057 = vmatprep.subr.bf16.mxu1 %v13660_v62  ;;  %v13661_v12 = vld [vmem:[%s18286_s10 + $0x708] ss:$20 sps:$4 sm:$0xff]   ;;  %v7204_v10 = vmax.f32 %v6967_v11, 0.0  ;;  %v7206_v35 = vmax.f32 %v7080_v36, 0.0 }
 0x530   : > { %v6973_v7 = vadd.f32 %v6972_v38, %v17119_v50  ;;  %v7086_v3 = vadd.f32 %v7085_v26, %v17132_v2  ;;  %10013 = vmatmul.mubr.bf16.gmra.mrb[24].mxu1 %v17079_v6  ;;  %9570 = vmatprep.mubr.bf16.mxu0 %v17146_v33  ;;  %v13664_v50 = vld [vmem:[%s18286_s10 + $0x710] ss:$20 sps:$4 sm:$0xff]   ;;  %v7205_v2 = vmax.f32 %v6969_v40, 0.0  ;;  %v7207_v44 = vmax.f32 %v7082_v57, 0.0  ;;  %v13669_v11 = vld [vmem:[%s18286_s10 + $0x734] ss:$20 sps:$4 sm:$0xff]  }
 0x531   : > { %v7212_v1 = vmax.f32 %v6971_v52, 0.0  ;;  %v7214_v62 = vmax.f32 %v7084_v21, 0.0  ;;  %9606 = vmatpush1.bf16.msra.mxu0 %v13655_v45  ;;  %10022 = vmatprep.mubr.bf16.mxu1 %v17146_v33  ;;  %v13672_v45 = vld [vmem:[%s18286_s10 + $0x73c] ss:$20 sps:$4 sm:$0xff]  }
 0x532   : > { %v7213_v38 = vmax.f32 %v6973_v7, 0.0  ;;  %v7215_v26 = vmax.f32 %v7086_v3, 0.0  ;;  %10058 = vmatpush1.bf16.msra.mxu1 %v13658_v8  ;;  %9607 = vmatprep.subr.bf16.mxu0 %v13663_v29  ;;  %v13667_v57 = vld [vmem:[%s18286_s10 + $0x730] ss:$20 sps:$4 sm:$0xff]   ;;  %v13670_v8 = vld [vmem:[%s18286_s10 + $0x738] ss:$20 sps:$4 sm:$0xff]  }
 0x533   : > { %v17491_v36 = vpack.c.bf16 %v7212_v1, %v7204_v10  ;;  %v17493_v52 = vpack.c.bf16 %v7214_v62, %v7206_v35  ;;  %10059 = vmatprep.subr.bf16.mxu1 %v13666_v25  ;;  %v13675_v29 = vld [vmem:[%s18286_s10 + $0x75c] ss:$20 sps:$4 sm:$0xff]   ;;  %v13678_v25 = vld [vmem:[%s18286_s10 + $0x764] ss:$20 sps:$4 sm:$0xff]   ;;  %v13676_v3 = vld [vmem:[%s18286_s10 + $0x760] ss:$20 sps:$4 sm:$0xff]  }
 0x534   : > { %v17498_v21 = vpack.c.bf16 %v7213_v38, %v7205_v2  ;;  %v17500_v40 = vpack.c.bf16 %v7215_v26, %v7207_v44  ;;  %v13673_v7 = vld [vmem:[%s18286_s10 + $0x758] ss:$20 sps:$4 sm:$0xff]   ;;  %v13679_v35 = vld [vmem:[%s18286_s10 + $0x780] ss:$20 sps:$4 sm:$0xff]   ;;  %v13682_v1 = vld [vmem:[%s18286_s10 + $0x788] ss:$20 sps:$4 sm:$0xff]  }
 0x535   : > { %9608 = vmatpush1.bf16.msra.mxu0 %v13661_v12  ;;  %v13681_v12 = vld [vmem:[%s18286_s10 + $0x784] ss:$20 sps:$4 sm:$0xff]   ;;  %v13684_v10 = vld [vmem:[%s18286_s10 + $0x78c] ss:$20 sps:$4 sm:$0xff]   ;;  %v13685_v2 = vld [vmem:[%s18286_s10 + $0x7a8] ss:$20 sps:$4 sm:$0xff]  }
 0x536   : > { %10060 = vmatpush1.bf16.msra.mxu1 %v13664_v50  ;;  %9609 = vmatprep.subr.bf16.mxu0 %v13669_v11  ;;  %v13687_v62 = vld [vmem:[%s18286_s10 + $0x7ac] ss:$20 sps:$4 sm:$0xff]   ;;  %v13690_v50 = vld [vmem:[%s18286_s10 + $0x7b4] ss:$20 sps:$4 sm:$0xff]   ;;  %v13688_v44 = vld [vmem:[%s18286_s10 + $0x7b0] ss:$20 sps:$4 sm:$0xff]  }
 0x537   : > { %9571 = vmatmul.mubr.bf16.gmra.mrb[28].mxu0 %v17142_v55  ;;  %10061 = vmatprep.subr.bf16.mxu1 %v13672_v45  ;;  %v13693_v38 = vld [vmem:[%s18286_s10 + $0x7d4] ss:$20 sps:$4 sm:$0xff]   ;;  %v13696_v26 = vld [vmem:[%s18286_s10 + $0x7dc] ss:$20 sps:$4 sm:$0xff]   ;;  %v13694_v45 = vld [vmem:[%s18286_s10 + $0x7d8] ss:$20 sps:$4 sm:$0xff]  }
 0x538   : > { %10023 = vmatmul.mubr.bf16.gmra.mrb[28].mxu1 %v17142_v55  ;;  %9613 = vmatprep.mubr.bf16.mxu0 %v17190_v18  ;;  %v13691_v11 = vld [vmem:[%s18286_s10 + $0x7d0] ss:$20 sps:$4 sm:$0xff]  }
 0x539   : > { %9610 = vmatpush1.bf16.msra.mxu0 %v13667_v57  ;;  %10065 = vmatprep.mubr.bf16.mxu1 %v17190_v18  ;;  %v13699_v57 = vld [vmem:[%s18286_s10 + $0x7fc] ss:$20 sps:$4 sm:$0xff]  }
 0x53a   : > { %10062 = vmatpush1.bf16.msra.mxu1 %v13670_v8  ;;  %9611 = vmatprep.subr.bf16.mxu0 %v13675_v29  ;;  %v13702_v8 = vld [vmem:[%s18286_s10 + $0x804] ss:$20 sps:$4 sm:$0xff]  }
 0x53b   : > { %10063 = vmatprep.subr.bf16.mxu1 %v13678_v25  ;;  %v13697_v29 = vld [vmem:[%s18286_s10 + $0x7f8] ss:$20 sps:$4 sm:$0xff]   ;;  %v13700_v25 = vld [vmem:[%s18286_s10 + $0x800] ss:$20 sps:$4 sm:$0xff]  }
 0x53d   : > { %9612 = vmatpush1.bf16.msra.mxu0 %v13673_v7  ;;  %v13705_v7 = vld [vmem:[%s18286_s10 + $0x824] ss:$20 sps:$4 sm:$0xff]  }
 0x53e   : > { %10064 = vmatpush1.bf16.msra.mxu1 %v13676_v3  ;;  %9694 = vmatprep.subr.bf16.mxu0 %v13681_v12  ;;  %v13708_v3 = vld [vmem:[%s18286_s10 + $0x82c] ss:$20 sps:$4 sm:$0xff]  }
 0x53f   : > { %10146 = vmatprep.subr.bf16.mxu1 %v13684_v10  ;;  %v13703_v12 = vld [vmem:[%s18286_s10 + $0x820] ss:$20 sps:$4 sm:$0xff]   ;;  %v13706_v10 = vld [vmem:[%s18286_s10 + $0x828] ss:$20 sps:$4 sm:$0xff]  }
 0x540   : > { %9614 = vmatmul.mubr.bf16.vlgmr.msra.gmra.mrb[0].mxu0 %v17186_v27 }
 0x541   : > { %10066 = vmatmul.mubr.bf16.vlgmr.msra.gmra.mrb[0].mxu1 %v17186_v27  ;;  %9623 = vmatprep.mubr.bf16.mxu0 %v17234_v41 }
 0x542   : > { %9695 = vmatpush1.bf16.msra.mxu0 %v13679_v35  ;;  %10075 = vmatprep.mubr.bf16.mxu1 %v17234_v41  ;;  %v13711_v35 = vld [vmem:[%s18286_s10 + $0x84c] ss:$20 sps:$4 sm:$0xff]  }
 0x543   : > { %10147 = vmatpush1.bf16.msra.mxu1 %v13682_v1  ;;  %9696 = vmatprep.subr.bf16.mxu0 %v13687_v62  ;;  %v13714_v1 = vld [vmem:[%s18286_s10 + $0x854] ss:$20 sps:$4 sm:$0xff]  }
 0x544   : > { %10148 = vmatprep.subr.bf16.mxu1 %v13690_v50  ;;  %v13709_v62 = vld [vmem:[%s18286_s10 + $0x848] ss:$20 sps:$4 sm:$0xff]   ;;  %v13712_v50 = vld [vmem:[%s18286_s10 + $0x850] ss:$20 sps:$4 sm:$0xff]  }
 0x546   : > { %9697 = vmatpush1.bf16.msra.mxu0 %v13685_v2  ;;  %v13717_v2 = vld [vmem:[%s18286_s10 + $0x874] ss:$20 sps:$4 sm:$0xff]  }
 0x547   : > { %10149 = vmatpush1.bf16.msra.mxu1 %v13688_v44  ;;  %9698 = vmatprep.subr.bf16.mxu0 %v13693_v38  ;;  %v13720_v44 = vld [vmem:[%s18286_s10 + $0x87c] ss:$20 sps:$4 sm:$0xff]  }
 0x548   : > { %9624 = vmatmul.mubr.bf16.gmra.mrb[4].mxu0 %v17227_v4  ;;  %10150 = vmatprep.subr.bf16.mxu1 %v13696_v26  ;;  %v13715_v38 = vld [vmem:[%s18286_s10 + $0x870] ss:$20 sps:$4 sm:$0xff]   ;;  %v13718_v26 = vld [vmem:[%s18286_s10 + $0x878] ss:$20 sps:$4 sm:$0xff]  }
 0x549   : > { %10076 = vmatmul.mubr.bf16.gmra.mrb[4].mxu1 %v17227_v4  ;;  %9633 = vmatprep.mubr.bf16.mxu0 %v17278_v19 }
 0x54a   : > { %9699 = vmatpush1.bf16.msra.mxu0 %v13691_v11  ;;  %10085 = vmatprep.mubr.bf16.mxu1 %v17278_v19  ;;  %v13723_v11 = vld [vmem:[%s18286_s10 + $0x89c] ss:$20 sps:$4 sm:$0xff]  }
 0x54b   : > { %10151 = vmatpush1.bf16.msra.mxu1 %v13694_v45  ;;  %9700 = vmatprep.subr.bf16.mxu0 %v13699_v57  ;;  %v13726_v45 = vld [vmem:[%s18286_s10 + $0x8a4] ss:$20 sps:$4 sm:$0xff]  }
 0x54c   : > { %10152 = vmatprep.subr.bf16.mxu1 %v13702_v8  ;;  %v13721_v57 = vld [vmem:[%s18286_s10 + $0x898] ss:$20 sps:$4 sm:$0xff]   ;;  %v13724_v8 = vld [vmem:[%s18286_s10 + $0x8a0] ss:$20 sps:$4 sm:$0xff]  }
 0x54e   : > { %9701 = vmatpush1.bf16.msra.mxu0 %v13697_v29  ;;  %v13729_v29 = vld [vmem:[%s18286_s10 + $0x8c4] ss:$20 sps:$4 sm:$0xff]  }
 0x54f   : > { %10153 = vmatpush1.bf16.msra.mxu1 %v13700_v25  ;;  %9702 = vmatprep.subr.bf16.mxu0 %v13705_v7  ;;  %v13732_v25 = vld [vmem:[%s18286_s10 + $0x8cc] ss:$20 sps:$4 sm:$0xff]  }
 0x550   : > { %9634 = vmatmul.mubr.bf16.gmra.mrb[8].mxu0 %v17271_v46  ;;  %10154 = vmatprep.subr.bf16.mxu1 %v13708_v3  ;;  %v13727_v7 = vld [vmem:[%s18286_s10 + $0x8c0] ss:$20 sps:$4 sm:$0xff]   ;;  %v13730_v3 = vld [vmem:[%s18286_s10 + $0x8c8] ss:$20 sps:$4 sm:$0xff]  }
 0x551   : > { %10086 = vmatmul.mubr.bf16.gmra.mrb[8].mxu1 %v17271_v46  ;;  %9643 = vmatprep.mubr.bf16.mxu0 %v17322_v60 }
 0x552   : > { %9703 = vmatpush1.bf16.msra.mxu0 %v13703_v12  ;;  %10095 = vmatprep.mubr.bf16.mxu1 %v17322_v60  ;;  %v13735_v12 = vld [vmem:[%s18286_s10 + $0x8ec] ss:$20 sps:$4 sm:$0xff]  }
 0x553   : > { %10155 = vmatpush1.bf16.msra.mxu1 %v13706_v10  ;;  %9704 = vmatprep.subr.bf16.mxu0 %v13711_v35  ;;  %v13738_v10 = vld [vmem:[%s18286_s10 + $0x8f4] ss:$20 sps:$4 sm:$0xff]  }
 0x554   : > { %10156 = vmatprep.subr.bf16.mxu1 %v13714_v1  ;;  %v13733_v35 = vld [vmem:[%s18286_s10 + $0x8e8] ss:$20 sps:$4 sm:$0xff]   ;;  %v13736_v1 = vld [vmem:[%s18286_s10 + $0x8f0] ss:$20 sps:$4 sm:$0xff]  }
 0x556   : > { %9705 = vmatpush1.bf16.msra.mxu0 %v13709_v62  ;;  %v13741_v62 = vld [vmem:[%s18286_s10 + $0x914] ss:$20 sps:$4 sm:$0xff]  }
 0x557   : > { %10157 = vmatpush1.bf16.msra.mxu1 %v13712_v50  ;;  %9706 = vmatprep.subr.bf16.mxu0 %v13717_v2  ;;  %v13744_v50 = vld [vmem:[%s18286_s10 + $0x91c] ss:$20 sps:$4 sm:$0xff]  }
 0x558   : > { %9644 = vmatmul.mubr.bf16.gmra.mrb[12].mxu0 %v17315_v43  ;;  %10158 = vmatprep.subr.bf16.mxu1 %v13720_v44  ;;  %v13739_v2 = vld [vmem:[%s18286_s10 + $0x910] ss:$20 sps:$4 sm:$0xff]   ;;  %v13742_v44 = vld [vmem:[%s18286_s10 + $0x918] ss:$20 sps:$4 sm:$0xff]  }
 0x559   : > { %10096 = vmatmul.mubr.bf16.gmra.mrb[12].mxu1 %v17315_v43  ;;  %9653 = vmatprep.mubr.bf16.mxu0 %v17366_v0 }
 0x55a   : > { %9707 = vmatpush1.bf16.msra.mxu0 %v13715_v38  ;;  %10105 = vmatprep.mubr.bf16.mxu1 %v17366_v0  ;;  %v13747_v38 = vld [vmem:[%s18286_s10 + $0x93c] ss:$20 sps:$4 sm:$0xff]  }
 0x55b   : > { %10159 = vmatpush1.bf16.msra.mxu1 %v13718_v26  ;;  %9708 = vmatprep.subr.bf16.mxu0 %v13723_v11  ;;  %v13750_v26 = vld [vmem:[%s18286_s10 + $0x944] ss:$20 sps:$4 sm:$0xff]  }
 0x55c   : > { %10160 = vmatprep.subr.bf16.mxu1 %v13726_v45  ;;  %v13745_v11 = vld [vmem:[%s18286_s10 + $0x938] ss:$20 sps:$4 sm:$0xff]   ;;  %v13748_v45 = vld [vmem:[%s18286_s10 + $0x940] ss:$20 sps:$4 sm:$0xff]  }
 0x55e   : > { %9709 = vmatpush1.bf16.msra.mxu0 %v13721_v57  ;;  %v13753_v57 = vld [vmem:[%s18286_s10 + $0x964] ss:$20 sps:$4 sm:$0xff]  }
 0x55f   : > { %10161 = vmatpush1.bf16.msra.mxu1 %v13724_v8  ;;  %9710 = vmatprep.subr.bf16.mxu0 %v13729_v29  ;;  %v13756_v8 = vld [vmem:[%s18286_s10 + $0x96c] ss:$20 sps:$4 sm:$0xff]  }
 0x560   : > { %9654 = vmatmul.mubr.bf16.gmra.mrb[16].mxu0 %v17359_v9  ;;  %10162 = vmatprep.subr.bf16.mxu1 %v13732_v25  ;;  %v13751_v29 = vld [vmem:[%s18286_s10 + $0x960] ss:$20 sps:$4 sm:$0xff]   ;;  %v13754_v25 = vld [vmem:[%s18286_s10 + $0x968] ss:$20 sps:$4 sm:$0xff]  }
 0x561   : > { %10106 = vmatmul.mubr.bf16.gmra.mrb[16].mxu1 %v17359_v9  ;;  %9663 = vmatprep.mubr.bf16.mxu0 %v17410_v42 }
 0x562   : > { %9711 = vmatpush1.bf16.msra.mxu0 %v13727_v7  ;;  %10115 = vmatprep.mubr.bf16.mxu1 %v17410_v42  ;;  %v13759_v7 = vld [vmem:[%s18286_s10 + $0x98c] ss:$20 sps:$4 sm:$0xff]  }
 0x563   : > { %10163 = vmatpush1.bf16.msra.mxu1 %v13730_v3  ;;  %9712 = vmatprep.subr.bf16.mxu0 %v13735_v12  ;;  %v13762_v3 = vld [vmem:[%s18286_s10 + $0x994] ss:$20 sps:$4 sm:$0xff]  }
 0x564   : > { %10164 = vmatprep.subr.bf16.mxu1 %v13738_v10  ;;  %v13757_v12 = vld [vmem:[%s18286_s10 + $0x988] ss:$20 sps:$4 sm:$0xff]   ;;  %v13760_v10 = vld [vmem:[%s18286_s10 + $0x990] ss:$20 sps:$4 sm:$0xff]  }
 0x566   : > { %9713 = vmatpush1.bf16.msra.mxu0 %v13733_v35  ;;  %v13765_v35 = vld [vmem:[%s18286_s10 + $0x9b4] ss:$20 sps:$4 sm:$0xff]  }
 0x567   : > { %10165 = vmatpush1.bf16.msra.mxu1 %v13736_v1  ;;  %9714 = vmatprep.subr.bf16.mxu0 %v13741_v62  ;;  %v13768_v1 = vld [vmem:[%s18286_s10 + $0x9bc] ss:$20 sps:$4 sm:$0xff]  }
 0x568   : > { %9664 = vmatmul.mubr.bf16.gmra.mrb[20].mxu0 %v17403_v23  ;;  %10166 = vmatprep.subr.bf16.mxu1 %v13744_v50  ;;  %v13763_v62 = vld [vmem:[%s18286_s10 + $0x9b0] ss:$20 sps:$4 sm:$0xff]   ;;  %v13766_v50 = vld [vmem:[%s18286_s10 + $0x9b8] ss:$20 sps:$4 sm:$0xff]  }
 0x569   : > { %10116 = vmatmul.mubr.bf16.gmra.mrb[20].mxu1 %v17403_v23  ;;  %9673 = vmatprep.mubr.bf16.mxu0 %v17454_v22 }
 0x56a   : > { %9715 = vmatpush1.bf16.msra.mxu0 %v13739_v2  ;;  %10125 = vmatprep.mubr.bf16.mxu1 %v17454_v22  ;;  %v13771_v2 = vld [vmem:[%s18286_s10 + $0x9dc] ss:$20 sps:$4 sm:$0xff]  }
 0x56b   : > { %10167 = vmatpush1.bf16.msra.mxu1 %v13742_v44  ;;  %9716 = vmatprep.subr.bf16.mxu0 %v13747_v38  ;;  %v13774_v44 = vld [vmem:[%s18286_s10 + $0x9e4] ss:$20 sps:$4 sm:$0xff]  }
 0x56c   : > { %10168 = vmatprep.subr.bf16.mxu1 %v13750_v26  ;;  %v13769_v38 = vld [vmem:[%s18286_s10 + $0x9d8] ss:$20 sps:$4 sm:$0xff]   ;;  %v13772_v26 = vld [vmem:[%s18286_s10 + $0x9e0] ss:$20 sps:$4 sm:$0xff]  }
 0x56e   : > { %9717 = vmatpush1.bf16.msra.mxu0 %v13745_v11  ;;  %v13775_v11 = vld [vmem:[%s18286_s10 + $0x150] ss:$20 sps:$4 sm:$0xff]  }
 0x56f   : > { %10169 = vmatpush1.bf16.msra.mxu1 %v13748_v45  ;;  %9718 = vmatprep.subr.bf16.mxu0 %v13753_v57  ;;  %v13777_v45 = vld [vmem:[%s18286_s10 + $0x3d0] ss:$20 sps:$4 sm:$0xff]  }
 0x570   : > { %9674 = vmatmul.mubr.bf16.gmra.mrb[24].mxu0 %v17447_v14  ;;  %10170 = vmatprep.subr.bf16.mxu1 %v13756_v8  ;;  %v13776_v57 = vld [vmem:[%s18286_s10 + $0x10] ss:$20 sps:$4 sm:$0xff]  }
 0x571   : > { %10126 = vmatmul.mubr.bf16.gmra.mrb[24].mxu1 %v17447_v14  ;;  %9683 = vmatprep.mubr.bf16.mxu0 %v17498_v21  ;;  %v13778_v8 = vld [vmem:[%s18286_s10 + $0x290] ss:$20 sps:$4 sm:$0xff]  }
 0x572   : > { %9719 = vmatpush1.bf16.msra.mxu0 %v13751_v29  ;;  %10135 = vmatprep.mubr.bf16.mxu1 %v17498_v21  ;;  %v13779_v29 = vld [vmem:[%s18286_s10 + $0x178] ss:$20 sps:$4 sm:$0xff]  }
 0x573   : > { %10171 = vmatpush1.bf16.msra.mxu1 %v13754_v25  ;;  %9720 = vmatprep.subr.bf16.mxu0 %v13759_v7  ;;  %v13781_v25 = vld [vmem:[%s18286_s10 + $0x3f8] ss:$20 sps:$4 sm:$0xff]  }
 0x574   : > { %10172 = vmatprep.subr.bf16.mxu1 %v13762_v3  ;;  %v13780_v7 = vld [vmem:[%s18286_s10 + $0x38] ss:$20 sps:$4 sm:$0xff]  }
 0x575   : > { %v13782_v3 = vld [vmem:[%s18286_s10 + $0x2b8] ss:$20 sps:$4 sm:$0xff]  }
 0x576   : > { %9721 = vmatpush1.bf16.msra.mxu0 %v13757_v12  ;;  %v13783_v12 = vld [vmem:[%s18286_s10 + $0x1a0] ss:$20 sps:$4 sm:$0xff]  }
 0x577   : > { %10173 = vmatpush1.bf16.msra.mxu1 %v13760_v10  ;;  %9722 = vmatprep.subr.bf16.mxu0 %v13765_v35  ;;  %v13785_v10 = vld [vmem:[%s18286_s10 + $0x420] ss:$20 sps:$4 sm:$0xff]  }
 0x578   : > { %9684 = vmatmul.mubr.bf16.gmra.mrb[28].mxu0 %v17491_v36  ;;  %10174 = vmatprep.subr.bf16.mxu1 %v13768_v1  ;;  %v13784_v35 = vld [vmem:[%s18286_s10 + $0x60] ss:$20 sps:$4 sm:$0xff]  }
 0x579   : > { %10136 = vmatmul.mubr.bf16.gmra.mrb[28].mxu1 %v17491_v36  ;;  %9726 = vmatprep.mubr.bf16.mxu0 %v17192_v49  ;;  %v13786_v1 = vld [vmem:[%s18286_s10 + $0x2e0] ss:$20 sps:$4 sm:$0xff]  }
 0x57a   : > { %9723 = vmatpush1.bf16.msra.mxu0 %v13763_v62  ;;  %10178 = vmatprep.mubr.bf16.mxu1 %v17192_v49  ;;  %v13787_v62 = vld [vmem:[%s18286_s10 + $0x1c8] ss:$20 sps:$4 sm:$0xff]  }
 0x57b   : > { %10175 = vmatpush1.bf16.msra.mxu1 %v13766_v50  ;;  %9724 = vmatprep.subr.bf16.mxu0 %v13771_v2  ;;  %v13789_v50 = vld [vmem:[%s18286_s10 + $0x448] ss:$20 sps:$4 sm:$0xff]  }
 0x57c   : > { %10176 = vmatprep.subr.bf16.mxu1 %v13774_v44  ;;  %v13788_v2 = vld [vmem:[%s18286_s10 + $0x88] ss:$20 sps:$4 sm:$0xff]  }
 0x57d   : > { %v13790_v44 = vld [vmem:[%s18286_s10 + $0x308] ss:$20 sps:$4 sm:$0xff]  }
 0x57e   : > { %9725 = vmatpush1.bf16.msra.mxu0 %v13769_v38  ;;  %v13791_v38 = vld [vmem:[%s18286_s10 + $0x1f0] ss:$20 sps:$4 sm:$0xff]  }
 0x57f   : > { %10177 = vmatpush1.bf16.msra.mxu1 %v13772_v26  ;;  %12300 = vmatprep.subr.bf16.mxu0 %v13775_v11  ;;  %v13793_v26 = vld [vmem:[%s18286_s10 + $0x470] ss:$20 sps:$4 sm:$0xff]  }
 0x580   : > { %12364 = vmatprep.subr.bf16.mxu1 %v13777_v45  ;;  %v13792_v11 = vld [vmem:[%s18286_s10 + $0xb0] ss:$20 sps:$4 sm:$0xff]  }
 0x581   : > { %9727 = vmatmul.mubr.bf16.vlgmr.msra.gmra.mrb[0].mxu0 %v17188_v61  ;;  %v13794_v45 = vld [vmem:[%s18286_s10 + $0x330] ss:$20 sps:$4 sm:$0xff]  }
 0x582   : > { %10179 = vmatmul.mubr.bf16.vlgmr.msra.gmra.mrb[0].mxu1 %v17188_v61  ;;  %9736 = vmatprep.mubr.bf16.mxu0 %v17236_v34 }
 0x583   : > { %10188 = vmatprep.mubr.bf16.mxu1 %v17236_v34  ;;  %12301 = vmatpush3.bf16.msra.mxu0 %v13776_v57  ;;  %v13795_v57 = vld [vmem:[%s18286_s10 + $0x218] ss:$20 sps:$4 sm:$0xff]  }
 0x584   : > { %12365 = vmatpush3.bf16.msra.mxu1 %v13778_v8  ;;  %12302 = vmatprep.subr.bf16.mxu0 %v13779_v29  ;;  %v13797_v8 = vld [vmem:[%s18286_s10 + $0x498] ss:$20 sps:$4 sm:$0xff]  }
 0x585   : > { %12366 = vmatprep.subr.bf16.mxu1 %v13781_v25  ;;  %v13796_v29 = vld [vmem:[%s18286_s10 + $0xd8] ss:$20 sps:$4 sm:$0xff]  }
 0x586   : > { %v13798_v25 = vld [vmem:[%s18286_s10 + $0x358] ss:$20 sps:$4 sm:$0xff]  }
 0x587   : > { %12303 = vmatpush3.bf16.msra.mxu0 %v13780_v7  ;;  %v13799_v7 = vld [vmem:[%s18286_s10 + $0x240] ss:$20 sps:$4 sm:$0xff]  }
 0x588   : > { %12367 = vmatpush3.bf16.msra.mxu1 %v13782_v3  ;;  %12304 = vmatprep.subr.bf16.mxu0 %v13783_v12  ;;  %v13801_v3 = vld [vmem:[%s18286_s10 + $0x4c0] ss:$20 sps:$4 sm:$0xff]  }
 0x589   : > { %9737 = vmatmul.mubr.bf16.gmra.mrb[4].mxu0 %v17229_v13  ;;  %12368 = vmatprep.subr.bf16.mxu1 %v13785_v10  ;;  %v13800_v12 = vld [vmem:[%s18286_s10 + $0x100] ss:$20 sps:$4 sm:$0xff]  }
 0x58a   : > { %10189 = vmatmul.mubr.bf16.gmra.mrb[4].mxu1 %v17229_v13  ;;  %9746 = vmatprep.mubr.bf16.mxu0 %v17280_v48  ;;  %v13802_v10 = vld [vmem:[%s18286_s10 + $0x380] ss:$20 sps:$4 sm:$0xff]  }
 0x58b   : > { %10198 = vmatprep.mubr.bf16.mxu1 %v17280_v48  ;;  %12305 = vmatpush3.bf16.msra.mxu0 %v13784_v35  ;;  %v13803_v35 = vld [vmem:[%s18286_s10 + $0x268] ss:$20 sps:$4 sm:$0xff]  }
 0x58c   : > { %12369 = vmatpush3.bf16.msra.mxu1 %v13786_v1  ;;  %12306 = vmatprep.subr.bf16.mxu0 %v13787_v62  ;;  %v13805_v1 = vld [vmem:[%s18286_s10 + $0x4e8] ss:$20 sps:$4 sm:$0xff]  }
 0x58d   : > { %12370 = vmatprep.subr.bf16.mxu1 %v13789_v50  ;;  %v13804_v62 = vld [vmem:[%s18286_s10 + $0x128] ss:$20 sps:$4 sm:$0xff]  }
 0x58e   : > { %v13806_v50 = vld [vmem:[%s18286_s10 + $0x3a8] ss:$20 sps:$4 sm:$0xff]  }
 0x58f   : > { %12307 = vmatpush3.bf16.msra.mxu0 %v13788_v2  ;;  %v13807_v2 = vld [vmem:[%s18286_s10 + $0x650] ss:$20 sps:$4 sm:$0xff]  }
 0x590   : > { %12371 = vmatpush3.bf16.msra.mxu1 %v13790_v44  ;;  %12308 = vmatprep.subr.bf16.mxu0 %v13791_v38  ;;  %v13809_v44 = vld [vmem:[%s18286_s10 + $0x8d0] ss:$20 sps:$4 sm:$0xff]  }
 0x591   : > { %9747 = vmatmul.mubr.bf16.gmra.mrb[8].mxu0 %v17273_v20  ;;  %12372 = vmatprep.subr.bf16.mxu1 %v13793_v26  ;;  %v13808_v38 = vld [vmem:[%s18286_s10 + $0x510] ss:$20 sps:$4 sm:$0xff]  }
 0x592   : > { %10199 = vmatmul.mubr.bf16.gmra.mrb[8].mxu1 %v17273_v20  ;;  %9756 = vmatprep.mubr.bf16.mxu0 %v17324_v53  ;;  %v13810_v26 = vld [vmem:[%s18286_s10 + $0x790] ss:$20 sps:$4 sm:$0xff]  }
 0x593   : > { %10208 = vmatprep.mubr.bf16.mxu1 %v17324_v53  ;;  %12309 = vmatpush3.bf16.msra.mxu0 %v13792_v11  ;;  %v13811_v11 = vld [vmem:[%s18286_s10 + $0x678] ss:$20 sps:$4 sm:$0xff]  }
 0x594   : > { %12373 = vmatpush3.bf16.msra.mxu1 %v13794_v45  ;;  %12310 = vmatprep.subr.bf16.mxu0 %v13795_v57  ;;  %v13815_v45 = vld [vmem:[%s18286_s10 + $0x6a0] ss:$20 sps:$4 sm:$0xff]   ;;  %v13819_v57 = vld [vmem:[%s18286_s10 + $0x6c8] ss:$20 sps:$4 sm:$0xff]  }
 0x595   : > { %12374 = vmatprep.subr.bf16.mxu1 %v13797_v8  ;;  %v13821_v8 = vld [vmem:[%s18286_s10 + $0x948] ss:$20 sps:$4 sm:$0xff]  }
 0x597   : > { %12311 = vmatpush3.bf16.msra.mxu0 %v13796_v29  ;;  %v13820_v29 = vld [vmem:[%s18286_s10 + $0x588] ss:$20 sps:$4 sm:$0xff]  }
 0x598   : > { %12375 = vmatpush3.bf16.msra.mxu1 %v13798_v25  ;;  %12312 = vmatprep.subr.bf16.mxu0 %v13799_v7  ;;  %v13823_v25 = vld [vmem:[%s18286_s10 + $0x6f0] ss:$20 sps:$4 sm:$0xff]   ;;  %v13827_v7 = vld [vmem:[%s18286_s10 + $0x718] ss:$20 sps:$4 sm:$0xff]  }
 0x599   : > { %9757 = vmatmul.mubr.bf16.gmra.mrb[12].mxu0 %v17317_v37  ;;  %12376 = vmatprep.subr.bf16.mxu1 %v13801_v3  ;;  %v18423_v3 = vld [vmem:[#allocation10_spill] sm:$0xff] }
 0x59a   : > { %10209 = vmatmul.mubr.bf16.gmra.mrb[12].mxu1 %v17317_v37  ;;  %9766 = vmatprep.mubr.bf16.mxu0 %v17368_v63 }
 0x59b   : > { %10218 = vmatprep.mubr.bf16.mxu1 %v17368_v63  ;;  %12313 = vmatpush3.bf16.msra.mxu0 %v13800_v12  ;;  %v13829_v12 = vld [vmem:[%s18286_s10 + $0x998] ss:$20 sps:$4 sm:$0xff]  }
 0x59c   : > { %12377 = vmatpush3.bf16.msra.mxu1 %v13802_v10  ;;  %12314 = vmatprep.subr.bf16.mxu0 %v13803_v35  ;;  %v18424_v10 = vld [vmem:[#allocation8_spill] sm:$0xff]  ;;  %v18425_v35 = vld [vmem:[#allocation14_spill] sm:$0xff] }
 0x59d   : > { %12378 = vmatprep.subr.bf16.mxu1 %v13805_v1  ;;  %v18426_v1 = vld [vmem:[#allocation11_spill] sm:$0xff] }
 0x59f   : > { %12315 = vmatpush3.bf16.msra.mxu0 %v13804_v62  ;;  %v13828_v62 = vld [vmem:[%s18286_s10 + $0x5d8] ss:$20 sps:$4 sm:$0xff]  }
 0x5a0   : > { %12379 = vmatpush3.bf16.msra.mxu1 %v13806_v50  ;;  %12428 = vmatprep.subr.bf16.mxu0 %v13807_v2  ;;  %v13830_v50 = vld [vmem:[%s18286_s10 + $0x858] ss:$20 sps:$4 sm:$0xff]   ;;  %v13831_v2 = vld [vmem:[%s18286_s10 + $0x740] ss:$20 sps:$4 sm:$0xff]  }
 0x5a1   : > { %9767 = vmatmul.mubr.bf16.gmra.mrb[16].mxu0 %v17361_v5  ;;  %12492 = vmatprep.subr.bf16.mxu1 %v13809_v44  ;;  %v13833_v44 = vld [vmem:[%s18286_s10 + $0x9c0] ss:$20 sps:$4 sm:$0xff]  }
 0x5a2   : > { %10219 = vmatmul.mubr.bf16.gmra.mrb[16].mxu1 %v17361_v5  ;;  %9776 = vmatprep.mubr.bf16.mxu0 %v17412_v30 }
 0x5a3   : > { %10228 = vmatprep.mubr.bf16.mxu1 %v17412_v30 }
 0x5a9   : > { %9777 = vmatmul.mubr.bf16.gmra.mrb[20].mxu0 %v17405_v51 }
 0x5aa   : > { %10229 = vmatmul.mubr.bf16.gmra.mrb[20].mxu1 %v17405_v51  ;;  %9786 = vmatprep.mubr.bf16.mxu0 %v17456_v16 }
 0x5ab   : > { %10238 = vmatprep.mubr.bf16.mxu1 %v17456_v16 }
 0x5b1   : > { %9787 = vmatmul.mubr.bf16.gmra.mrb[24].mxu0 %v17449_v56 }
 0x5b2   : > { %10239 = vmatmul.mubr.bf16.gmra.mrb[24].mxu1 %v17449_v56  ;;  %9796 = vmatprep.mubr.bf16.mxu0 %v17500_v40 }
 0x5b3   : > { %10248 = vmatprep.mubr.bf16.mxu1 %v17500_v40 }
 0x5b9   : > { %9797 = vmatmul.mubr.bf16.gmra.mrb[28].mxu0 %v17493_v52 }
 0x5ba   : > { %10249 = vmatmul.mubr.bf16.gmra.mrb[28].mxu1 %v17493_v52  ;;  %10291 = vmatprep.mubr.bf16.mxu0 %v16817_v54  ;;  %v13813_v54 = vld [vmem:[%s18286_s10 + $0x8f8] ss:$20 sps:$4 sm:$0xff]  }
 0x5bb   : > { %10388 = vmatprep.mubr.bf16.mxu1 %v16819_v31  ;;  %v13812_v31 = vld [vmem:[%s18286_s10 + $0x538] ss:$20 sps:$4 sm:$0xff]  }
 0x5c1   : > { %10292 = vmatmul.mubr.bf16.vlgmr.msra.gmra.mrb[32].mxu0 %v16813_v28  ;;  %v13814_v28 = vld [vmem:[%s18286_s10 + $0x7b8] ss:$20 sps:$4 sm:$0xff]  }
 0x5c2   : > { %10389 = vmatmul.mubr.bf16.vlgmr.msra.gmra.mrb[32].mxu1 %v16815_v17  ;;  %10299 = vmatprep.mubr.bf16.mxu0 %v16861_v32  ;;  %v13817_v17 = vld [vmem:[%s18286_s10 + $0x920] ss:$20 sps:$4 sm:$0xff]  }
 0x5c3   : > { %10396 = vmatprep.mubr.bf16.mxu1 %v16863_v24  ;;  %12429 = vmatpush3.bf16.msra.mxu0 %v13808_v38  ;;  %v13816_v32 = vld [vmem:[%s18286_s10 + $0x560] ss:$20 sps:$4 sm:$0xff]  }
 0x5c4   : > { %12493 = vmatpush3.bf16.msra.mxu1 %v13810_v26  ;;  %12430 = vmatprep.subr.bf16.mxu0 %v13811_v11  ;;  %v13818_v24 = vld [vmem:[%s18286_s10 + $0x7e0] ss:$20 sps:$4 sm:$0xff]   ;;  %v13835_v11 = vld [vmem:[%s18286_s10 + $0x768] ss:$20 sps:$4 sm:$0xff]  }
 0x5c5   : > { %12494 = vmatprep.subr.bf16.mxu1 %v13813_v54  ;;  %v13832_v38 = vld [vmem:[%s18286_s10 + $0x600] ss:$20 sps:$4 sm:$0xff]   ;;  %v18427_v54 = vld [vmem:[#allocation9_spill] sm:$0xff] }
 0x5c6   : > { %v13834_v26 = vld [vmem:[%s18286_s10 + $0x880] ss:$20 sps:$4 sm:$0xff]  }
 0x5c7   : > { %12431 = vmatpush3.bf16.msra.mxu0 %v13812_v31  ;;  %v13837_v31 = vld [vmem:[%s18286_s10 + $0x9e8] ss:$20 sps:$4 sm:$0xff]  }
 0x5c8   : > { %12495 = vmatpush3.bf16.msra.mxu1 %v13814_v28  ;;  %12432 = vmatprep.subr.bf16.mxu0 %v13815_v45  ;;  %v18428_v28 = vld [vmem:[#allocation12_spill] sm:$0xff]  ;;  %v18429_v45 = vld [vmem:[#allocation18_spill] sm:$0xff] }
 0x5c9   : > { %10300 = vmatmul.mubr.bf16.gmra.mrb[36].mxu0 %v16857_v58  ;;  %12496 = vmatprep.subr.bf16.mxu1 %v13817_v17  ;;  %v13822_v58 = vld [vmem:[%s18286_s10 + $0x808] ss:$20 sps:$4 sm:$0xff]  }
 0x5ca   : > { %10397 = vmatmul.mubr.bf16.gmra.mrb[36].mxu1 %v16859_v15  ;;  %10307 = vmatprep.mubr.bf16.mxu0 %v16905_v59  ;;  %v13825_v15 = vld [vmem:[%s18286_s10 + $0x970] ss:$20 sps:$4 sm:$0xff]   ;;  %v18430_v17 = vld [vmem:[#allocation15_spill] sm:$0xff] }
 0x5cb   : > { %10404 = vmatprep.mubr.bf16.mxu1 %v16907_v39  ;;  %12433 = vmatpush3.bf16.msra.mxu0 %v13816_v32  ;;  %v13824_v59 = vld [vmem:[%s18286_s10 + $0x5b0] ss:$20 sps:$4 sm:$0xff]   ;;  %v13836_v32 = vld [vmem:[%s18286_s10 + $0x628] ss:$20 sps:$4 sm:$0xff]  }
 0x5cc   : > { %12497 = vmatpush3.bf16.msra.mxu1 %v13818_v24  ;;  %12434 = vmatprep.subr.bf16.mxu0 %v13819_v57  ;;  %v13826_v39 = vld [vmem:[%s18286_s10 + $0x830] ss:$20 sps:$4 sm:$0xff]   ;;  %v13838_v24 = vld [vmem:[%s18286_s10 + $0x8a8] ss:$20 sps:$4 sm:$0xff]  }
 0x5cd   : > { %12498 = vmatprep.subr.bf16.mxu1 %v13821_v8  ;;  %v18431_v57 = vld [vmem:[#allocation13_spill] sm:$0xff]  ;;  %v18432_v8 = vld [vmem:[#allocation16_spill] sm:$0xff] }
 0x5cf   : > { %12435 = vmatpush3.bf16.msra.mxu0 %v13820_v29  ;;  %v18433_v29 = vld [vmem:[#allocation22_spill] sm:$0xff] }
 0x5d0   : > { %12499 = vmatpush3.bf16.msra.mxu1 %v13822_v58  ;;  %12436 = vmatprep.subr.bf16.mxu0 %v13823_v25  ;;  %v18434_v58 = vld [vmem:[#allocation19_spill] sm:$0xff]  ;;  %v18435_v25 = vld [vmem:[#allocation17_spill] sm:$0xff] }
 0x5d1   : > { %10308 = vmatmul.mubr.bf16.gmra.mrb[40].mxu0 %v18423_v3  ;;  %12500 = vmatprep.subr.bf16.mxu1 %v13825_v15  ;;  %v18436_v15 = vld [vmem:[#allocation20_spill] sm:$0xff]  ;;  %v18440_v3 = vld [vmem:[#allocation26_spill] sm:$0xff] }
 0x5d2   : > { %10405 = vmatmul.mubr.bf16.gmra.mrb[40].mxu1 %v18424_v10  ;;  %10315 = vmatprep.mubr.bf16.mxu0 %v18425_v35 }
 0x5d3   : > { %10412 = vmatprep.mubr.bf16.mxu1 %v18426_v1  ;;  %12437 = vmatpush3.bf16.msra.mxu0 %v13824_v59  ;;  %v18437_v59 = vld [vmem:[#allocation24_spill] sm:$0xff] }
 0x5d4   : > { %12501 = vmatpush3.bf16.msra.mxu1 %v13826_v39  ;;  %12438 = vmatprep.subr.bf16.mxu0 %v13827_v7  ;;  %v18438_v39 = vld [vmem:[#allocation21_spill] sm:$0xff]  ;;  %v18439_v7 = vld [vmem:[#allocation23_spill] sm:$0xff] }
 0x5d5   : > { %12502 = vmatprep.subr.bf16.mxu1 %v13829_v12 }
 0x5d7   : > { %12439 = vmatpush3.bf16.msra.mxu0 %v13828_v62 }
 0x5d8   : > { %12503 = vmatpush3.bf16.msra.mxu1 %v13830_v50  ;;  %12440 = vmatprep.subr.bf16.mxu0 %v13831_v2 }
 0x5d9   : > { %10316 = vmatmul.mubr.bf16.gmra.mrb[44].mxu0 %v18427_v54  ;;  %12504 = vmatprep.subr.bf16.mxu1 %v13833_v44 }
 0x5da   : > { %10413 = vmatmul.mubr.bf16.gmra.mrb[44].mxu1 %v18428_v28  ;;  %10323 = vmatprep.mubr.bf16.mxu0 %v18429_v45 }
 0x5db   : > { %10420 = vmatprep.mubr.bf16.mxu1 %v18430_v17  ;;  %12441 = vmatpush3.bf16.msra.mxu0 %v13832_v38 }
 0x5dc   : > { %12505 = vmatpush3.bf16.msra.mxu1 %v13834_v26  ;;  %12442 = vmatprep.subr.bf16.mxu0 %v13835_v11 }
 0x5dd   : > { %12506 = vmatprep.subr.bf16.mxu1 %v13837_v31 }
 0x5df   : > { %12443 = vmatpush3.bf16.msra.mxu0 %v13836_v32 }
 0x5e0   : > { %12507 = vmatpush3.bf16.msra.mxu1 %v13838_v24 }
 0x5e1   : > { %10324 = vmatmul.mubr.bf16.gmra.mrb[48].mxu0 %v18431_v57 }
 0x5e2   : > { %10421 = vmatmul.mubr.bf16.gmra.mrb[48].mxu1 %v18432_v8  ;;  %10331 = vmatprep.mubr.bf16.mxu0 %v18433_v29 }
 0x5e3   : > { %10428 = vmatprep.mubr.bf16.mxu1 %v18434_v58 }
 0x5e9   : > { %10332 = vmatmul.mubr.bf16.gmra.mrb[52].mxu0 %v18435_v25 }
 0x5ea   : > { %10429 = vmatmul.mubr.bf16.gmra.mrb[52].mxu1 %v18436_v15  ;;  %10339 = vmatprep.mubr.bf16.mxu0 %v18437_v59 }
 0x5eb   : > { %10436 = vmatprep.mubr.bf16.mxu1 %v17083_v47  ;;  %v18441_v47 = vld [vmem:[#allocation3_spill] sm:$0xff] }
 0x5f1   : > { %10340 = vmatmul.mubr.bf16.gmra.mrb[56].mxu0 %v18438_v39 }
 0x5f2   : > { %10437 = vmatmul.mubr.bf16.gmra.mrb[56].mxu1 %v17079_v6  ;;  %10347 = vmatprep.mubr.bf16.mxu0 %v18439_v7  ;;  %v18037_v6 = vld [vmem:[%s18287_s11] sm:$0x1f] }
 0x5f3   : > { %10444 = vmatprep.mubr.bf16.mxu1 %v17146_v33  ;;  %v18442_v33 = vld [vmem:[#allocation4_spill] sm:$0xff] }
 0x5f9   : > { %10348 = vmatmul.mubr.bf16.gmra.mrb[60].mxu0 %v18440_v3 }
 0x5fa   : > { %10445 = vmatmul.mubr.bf16.gmra.mrb[60].mxu1 %v17142_v55  ;;  %10485 = vmatprep.mubr.bf16.mxu0 %v17190_v18  ;;  %v18042_v55 = vrot.slane %v18037_v6, %v18441_v47 }
 0x5fb   : > { %10582 = vmatprep.mubr.bf16.mxu1 %v17192_v49  ;;  %v18444_v49 = vld [vmem:[#allocation6_spill] sm:$0xff] }
 0x601   : > { %10486 = vmatmul.mubr.bf16.vlgmr.msra.gmra.mrb[64].mxu0 %v17186_v27  ;;  %v18046_v27 = vrot.slane %v18037_v6, %v18442_v33 }
 0x602   : > { %10583 = vmatmul.mubr.bf16.vlgmr.msra.gmra.mrb[64].mxu1 %v17188_v61  ;;  %10493 = vmatprep.mubr.bf16.mxu0 %v17234_v41  ;;  %v18443_v61 = vld [vmem:[#allocation5_spill] sm:$0xff] }
 0x603   : > { %10590 = vmatprep.mubr.bf16.mxu1 %v17236_v34  ;;  %v18050_v18 = vrot.slane %v18037_v6, %v18443_v61 }
 0x609   : > { %10494 = vmatmul.mubr.bf16.gmra.mrb[68].mxu0 %v17227_v4  ;;  %v18054_v4 = vrot.slane %v18037_v6, %v18444_v49 }
 0x60a   : > { %10591 = vmatmul.mubr.bf16.gmra.mrb[68].mxu1 %v17229_v13  ;;  %10501 = vmatprep.mubr.bf16.mxu0 %v17278_v19 }
 0x60b   : > { %10598 = vmatprep.mubr.bf16.mxu1 %v17280_v48 }
 0x611   : > { %10502 = vmatmul.mubr.bf16.gmra.mrb[72].mxu0 %v17271_v46 }
 0x612   : > { %10599 = vmatmul.mubr.bf16.gmra.mrb[72].mxu1 %v17273_v20  ;;  %10509 = vmatprep.mubr.bf16.mxu0 %v17322_v60 }
 0x613   : > { %10606 = vmatprep.mubr.bf16.mxu1 %v17324_v53 }
 0x619   : > { %10510 = vmatmul.mubr.bf16.gmra.mrb[76].mxu0 %v17315_v43 }
 0x61a   : > { %10607 = vmatmul.mubr.bf16.gmra.mrb[76].mxu1 %v17317_v37  ;;  %10517 = vmatprep.mubr.bf16.mxu0 %v17366_v0 }
 0x61b   : > { %10614 = vmatprep.mubr.bf16.mxu1 %v17368_v63 }
 0x621   : > { %10518 = vmatmul.mubr.bf16.gmra.mrb[80].mxu0 %v17359_v9 }
 0x622   : > { %10615 = vmatmul.mubr.bf16.gmra.mrb[80].mxu1 %v17361_v5  ;;  %10525 = vmatprep.mubr.bf16.mxu0 %v17410_v42 }
 0x623   : > { %10622 = vmatprep.mubr.bf16.mxu1 %v17412_v30 }
 0x629   : > { %10526 = vmatmul.mubr.bf16.gmra.mrb[84].mxu0 %v17403_v23 }
 0x62a   : > { %10623 = vmatmul.mubr.bf16.gmra.mrb[84].mxu1 %v17405_v51  ;;  %10533 = vmatprep.mubr.bf16.mxu0 %v17454_v22 }
 0x62b   : > { %10630 = vmatprep.mubr.bf16.mxu1 %v17456_v16 }
 0x631   : > { %10534 = vmatmul.mubr.bf16.gmra.mrb[88].mxu0 %v17447_v14 }
 0x632   : > { %10631 = vmatmul.mubr.bf16.gmra.mrb[88].mxu1 %v17449_v56  ;;  %10541 = vmatprep.mubr.bf16.mxu0 %v17498_v21 }
 0x633   : > { %10638 = vmatprep.mubr.bf16.mxu1 %v17500_v40 }
 0x639   : > { %10542 = vmatmul.mubr.bf16.gmra.mrb[92].mxu0 %v17491_v36 }
 0x63a   : > { %10639 = vmatmul.mubr.bf16.gmra.mrb[92].mxu1 %v17493_v52 }
 0x654   : > { %v9728_v13 = vpop.f32.mrb[0].mxu0 }
 0x655   : > { %v12684_v41 = vadd.f32 %v9728_v13, %v18042_v55  ;;  %v10180_v34 = vpop.f32.mrb[0].mxu1  ;;  %v9730_v46 = vpop.f32.mrb[1].mxu0 }
 0x656   : > { %v12716_v20 = vadd.f32 %v10180_v34, %v18046_v27  ;;  %v12685_v19 = vadd.f32 %v9730_v46, %v18050_v18  ;;  %v10182_v48 = vpop.f32.mrb[1].mxu1  ;;  %v9732_v43 = vpop.f32.mrb[2].mxu0 }
 0x657   : > { %10647 = vst [vmem:[%s18059_s25] sm:$0xff] %v12684_v41  ;;  %v12717_v37 = vadd.f32 %v10182_v48, %v18054_v4  ;;  %v12686_v60 = vadd.f32 %v9732_v43, %v18042_v55  ;;  %v10184_v53 = vpop.f32.mrb[2].mxu1  ;;  %v9734_v9 = vpop.f32.mrb[3].mxu0 }
 0x658   : > { %10649 = vst [vmem:[%s18059_s25 + $0x10] sm:$0xff] %v12716_v20  ;;  %10648 = vst [vmem:[%s18059_s25 + $0x8] sm:$0xff] %v12685_v19  ;;  %v12718_v5 = vadd.f32 %v10184_v53, %v18046_v27  ;;  %v12687_v0 = vadd.f32 %v9734_v9, %v18050_v18  ;;  %v10186_v63 = vpop.f32.mrb[3].mxu1 }
 0x659   : > { %10650 = vst [vmem:[%s18059_s25 + $0x18] sm:$0xff] %v12717_v37  ;;  %10652 = vst [vmem:[%s18059_s25 + $0x28] sm:$0xff] %v12686_v60  ;;  %v12719_v23 = vadd.f32 %v10186_v63, %v18054_v4 }
 0x65a   : > { %10654 = vst [vmem:[%s18059_s25 + $0x38] sm:$0xff] %v12718_v5  ;;  %10653 = vst [vmem:[%s18059_s25 + $0x30] sm:$0xff] %v12687_v0 }
 0x65b   : > { %10655 = vst [vmem:[%s18059_s25 + $0x40] sm:$0xff] %v12719_v23 }
 0x65c   : > { %v9738_v51 = vpop.f32.mrb[4].mxu0 }
 0x65d   : > { %v12688_v42 = vadd.f32 %v9738_v51, %v18042_v55  ;;  %v10190_v30 = vpop.f32.mrb[4].mxu1  ;;  %v9740_v14 = vpop.f32.mrb[5].mxu0 }
 0x65e   : > { %v12720_v56 = vadd.f32 %v10190_v30, %v18046_v27  ;;  %v12689_v22 = vadd.f32 %v9740_v14, %v18050_v18  ;;  %v10192_v16 = vpop.f32.mrb[5].mxu1  ;;  %v9742_v36 = vpop.f32.mrb[6].mxu0 }
 0x65f   : > { %10657 = vst [vmem:[%s18059_s25 + $0x50] sm:$0xff] %v12688_v42  ;;  %v12721_v52 = vadd.f32 %v10192_v16, %v18054_v4  ;;  %v12690_v21 = vadd.f32 %v9742_v36, %v18042_v55  ;;  %v10194_v40 = vpop.f32.mrb[6].mxu1  ;;  %v9744_v12 = vpop.f32.mrb[7].mxu0 }
 0x660   : > { %10659 = vst [vmem:[%s18059_s25 + $0x60] sm:$0xff] %v12720_v56  ;;  %10658 = vst [vmem:[%s18059_s25 + $0x58] sm:$0xff] %v12689_v22  ;;  %v12722_v10 = vadd.f32 %v10194_v40, %v18046_v27  ;;  %v12691_v35 = vadd.f32 %v9744_v12, %v18050_v18  ;;  %v10196_v1 = vpop.f32.mrb[7].mxu1 }
 0x661   : > { %10660 = vst [vmem:[%s18059_s25 + $0x68] sm:$0xff] %v12721_v52  ;;  %10662 = vst [vmem:[%s18059_s25 + $0x78] sm:$0xff] %v12690_v21  ;;  %v12723_v62 = vadd.f32 %v10196_v1, %v18054_v4 }
 0x662   : > { %10664 = vst [vmem:[%s18059_s25 + $0x88] sm:$0xff] %v12722_v10  ;;  %10663 = vst [vmem:[%s18059_s25 + $0x80] sm:$0xff] %v12691_v35 }
 0x663   : > { %10665 = vst [vmem:[%s18059_s25 + $0x90] sm:$0xff] %v12723_v62 }
 0x664   : > { %v9748_v50 = vpop.f32.mrb[8].mxu0 }
 0x665   : > { %v12692_v2 = vadd.f32 %v9748_v50, %v18042_v55  ;;  %v10200_v44 = vpop.f32.mrb[8].mxu1  ;;  %v9750_v38 = vpop.f32.mrb[9].mxu0 }
 0x666   : > { %v12724_v26 = vadd.f32 %v10200_v44, %v18046_v27  ;;  %v12693_v11 = vadd.f32 %v9750_v38, %v18050_v18  ;;  %v10202_v54 = vpop.f32.mrb[9].mxu1  ;;  %v9752_v31 = vpop.f32.mrb[10].mxu0 }
 0x667   : > { %10667 = vst [vmem:[%s18059_s25 + $0xa0] sm:$0xff] %v12692_v2  ;;  %v12725_v28 = vadd.f32 %v10202_v54, %v18054_v4  ;;  %v12694_v45 = vadd.f32 %v9752_v31, %v18042_v55  ;;  %v10204_v17 = vpop.f32.mrb[10].mxu1  ;;  %v9754_v32 = vpop.f32.mrb[11].mxu0 }
 0x668   : > { %10669 = vst [vmem:[%s18059_s25 + $0xb0] sm:$0xff] %v12724_v26  ;;  %10668 = vst [vmem:[%s18059_s25 + $0xa8] sm:$0xff] %v12693_v11  ;;  %v12726_v24 = vadd.f32 %v10204_v17, %v18046_v27  ;;  %v12695_v57 = vadd.f32 %v9754_v32, %v18050_v18  ;;  %v10206_v8 = vpop.f32.mrb[11].mxu1 }
 0x669   : > { %10670 = vst [vmem:[%s18059_s25 + $0xb8] sm:$0xff] %v12725_v28  ;;  %10672 = vst [vmem:[%s18059_s25 + $0xc8] sm:$0xff] %v12694_v45  ;;  %v12727_v29 = vadd.f32 %v10206_v8, %v18054_v4 }
 0x66a   : > { %10674 = vst [vmem:[%s18059_s25 + $0xd8] sm:$0xff] %v12726_v24  ;;  %10673 = vst [vmem:[%s18059_s25 + $0xd0] sm:$0xff] %v12695_v57 }
 0x66b   : > { %10675 = vst [vmem:[%s18059_s25 + $0xe0] sm:$0xff] %v12727_v29 }
 0x66c   : > { %v9758_v58 = vpop.f32.mrb[12].mxu0 }
 0x66d   : > { %v12696_v25 = vadd.f32 %v9758_v58, %v18042_v55  ;;  %v10210_v15 = vpop.f32.mrb[12].mxu1  ;;  %v9760_v59 = vpop.f32.mrb[13].mxu0 }
 0x66e   : > { %v12728_v39 = vadd.f32 %v10210_v15, %v18046_v27  ;;  %v12697_v7 = vadd.f32 %v9760_v59, %v18050_v18  ;;  %v10212_v3 = vpop.f32.mrb[13].mxu1  ;;  %v9762_v47 = vpop.f32.mrb[14].mxu0 }
 0x66f   : > { %10677 = vst [vmem:[%s18059_s25 + $0xf0] sm:$0xff] %v12696_v25  ;;  %v12729_v33 = vadd.f32 %v10212_v3, %v18054_v4  ;;  %v12698_v61 = vadd.f32 %v9762_v47, %v18042_v55  ;;  %v10214_v49 = vpop.f32.mrb[14].mxu1  ;;  %v9764_v13 = vpop.f32.mrb[15].mxu0 }
 0x670   : > { %10679 = vst [vmem:[%s18059_s25 + $0x100] sm:$0xff] %v12728_v39  ;;  %10678 = vst [vmem:[%s18059_s25 + $0xf8] sm:$0xff] %v12697_v7  ;;  %v12730_v41 = vadd.f32 %v10214_v49, %v18046_v27  ;;  %v12699_v34 = vadd.f32 %v9764_v13, %v18050_v18  ;;  %v10216_v46 = vpop.f32.mrb[15].mxu1 }
 0x671   : > { %10680 = vst [vmem:[%s18059_s25 + $0x108] sm:$0xff] %v12729_v33  ;;  %10682 = vst [vmem:[%s18059_s25 + $0x118] sm:$0xff] %v12698_v61  ;;  %v12731_v20 = vadd.f32 %v10216_v46, %v18054_v4 }
 0x672   : > { %10684 = vst [vmem:[%s18059_s25 + $0x128] sm:$0xff] %v12730_v41  ;;  %10683 = vst [vmem:[%s18059_s25 + $0x120] sm:$0xff] %v12699_v34 }
 0x673   : > { %10685 = vst [vmem:[%s18059_s25 + $0x130] sm:$0xff] %v12731_v20 }
 0x674   : > { %v9768_v19 = vpop.f32.mrb[16].mxu0 }
 0x675   : > { %v12700_v48 = vadd.f32 %v9768_v19, %v18042_v55  ;;  %v10220_v43 = vpop.f32.mrb[16].mxu1  ;;  %v9770_v37 = vpop.f32.mrb[17].mxu0 }
 0x676   : > { %v12732_v60 = vadd.f32 %v10220_v43, %v18046_v27  ;;  %v12701_v53 = vadd.f32 %v9770_v37, %v18050_v18  ;;  %v10222_v9 = vpop.f32.mrb[17].mxu1  ;;  %v9772_v5 = vpop.f32.mrb[18].mxu0 }
 0x677   : > { %10687 = vst [vmem:[%s18059_s25 + $0x140] sm:$0xff] %v12700_v48  ;;  %v12733_v0 = vadd.f32 %v10222_v9, %v18054_v4  ;;  %v12702_v63 = vadd.f32 %v9772_v5, %v18042_v55  ;;  %v10224_v23 = vpop.f32.mrb[18].mxu1  ;;  %v9774_v51 = vpop.f32.mrb[19].mxu0  ;;  %v18445_v9 = vld [vmem:[#allocation7_spill] sm:$0xff] }
 0x678   : > { %10689 = vst [vmem:[%s18059_s25 + $0x150] sm:$0xff] %v12732_v60  ;;  %10688 = vst [vmem:[%s18059_s25 + $0x148] sm:$0xff] %v12701_v53  ;;  %v12734_v42 = vadd.f32 %v10224_v23, %v18046_v27  ;;  %v12703_v30 = vadd.f32 %v9774_v51, %v18050_v18  ;;  %v10226_v14 = vpop.f32.mrb[19].mxu1 }
 0x679   : > { %10690 = vst [vmem:[%s18059_s25 + $0x158] sm:$0xff] %v12733_v0  ;;  %10692 = vst [vmem:[%s18059_s25 + $0x168] sm:$0xff] %v12702_v63  ;;  %v12735_v56 = vadd.f32 %v10226_v14, %v18054_v4 }
 0x67a   : > { %10694 = vst [vmem:[%s18059_s25 + $0x178] sm:$0xff] %v12734_v42  ;;  %10693 = vst [vmem:[%s18059_s25 + $0x170] sm:$0xff] %v12703_v30 }
 0x67b   : > { %10695 = vst [vmem:[%s18059_s25 + $0x180] sm:$0xff] %v12735_v56 }
 0x67c   : > { %v9778_v22 = vpop.f32.mrb[20].mxu0 }
 0x67d   : > { %v12704_v16 = vadd.f32 %v9778_v22, %v18042_v55  ;;  %v10230_v36 = vpop.f32.mrb[20].mxu1  ;;  %v9780_v52 = vpop.f32.mrb[21].mxu0 }
 0x67e   : > { %v12736_v21 = vadd.f32 %v10230_v36, %v18046_v27  ;;  %v12705_v40 = vadd.f32 %v9780_v52, %v18050_v18  ;;  %v10232_v12 = vpop.f32.mrb[21].mxu1  ;;  %v9782_v10 = vpop.f32.mrb[22].mxu0 }
 0x67f   : > { %10697 = vst [vmem:[%s18059_s25 + $0x190] sm:$0xff] %v12704_v16  ;;  %v12737_v35 = vadd.f32 %v10232_v12, %v18054_v4  ;;  %v12706_v1 = vadd.f32 %v9782_v10, %v18042_v55  ;;  %v10234_v62 = vpop.f32.mrb[22].mxu1  ;;  %v9784_v50 = vpop.f32.mrb[23].mxu0 }
 0x680   : > { %10699 = vst [vmem:[%s18059_s25 + $0x1a0] sm:$0xff] %v12736_v21  ;;  %10698 = vst [vmem:[%s18059_s25 + $0x198] sm:$0xff] %v12705_v40  ;;  %v12738_v2 = vadd.f32 %v10234_v62, %v18046_v27  ;;  %v12707_v44 = vadd.f32 %v9784_v50, %v18050_v18  ;;  %v10236_v38 = vpop.f32.mrb[23].mxu1 }
 0x681   : > { %10700 = vst [vmem:[%s18059_s25 + $0x1a8] sm:$0xff] %v12737_v35  ;;  %10702 = vst [vmem:[%s18059_s25 + $0x1b8] sm:$0xff] %v12706_v1  ;;  %v12739_v26 = vadd.f32 %v10236_v38, %v18054_v4 }
 0x682   : > { %10704 = vst [vmem:[%s18059_s25 + $0x1c8] sm:$0xff] %v12738_v2  ;;  %10703 = vst [vmem:[%s18059_s25 + $0x1c0] sm:$0xff] %v12707_v44 }
 0x683   : > { %10705 = vst [vmem:[%s18059_s25 + $0x1d0] sm:$0xff] %v12739_v26 }
 0x684   : > { %v9788_v11 = vpop.f32.mrb[24].mxu0 }
 0x685   : > { %v12708_v54 = vadd.f32 %v9788_v11, %v18042_v55  ;;  %v10240_v31 = vpop.f32.mrb[24].mxu1  ;;  %v9790_v28 = vpop.f32.mrb[25].mxu0 }
 0x686   : > { %v12740_v45 = vadd.f32 %v10240_v31, %v18046_v27  ;;  %v12709_v17 = vadd.f32 %v9790_v28, %v18050_v18  ;;  %v10242_v32 = vpop.f32.mrb[25].mxu1  ;;  %v9792_v24 = vpop.f32.mrb[26].mxu0 }
 0x687   : > { %10707 = vst [vmem:[%s18059_s25 + $0x1e0] sm:$0xff] %v12708_v54  ;;  %v12741_v57 = vadd.f32 %v10242_v32, %v18054_v4  ;;  %v12710_v8 = vadd.f32 %v9792_v24, %v18042_v55  ;;  %v10244_v29 = vpop.f32.mrb[26].mxu1  ;;  %v9794_v58 = vpop.f32.mrb[27].mxu0 }
 0x688   : > { %10709 = vst [vmem:[%s18059_s25 + $0x1f0] sm:$0xff] %v12740_v45  ;;  %10708 = vst [vmem:[%s18059_s25 + $0x1e8] sm:$0xff] %v12709_v17  ;;  %v12742_v25 = vadd.f32 %v10244_v29, %v18046_v27  ;;  %v12711_v15 = vadd.f32 %v9794_v58, %v18050_v18  ;;  %v10246_v59 = vpop.f32.mrb[27].mxu1 }
 0x689   : > { %10710 = vst [vmem:[%s18059_s25 + $0x1f8] sm:$0xff] %v12741_v57  ;;  %10712 = vst [vmem:[%s18059_s25 + $0x208] sm:$0xff] %v12710_v8  ;;  %v12743_v39 = vadd.f32 %v10246_v59, %v18054_v4 }
 0x68a   : > { %10714 = vst [vmem:[%s18059_s25 + $0x218] sm:$0xff] %v12742_v25  ;;  %10713 = vst [vmem:[%s18059_s25 + $0x210] sm:$0xff] %v12711_v15 }
 0x68b   : > { %10715 = vst [vmem:[%s18059_s25 + $0x220] sm:$0xff] %v12743_v39 }
 0x68c   : > { %v9798_v7 = vpop.f32.mrb[28].mxu0 }
 0x68d   : > { %v12712_v3 = vadd.f32 %v9798_v7, %v18042_v55  ;;  %v10250_v47 = vpop.f32.mrb[28].mxu1  ;;  %v9800_v33 = vpop.f32.mrb[29].mxu0 }
 0x68e   : > { %v12744_v61 = vadd.f32 %v10250_v47, %v18046_v27  ;;  %v12713_v49 = vadd.f32 %v9800_v33, %v18050_v18  ;;  %v10252_v13 = vpop.f32.mrb[29].mxu1  ;;  %v9802_v41 = vpop.f32.mrb[30].mxu0 }
 0x68f   : > { %10717 = vst [vmem:[%s18059_s25 + $0x230] sm:$0xff] %v12712_v3  ;;  %v12745_v34 = vadd.f32 %v10252_v13, %v18054_v4  ;;  %v12714_v46 = vadd.f32 %v9802_v41, %v18042_v55  ;;  %v10254_v20 = vpop.f32.mrb[30].mxu1  ;;  %v9804_v19 = vpop.f32.mrb[31].mxu0  ;;  %v18191_v55 = vrot.slane %v18037_v6, %v18445_v9 }
 0x690   : > { %10719 = vst [vmem:[%s18059_s25 + $0x240] sm:$0xff] %v12744_v61  ;;  %10718 = vst [vmem:[%s18059_s25 + $0x238] sm:$0xff] %v12713_v49  ;;  %v12746_v48 = vadd.f32 %v10254_v20, %v18046_v27  ;;  %v12715_v43 = vadd.f32 %v9804_v19, %v18050_v18  ;;  %v10256_v37 = vpop.f32.mrb[31].mxu1 }
 0x691   : > { %10720 = vst [vmem:[%s18059_s25 + $0x248] sm:$0xff] %v12745_v34  ;;  %10722 = vst [vmem:[%s18059_s25 + $0x258] sm:$0xff] %v12714_v46  ;;  %v12747_v60 = vadd.f32 %v10256_v37, %v18054_v4 }
 0x692   : > { %10724 = vst [vmem:[%s18059_s25 + $0x268] sm:$0xff] %v12746_v48  ;;  %10723 = vst [vmem:[%s18059_s25 + $0x260] sm:$0xff] %v12715_v43 }
 0x693   : > { %10725 = vst [vmem:[%s18059_s25 + $0x270] sm:$0xff] %v12747_v60 }
 0x694   : > { %v12316_v53 = vpop.f32.mrb[32].mxu0 }
 0x695   : > { %v12380_v5 = vpop.f32.mrb[32].mxu1  ;;  %v12317_v0 = vpop.f32.mrb[33].mxu0 }
 0x696   : > { %v12318_v63 = vadd.f32 %v12317_v0, %v12316_v53  ;;  %v12381_v23 = vpop.f32.mrb[33].mxu1  ;;  %v12319_v27 = vpop.f32.mrb[34].mxu0 }
 0x697   : > { %v12382_v51 = vadd.f32 %v12381_v23, %v12380_v5  ;;  %v12383_v18 = vpop.f32.mrb[34].mxu1  ;;  %v12320_v42 = vpop.f32.mrb[35].mxu0 }
 0x698   : > { %v10294_v30 = vadd.f32 %v12318_v63, %v18191_v55  ;;  %v12321_v14 = vadd.f32 %v12320_v42, %v12319_v27  ;;  %v12384_v4 = vpop.f32.mrb[35].mxu1 }
 0x699   : > { %v12385_v56 = vadd.f32 %v12384_v4, %v12383_v18 }
 0x69a   : > { %v18194_v22 = vadd.f32 %v12382_v51, %v10294_v30  ;;  %v10297_v16 = vadd.f32 %v12321_v14, %v18191_v55 }
 0x69c   : > { %v18197_v36 = vadd.f32 %v12385_v56, %v10297_v16  ;;  %v12322_v6 = vpop.f32.mrb[36].mxu0 }
 0x69d   : > { %v12386_v52 = vpop.f32.mrb[36].mxu1  ;;  %v12323_v21 = vpop.f32.mrb[37].mxu0 }
 0x69e   : > { %v12324_v40 = vadd.f32 %v12323_v21, %v12322_v6  ;;  %v12387_v12 = vpop.f32.mrb[37].mxu1  ;;  %v12325_v10 = vpop.f32.mrb[38].mxu0 }
 0x69f   : > { %v12388_v35 = vadd.f32 %v12387_v12, %v12386_v52  ;;  %v12389_v1 = vpop.f32.mrb[38].mxu1  ;;  %v12326_v62 = vpop.f32.mrb[39].mxu0 }
 0x6a0   : > { %v10302_v50 = vadd.f32 %v12324_v40, %v18191_v55  ;;  %v12327_v2 = vadd.f32 %v12326_v62, %v12325_v10  ;;  %v12390_v44 = vpop.f32.mrb[39].mxu1 }
 0x6a1   : > { %v12391_v38 = vadd.f32 %v12390_v44, %v12389_v1 }
 0x6a2   : > { %v18200_v26 = vadd.f32 %v12388_v35, %v10302_v50  ;;  %v10305_v11 = vadd.f32 %v12327_v2, %v18191_v55 }
 0x6a4   : > { %v18203_v54 = vadd.f32 %v12391_v38, %v10305_v11  ;;  %v12328_v31 = vpop.f32.mrb[40].mxu0 }
 0x6a5   : > { %v12392_v28 = vpop.f32.mrb[40].mxu1  ;;  %v12329_v45 = vpop.f32.mrb[41].mxu0 }
 0x6a6   : > { %v12330_v17 = vadd.f32 %v12329_v45, %v12328_v31  ;;  %v12393_v32 = vpop.f32.mrb[41].mxu1  ;;  %v12331_v24 = vpop.f32.mrb[42].mxu0 }
 0x6a7   : > { %v12394_v57 = vadd.f32 %v12393_v32, %v12392_v28  ;;  %v12395_v8 = vpop.f32.mrb[42].mxu1  ;;  %v12332_v29 = vpop.f32.mrb[43].mxu0 }
 0x6a8   : > { %v10310_v58 = vadd.f32 %v12330_v17, %v18191_v55  ;;  %v12333_v25 = vadd.f32 %v12332_v29, %v12331_v24  ;;  %v12396_v15 = vpop.f32.mrb[43].mxu1 }
 0x6a9   : > { %v12397_v59 = vadd.f32 %v12396_v15, %v12395_v8 }
 0x6aa   : > { %v18206_v39 = vadd.f32 %v12394_v57, %v10310_v58  ;;  %v10313_v7 = vadd.f32 %v12333_v25, %v18191_v55 }
 0x6ac   : > { %v18209_v3 = vadd.f32 %v12397_v59, %v10313_v7  ;;  %v12334_v47 = vpop.f32.mrb[44].mxu0 }
 0x6ad   : > { %v12398_v33 = vpop.f32.mrb[44].mxu1  ;;  %v12335_v61 = vpop.f32.mrb[45].mxu0 }
 0x6ae   : > { %v12336_v49 = vadd.f32 %v12335_v61, %v12334_v47  ;;  %v12399_v13 = vpop.f32.mrb[45].mxu1  ;;  %v12337_v41 = vpop.f32.mrb[46].mxu0 }
 0x6af   : > { %v12400_v34 = vadd.f32 %v12399_v13, %v12398_v33  ;;  %v12401_v46 = vpop.f32.mrb[46].mxu1  ;;  %v12338_v20 = vpop.f32.mrb[47].mxu0 }
 0x6b0   : > { %v10318_v19 = vadd.f32 %v12336_v49, %v18191_v55  ;;  %v12339_v48 = vadd.f32 %v12338_v20, %v12337_v41  ;;  %v12402_v43 = vpop.f32.mrb[47].mxu1 }
 0x6b1   : > { %v12403_v37 = vadd.f32 %v12402_v43, %v12401_v46 }
 0x6b2   : > { %v18212_v60 = vadd.f32 %v12400_v34, %v10318_v19  ;;  %v10321_v53 = vadd.f32 %v12339_v48, %v18191_v55 }
 0x6b4   : > { %v18215_v9 = vadd.f32 %v12403_v37, %v10321_v53  ;;  %v12340_v5 = vpop.f32.mrb[48].mxu0 }
 0x6b5   : > { %v12404_v0 = vpop.f32.mrb[48].mxu1  ;;  %v12341_v63 = vpop.f32.mrb[49].mxu0 }
 0x6b6   : > { %v12342_v23 = vadd.f32 %v12341_v63, %v12340_v5  ;;  %v12405_v27 = vpop.f32.mrb[49].mxu1  ;;  %v12343_v51 = vpop.f32.mrb[50].mxu0 }
 0x6b7   : > { %v12406_v18 = vadd.f32 %v12405_v27, %v12404_v0  ;;  %v12407_v42 = vpop.f32.mrb[50].mxu1  ;;  %v12344_v30 = vpop.f32.mrb[51].mxu0 }
 0x6b8   : > { %v10326_v14 = vadd.f32 %v12342_v23, %v18191_v55  ;;  %v12345_v4 = vadd.f32 %v12344_v30, %v12343_v51  ;;  %v12408_v56 = vpop.f32.mrb[51].mxu1 }
 0x6b9   : > { %v12409_v16 = vadd.f32 %v12408_v56, %v12407_v42 }
 0x6ba   : > { %v18218_v6 = vadd.f32 %v12406_v18, %v10326_v14  ;;  %v10329_v52 = vadd.f32 %v12345_v4, %v18191_v55 }
 0x6bc   : > { %v18221_v21 = vadd.f32 %v12409_v16, %v10329_v52  ;;  %v12346_v40 = vpop.f32.mrb[52].mxu0 }
 0x6bd   : > { %v12410_v12 = vpop.f32.mrb[52].mxu1  ;;  %v12347_v10 = vpop.f32.mrb[53].mxu0 }
 0x6be   : > { %v12348_v35 = vadd.f32 %v12347_v10, %v12346_v40  ;;  %v12411_v1 = vpop.f32.mrb[53].mxu1  ;;  %v12349_v62 = vpop.f32.mrb[54].mxu0 }
 0x6bf   : > { %v12412_v50 = vadd.f32 %v12411_v1, %v12410_v12  ;;  %v12413_v2 = vpop.f32.mrb[54].mxu1  ;;  %v12350_v44 = vpop.f32.mrb[55].mxu0 }
 0x6c0   : > { %v10334_v38 = vadd.f32 %v12348_v35, %v18191_v55  ;;  %v12351_v11 = vadd.f32 %v12350_v44, %v12349_v62  ;;  %v12414_v31 = vpop.f32.mrb[55].mxu1 }
 0x6c1   : > { %v12415_v28 = vadd.f32 %v12414_v31, %v12413_v2 }
 0x6c2   : > { %v18224_v45 = vadd.f32 %v12412_v50, %v10334_v38  ;;  %v10337_v17 = vadd.f32 %v12351_v11, %v18191_v55 }
 0x6c4   : > { %v18227_v32 = vadd.f32 %v12415_v28, %v10337_v17  ;;  %v12352_v24 = vpop.f32.mrb[56].mxu0 }
 0x6c5   : > { %v12416_v57 = vpop.f32.mrb[56].mxu1  ;;  %v12353_v8 = vpop.f32.mrb[57].mxu0 }
 0x6c6   : > { %v12354_v29 = vadd.f32 %v12353_v8, %v12352_v24  ;;  %v12417_v58 = vpop.f32.mrb[57].mxu1  ;;  %v12355_v25 = vpop.f32.mrb[58].mxu0 }
 0x6c7   : > { %v12418_v15 = vadd.f32 %v12417_v58, %v12416_v57  ;;  %v12419_v59 = vpop.f32.mrb[58].mxu1  ;;  %v12356_v7 = vpop.f32.mrb[59].mxu0 }
 0x6c8   : > { %v10342_v47 = vadd.f32 %v12354_v29, %v18191_v55  ;;  %v12357_v33 = vadd.f32 %v12356_v7, %v12355_v25  ;;  %v12420_v61 = vpop.f32.mrb[59].mxu1 }
 0x6c9   : > { %v12421_v49 = vadd.f32 %v12420_v61, %v12419_v59 }
 0x6ca   : > { %v18230_v13 = vadd.f32 %v12418_v15, %v10342_v47  ;;  %v10345_v41 = vadd.f32 %v12357_v33, %v18191_v55 }
 0x6cc   : > { %v18233_v34 = vadd.f32 %v12421_v49, %v10345_v41  ;;  %v12358_v46 = vpop.f32.mrb[60].mxu0 }
 0x6cd   : > { %v12422_v20 = vpop.f32.mrb[60].mxu1  ;;  %v12359_v19 = vpop.f32.mrb[61].mxu0 }
 0x6ce   : > { %v12360_v48 = vadd.f32 %v12359_v19, %v12358_v46  ;;  %v12423_v43 = vpop.f32.mrb[61].mxu1  ;;  %v12361_v37 = vpop.f32.mrb[62].mxu0 }
 0x6cf   : > { %v12424_v53 = vadd.f32 %v12423_v43, %v12422_v20  ;;  %v12425_v5 = vpop.f32.mrb[62].mxu1  ;;  %v12362_v0 = vpop.f32.mrb[63].mxu0 }
 0x6d0   : > { %v10350_v63 = vadd.f32 %v12360_v48, %v18191_v55  ;;  %v12363_v23 = vadd.f32 %v12362_v0, %v12361_v37  ;;  %v12426_v27 = vpop.f32.mrb[63].mxu1 }
 0x6d1   : > { %v12427_v51 = vadd.f32 %v12426_v27, %v12425_v5 }
 0x6d2   : > { %v18236_v18 = vadd.f32 %v12424_v53, %v10350_v63  ;;  %v10353_v42 = vadd.f32 %v12363_v23, %v18191_v55 }
 0x6d4   : > { %v18239_v30 = vadd.f32 %v12427_v51, %v10353_v42  ;;  %v12444_v14 = vpop.f32.mrb[64].mxu0 }
 0x6d5   : > { %v12508_v4 = vpop.f32.mrb[64].mxu1  ;;  %v12445_v56 = vpop.f32.mrb[65].mxu0 }
 0x6d6   : > { %v12446_v16 = vadd.f32 %v12445_v56, %v12444_v14  ;;  %v12509_v52 = vpop.f32.mrb[65].mxu1  ;;  %v12447_v40 = vpop.f32.mrb[66].mxu0 }
 0x6d7   : > { %v12510_v12 = vadd.f32 %v12509_v52, %v12508_v4  ;;  %v12511_v10 = vpop.f32.mrb[66].mxu1  ;;  %v12448_v35 = vpop.f32.mrb[67].mxu0 }
 0x6d8   : > { %v10488_v1 = vadd.f32 %v12446_v16, %v18194_v22  ;;  %v12449_v62 = vadd.f32 %v12448_v35, %v12447_v40  ;;  %v12512_v50 = vpop.f32.mrb[67].mxu1 }
 0x6d9   : > { %v12513_v2 = vadd.f32 %v12512_v50, %v12511_v10 }
 0x6da   : > { %v10585_v44 = vadd.f32 %v12510_v12, %v10488_v1  ;;  %v10491_v55 = vadd.f32 %v12449_v62, %v18197_v36 }
 0x6dc   : > { %10651 = vst [vmem:[%s18059_s25 + $0x20] sm:$0xff] %v10585_v44  ;;  %v10588_v38 = vadd.f32 %v12513_v2, %v10491_v55  ;;  %v12450_v11 = vpop.f32.mrb[68].mxu0 }
 0x6dd   : > { %v12514_v31 = vpop.f32.mrb[68].mxu1  ;;  %v12451_v28 = vpop.f32.mrb[69].mxu0 }
 0x6de   : > { %10656 = vst [vmem:[%s18059_s25 + $0x48] sm:$0xff] %v10588_v38  ;;  %v12452_v17 = vadd.f32 %v12451_v28, %v12450_v11  ;;  %v12515_v24 = vpop.f32.mrb[69].mxu1  ;;  %v12453_v57 = vpop.f32.mrb[70].mxu0 }
 0x6df   : > { %v12516_v8 = vadd.f32 %v12515_v24, %v12514_v31  ;;  %v12517_v29 = vpop.f32.mrb[70].mxu1  ;;  %v12454_v22 = vpop.f32.mrb[71].mxu0 }
 0x6e0   : > { %v10496_v58 = vadd.f32 %v12452_v17, %v18200_v26  ;;  %v12455_v25 = vadd.f32 %v12454_v22, %v12453_v57  ;;  %v12518_v15 = vpop.f32.mrb[71].mxu1 }
 0x6e1   : > { %v12519_v59 = vadd.f32 %v12518_v15, %v12517_v29 }
 0x6e2   : > { %v10593_v36 = vadd.f32 %v12516_v8, %v10496_v58  ;;  %v10499_v7 = vadd.f32 %v12455_v25, %v18203_v54 }
 0x6e4   : > { %10661 = vst [vmem:[%s18059_s25 + $0x70] sm:$0xff] %v10593_v36  ;;  %v10596_v47 = vadd.f32 %v12519_v59, %v10499_v7  ;;  %v12456_v33 = vpop.f32.mrb[72].mxu0 }
 0x6e5   : > { %v12520_v61 = vpop.f32.mrb[72].mxu1  ;;  %v12457_v49 = vpop.f32.mrb[73].mxu0 }
 0x6e6   : > { %10666 = vst [vmem:[%s18059_s25 + $0x98] sm:$0xff] %v10596_v47  ;;  %v12458_v41 = vadd.f32 %v12457_v49, %v12456_v33  ;;  %v12521_v46 = vpop.f32.mrb[73].mxu1  ;;  %v12459_v20 = vpop.f32.mrb[74].mxu0 }
 0x6e7   : > { %v12522_v19 = vadd.f32 %v12521_v46, %v12520_v61  ;;  %v12523_v48 = vpop.f32.mrb[74].mxu1  ;;  %v12460_v26 = vpop.f32.mrb[75].mxu0 }
 0x6e8   : > { %v10504_v43 = vadd.f32 %v12458_v41, %v18206_v39  ;;  %v12461_v37 = vadd.f32 %v12460_v26, %v12459_v20  ;;  %v12524_v53 = vpop.f32.mrb[75].mxu1 }
 0x6e9   : > { %v12525_v5 = vadd.f32 %v12524_v53, %v12523_v48 }
 0x6ea   : > { %v10601_v54 = vadd.f32 %v12522_v19, %v10504_v43  ;;  %v10507_v0 = vadd.f32 %v12461_v37, %v18209_v3 }
 0x6ec   : > { %10671 = vst [vmem:[%s18059_s25 + $0xc0] sm:$0xff] %v10601_v54  ;;  %v10604_v63 = vadd.f32 %v12525_v5, %v10507_v0  ;;  %v12462_v23 = vpop.f32.mrb[76].mxu0 }
 0x6ed   : > { %v12526_v27 = vpop.f32.mrb[76].mxu1  ;;  %v12463_v51 = vpop.f32.mrb[77].mxu0 }
 0x6ee   : > { %10676 = vst [vmem:[%s18059_s25 + $0xe8] sm:$0xff] %v10604_v63  ;;  %v12464_v42 = vadd.f32 %v12463_v51, %v12462_v23  ;;  %v12527_v14 = vpop.f32.mrb[77].mxu1  ;;  %v12465_v4 = vpop.f32.mrb[78].mxu0 }
 0x6ef   : > { %v12528_v56 = vadd.f32 %v12527_v14, %v12526_v27  ;;  %v12529_v16 = vpop.f32.mrb[78].mxu1  ;;  %v12466_v39 = vpop.f32.mrb[79].mxu0 }
 0x6f0   : > { %v10512_v52 = vadd.f32 %v12464_v42, %v18212_v60  ;;  %v12467_v40 = vadd.f32 %v12466_v39, %v12465_v4  ;;  %v12530_v12 = vpop.f32.mrb[79].mxu1 }
 0x6f1   : > { %v12531_v10 = vadd.f32 %v12530_v12, %v12529_v16 }
 0x6f2   : > { %v10609_v3 = vadd.f32 %v12528_v56, %v10512_v52  ;;  %v10515_v35 = vadd.f32 %v12467_v40, %v18215_v9 }
 0x6f4   : > { %10681 = vst [vmem:[%s18059_s25 + $0x110] sm:$0xff] %v10609_v3  ;;  %v10612_v1 = vadd.f32 %v12531_v10, %v10515_v35  ;;  %v12468_v62 = vpop.f32.mrb[80].mxu0 }
 0x6f5   : > { %v12532_v50 = vpop.f32.mrb[80].mxu1  ;;  %v12469_v2 = vpop.f32.mrb[81].mxu0 }
 0x6f6   : > { %10686 = vst [vmem:[%s18059_s25 + $0x138] sm:$0xff] %v10612_v1  ;;  %v12470_v44 = vadd.f32 %v12469_v2, %v12468_v62  ;;  %v12533_v55 = vpop.f32.mrb[81].mxu1  ;;  %v12471_v38 = vpop.f32.mrb[82].mxu0 }
 0x6f7   : > { %v12534_v11 = vadd.f32 %v12533_v55, %v12532_v50  ;;  %v12535_v31 = vpop.f32.mrb[82].mxu1  ;;  %v12472_v60 = vpop.f32.mrb[83].mxu0 }
 0x6f8   : > { %v10520_v28 = vadd.f32 %v12470_v44, %v18218_v6  ;;  %v12473_v17 = vadd.f32 %v12472_v60, %v12471_v38  ;;  %v12536_v24 = vpop.f32.mrb[83].mxu1 }
 0x6f9   : > { %v12537_v57 = vadd.f32 %v12536_v24, %v12535_v31 }
 0x6fa   : > { %v10617_v9 = vadd.f32 %v12534_v11, %v10520_v28  ;;  %v10523_v8 = vadd.f32 %v12473_v17, %v18221_v21 }
 0x6fc   : > { %10691 = vst [vmem:[%s18059_s25 + $0x160] sm:$0xff] %v10617_v9  ;;  %v10620_v29 = vadd.f32 %v12537_v57, %v10523_v8  ;;  %v12474_v22 = vpop.f32.mrb[84].mxu0 }
 0x6fd   : > { %v12538_v58 = vpop.f32.mrb[84].mxu1  ;;  %v12475_v25 = vpop.f32.mrb[85].mxu0 }
 0x6fe   : > { %10696 = vst [vmem:[%s18059_s25 + $0x188] sm:$0xff] %v10620_v29  ;;  %v12476_v15 = vadd.f32 %v12475_v25, %v12474_v22  ;;  %v12539_v59 = vpop.f32.mrb[85].mxu1  ;;  %v12477_v36 = vpop.f32.mrb[86].mxu0 }
 0x6ff   : > { %v12540_v7 = vadd.f32 %v12539_v59, %v12538_v58  ;;  %v12541_v47 = vpop.f32.mrb[86].mxu1  ;;  %v12478_v6 = vpop.f32.mrb[87].mxu0 }
 0x700   : > { %v10528_v33 = vadd.f32 %v12476_v15, %v18224_v45  ;;  %v12479_v61 = vadd.f32 %v12478_v6, %v12477_v36  ;;  %v12542_v49 = vpop.f32.mrb[87].mxu1 }
 0x701   : > { %v12543_v41 = vadd.f32 %v12542_v49, %v12541_v47 }
 0x702   : > { %v10625_v21 = vadd.f32 %v12540_v7, %v10528_v33  ;;  %v10531_v46 = vadd.f32 %v12479_v61, %v18227_v32 }
 0x704   : > { %10701 = vst [vmem:[%s18059_s25 + $0x1b0] sm:$0xff] %v10625_v21  ;;  %v10628_v20 = vadd.f32 %v12543_v41, %v10531_v46  ;;  %v12480_v19 = vpop.f32.mrb[88].mxu0 }
 0x705   : > { %v12544_v48 = vpop.f32.mrb[88].mxu1  ;;  %v12481_v26 = vpop.f32.mrb[89].mxu0 }
 0x706   : > { %10706 = vst [vmem:[%s18059_s25 + $0x1d8] sm:$0xff] %v10628_v20  ;;  %v12482_v43 = vadd.f32 %v12481_v26, %v12480_v19  ;;  %v12545_v37 = vpop.f32.mrb[89].mxu1  ;;  %v12483_v53 = vpop.f32.mrb[90].mxu0 }
 0x707   : > { %v12546_v5 = vadd.f32 %v12545_v37, %v12544_v48  ;;  %v12547_v54 = vpop.f32.mrb[90].mxu1  ;;  %v12484_v45 = vpop.f32.mrb[91].mxu0 }
 0x708   : > { %v10536_v0 = vadd.f32 %v12482_v43, %v18230_v13  ;;  %v12485_v63 = vadd.f32 %v12484_v45, %v12483_v53  ;;  %v12548_v23 = vpop.f32.mrb[91].mxu1 }
 0x709   : > { %v12549_v27 = vadd.f32 %v12548_v23, %v12547_v54 }
 0x70a   : > { %v10633_v32 = vadd.f32 %v12546_v5, %v10536_v0  ;;  %v10539_v51 = vadd.f32 %v12485_v63, %v18233_v34 }
 0x70c   : > { %10711 = vst [vmem:[%s18059_s25 + $0x200] sm:$0xff] %v10633_v32  ;;  %v10636_v42 = vadd.f32 %v12549_v27, %v10539_v51  ;;  %v12486_v14 = vpop.f32.mrb[92].mxu0 }
 0x70d   : > { %v12550_v4 = vpop.f32.mrb[92].mxu1  ;;  %v12487_v56 = vpop.f32.mrb[93].mxu0 }
 0x70e   : > { %10716 = vst [vmem:[%s18059_s25 + $0x228] sm:$0xff] %v10636_v42  ;;  %v12488_v16 = vadd.f32 %v12487_v56, %v12486_v14  ;;  %v12551_v39 = vpop.f32.mrb[93].mxu1  ;;  %v12489_v52 = vpop.f32.mrb[94].mxu0 }
 0x70f   : > { %v12552_v40 = vadd.f32 %v12551_v39, %v12550_v4  ;;  %v12553_v12 = vpop.f32.mrb[94].mxu1  ;;  %v12490_v13 = vpop.f32.mrb[95].mxu0 }
 0x710   : > { %v10544_v10 = vadd.f32 %v12488_v16, %v18236_v18  ;;  %v12491_v3 = vadd.f32 %v12490_v13, %v12489_v52  ;;  %v12554_v35 = vpop.f32.mrb[95].mxu1 }
 0x711   : > { %v12555_v1 = vadd.f32 %v12554_v35, %v12553_v12 }
 0x712   : > { %v10641_v34 = vadd.f32 %v12552_v40, %v10544_v10  ;;  %v10547_v62 = vadd.f32 %v12491_v3, %v18239_v30 }
 0x714   : > { %10721 = vst [vmem:[%s18059_s25 + $0x250] sm:$0xff] %v10641_v34  ;;  %v10644_v50 = vadd.f32 %v12555_v1, %v10547_v62 }
 0x716   : > { %10726 = vst [vmem:[%s18059_s25 + $0x278] sm:$0xff] %v10644_v50 }
 0x717 PF: > { %s25_s29 = sadd.s32 1, %s13924_s29  }
 0x718   : > { %p22_p4 = scmp.ge.s32.totalorder %s25_s29, 4  }
 0x71a   :  { %24 = sbr.rel (!%p22_p4) target bundleno = 1 (0x1), region = 125 }

</bundles_post_ra>
